<compile_context>
chip_gen: v7x
topology: tpu7x:2x2x1
jax: 0.10.0
libtpu: 0.0.40
codegen_flags: <defaults>
</compile_context>

<pallas_src>
import functools

import jax
import jax.numpy as jnp
import numpy as np
from jax import lax
from jax.experimental import pallas as pl
from jax.experimental.pallas import tpu as pltpu

TM_MAX = 256                     # max row tile (M / flattened pixels) for matmuls
TN_MAX = 256                     # max Cout tile
TK_MAX = 1024                    # max reduction tile (im2col K axis)
EW_ROWS = 512                    # max row tile for the elementwise magnitude/phase kernel
SMALL_M = 64                     # below this, route the matmul to plain XLA
VMEM_LIMIT = 32 * 1024 * 1024    # hard design point: fits v5e/v6e/v7x scoped budgets


def _round_up(x, m):
    return ((x + m - 1) // m) * m


def _pick_tk(kp):
    """Reduction tile: largest 128-multiple divisor of kp, capped so Kp>=512 gets >=2 steps."""
    if kp < 512:
        return kp
    cap = min(TK_MAX, max(256, kp // 2))
    q = kp // 128
    best = 1
    for t in range(1, min(q, cap // 128) + 1):
        if q % t == 0:
            best = t
    return best * 128


def _pick_tm(m):
    """Row tile: at most TM_MAX, 16-aligned (bf16 sublane packing)."""
    return min(TM_MAX, _round_up(m, 16))


# ----------------------------- Pallas kernels -----------------------------

def _mag_stats_epilogue(or_ref, oi_ref, st_ref):
    """Per-tile partial sums of |out| and |out|^2 (rows 0/1 of an 8-row stats block)."""
    o_r = or_ref[...]
    o_i = oi_ref[...]
    mag2 = o_r * o_r + o_i * o_i
    mag = jnp.sqrt(mag2)
    tn = o_r.shape[1]
    st_ref[0:1, :] = jnp.sum(mag, axis=0, keepdims=True)
    st_ref[1:2, :] = jnp.sum(mag2, axis=0, keepdims=True)
    st_ref[2:8, :] = jnp.zeros((6, tn), jnp.float32)


def _complex_mm_kernel(ar_ref, ai_ref, wr_ref, wi_ref, ws_ref, br_ref, bi_ref,
                       or_ref, oi_ref, st_ref):
    """Tiled complex matmul (Karatsuba, 3 MXU dots), bf16 inputs / f32 accumulation.

    Output blocks are resident across the k grid axis; bias is the k==0 initializer and
    per-channel |out| statistics are emitted on the last k step.
    """
    k = pl.program_id(2)

    @pl.when(k == 0)
    def _():
        or_ref[...] = jnp.broadcast_to(br_ref[...], or_ref.shape)
        oi_ref[...] = jnp.broadcast_to(bi_ref[...], oi_ref.shape)

    a_r = ar_ref[...]
    a_i = ai_ref[...]
    t1 = jnp.dot(a_r, wr_ref[...], preferred_element_type=jnp.float32)
    t2 = jnp.dot(a_i, wi_ref[...], preferred_element_type=jnp.float32)
    t3 = jnp.dot(a_r + a_i, ws_ref[...], preferred_element_type=jnp.float32)
    or_ref[...] += t1 - t2
    oi_ref[...] += t3 - t1 - t2

    @pl.when(k == pl.num_programs(2) - 1)
    def _():
        _mag_stats_epilogue(or_ref, oi_ref, st_ref)


def _real_complex_mm_kernel(a_ref, wr_ref, wi_ref, br_ref, bi_ref,
                            or_ref, oi_ref, st_ref):
    """Real LHS x complex RHS (stem conv): only 2 MXU dots, no zero imaginary operand."""
    k = pl.program_id(2)

    @pl.when(k == 0)
    def _():
        or_ref[...] = jnp.broadcast_to(br_ref[...], or_ref.shape)
        oi_ref[...] = jnp.broadcast_to(bi_ref[...], oi_ref.shape)

    a = a_ref[...]
    or_ref[...] += jnp.dot(a, wr_ref[...], preferred_element_type=jnp.float32)
    oi_ref[...] += jnp.dot(a, wi_ref[...], preferred_element_type=jnp.float32)

    @pl.when(k == pl.num_programs(2) - 1)
    def _():
        _mag_stats_epilogue(or_ref, oi_ref, st_ref)


def _magphase_kernel(*refs, apply_relu, has_residual):
    """out = relu_opt(|x| * scale + shift) * exp(i * stable_angle(x)), x = conv (+ identity)."""
    if has_residual:
        xr_ref, xi_ref, scale_ref, shift_ref, idr_ref, idi_ref, or_ref, oi_ref = refs
        xr = xr_ref[...] + idr_ref[...]
        xi = xi_ref[...] + idi_ref[...]
    else:
        xr_ref, xi_ref, scale_ref, shift_ref, or_ref, oi_ref = refs
        xr = xr_ref[...]
        xi = xi_ref[...]
    mag2 = xr * xr + xi * xi
    inv = lax.rsqrt(mag2 + 1e-12)          # single EUP push (replaces sqrt + reciprocal)
    mag = mag2 * inv                        # ~= |x|
    new_mag = mag * scale_ref[...] + shift_ref[...]
    if apply_relu:
        new_mag = jnp.maximum(new_mag, 0.0)
    # exp(i * stable_angle(x)) ~= (xr + i*xi) / |x|
    ratio = new_mag * inv
    or_ref[...] = xr * ratio
    oi_ref[...] = xi * ratio


# ----------------------------- Pallas wrappers ------------------------------

def _mm_call(kernel, a_list, w_list, br, bi):
    """Shared Pallas GEMM driver.

    a_list: bf16 (M, K) operands; w_list: bf16 (K, Cout) operands; br/bi: f32 (Cout,).
    Returns (out_r, out_i, sum(|out|), sum(|out|^2)) with padded-row contributions removed.
    """
    M, K = a_list[0].shape
    Cout = w_list[0].shape[1]
    tm = _pick_tm(M)
    Mp = _round_up(M, tm)
    Kp = _round_up(K, 128)
    tk = _pick_tk(Kp)
    Coutp = _round_up(Cout, 128)
    tn = min(TN_MAX, Coutp)
    n_mt = Mp // tm

    a_pad = [jnp.pad(a, ((0, Mp - M), (0, Kp - K))) for a in a_list]
    w_pad = [jnp.pad(w, ((0, Kp - K), (0, Coutp - Cout))) for w in w_list]
    br2 = jnp.pad(br, (0, Coutp - Cout)).reshape(1, Coutp)
    bi2 = jnp.pad(bi, (0, Coutp - Cout)).reshape(1, Coutp)

    a_spec = pl.BlockSpec((tm, tk), lambda m, n, k: (m, k))
    w_spec = pl.BlockSpec((tk, tn), lambda m, n, k: (k, n))
    b_spec = pl.BlockSpec((1, tn), lambda m, n, k: (0, n))
    o_spec = pl.BlockSpec((tm, tn), lambda m, n, k: (m, n))
    s_spec = pl.BlockSpec((8, tn), lambda m, n, k: (m, n))

    out_r, out_i, st = pl.pallas_call(
        kernel,
        out_shape=(jax.ShapeDtypeStruct((Mp, Coutp), jnp.float32),
                   jax.ShapeDtypeStruct((Mp, Coutp), jnp.float32),
                   jax.ShapeDtypeStruct((n_mt * 8, Coutp), jnp.float32)),
        grid_spec=pltpu.PrefetchScalarGridSpec(
            num_scalar_prefetch=0,
            grid=(n_mt, Coutp // tn, Kp // tk),
            in_specs=[a_spec] * len(a_pad) + [w_spec] * len(w_pad) + [b_spec, b_spec],
            out_specs=[o_spec, o_spec, s_spec],
        ),
        compiler_params=pltpu.CompilerParams(
            dimension_semantics=("parallel", "parallel", "arbitrary"),
            vmem_limit_bytes=VMEM_LIMIT),
    )(*a_pad, *w_pad, br2, bi2)

    st = st.reshape(n_mt, 8, Coutp)
    msum = jnp.sum(st[:, 0, :Cout], axis=0)
    msq = jnp.sum(st[:, 1, :Cout], axis=0)
    n_pad_rows = Mp - M
    if n_pad_rows:
        # Zero-padded A rows produce exactly the bias -> subtract them analytically.
        bmag = jnp.sqrt(br * br + bi * bi)
        msum = msum - n_pad_rows * bmag
        msq = msq - n_pad_rows * bmag * bmag
    return out_r[:M, :Cout], out_i[:M, :Cout], msum, msq


def _xla_complex_mm(ar, ai, wr, wi, br, bi):
    """Tiny-M fallback (M < SMALL_M): plain XLA matmul; Pallas tile would be >95% padding."""
    wr = wr.astype(jnp.float32)
    wi = wi.astype(jnp.float32)
    arf = ar.astype(jnp.float32)
    if ai is None:
        out_r = arf @ wr + br
        out_i = arf @ wi + bi
    else:
        aif = ai.astype(jnp.float32)
        out_r = arf @ wr - aif @ wi + br
        out_i = arf @ wi + aif @ wr + bi
    mag2 = out_r * out_r + out_i * out_i
    mag = jnp.sqrt(mag2)
    return out_r, out_i, jnp.sum(mag, axis=0), jnp.sum(mag2, axis=0)


def bn_phase(xr, xi, scale, shift, apply_relu, idr=None, idi=None):
    """(relu o affine)(|x|) * exp(i*angle(x)) per channel; optionally fuses a residual add."""
    N, H, W, C = xr.shape
    P = N * H * W
    has_residual = idr is not None

    # Lane-dense folding: for C < 128 (e.g. C=64) pack `fold` rows into 128 lanes so
    # output stores are unmasked full-lane vst.
    fold = 1
    if C < 128 and 128 % C == 0 and P % (128 // C) == 0:
        fold = 128 // C
    Cf = C * fold
    Pf = P // fold

    br = min(EW_ROWS, _round_up(Pf, 8))
    Pp = _round_up(Pf, br)

    def prep(a):
        return jnp.pad(a.reshape(Pf, Cf), ((0, Pp - Pf), (0, 0)))

    scale_f = jnp.tile(scale, (fold,)).reshape(1, Cf)
    shift_f = jnp.tile(shift, (fold,)).reshape(1, Cf)

    row_spec = pl.BlockSpec((br, Cf), lambda i: (i, 0))
    vec_spec = pl.BlockSpec((1, Cf), lambda i: (0, 0))

    inputs = [prep(xr), prep(xi), scale_f, shift_f]
    in_specs = [row_spec, row_spec, vec_spec, vec_spec]
    if has_residual:
        inputs += [prep(idr), prep(idi)]
        in_specs += [row_spec, row_spec]

    kern = functools.partial(_magphase_kernel, apply_relu=apply_relu,
                             has_residual=has_residual)
    out_r, out_i = pl.pallas_call(
        kern,
        out_shape=(jax.ShapeDtypeStruct((Pp, Cf), jnp.float32),
                   jax.ShapeDtypeStruct((Pp, Cf), jnp.float32)),
        grid=(Pp // br,),
        in_specs=in_specs,
        out_specs=(row_spec, row_spec),
        compiler_params=pltpu.CompilerParams(
            dimension_semantics=("parallel",),
            vmem_limit_bytes=VMEM_LIMIT),
    )(*inputs)
    return (out_r[:Pf].reshape(N, H, W, C), out_i[:Pf].reshape(N, H, W, C))


# ----------------------------- JAX glue -----------------------------------

def im2col(x, kh, kw, stride, padding):
    """x: (N, H, W, C) -> ((N*OH*OW, kh*kw*C), (N, OH, OW)). Patches keep x's dtype (bf16)."""
    # TODO(synk): patch extraction is still materialized in HBM by XLA (now in bf16); full
    # implicit GEMM (kh*kw grid axis over the padded NHWC input) would remove it entirely.
    N, H, W, C = x.shape
    xp = jnp.pad(x, ((0, 0), (padding, padding), (padding, padding), (0, 0)))
    OH = (H + 2 * padding - kh) // stride + 1
    OW = (W + 2 * padding - kw) // stride + 1
    cols = []
    for i in range(kh):
        for j in range(kw):
            cols.append(xp[:, i:i + (OH - 1) * stride + 1:stride,
                              j:j + (OW - 1) * stride + 1:stride, :])
    patches = jnp.concatenate(cols, axis=-1)
    return patches.reshape(N * OH * OW, kh * kw * C), (N, OH, OW)


def complex_conv2d(xr, xi, p, stride, padding):
    """ComplexConv2d via im2col + Pallas complex matmul. xi=None => real input (stem).

    Returns (out_r, out_i, sum(|out|), sum(|out|^2)) with per-channel magnitude sums for BN.
    """
    kh, kw, cin, cout = p['wr'].shape
    ar, dims = im2col(xr.astype(jnp.bfloat16), kh, kw, stride, padding)
    ai = None
    if xi is not None:
        ai, _ = im2col(xi.astype(jnp.bfloat16), kh, kw, stride, padding)
    wr = p['wr'].reshape(kh * kw * cin, cout)
    wi = p['wi'].reshape(kh * kw * cin, cout)
    M = ar.shape[0]

    if M < SMALL_M:
        out_r, out_i, msum, msq = _xla_complex_mm(ar, ai, wr, wi, p['br'], p['bi'])
    elif ai is None:
        out_r, out_i, msum, msq = _mm_call(
            _real_complex_mm_kernel, [ar],
            [wr.astype(jnp.bfloat16), wi.astype(jnp.bfloat16)],
            p['br'], p['bi'])
    else:
        out_r, out_i, msum, msq = _mm_call(
            _complex_mm_kernel, [ar, ai],
            [wr.astype(jnp.bfloat16), wi.astype(jnp.bfloat16),
             (wr + wi).astype(jnp.bfloat16)],            # precomputed Karatsuba weight sum
            p['br'], p['bi'])

    N, OH, OW = dims
    return (out_r.reshape(N, OH, OW, cout),
            out_i.reshape(N, OH, OW, cout), msum, msq)


def bn_from_sums(msum, msq, count, gamma, beta, eps=1e-5):
    """Fold training-mode BatchNorm2d(|x|) stats (from the GEMM epilogue) into scale/shift."""
    mean = msum / count
    var = jnp.maximum(msq / count - mean * mean, 0.0)
    scale = gamma / jnp.sqrt(var + eps)
    shift = beta - mean * scale
    return scale, shift


def bn_real(x, gamma, beta, eps=1e-5):
    mean = x.mean(axis=(0, 1, 2))
    var = ((x - mean) ** 2).mean(axis=(0, 1, 2))
    return (x - mean) / jnp.sqrt(var + eps) * gamma + beta


def complex_maxpool(xr, xi, k, stride, padding):
    """ComplexMaxPool2d: pick the window element with maximum magnitude."""
    # TODO(synk): magnitude-argmax gather stays in XLA glue (data-dependent select).
    def patches(x):
        N, H, W, C = x.shape
        xp = jnp.pad(x, ((0, 0), (padding, padding), (padding, padding), (0, 0)))
        OH = (H + 2 * padding - k) // stride + 1
        OW = (W + 2 * padding - k) // stride + 1
        ws = []
        for i in range(k):
            for j in range(k):
                ws.append(xp[:, i:i + (OH - 1) * stride + 1:stride,
                                j:j + (OW - 1) * stride + 1:stride, :])
        return jnp.stack(ws, axis=3)  # (N, OH, OW, k*k, C)

    pr = patches(xr)
    pi = patches(xi)
    mag2 = pr * pr + pi * pi
    idx = jnp.argmax(mag2, axis=3)
    out_r = jnp.take_along_axis(pr, idx[:, :, :, None, :], axis=3)[:, :, :, 0, :]
    out_i = jnp.take_along_axis(pi, idx[:, :, :, None, :], axis=3)[:, :, :, 0, :]
    return out_r, out_i


# ----------------------------- parameters ---------------------------------

def init_conv(key, kh, kw, cin, cout):
    ks = jax.random.split(key, 4)
    bound = 1.0 / float(np.sqrt(kh * kw * cin))
    return {
        'wr': jax.random.uniform(ks[0], (kh, kw, cin, cout), jnp.float32, -bound, bound),
        'wi': jax.random.uniform(ks[1], (kh, kw, cin, cout), jnp.float32, -bound, bound),
        'br': jax.random.uniform(ks[2], (cout,), jnp.float32, -bound, bound),
        'bi': jax.random.uniform(ks[3], (cout,), jnp.float32, -bound, bound),
    }


def init_bn(c):
    return {'gamma': jnp.ones((c,), jnp.float32),
            'beta': jnp.zeros((c,), jnp.float32)}


STAGE_STRIDES = (1, 2, 2, 2)


def init_resnet(key, layers, num_classes):
    keys = iter(jax.random.split(key, 256))
    expansion = 1  # BasicBlock
    params = {'conv1': init_conv(next(keys), 7, 7, 3, 64), 'bn1': init_bn(64)}
    inplanes = 64
    configs = [(64, layers[0], STAGE_STRIDES[0]), (128, layers[1], STAGE_STRIDES[1]),
               (256, layers[2], STAGE_STRIDES[2]), (512, layers[3], STAGE_STRIDES[3])]
    all_layers = []
    for planes, nblocks, stride in configs:
        blocks = []
        for b in range(nblocks):
            s = stride if b == 0 else 1
            blk = {
                'conv1': init_conv(next(keys), 3, 3, inplanes, planes),
                'bn1': init_bn(planes),
                'conv2': init_conv(next(keys), 3, 3, planes, planes),
                'bn2': init_bn(planes),
            }
            if s != 1 or inplanes != planes * expansion:
                blk['down_conv'] = init_conv(next(keys), 1, 1, inplanes,
                                             planes * expansion)
                blk['down_bn'] = init_bn(planes * expansion)
            blocks.append(blk)
            inplanes = planes * expansion
        all_layers.append(blocks)
    params['layers'] = all_layers
    params['fc'] = init_conv(next(keys), 1, 1, 512 * expansion, num_classes)
    return params


# ----------------------------- forward ------------------------------------

def basic_block_forward(xr, xi, blk, stride):
    or_, oi_, msum, msq = complex_conv2d(xr, xi, blk['conv1'], stride=stride, padding=1)
    cnt = or_.shape[0] * or_.shape[1] * or_.shape[2]
    scale, shift = bn_from_sums(msum, msq, cnt, blk['bn1']['gamma'], blk['bn1']['beta'])
    or_, oi_ = bn_phase(or_, oi_, scale, shift, apply_relu=True)

    or_, oi_, msum, msq = complex_conv2d(or_, oi_, blk['conv2'], stride=1, padding=1)
    cnt = or_.shape[0] * or_.shape[1] * or_.shape[2]
    scale, shift = bn_from_sums(msum, msq, cnt, blk['bn2']['gamma'], blk['bn2']['beta'])
    or_, oi_ = bn_phase(or_, oi_, scale, shift, apply_relu=False)

    if 'down_conv' in blk:
        idr, idi, _, _ = complex_conv2d(xr, xi, blk['down_conv'], stride=stride, padding=0)
        # TODO(synk): cf.Sequential feeds a complex tensor into nn.BatchNorm2d; here BN is
        # applied independently to the real and imaginary parts (plain XLA, tiny tensors).
        idr = bn_real(idr, blk['down_bn']['gamma'], blk['down_bn']['beta'])
        idi = bn_real(idi, blk['down_bn']['gamma'], blk['down_bn']['beta'])
    else:
        idr, idi = xr, xi

    # Fused: (out + identity) -> relu(|.|) * exp(i*angle(.)) in one Pallas pass.
    c = or_.shape[-1]
    return bn_phase(or_, oi_, jnp.ones((c,), jnp.float32),
                    jnp.zeros((c,), jnp.float32), apply_relu=True,
                    idr=idr, idi=idi)


def resnet_forward(params, x_nchw):
    x = jnp.transpose(x_nchw, (0, 2, 3, 1)).astype(jnp.float32)  # NCHW -> NHWC
    # RealToComplexConvolution2D: complex weights applied to a real input (2-dot kernel).
    xr, xi, msum, msq = complex_conv2d(x, None, params['conv1'], stride=2, padding=3)
    cnt = xr.shape[0] * xr.shape[1] * xr.shape[2]
    scale, shift = bn_from_sums(msum, msq, cnt,
                                params['bn1']['gamma'], params['bn1']['beta'])
    xr, xi = bn_phase(xr, xi, scale, shift, apply_relu=True)
    xr, xi = complex_maxpool(xr, xi, k=3, stride=2, padding=1)

    for stage_stride, blocks in zip(STAGE_STRIDES, params['layers']):
        for b_idx, blk in enumerate(blocks):
            s = stage_stride if b_idx == 0 else 1
            xr, xi = basic_block_forward(xr, xi, blk, stride=s)

    # AdaptiveAvgPoolToConv(kernel_size=1): global average pool to 1x1.
    xr = jnp.mean(xr, axis=(1, 2), keepdims=True)
    xi = jnp.mean(xi, axis=(1, 2), keepdims=True)

    # fc: tiny (M=batch, Cout=num_classes) complex 1x1 conv -> plain XLA matmul
    # (too small to usefully tile for the MXU).
    p = params['fc']
    fr = xr.reshape(xr.shape[0], -1)
    fi = xi.reshape(xi.shape[0], -1)
    wr = p['wr'].reshape(-1, p['wr'].shape[-1])
    wi = p['wi'].reshape(-1, p['wi'].shape[-1])
    out_r = fr @ wr - fi @ wi + p['br']
    out_i = fr @ wi + fi @ wr + p['bi']
    out = jax.lax.complex(out_r, out_i)           # (N, num_classes)
    return out[:, :, None, None]                  # NCHW: (N, num_classes, 1, 1)


# ----------------------------- main ----------------------------------------

if __name__ == "__main__":
    key = jax.random.PRNGKey(0)
    pkey, xkey = jax.random.split(key)
    # ResNet(BasicBlock, [1, 1, 1, 1], num_classes=10); small 2x3x32x32 input.
    params = init_resnet(pkey, layers=[1, 1, 1, 1], num_classes=10)
    x = jax.random.normal(xkey, (2, 3, 32, 32), dtype=jnp.float32)

    fwd = jax.jit(resnet_forward)
    out = jax.block_until_ready(fwd(params, x))

    assert out.shape == (2, 10, 1, 1), out.shape
    assert out.dtype == jnp.complex64, out.dtype
    assert bool(jnp.all(jnp.isfinite(out.real)) & jnp.all(jnp.isfinite(out.imag)))
    print("KERNEL_OK")
</pallas_src>

<mosaic_0001>
module attributes {stable_mosaic.version = 11 : i64} {
  func.func private @main(%arg0: i32) attributes {dimension_semantics = [#tpu.dimension_semantics<core_parallel>], iteration_bounds = array<i64: 2>, tpu.core_type = #tpu.core_type<sc_scalar_subcore>, window_params = []} {
    return
  }
}

module attributes {stable_mosaic.version = 11 : i64} {
  func.func private @main(%arg0: i32) attributes {dimension_semantics = [#tpu.dimension_semantics<core_parallel>], iteration_bounds = array<i64: 2>, tpu.core_type = #tpu.core_type<sc_scalar_subcore>, window_params = []} {
    return
  }
}

module attributes {stable_mosaic.version = 11 : i64} {
  func.func @_real_complex_mm_kernel(%arg0: i32, %arg1: i32, %arg2: i32, %arg3: memref<256x256xbf16, #tpu.memory_space<vmem>>, %arg4: memref<256x128xbf16, #tpu.memory_space<vmem>>, %arg5: memref<256x128xbf16, #tpu.memory_space<vmem>>, %arg6: memref<1x128xf32, #tpu.memory_space<vmem>>, %arg7: memref<1x128xf32, #tpu.memory_space<vmem>>, %arg8: memref<256x128xf32, #tpu.memory_space<vmem>>, %arg9: memref<256x128xf32, #tpu.memory_space<vmem>>, %arg10: memref<8x128xf32, #tpu.memory_space<vmem>>) attributes {dimension_semantics = [#tpu.dimension_semantics<parallel>, #tpu.dimension_semantics<parallel>, #tpu.dimension_semantics<arbitrary>], iteration_bounds = array<i64: 2, 1, 1>, scalar_prefetch = 0 : i64, scratch_operands = 0 : i64, tpu.core_type = #tpu.core_type<tc>, window_params = [{transform_indices = @transform_0, window_bounds = array<i64: 256, 256>}, {transform_indices = @transform_1, window_bounds = array<i64: 256, 128>}, {transform_indices = @transform_2, window_bounds = array<i64: 256, 128>}, {transform_indices = @transform_3, window_bounds = array<i64: 1, 128>}, {transform_indices = @transform_4, window_bounds = array<i64: 1, 128>}, {transform_indices = @transform_5, window_bounds = array<i64: 256, 128>}, {transform_indices = @transform_6, window_bounds = array<i64: 256, 128>}, {transform_indices = @transform_7, window_bounds = array<i64: 8, 128>}]} {
    %c0_i32 = arith.constant 0 : i32
    %0 = arith.cmpi eq, %arg2, %c0_i32 : i32
    %1 = arith.extui %0 : i1 to i32
    %c0_i32_0 = arith.constant 0 : i32
    %2 = arith.cmpi ne, %1, %c0_i32_0 : i32
    scf.if %2 {
      %c0_17 = arith.constant 0 : index
      %c0_18 = arith.constant 0 : index
      %17 = vector.load %arg6[%c0_17, %c0_18] : memref<1x128xf32, #tpu.memory_space<vmem>>, vector<1x128xf32>
      %18 = vector.shape_cast %17 : vector<1x128xf32> to vector<1x128xf32>
      %19 = vector.broadcast %18 : vector<1x128xf32> to vector<256x128xf32>
      %c0_19 = arith.constant 0 : index
      %c0_20 = arith.constant 0 : index
      %20 = vector.load %arg8[%c0_19, %c0_20] : memref<256x128xf32, #tpu.memory_space<vmem>>, vector<256x128xf32>
      tpu.vector_store %arg8[%c0_19, %c0_20], %19 {strides = array<i32>} : memref<256x128xf32, #tpu.memory_space<vmem>>, vector<256x128xf32>,
      %c0_21 = arith.constant 0 : index
      %c0_22 = arith.constant 0 : index
      %21 = vector.load %arg7[%c0_21, %c0_22] : memref<1x128xf32, #tpu.memory_space<vmem>>, vector<1x128xf32>
      %22 = vector.shape_cast %21 : vector<1x128xf32> to vector<1x128xf32>
      %23 = vector.broadcast %22 : vector<1x128xf32> to vector<256x128xf32>
      %c0_23 = arith.constant 0 : index
      %c0_24 = arith.constant 0 : index
      %24 = vector.load %arg9[%c0_23, %c0_24] : memref<256x128xf32, #tpu.memory_space<vmem>>, vector<256x128xf32>
      tpu.vector_store %arg9[%c0_23, %c0_24], %23 {strides = array<i32>} : memref<256x128xf32, #tpu.memory_space<vmem>>, vector<256x128xf32>,
    } else {
    }
    %c0 = arith.constant 0 : index
    %c0_1 = arith.constant 0 : index
    %3 = vector.load %arg3[%c0, %c0_1] : memref<256x256xbf16, #tpu.memory_space<vmem>>, vector<256x256xbf16>
    %c0_2 = arith.constant 0 : index
    %c0_3 = arith.constant 0 : index
    %4 = vector.load %arg8[%c0_2, %c0_3] : memref<256x128xf32, #tpu.memory_space<vmem>>, vector<256x128xf32>
    %c0_4 = arith.constant 0 : index
    %c0_5 = arith.constant 0 : index
    %5 = vector.load %arg4[%c0_4, %c0_5] : memref<256x128xbf16, #tpu.memory_space<vmem>>, vector<256x128xbf16>
    %cst = arith.constant dense<0.000000e+00> : vector<256x128xf32>
    %6 = tpu.matmul %3, %5, %cst {dimension_numbers = #tpu.dot_dimension_numbers<[1], [0], [0], [1], [0, 0, 1, 1], [], []>} : vector<256x256xbf16>, vector<256x128xbf16>, vector<256x128xf32> -> vector<256x128xf32>
    %7 = arith.addf %4, %6 : vector<256x128xf32>
    %c0_6 = arith.constant 0 : index
    %c0_7 = arith.constant 0 : index
    %8 = vector.load %arg8[%c0_6, %c0_7] : memref<256x128xf32, #tpu.memory_space<vmem>>, vector<256x128xf32>
    tpu.vector_store %arg8[%c0_6, %c0_7], %7 {strides = array<i32>} : memref<256x128xf32, #tpu.memory_space<vmem>>, vector<256x128xf32>,
    %c0_8 = arith.constant 0 : index
    %c0_9 = arith.constant 0 : index
    %9 = vector.load %arg9[%c0_8, %c0_9] : memref<256x128xf32, #tpu.memory_space<vmem>>, vector<256x128xf32>
    %c0_10 = arith.constant 0 : index
    %c0_11 = arith.constant 0 : index
    %10 = vector.load %arg5[%c0_10, %c0_11] : memref<256x128xbf16, #tpu.memory_space<vmem>>, vector<256x128xbf16>
    %cst_12 = arith.constant dense<0.000000e+00> : vector<256x128xf32>
    %11 = tpu.matmul %3, %10, %cst_12 {dimension_numbers = #tpu.dot_dimension_numbers<[1], [0], [0], [1], [0, 0, 1, 1], [], []>} : vector<256x256xbf16>, vector<256x128xbf16>, vector<256x128xf32> -> vector<256x128xf32>
    %12 = arith.addf %9, %11 : vector<256x128xf32>
    %c0_13 = arith.constant 0 : index
    %c0_14 = arith.constant 0 : index
    %13 = vector.load %arg9[%c0_13, %c0_14] : memref<256x128xf32, #tpu.memory_space<vmem>>, vector<256x128xf32>
    tpu.vector_store %arg9[%c0_13, %c0_14], %12 {strides = array<i32>} : memref<256x128xf32, #tpu.memory_space<vmem>>, vector<256x128xf32>,
    %c0_i32_15 = arith.constant 0 : i32
    %14 = arith.cmpi eq, %arg2, %c0_i32_15 : i32
    %15 = arith.extui %14 : i1 to i32
    %c0_i32_16 = arith.constant 0 : i32
    %16 = arith.cmpi ne, %15, %c0_i32_16 : i32
    scf.if %16 {
      %c0_17 = arith.constant 0 : index
      %c0_18 = arith.constant 0 : index
      %17 = vector.load %arg8[%c0_17, %c0_18] : memref<256x128xf32, #tpu.memory_space<vmem>>, vector<256x128xf32>
      %c0_19 = arith.constant 0 : index
      %c0_20 = arith.constant 0 : index
      %18 = vector.load %arg9[%c0_19, %c0_20] : memref<256x128xf32, #tpu.memory_space<vmem>>, vector<256x128xf32>
      %19 = arith.mulf %17, %17 : vector<256x128xf32>
      %20 = arith.mulf %18, %18 : vector<256x128xf32>
      %21 = arith.addf %19, %20 : vector<256x128xf32>
      %22 = math.sqrt %21 : vector<256x128xf32>
      %cst_21 = arith.constant dense<0.000000e+00> : vector<128xf32>
      %23 = vector.multi_reduction <add>, %22, %cst_21 [0] : vector<256x128xf32> to vector<128xf32>
      %24 = vector.shape_cast %23 : vector<128xf32> to vector<1x128xf32>
      %c0_22 = arith.constant 0 : index
      %c0_23 = arith.constant 0 : index
      %25 = vector.load %arg10[%c0_22, %c0_23] : memref<8x128xf32, #tpu.memory_space<vmem>>, vector<1x128xf32>
      tpu.vector_store %arg10[%c0_22, %c0_23], %24 {strides = array<i32>} : memref<8x128xf32, #tpu.memory_space<vmem>>, vector<1x128xf32>,
      %cst_24 = arith.constant dense<0.000000e+00> : vector<128xf32>
      %26 = vector.multi_reduction <add>, %21, %cst_24 [0] : vector<256x128xf32> to vector<128xf32>
      %27 = vector.shape_cast %26 : vector<128xf32> to vector<1x128xf32>
      %c1 = arith.constant 1 : index
      %c0_25 = arith.constant 0 : index
      %28 = vector.load %arg10[%c1, %c0_25] : memref<8x128xf32, #tpu.memory_space<vmem>>, vector<1x128xf32>
      tpu.vector_store %arg10[%c1, %c0_25], %27 {strides = array<i32>} : memref<8x128xf32, #tpu.memory_space<vmem>>, vector<1x128xf32>,
      %cst_26 = arith.constant 0.000000e+00 : f32
      %29 = vector.broadcast %cst_26 : f32 to vector<6x128xf32>
      %c2 = arith.constant 2 : index
      %c0_27 = arith.constant 0 : index
      %30 = vector.load %arg10[%c2, %c0_27] : memref<8x128xf32, #tpu.memory_space<vmem>>, vector<6x128xf32>
      tpu.vector_store %arg10[%c2, %c0_27], %29 {strides = array<i32>} : memref<8x128xf32, #tpu.memory_space<vmem>>, vector<6x128xf32>,
    } else {
    }
    return
  }
  func.func @transform_0(%arg0: i32, %arg1: i32, %arg2: i32) -> (i32, i32) {
    %c0_i32 = arith.constant 0 : i32
    return %arg0, %arg2 : i32, i32
  }
  func.func @transform_1(%arg0: i32, %arg1: i32, %arg2: i32) -> (i32, i32) {
    %c0_i32 = arith.constant 0 : i32
    return %arg2, %arg1 : i32, i32
  }
  func.func @transform_2(%arg0: i32, %arg1: i32, %arg2: i32) -> (i32, i32) {
    %c0_i32 = arith.constant 0 : i32
    return %arg2, %arg1 : i32, i32
  }
  func.func @transform_3(%arg0: i32, %arg1: i32, %arg2: i32) -> (i32, i32) {
    %c0_i32 = arith.constant 0 : i32
    %c0_i32_0 = arith.constant 0 : i32
    return %c0_i32, %arg1 : i32, i32
  }
  func.func @transform_4(%arg0: i32, %arg1: i32, %arg2: i32) -> (i32, i32) {
    %c0_i32 = arith.constant 0 : i32
    %c0_i32_0 = arith.constant 0 : i32
    return %c0_i32, %arg1 : i32, i32
  }
  func.func @transform_5(%arg0: i32, %arg1: i32, %arg2: i32) -> (i32, i32) {
    %c0_i32 = arith.constant 0 : i32
    return %arg0, %arg1 : i32, i32
  }
  func.func @transform_6(%arg0: i32, %arg1: i32, %arg2: i32) -> (i32, i32) {
    %c0_i32 = arith.constant 0 : i32
    return %arg0, %arg1 : i32, i32
  }
  func.func @transform_7(%arg0: i32, %arg1: i32, %arg2: i32) -> (i32, i32) {
    %c0_i32 = arith.constant 0 : i32
    return %arg0, %arg1 : i32, i32
  }
}

module attributes {stable_mosaic.version = 11 : i64} {
  func.func @_magphase_kernel(%arg0: i32, %arg1: memref<256x128xf32, #tpu.memory_space<vmem>>, %arg2: memref<256x128xf32, #tpu.memory_space<vmem>>, %arg3: memref<1x128xf32, #tpu.memory_space<vmem>>, %arg4: memref<1x128xf32, #tpu.memory_space<vmem>>, %arg5: memref<256x128xf32, #tpu.memory_space<vmem>>, %arg6: memref<256x128xf32, #tpu.memory_space<vmem>>) attributes {dimension_semantics = [#tpu.dimension_semantics<parallel>], iteration_bounds = array<i64: 1>, scalar_prefetch = 0 : i64, scratch_operands = 0 : i64, tpu.core_type = #tpu.core_type<tc>, window_params = [{transform_indices = @transform_0, window_bounds = array<i64: 256, 128>}, {transform_indices = @transform_1, window_bounds = array<i64: 256, 128>}, {pipeline_mode = #tpu.pipeline_mode<synchronous>, transform_indices = @transform_2, window_bounds = array<i64: 1, 128>}, {pipeline_mode = #tpu.pipeline_mode<synchronous>, transform_indices = @transform_3, window_bounds = array<i64: 1, 128>}, {transform_indices = @transform_4, window_bounds = array<i64: 256, 128>}, {transform_indices = @transform_5, window_bounds = array<i64: 256, 128>}]} {
    %c0 = arith.constant 0 : index
    %c0_0 = arith.constant 0 : index
    %0 = vector.load %arg1[%c0, %c0_0] : memref<256x128xf32, #tpu.memory_space<vmem>>, vector<256x128xf32>
    %c0_1 = arith.constant 0 : index
    %c0_2 = arith.constant 0 : index
    %1 = vector.load %arg2[%c0_1, %c0_2] : memref<256x128xf32, #tpu.memory_space<vmem>>, vector<256x128xf32>
    %2 = arith.mulf %0, %0 : vector<256x128xf32>
    %3 = arith.mulf %1, %1 : vector<256x128xf32>
    %4 = arith.addf %2, %3 : vector<256x128xf32>
    %cst = arith.constant 9.99999996E-13 : f32
    %5 = vector.broadcast %cst : f32 to vector<256x128xf32>
    %6 = arith.addf %4, %5 : vector<256x128xf32>
    %7 = math.rsqrt %6 : vector<256x128xf32>
    %8 = arith.mulf %4, %7 : vector<256x128xf32>
    %c0_3 = arith.constant 0 : index
    %c0_4 = arith.constant 0 : index
    %9 = vector.load %arg3[%c0_3, %c0_4] : memref<1x128xf32, #tpu.memory_space<vmem>>, vector<1x128xf32>
    %10 = vector.broadcast %9 : vector<1x128xf32> to vector<256x128xf32>
    %11 = arith.mulf %8, %10 : vector<256x128xf32>
    %c0_5 = arith.constant 0 : index
    %c0_6 = arith.constant 0 : index
    %12 = vector.load %arg4[%c0_5, %c0_6] : memref<1x128xf32, #tpu.memory_space<vmem>>, vector<1x128xf32>
    %13 = vector.broadcast %12 : vector<1x128xf32> to vector<256x128xf32>
    %14 = arith.addf %11, %13 : vector<256x128xf32>
    %cst_7 = arith.constant 0.000000e+00 : f32
    %15 = vector.broadcast %cst_7 : f32 to vector<256x128xf32>
    %16 = arith.maximumf %14, %15 : vector<256x128xf32>
    %17 = arith.mulf %16, %7 : vector<256x128xf32>
    %18 = arith.mulf %0, %17 : vector<256x128xf32>
    %c0_8 = arith.constant 0 : index
    %c0_9 = arith.constant 0 : index
    %19 = vector.load %arg5[%c0_8, %c0_9] : memref<256x128xf32, #tpu.memory_space<vmem>>, vector<256x128xf32>
    tpu.vector_store %arg5[%c0_8, %c0_9], %18 {strides = array<i32>} : memref<256x128xf32, #tpu.memory_space<vmem>>, vector<256x128xf32>,
    %20 = arith.mulf %1, %17 : vector<256x128xf32>
    %c0_10 = arith.constant 0 : index
    %c0_11 = arith.constant 0 : index
    %21 = vector.load %arg6[%c0_10, %c0_11] : memref<256x128xf32, #tpu.memory_space<vmem>>, vector<256x128xf32>
    tpu.vector_store %arg6[%c0_10, %c0_11], %20 {strides = array<i32>} : memref<256x128xf32, #tpu.memory_space<vmem>>, vector<256x128xf32>,
    return
  }
  func.func @transform_0(%arg0: i32) -> (i32, i32) {
    %c0_i32 = arith.constant 0 : i32
    %c0_i32_0 = arith.constant 0 : i32
    return %arg0, %c0_i32 : i32, i32
  }
  func.func @transform_1(%arg0: i32) -> (i32, i32) {
    %c0_i32 = arith.constant 0 : i32
    %c0_i32_0 = arith.constant 0 : i32
    return %arg0, %c0_i32 : i32, i32
  }
  func.func @transform_2(%arg0: i32) -> (i32, i32) {
    %c0_i32 = arith.constant 0 : i32
    %c0_i32_0 = arith.constant 0 : i32
    %c0_i32_1 = arith.constant 0 : i32
    return %c0_i32, %c0_i32_0 : i32, i32
  }
  func.func @transform_3(%arg0: i32) -> (i32, i32) {
    %c0_i32 = arith.constant 0 : i32
    %c0_i32_0 = arith.constant 0 : i32
    %c0_i32_1 = arith.constant 0 : i32
    return %c0_i32, %c0_i32_0 : i32, i32
  }
  func.func @transform_4(%arg0: i32) -> (i32, i32) {
    %c0_i32 = arith.constant 0 : i32
    %c0_i32_0 = arith.constant 0 : i32
    return %arg0, %c0_i32 : i32, i32
  }
  func.func @transform_5(%arg0: i32) -> (i32, i32) {
    %c0_i32 = arith.constant 0 : i32
    %c0_i32_0 = arith.constant 0 : i32
    return %arg0, %c0_i32 : i32, i32
  }
}

module attributes {stable_mosaic.version = 11 : i64} {
  func.func @_complex_mm_kernel(%arg0: i32, %arg1: i32, %arg2: i32, %arg3: memref<128x128xbf16, #tpu.memory_space<vmem>>, %arg4: memref<128x128xbf16, #tpu.memory_space<vmem>>, %arg5: memref<128x128xbf16, #tpu.memory_space<vmem>>, %arg6: memref<128x128xbf16, #tpu.memory_space<vmem>>, %arg7: memref<128x128xbf16, #tpu.memory_space<vmem>>, %arg8: memref<1x128xf32, #tpu.memory_space<vmem>>, %arg9: memref<1x128xf32, #tpu.memory_space<vmem>>, %arg10: memref<128x128xf32, #tpu.memory_space<vmem>>, %arg11: memref<128x128xf32, #tpu.memory_space<vmem>>, %arg12: memref<8x128xf32, #tpu.memory_space<vmem>>) attributes {dimension_semantics = [#tpu.dimension_semantics<parallel>, #tpu.dimension_semantics<parallel>, #tpu.dimension_semantics<arbitrary>], iteration_bounds = array<i64: 1, 1, 5>, scalar_prefetch = 0 : i64, scratch_operands = 0 : i64, tpu.core_type = #tpu.core_type<tc>, window_params = [{transform_indices = @transform_0, window_bounds = array<i64: 128, 128>}, {transform_indices = @transform_1, window_bounds = array<i64: 128, 128>}, {transform_indices = @transform_2, window_bounds = array<i64: 128, 128>}, {transform_indices = @transform_3, window_bounds = array<i64: 128, 128>}, {transform_indices = @transform_4, window_bounds = array<i64: 128, 128>}, {transform_indices = @transform_5, window_bounds = array<i64: 1, 128>}, {transform_indices = @transform_6, window_bounds = array<i64: 1, 128>}, {transform_indices = @transform_7, window_bounds = array<i64: 128, 128>}, {transform_indices = @transform_8, window_bounds = array<i64: 128, 128>}, {transform_indices = @transform_9, window_bounds = array<i64: 8, 128>}]} {
    %c0_i32 = arith.constant 0 : i32
    %0 = arith.cmpi eq, %arg2, %c0_i32 : i32
    %1 = arith.extui %0 : i1 to i32
    %c0_i32_0 = arith.constant 0 : i32
    %2 = arith.cmpi ne, %1, %c0_i32_0 : i32
    scf.if %2 {
      %c0_21 = arith.constant 0 : index
      %c0_22 = arith.constant 0 : index
      %24 = vector.load %arg8[%c0_21, %c0_22] : memref<1x128xf32, #tpu.memory_space<vmem>>, vector<1x128xf32>
      %25 = vector.shape_cast %24 : vector<1x128xf32> to vector<1x128xf32>
      %26 = vector.broadcast %25 : vector<1x128xf32> to vector<128x128xf32>
      %c0_23 = arith.constant 0 : index
      %c0_24 = arith.constant 0 : index
      %27 = vector.load %arg10[%c0_23, %c0_24] : memref<128x128xf32, #tpu.memory_space<vmem>>, vector<128x128xf32>
      tpu.vector_store %arg10[%c0_23, %c0_24], %26 {strides = array<i32>} : memref<128x128xf32, #tpu.memory_space<vmem>>, vector<128x128xf32>,
      %c0_25 = arith.constant 0 : index
      %c0_26 = arith.constant 0 : index
      %28 = vector.load %arg9[%c0_25, %c0_26] : memref<1x128xf32, #tpu.memory_space<vmem>>, vector<1x128xf32>
      %29 = vector.shape_cast %28 : vector<1x128xf32> to vector<1x128xf32>
      %30 = vector.broadcast %29 : vector<1x128xf32> to vector<128x128xf32>
      %c0_27 = arith.constant 0 : index
      %c0_28 = arith.constant 0 : index
      %31 = vector.load %arg11[%c0_27, %c0_28] : memref<128x128xf32, #tpu.memory_space<vmem>>, vector<128x128xf32>
      tpu.vector_store %arg11[%c0_27, %c0_28], %30 {strides = array<i32>} : memref<128x128xf32, #tpu.memory_space<vmem>>, vector<128x128xf32>,
    } else {
    }
    %c0 = arith.constant 0 : index
    %c0_1 = arith.constant 0 : index
    %3 = vector.load %arg3[%c0, %c0_1] : memref<128x128xbf16, #tpu.memory_space<vmem>>, vector<128x128xbf16>
    %c0_2 = arith.constant 0 : index
    %c0_3 = arith.constant 0 : index
    %4 = vector.load %arg4[%c0_2, %c0_3] : memref<128x128xbf16, #tpu.memory_space<vmem>>, vector<128x128xbf16>
    %c0_4 = arith.constant 0 : index
    %c0_5 = arith.constant 0 : index
    %5 = vector.load %arg5[%c0_4, %c0_5] : memref<128x128xbf16, #tpu.memory_space<vmem>>, vector<128x128xbf16>
    %cst = arith.constant dense<0.000000e+00> : vector<128x128xf32>
    %6 = tpu.matmul %3, %5, %cst {dimension_numbers = #tpu.dot_dimension_numbers<[1], [0], [0], [1], [0, 0, 1, 1], [], []>} : vector<128x128xbf16>, vector<128x128xbf16>, vector<128x128xf32> -> vector<128x128xf32>
    %c0_6 = arith.constant 0 : index
    %c0_7 = arith.constant 0 : index
    %7 = vector.load %arg6[%c0_6, %c0_7] : memref<128x128xbf16, #tpu.memory_space<vmem>>, vector<128x128xbf16>
    %cst_8 = arith.constant dense<0.000000e+00> : vector<128x128xf32>
    %8 = tpu.matmul %4, %7, %cst_8 {dimension_numbers = #tpu.dot_dimension_numbers<[1], [0], [0], [1], [0, 0, 1, 1], [], []>} : vector<128x128xbf16>, vector<128x128xbf16>, vector<128x128xf32> -> vector<128x128xf32>
    %9 = arith.addf %3, %4 : vector<128x128xbf16>
    %c0_9 = arith.constant 0 : index
    %c0_10 = arith.constant 0 : index
    %10 = vector.load %arg7[%c0_9, %c0_10] : memref<128x128xbf16, #tpu.memory_space<vmem>>, vector<128x128xbf16>
    %cst_11 = arith.constant dense<0.000000e+00> : vector<128x128xf32>
    %11 = tpu.matmul %9, %10, %cst_11 {dimension_numbers = #tpu.dot_dimension_numbers<[1], [0], [0], [1], [0, 0, 1, 1], [], []>} : vector<128x128xbf16>, vector<128x128xbf16>, vector<128x128xf32> -> vector<128x128xf32>
    %c0_12 = arith.constant 0 : index
    %c0_13 = arith.constant 0 : index
    %12 = vector.load %arg10[%c0_12, %c0_13] : memref<128x128xf32, #tpu.memory_space<vmem>>, vector<128x128xf32>
    %13 = arith.subf %6, %8 : vector<128x128xf32>
    %14 = arith.addf %12, %13 : vector<128x128xf32>
    %c0_14 = arith.constant 0 : index
    %c0_15 = arith.constant 0 : index
    %15 = vector.load %arg10[%c0_14, %c0_15] : memref<128x128xf32, #tpu.memory_space<vmem>>, vector<128x128xf32>
    tpu.vector_store %arg10[%c0_14, %c0_15], %14 {strides = array<i32>} : memref<128x128xf32, #tpu.memory_space<vmem>>, vector<128x128xf32>,
    %c0_16 = arith.constant 0 : index
    %c0_17 = arith.constant 0 : index
    %16 = vector.load %arg11[%c0_16, %c0_17] : memref<128x128xf32, #tpu.memory_space<vmem>>, vector<128x128xf32>
    %17 = arith.subf %11, %6 : vector<128x128xf32>
    %18 = arith.subf %17, %8 : vector<128x128xf32>
    %19 = arith.addf %16, %18 : vector<128x128xf32>
    %c0_18 = arith.constant 0 : index
    %c0_19 = arith.constant 0 : index
    %20 = vector.load %arg11[%c0_18, %c0_19] : memref<128x128xf32, #tpu.memory_space<vmem>>, vector<128x128xf32>
    tpu.vector_store %arg11[%c0_18, %c0_19], %19 {strides = array<i32>} : memref<128x128xf32, #tpu.memory_space<vmem>>, vector<128x128xf32>,
    %c4_i32 = arith.constant 4 : i32
    %21 = arith.cmpi eq, %arg2, %c4_i32 : i32
    %22 = arith.extui %21 : i1 to i32
    %c0_i32_20 = arith.constant 0 : i32
    %23 = arith.cmpi ne, %22, %c0_i32_20 : i32
    scf.if %23 {
      %c0_21 = arith.constant 0 : index
      %c0_22 = arith.constant 0 : index
      %24 = vector.load %arg10[%c0_21, %c0_22] : memref<128x128xf32, #tpu.memory_space<vmem>>, vector<128x128xf32>
      %c0_23 = arith.constant 0 : index
      %c0_24 = arith.constant 0 : index
      %25 = vector.load %arg11[%c0_23, %c0_24] : memref<128x128xf32, #tpu.memory_space<vmem>>, vector<128x128xf32>
      %26 = arith.mulf %24, %24 : vector<128x128xf32>
      %27 = arith.mulf %25, %25 : vector<128x128xf32>
      %28 = arith.addf %26, %27 : vector<128x128xf32>
      %29 = math.sqrt %28 : vector<128x128xf32>
      %cst_25 = arith.constant dense<0.000000e+00> : vector<128xf32>
      %30 = vector.multi_reduction <add>, %29, %cst_25 [0] : vector<128x128xf32> to vector<128xf32>
      %31 = vector.shape_cast %30 : vector<128xf32> to vector<1x128xf32>
      %c0_26 = arith.constant 0 : index
      %c0_27 = arith.constant 0 : index
      %32 = vector.load %arg12[%c0_26, %c0_27] : memref<8x128xf32, #tpu.memory_space<vmem>>, vector<1x128xf32>
      tpu.vector_store %arg12[%c0_26, %c0_27], %31 {strides = array<i32>} : memref<8x128xf32, #tpu.memory_space<vmem>>, vector<1x128xf32>,
      %cst_28 = arith.constant dense<0.000000e+00> : vector<128xf32>
      %33 = vector.multi_reduction <add>, %28, %cst_28 [0] : vector<128x128xf32> to vector<128xf32>
      %34 = vector.shape_cast %33 : vector<128xf32> to vector<1x128xf32>
      %c1 = arith.constant 1 : index
      %c0_29 = arith.constant 0 : index
      %35 = vector.load %arg12[%c1, %c0_29] : memref<8x128xf32, #tpu.memory_space<vmem>>, vector<1x128xf32>
      tpu.vector_store %arg12[%c1, %c0_29], %34 {strides = array<i32>} : memref<8x128xf32, #tpu.memory_space<vmem>>, vector<1x128xf32>,
      %cst_30 = arith.constant 0.000000e+00 : f32
      %36 = vector.broadcast %cst_30 : f32 to vector<6x128xf32>
      %c2 = arith.constant 2 : index
      %c0_31 = arith.constant 0 : index
      %37 = vector.load %arg12[%c2, %c0_31] : memref<8x128xf32, #tpu.memory_space<vmem>>, vector<6x128xf32>
      tpu.vector_store %arg12[%c2, %c0_31], %36 {strides = array<i32>} : memref<8x128xf32, #tpu.memory_space<vmem>>, vector<6x128xf32>,
    } else {
    }
    return
  }
  func.func @transform_0(%arg0: i32, %arg1: i32, %arg2: i32) -> (i32, i32) {
    %c0_i32 = arith.constant 0 : i32
    return %arg0, %arg2 : i32, i32
  }
  func.func @transform_1(%arg0: i32, %arg1: i32, %arg2: i32) -> (i32, i32) {
    %c0_i32 = arith.constant 0 : i32
    return %arg0, %arg2 : i32, i32
  }
  func.func @transform_2(%arg0: i32, %arg1: i32, %arg2: i32) -> (i32, i32) {
    %c0_i32 = arith.constant 0 : i32
    return %arg2, %arg1 : i32, i32
  }
  func.func @transform_3(%arg0: i32, %arg1: i32, %arg2: i32) -> (i32, i32) {
    %c0_i32 = arith.constant 0 : i32
    return %arg2, %arg1 : i32, i32
  }
  func.func @transform_4(%arg0: i32, %arg1: i32, %arg2: i32) -> (i32, i32) {
    %c0_i32 = arith.constant 0 : i32
    return %arg2, %arg1 : i32, i32
  }
  func.func @transform_5(%arg0: i32, %arg1: i32, %arg2: i32) -> (i32, i32) {
    %c0_i32 = arith.constant 0 : i32
    %c0_i32_0 = arith.constant 0 : i32
    return %c0_i32, %arg1 : i32, i32
  }
  func.func @transform_6(%arg0: i32, %arg1: i32, %arg2: i32) -> (i32, i32) {
    %c0_i32 = arith.constant 0 : i32
    %c0_i32_0 = arith.constant 0 : i32
    return %c0_i32, %arg1 : i32, i32
  }
  func.func @transform_7(%arg0: i32, %arg1: i32, %arg2: i32) -> (i32, i32) {
    %c0_i32 = arith.constant 0 : i32
    return %arg0, %arg1 : i32, i32
  }
  func.func @transform_8(%arg0: i32, %arg1: i32, %arg2: i32) -> (i32, i32) {
    %c0_i32 = arith.constant 0 : i32
    return %arg0, %arg1 : i32, i32
  }
  func.func @transform_9(%arg0: i32, %arg1: i32, %arg2: i32) -> (i32, i32) {
    %c0_i32 = arith.constant 0 : i32
    return %arg0, %arg1 : i32, i32
  }
}

module attributes {stable_mosaic.version = 11 : i64} {
  func.func @_magphase_kernel(%arg0: i32, %arg1: memref<64x128xf32, #tpu.memory_space<vmem>>, %arg2: memref<64x128xf32, #tpu.memory_space<vmem>>, %arg3: memref<1x128xf32, #tpu.memory_space<vmem>>, %arg4: memref<1x128xf32, #tpu.memory_space<vmem>>, %arg5: memref<64x128xf32, #tpu.memory_space<vmem>>, %arg6: memref<64x128xf32, #tpu.memory_space<vmem>>) attributes {dimension_semantics = [#tpu.dimension_semantics<parallel>], iteration_bounds = array<i64: 1>, scalar_prefetch = 0 : i64, scratch_operands = 0 : i64, tpu.core_type = #tpu.core_type<tc>, window_params = [{transform_indices = @transform_0, window_bounds = array<i64: 64, 128>}, {transform_indices = @transform_1, window_bounds = array<i64: 64, 128>}, {pipeline_mode = #tpu.pipeline_mode<synchronous>, transform_indices = @transform_2, window_bounds = array<i64: 1, 128>}, {pipeline_mode = #tpu.pipeline_mode<synchronous>, transform_indices = @transform_3, window_bounds = array<i64: 1, 128>}, {transform_indices = @transform_4, window_bounds = array<i64: 64, 128>}, {transform_indices = @transform_5, window_bounds = array<i64: 64, 128>}]} {
    %c0 = arith.constant 0 : index
    %c0_0 = arith.constant 0 : index
    %0 = vector.load %arg1[%c0, %c0_0] : memref<64x128xf32, #tpu.memory_space<vmem>>, vector<64x128xf32>
    %c0_1 = arith.constant 0 : index
    %c0_2 = arith.constant 0 : index
    %1 = vector.load %arg2[%c0_1, %c0_2] : memref<64x128xf32, #tpu.memory_space<vmem>>, vector<64x128xf32>
    %2 = arith.mulf %0, %0 : vector<64x128xf32>
    %3 = arith.mulf %1, %1 : vector<64x128xf32>
    %4 = arith.addf %2, %3 : vector<64x128xf32>
    %cst = arith.constant 9.99999996E-13 : f32
    %5 = vector.broadcast %cst : f32 to vector<64x128xf32>
    %6 = arith.addf %4, %5 : vector<64x128xf32>
    %7 = math.rsqrt %6 : vector<64x128xf32>
    %8 = arith.mulf %4, %7 : vector<64x128xf32>
    %c0_3 = arith.constant 0 : index
    %c0_4 = arith.constant 0 : index
    %9 = vector.load %arg3[%c0_3, %c0_4] : memref<1x128xf32, #tpu.memory_space<vmem>>, vector<1x128xf32>
    %10 = vector.broadcast %9 : vector<1x128xf32> to vector<64x128xf32>
    %11 = arith.mulf %8, %10 : vector<64x128xf32>
    %c0_5 = arith.constant 0 : index
    %c0_6 = arith.constant 0 : index
    %12 = vector.load %arg4[%c0_5, %c0_6] : memref<1x128xf32, #tpu.memory_space<vmem>>, vector<1x128xf32>
    %13 = vector.broadcast %12 : vector<1x128xf32> to vector<64x128xf32>
    %14 = arith.addf %11, %13 : vector<64x128xf32>
    %cst_7 = arith.constant 0.000000e+00 : f32
    %15 = vector.broadcast %cst_7 : f32 to vector<64x128xf32>
    %16 = arith.maximumf %14, %15 : vector<64x128xf32>
    %17 = arith.mulf %16, %7 : vector<64x128xf32>
    %18 = arith.mulf %0, %17 : vector<64x128xf32>
    %c0_8 = arith.constant 0 : index
    %c0_9 = arith.constant 0 : index
    %19 = vector.load %arg5[%c0_8, %c0_9] : memref<64x128xf32, #tpu.memory_space<vmem>>, vector<64x128xf32>
    tpu.vector_store %arg5[%c0_8, %c0_9], %18 {strides = array<i32>} : memref<64x128xf32, #tpu.memory_space<vmem>>, vector<64x128xf32>,
    %20 = arith.mulf %1, %17 : vector<64x128xf32>
    %c0_10 = arith.constant 0 : index
    %c0_11 = arith.constant 0 : index
    %21 = vector.load %arg6[%c0_10, %c0_11] : memref<64x128xf32, #tpu.memory_space<vmem>>, vector<64x128xf32>
    tpu.vector_store %arg6[%c0_10, %c0_11], %20 {strides = array<i32>} : memref<64x128xf32, #tpu.memory_space<vmem>>, vector<64x128xf32>,
    return
  }
  func.func @transform_0(%arg0: i32) -> (i32, i32) {
    %c0_i32 = arith.constant 0 : i32
    %c0_i32_0 = arith.constant 0 : i32
    return %arg0, %c0_i32 : i32, i32
  }
  func.func @transform_1(%arg0: i32) -> (i32, i32) {
    %c0_i32 = arith.constant 0 : i32
    %c0_i32_0 = arith.constant 0 : i32
    return %arg0, %c0_i32 : i32, i32
  }
  func.func @transform_2(%arg0: i32) -> (i32, i32) {
    %c0_i32 = arith.constant 0 : i32
    %c0_i32_0 = arith.constant 0 : i32
    %c0_i32_1 = arith.constant 0 : i32
    return %c0_i32, %c0_i32_0 : i32, i32
  }
  func.func @transform_3(%arg0: i32) -> (i32, i32) {
    %c0_i32 = arith.constant 0 : i32
    %c0_i32_0 = arith.constant 0 : i32
    %c0_i32_1 = arith.constant 0 : i32
    return %c0_i32, %c0_i32_0 : i32, i32
  }
  func.func @transform_4(%arg0: i32) -> (i32, i32) {
    %c0_i32 = arith.constant 0 : i32
    %c0_i32_0 = arith.constant 0 : i32
    return %arg0, %c0_i32 : i32, i32
  }
  func.func @transform_5(%arg0: i32) -> (i32, i32) {
    %c0_i32 = arith.constant 0 : i32
    %c0_i32_0 = arith.constant 0 : i32
    return %arg0, %c0_i32 : i32, i32
  }
}

module attributes {stable_mosaic.version = 11 : i64} {
  func.func @_magphase_kernel(%arg0: i32, %arg1: memref<64x128xf32, #tpu.memory_space<vmem>>, %arg2: memref<64x128xf32, #tpu.memory_space<vmem>>, %arg3: memref<1x128xf32, #tpu.memory_space<vmem>>, %arg4: memref<1x128xf32, #tpu.memory_space<vmem>>, %arg5: memref<64x128xf32, #tpu.memory_space<vmem>>, %arg6: memref<64x128xf32, #tpu.memory_space<vmem>>) attributes {dimension_semantics = [#tpu.dimension_semantics<parallel>], iteration_bounds = array<i64: 1>, scalar_prefetch = 0 : i64, scratch_operands = 0 : i64, tpu.core_type = #tpu.core_type<tc>, window_params = [{transform_indices = @transform_0, window_bounds = array<i64: 64, 128>}, {transform_indices = @transform_1, window_bounds = array<i64: 64, 128>}, {pipeline_mode = #tpu.pipeline_mode<synchronous>, transform_indices = @transform_2, window_bounds = array<i64: 1, 128>}, {pipeline_mode = #tpu.pipeline_mode<synchronous>, transform_indices = @transform_3, window_bounds = array<i64: 1, 128>}, {transform_indices = @transform_4, window_bounds = array<i64: 64, 128>}, {transform_indices = @transform_5, window_bounds = array<i64: 64, 128>}]} {
    %c0 = arith.constant 0 : index
    %c0_0 = arith.constant 0 : index
    %0 = vector.load %arg1[%c0, %c0_0] : memref<64x128xf32, #tpu.memory_space<vmem>>, vector<64x128xf32>
    %c0_1 = arith.constant 0 : index
    %c0_2 = arith.constant 0 : index
    %1 = vector.load %arg2[%c0_1, %c0_2] : memref<64x128xf32, #tpu.memory_space<vmem>>, vector<64x128xf32>
    %2 = arith.mulf %0, %0 : vector<64x128xf32>
    %3 = arith.mulf %1, %1 : vector<64x128xf32>
    %4 = arith.addf %2, %3 : vector<64x128xf32>
    %cst = arith.constant 9.99999996E-13 : f32
    %5 = vector.broadcast %cst : f32 to vector<64x128xf32>
    %6 = arith.addf %4, %5 : vector<64x128xf32>
    %7 = math.rsqrt %6 : vector<64x128xf32>
    %8 = arith.mulf %4, %7 : vector<64x128xf32>
    %c0_3 = arith.constant 0 : index
    %c0_4 = arith.constant 0 : index
    %9 = vector.load %arg3[%c0_3, %c0_4] : memref<1x128xf32, #tpu.memory_space<vmem>>, vector<1x128xf32>
    %10 = vector.broadcast %9 : vector<1x128xf32> to vector<64x128xf32>
    %11 = arith.mulf %8, %10 : vector<64x128xf32>
    %c0_5 = arith.constant 0 : index
    %c0_6 = arith.constant 0 : index
    %12 = vector.load %arg4[%c0_5, %c0_6] : memref<1x128xf32, #tpu.memory_space<vmem>>, vector<1x128xf32>
    %13 = vector.broadcast %12 : vector<1x128xf32> to vector<64x128xf32>
    %14 = arith.addf %11, %13 : vector<64x128xf32>
    %15 = arith.mulf %14, %7 : vector<64x128xf32>
    %16 = arith.mulf %0, %15 : vector<64x128xf32>
    %c0_7 = arith.constant 0 : index
    %c0_8 = arith.constant 0 : index
    %17 = vector.load %arg5[%c0_7, %c0_8] : memref<64x128xf32, #tpu.memory_space<vmem>>, vector<64x128xf32>
    tpu.vector_store %arg5[%c0_7, %c0_8], %16 {strides = array<i32>} : memref<64x128xf32, #tpu.memory_space<vmem>>, vector<64x128xf32>,
    %18 = arith.mulf %1, %15 : vector<64x128xf32>
    %c0_9 = arith.constant 0 : index
    %c0_10 = arith.constant 0 : index
    %19 = vector.load %arg6[%c0_9, %c0_10] : memref<64x128xf32, #tpu.memory_space<vmem>>, vector<64x128xf32>
    tpu.vector_store %arg6[%c0_9, %c0_10], %18 {strides = array<i32>} : memref<64x128xf32, #tpu.memory_space<vmem>>, vector<64x128xf32>,
    return
  }
  func.func @transform_0(%arg0: i32) -> (i32, i32) {
    %c0_i32 = arith.constant 0 : i32
    %c0_i32_0 = arith.constant 0 : i32
    return %arg0, %c0_i32 : i32, i32
  }
  func.func @transform_1(%arg0: i32) -> (i32, i32) {
    %c0_i32 = arith.constant 0 : i32
    %c0_i32_0 = arith.constant 0 : i32
    return %arg0, %c0_i32 : i32, i32
  }
  func.func @transform_2(%arg0: i32) -> (i32, i32) {
    %c0_i32 = arith.constant 0 : i32
    %c0_i32_0 = arith.constant 0 : i32
    %c0_i32_1 = arith.constant 0 : i32
    return %c0_i32, %c0_i32_0 : i32, i32
  }
  func.func @transform_3(%arg0: i32) -> (i32, i32) {
    %c0_i32 = arith.constant 0 : i32
    %c0_i32_0 = arith.constant 0 : i32
    %c0_i32_1 = arith.constant 0 : i32
    return %c0_i32, %c0_i32_0 : i32, i32
  }
  func.func @transform_4(%arg0: i32) -> (i32, i32) {
    %c0_i32 = arith.constant 0 : i32
    %c0_i32_0 = arith.constant 0 : i32
    return %arg0, %c0_i32 : i32, i32
  }
  func.func @transform_5(%arg0: i32) -> (i32, i32) {
    %c0_i32 = arith.constant 0 : i32
    %c0_i32_0 = arith.constant 0 : i32
    return %arg0, %c0_i32 : i32, i32
  }
}

module attributes {stable_mosaic.version = 11 : i64} {
  func.func @_magphase_kernel(%arg0: i32, %arg1: memref<64x128xf32, #tpu.memory_space<vmem>>, %arg2: memref<64x128xf32, #tpu.memory_space<vmem>>, %arg3: memref<1x128xf32, #tpu.memory_space<vmem>>, %arg4: memref<1x128xf32, #tpu.memory_space<vmem>>, %arg5: memref<64x128xf32, #tpu.memory_space<vmem>>, %arg6: memref<64x128xf32, #tpu.memory_space<vmem>>, %arg7: memref<64x128xf32, #tpu.memory_space<vmem>>, %arg8: memref<64x128xf32, #tpu.memory_space<vmem>>) attributes {dimension_semantics = [#tpu.dimension_semantics<parallel>], iteration_bounds = array<i64: 1>, scalar_prefetch = 0 : i64, scratch_operands = 0 : i64, tpu.core_type = #tpu.core_type<tc>, window_params = [{transform_indices = @transform_0, window_bounds = array<i64: 64, 128>}, {transform_indices = @transform_1, window_bounds = array<i64: 64, 128>}, {pipeline_mode = #tpu.pipeline_mode<synchronous>, transform_indices = @transform_2, window_bounds = array<i64: 1, 128>}, {pipeline_mode = #tpu.pipeline_mode<synchronous>, transform_indices = @transform_3, window_bounds = array<i64: 1, 128>}, {transform_indices = @transform_4, window_bounds = array<i64: 64, 128>}, {transform_indices = @transform_5, window_bounds = array<i64: 64, 128>}, {transform_indices = @transform_6, window_bounds = array<i64: 64, 128>}, {transform_indices = @transform_7, window_bounds = array<i64: 64, 128>}]} {
    %c0 = arith.constant 0 : index
    %c0_0 = arith.constant 0 : index
    %0 = vector.load %arg1[%c0, %c0_0] : memref<64x128xf32, #tpu.memory_space<vmem>>, vector<64x128xf32>
    %c0_1 = arith.constant 0 : index
    %c0_2 = arith.constant 0 : index
    %1 = vector.load %arg5[%c0_1, %c0_2] : memref<64x128xf32, #tpu.memory_space<vmem>>, vector<64x128xf32>
    %2 = arith.addf %0, %1 : vector<64x128xf32>
    %c0_3 = arith.constant 0 : index
    %c0_4 = arith.constant 0 : index
    %3 = vector.load %arg2[%c0_3, %c0_4] : memref<64x128xf32, #tpu.memory_space<vmem>>, vector<64x128xf32>
    %c0_5 = arith.constant 0 : index
    %c0_6 = arith.constant 0 : index
    %4 = vector.load %arg6[%c0_5, %c0_6] : memref<64x128xf32, #tpu.memory_space<vmem>>, vector<64x128xf32>
    %5 = arith.addf %3, %4 : vector<64x128xf32>
    %6 = arith.mulf %2, %2 : vector<64x128xf32>
    %7 = arith.mulf %5, %5 : vector<64x128xf32>
    %8 = arith.addf %6, %7 : vector<64x128xf32>
    %cst = arith.constant 9.99999996E-13 : f32
    %9 = vector.broadcast %cst : f32 to vector<64x128xf32>
    %10 = arith.addf %8, %9 : vector<64x128xf32>
    %11 = math.rsqrt %10 : vector<64x128xf32>
    %12 = arith.mulf %8, %11 : vector<64x128xf32>
    %c0_7 = arith.constant 0 : index
    %c0_8 = arith.constant 0 : index
    %13 = vector.load %arg3[%c0_7, %c0_8] : memref<1x128xf32, #tpu.memory_space<vmem>>, vector<1x128xf32>
    %14 = vector.broadcast %13 : vector<1x128xf32> to vector<64x128xf32>
    %15 = arith.mulf %12, %14 : vector<64x128xf32>
    %c0_9 = arith.constant 0 : index
    %c0_10 = arith.constant 0 : index
    %16 = vector.load %arg4[%c0_9, %c0_10] : memref<1x128xf32, #tpu.memory_space<vmem>>, vector<1x128xf32>
    %17 = vector.broadcast %16 : vector<1x128xf32> to vector<64x128xf32>
    %18 = arith.addf %15, %17 : vector<64x128xf32>
    %cst_11 = arith.constant 0.000000e+00 : f32
    %19 = vector.broadcast %cst_11 : f32 to vector<64x128xf32>
    %20 = arith.maximumf %18, %19 : vector<64x128xf32>
    %21 = arith.mulf %20, %11 : vector<64x128xf32>
    %22 = arith.mulf %2, %21 : vector<64x128xf32>
    %c0_12 = arith.constant 0 : index
    %c0_13 = arith.constant 0 : index
    %23 = vector.load %arg7[%c0_12, %c0_13] : memref<64x128xf32, #tpu.memory_space<vmem>>, vector<64x128xf32>
    tpu.vector_store %arg7[%c0_12, %c0_13], %22 {strides = array<i32>} : memref<64x128xf32, #tpu.memory_space<vmem>>, vector<64x128xf32>,
    %24 = arith.mulf %5, %21 : vector<64x128xf32>
    %c0_14 = arith.constant 0 : index
    %c0_15 = arith.constant 0 : index
    %25 = vector.load %arg8[%c0_14, %c0_15] : memref<64x128xf32, #tpu.memory_space<vmem>>, vector<64x128xf32>
    tpu.vector_store %arg8[%c0_14, %c0_15], %24 {strides = array<i32>} : memref<64x128xf32, #tpu.memory_space<vmem>>, vector<64x128xf32>,
    return
  }
  func.func @transform_0(%arg0: i32) -> (i32, i32) {
    %c0_i32 = arith.constant 0 : i32
    %c0_i32_0 = arith.constant 0 : i32
    return %arg0, %c0_i32 : i32, i32
  }
  func.func @transform_1(%arg0: i32) -> (i32, i32) {
    %c0_i32 = arith.constant 0 : i32
    %c0_i32_0 = arith.constant 0 : i32
    return %arg0, %c0_i32 : i32, i32
  }
  func.func @transform_2(%arg0: i32) -> (i32, i32) {
    %c0_i32 = arith.constant 0 : i32
    %c0_i32_0 = arith.constant 0 : i32
    %c0_i32_1 = arith.constant 0 : i32
    return %c0_i32, %c0_i32_0 : i32, i32
  }
  func.func @transform_3(%arg0: i32) -> (i32, i32) {
    %c0_i32 = arith.constant 0 : i32
    %c0_i32_0 = arith.constant 0 : i32
    %c0_i32_1 = arith.constant 0 : i32
    return %c0_i32, %c0_i32_0 : i32, i32
  }
  func.func @transform_4(%arg0: i32) -> (i32, i32) {
    %c0_i32 = arith.constant 0 : i32
    %c0_i32_0 = arith.constant 0 : i32
    return %arg0, %c0_i32 : i32, i32
  }
  func.func @transform_5(%arg0: i32) -> (i32, i32) {
    %c0_i32 = arith.constant 0 : i32
    %c0_i32_0 = arith.constant 0 : i32
    return %arg0, %c0_i32 : i32, i32
  }
  func.func @transform_6(%arg0: i32) -> (i32, i32) {
    %c0_i32 = arith.constant 0 : i32
    %c0_i32_0 = arith.constant 0 : i32
    return %arg0, %c0_i32 : i32, i32
  }
  func.func @transform_7(%arg0: i32) -> (i32, i32) {
    %c0_i32 = arith.constant 0 : i32
    %c0_i32_0 = arith.constant 0 : i32
    return %arg0, %c0_i32 : i32, i32
  }
}

module attributes {stable_mosaic.version = 11 : i64} {
  func.func @_magphase_kernel(%arg0: i32, %arg1: memref<32x128xf32, #tpu.memory_space<vmem>>, %arg2: memref<32x128xf32, #tpu.memory_space<vmem>>, %arg3: memref<1x128xf32, #tpu.memory_space<vmem>>, %arg4: memref<1x128xf32, #tpu.memory_space<vmem>>, %arg5: memref<32x128xf32, #tpu.memory_space<vmem>>, %arg6: memref<32x128xf32, #tpu.memory_space<vmem>>) attributes {dimension_semantics = [#tpu.dimension_semantics<parallel>], iteration_bounds = array<i64: 1>, scalar_prefetch = 0 : i64, scratch_operands = 0 : i64, tpu.core_type = #tpu.core_type<tc>, window_params = [{transform_indices = @transform_0, window_bounds = array<i64: 32, 128>}, {transform_indices = @transform_1, window_bounds = array<i64: 32, 128>}, {pipeline_mode = #tpu.pipeline_mode<synchronous>, transform_indices = @transform_2, window_bounds = array<i64: 1, 128>}, {pipeline_mode = #tpu.pipeline_mode<synchronous>, transform_indices = @transform_3, window_bounds = array<i64: 1, 128>}, {transform_indices = @transform_4, window_bounds = array<i64: 32, 128>}, {transform_indices = @transform_5, window_bounds = array<i64: 32, 128>}]} {
    %c0 = arith.constant 0 : index
    %c0_0 = arith.constant 0 : index
    %0 = vector.load %arg1[%c0, %c0_0] : memref<32x128xf32, #tpu.memory_space<vmem>>, vector<32x128xf32>
    %c0_1 = arith.constant 0 : index
    %c0_2 = arith.constant 0 : index
    %1 = vector.load %arg2[%c0_1, %c0_2] : memref<32x128xf32, #tpu.memory_space<vmem>>, vector<32x128xf32>
    %2 = arith.mulf %0, %0 : vector<32x128xf32>
    %3 = arith.mulf %1, %1 : vector<32x128xf32>
    %4 = arith.addf %2, %3 : vector<32x128xf32>
    %cst = arith.constant 9.99999996E-13 : f32
    %5 = vector.broadcast %cst : f32 to vector<32x128xf32>
    %6 = arith.addf %4, %5 : vector<32x128xf32>
    %7 = math.rsqrt %6 : vector<32x128xf32>
    %8 = arith.mulf %4, %7 : vector<32x128xf32>
    %c0_3 = arith.constant 0 : index
    %c0_4 = arith.constant 0 : index
    %9 = vector.load %arg3[%c0_3, %c0_4] : memref<1x128xf32, #tpu.memory_space<vmem>>, vector<1x128xf32>
    %10 = vector.broadcast %9 : vector<1x128xf32> to vector<32x128xf32>
    %11 = arith.mulf %8, %10 : vector<32x128xf32>
    %c0_5 = arith.constant 0 : index
    %c0_6 = arith.constant 0 : index
    %12 = vector.load %arg4[%c0_5, %c0_6] : memref<1x128xf32, #tpu.memory_space<vmem>>, vector<1x128xf32>
    %13 = vector.broadcast %12 : vector<1x128xf32> to vector<32x128xf32>
    %14 = arith.addf %11, %13 : vector<32x128xf32>
    %cst_7 = arith.constant 0.000000e+00 : f32
    %15 = vector.broadcast %cst_7 : f32 to vector<32x128xf32>
    %16 = arith.maximumf %14, %15 : vector<32x128xf32>
    %17 = arith.mulf %16, %7 : vector<32x128xf32>
    %18 = arith.mulf %0, %17 : vector<32x128xf32>
    %c0_8 = arith.constant 0 : index
    %c0_9 = arith.constant 0 : index
    %19 = vector.load %arg5[%c0_8, %c0_9] : memref<32x128xf32, #tpu.memory_space<vmem>>, vector<32x128xf32>
    tpu.vector_store %arg5[%c0_8, %c0_9], %18 {strides = array<i32>} : memref<32x128xf32, #tpu.memory_space<vmem>>, vector<32x128xf32>,
    %20 = arith.mulf %1, %17 : vector<32x128xf32>
    %c0_10 = arith.constant 0 : index
    %c0_11 = arith.constant 0 : index
    %21 = vector.load %arg6[%c0_10, %c0_11] : memref<32x128xf32, #tpu.memory_space<vmem>>, vector<32x128xf32>
    tpu.vector_store %arg6[%c0_10, %c0_11], %20 {strides = array<i32>} : memref<32x128xf32, #tpu.memory_space<vmem>>, vector<32x128xf32>,
    return
  }
  func.func @transform_0(%arg0: i32) -> (i32, i32) {
    %c0_i32 = arith.constant 0 : i32
    %c0_i32_0 = arith.constant 0 : i32
    return %arg0, %c0_i32 : i32, i32
  }
  func.func @transform_1(%arg0: i32) -> (i32, i32) {
    %c0_i32 = arith.constant 0 : i32
    %c0_i32_0 = arith.constant 0 : i32
    return %arg0, %c0_i32 : i32, i32
  }
  func.func @transform_2(%arg0: i32) -> (i32, i32) {
    %c0_i32 = arith.constant 0 : i32
    %c0_i32_0 = arith.constant 0 : i32
    %c0_i32_1 = arith.constant 0 : i32
    return %c0_i32, %c0_i32_0 : i32, i32
  }
  func.func @transform_3(%arg0: i32) -> (i32, i32) {
    %c0_i32 = arith.constant 0 : i32
    %c0_i32_0 = arith.constant 0 : i32
    %c0_i32_1 = arith.constant 0 : i32
    return %c0_i32, %c0_i32_0 : i32, i32
  }
  func.func @transform_4(%arg0: i32) -> (i32, i32) {
    %c0_i32 = arith.constant 0 : i32
    %c0_i32_0 = arith.constant 0 : i32
    return %arg0, %c0_i32 : i32, i32
  }
  func.func @transform_5(%arg0: i32) -> (i32, i32) {
    %c0_i32 = arith.constant 0 : i32
    %c0_i32_0 = arith.constant 0 : i32
    return %arg0, %c0_i32 : i32, i32
  }
}

module attributes {stable_mosaic.version = 11 : i64} {
  func.func @_magphase_kernel(%arg0: i32, %arg1: memref<32x128xf32, #tpu.memory_space<vmem>>, %arg2: memref<32x128xf32, #tpu.memory_space<vmem>>, %arg3: memref<1x128xf32, #tpu.memory_space<vmem>>, %arg4: memref<1x128xf32, #tpu.memory_space<vmem>>, %arg5: memref<32x128xf32, #tpu.memory_space<vmem>>, %arg6: memref<32x128xf32, #tpu.memory_space<vmem>>) attributes {dimension_semantics = [#tpu.dimension_semantics<parallel>], iteration_bounds = array<i64: 1>, scalar_prefetch = 0 : i64, scratch_operands = 0 : i64, tpu.core_type = #tpu.core_type<tc>, window_params = [{transform_indices = @transform_0, window_bounds = array<i64: 32, 128>}, {transform_indices = @transform_1, window_bounds = array<i64: 32, 128>}, {pipeline_mode = #tpu.pipeline_mode<synchronous>, transform_indices = @transform_2, window_bounds = array<i64: 1, 128>}, {pipeline_mode = #tpu.pipeline_mode<synchronous>, transform_indices = @transform_3, window_bounds = array<i64: 1, 128>}, {transform_indices = @transform_4, window_bounds = array<i64: 32, 128>}, {transform_indices = @transform_5, window_bounds = array<i64: 32, 128>}]} {
    %c0 = arith.constant 0 : index
    %c0_0 = arith.constant 0 : index
    %0 = vector.load %arg1[%c0, %c0_0] : memref<32x128xf32, #tpu.memory_space<vmem>>, vector<32x128xf32>
    %c0_1 = arith.constant 0 : index
    %c0_2 = arith.constant 0 : index
    %1 = vector.load %arg2[%c0_1, %c0_2] : memref<32x128xf32, #tpu.memory_space<vmem>>, vector<32x128xf32>
    %2 = arith.mulf %0, %0 : vector<32x128xf32>
    %3 = arith.mulf %1, %1 : vector<32x128xf32>
    %4 = arith.addf %2, %3 : vector<32x128xf32>
    %cst = arith.constant 9.99999996E-13 : f32
    %5 = vector.broadcast %cst : f32 to vector<32x128xf32>
    %6 = arith.addf %4, %5 : vector<32x128xf32>
    %7 = math.rsqrt %6 : vector<32x128xf32>
    %8 = arith.mulf %4, %7 : vector<32x128xf32>
    %c0_3 = arith.constant 0 : index
    %c0_4 = arith.constant 0 : index
    %9 = vector.load %arg3[%c0_3, %c0_4] : memref<1x128xf32, #tpu.memory_space<vmem>>, vector<1x128xf32>
    %10 = vector.broadcast %9 : vector<1x128xf32> to vector<32x128xf32>
    %11 = arith.mulf %8, %10 : vector<32x128xf32>
    %c0_5 = arith.constant 0 : index
    %c0_6 = arith.constant 0 : index
    %12 = vector.load %arg4[%c0_5, %c0_6] : memref<1x128xf32, #tpu.memory_space<vmem>>, vector<1x128xf32>
    %13 = vector.broadcast %12 : vector<1x128xf32> to vector<32x128xf32>
    %14 = arith.addf %11, %13 : vector<32x128xf32>
    %15 = arith.mulf %14, %7 : vector<32x128xf32>
    %16 = arith.mulf %0, %15 : vector<32x128xf32>
    %c0_7 = arith.constant 0 : index
    %c0_8 = arith.constant 0 : index
    %17 = vector.load %arg5[%c0_7, %c0_8] : memref<32x128xf32, #tpu.memory_space<vmem>>, vector<32x128xf32>
    tpu.vector_store %arg5[%c0_7, %c0_8], %16 {strides = array<i32>} : memref<32x128xf32, #tpu.memory_space<vmem>>, vector<32x128xf32>,
    %18 = arith.mulf %1, %15 : vector<32x128xf32>
    %c0_9 = arith.constant 0 : index
    %c0_10 = arith.constant 0 : index
    %19 = vector.load %arg6[%c0_9, %c0_10] : memref<32x128xf32, #tpu.memory_space<vmem>>, vector<32x128xf32>
    tpu.vector_store %arg6[%c0_9, %c0_10], %18 {strides = array<i32>} : memref<32x128xf32, #tpu.memory_space<vmem>>, vector<32x128xf32>,
    return
  }
  func.func @transform_0(%arg0: i32) -> (i32, i32) {
    %c0_i32 = arith.constant 0 : i32
    %c0_i32_0 = arith.constant 0 : i32
    return %arg0, %c0_i32 : i32, i32
  }
  func.func @transform_1(%arg0: i32) -> (i32, i32) {
    %c0_i32 = arith.constant 0 : i32
    %c0_i32_0 = arith.constant 0 : i32
    return %arg0, %c0_i32 : i32, i32
  }
  func.func @transform_2(%arg0: i32) -> (i32, i32) {
    %c0_i32 = arith.constant 0 : i32
    %c0_i32_0 = arith.constant 0 : i32
    %c0_i32_1 = arith.constant 0 : i32
    return %c0_i32, %c0_i32_0 : i32, i32
  }
  func.func @transform_3(%arg0: i32) -> (i32, i32) {
    %c0_i32 = arith.constant 0 : i32
    %c0_i32_0 = arith.constant 0 : i32
    %c0_i32_1 = arith.constant 0 : i32
    return %c0_i32, %c0_i32_0 : i32, i32
  }
  func.func @transform_4(%arg0: i32) -> (i32, i32) {
    %c0_i32 = arith.constant 0 : i32
    %c0_i32_0 = arith.constant 0 : i32
    return %arg0, %c0_i32 : i32, i32
  }
  func.func @transform_5(%arg0: i32) -> (i32, i32) {
    %c0_i32 = arith.constant 0 : i32
    %c0_i32_0 = arith.constant 0 : i32
    return %arg0, %c0_i32 : i32, i32
  }
}

module attributes {stable_mosaic.version = 11 : i64} {
  func.func @_magphase_kernel(%arg0: i32, %arg1: memref<32x128xf32, #tpu.memory_space<vmem>>, %arg2: memref<32x128xf32, #tpu.memory_space<vmem>>, %arg3: memref<1x128xf32, #tpu.memory_space<vmem>>, %arg4: memref<1x128xf32, #tpu.memory_space<vmem>>, %arg5: memref<32x128xf32, #tpu.memory_space<vmem>>, %arg6: memref<32x128xf32, #tpu.memory_space<vmem>>, %arg7: memref<32x128xf32, #tpu.memory_space<vmem>>, %arg8: memref<32x128xf32, #tpu.memory_space<vmem>>) attributes {dimension_semantics = [#tpu.dimension_semantics<parallel>], iteration_bounds = array<i64: 1>, scalar_prefetch = 0 : i64, scratch_operands = 0 : i64, tpu.core_type = #tpu.core_type<tc>, window_params = [{transform_indices = @transform_0, window_bounds = array<i64: 32, 128>}, {transform_indices = @transform_1, window_bounds = array<i64: 32, 128>}, {pipeline_mode = #tpu.pipeline_mode<synchronous>, transform_indices = @transform_2, window_bounds = array<i64: 1, 128>}, {pipeline_mode = #tpu.pipeline_mode<synchronous>, transform_indices = @transform_3, window_bounds = array<i64: 1, 128>}, {transform_indices = @transform_4, window_bounds = array<i64: 32, 128>}, {transform_indices = @transform_5, window_bounds = array<i64: 32, 128>}, {transform_indices = @transform_6, window_bounds = array<i64: 32, 128>}, {transform_indices = @transform_7, window_bounds = array<i64: 32, 128>}]} {
    %c0 = arith.constant 0 : index
    %c0_0 = arith.constant 0 : index
    %0 = vector.load %arg1[%c0, %c0_0] : memref<32x128xf32, #tpu.memory_space<vmem>>, vector<32x128xf32>
    %c0_1 = arith.constant 0 : index
    %c0_2 = arith.constant 0 : index
    %1 = vector.load %arg5[%c0_1, %c0_2] : memref<32x128xf32, #tpu.memory_space<vmem>>, vector<32x128xf32>
    %2 = arith.addf %0, %1 : vector<32x128xf32>
    %c0_3 = arith.constant 0 : index
    %c0_4 = arith.constant 0 : index
    %3 = vector.load %arg2[%c0_3, %c0_4] : memref<32x128xf32, #tpu.memory_space<vmem>>, vector<32x128xf32>
    %c0_5 = arith.constant 0 : index
    %c0_6 = arith.constant 0 : index
    %4 = vector.load %arg6[%c0_5, %c0_6] : memref<32x128xf32, #tpu.memory_space<vmem>>, vector<32x128xf32>
    %5 = arith.addf %3, %4 : vector<32x128xf32>
    %6 = arith.mulf %2, %2 : vector<32x128xf32>
    %7 = arith.mulf %5, %5 : vector<32x128xf32>
    %8 = arith.addf %6, %7 : vector<32x128xf32>
    %cst = arith.constant 9.99999996E-13 : f32
    %9 = vector.broadcast %cst : f32 to vector<32x128xf32>
    %10 = arith.addf %8, %9 : vector<32x128xf32>
    %11 = math.rsqrt %10 : vector<32x128xf32>
    %12 = arith.mulf %8, %11 : vector<32x128xf32>
    %c0_7 = arith.constant 0 : index
    %c0_8 = arith.constant 0 : index
    %13 = vector.load %arg3[%c0_7, %c0_8] : memref<1x128xf32, #tpu.memory_space<vmem>>, vector<1x128xf32>
    %14 = vector.broadcast %13 : vector<1x128xf32> to vector<32x128xf32>
    %15 = arith.mulf %12, %14 : vector<32x128xf32>
    %c0_9 = arith.constant 0 : index
    %c0_10 = arith.constant 0 : index
    %16 = vector.load %arg4[%c0_9, %c0_10] : memref<1x128xf32, #tpu.memory_space<vmem>>, vector<1x128xf32>
    %17 = vector.broadcast %16 : vector<1x128xf32> to vector<32x128xf32>
    %18 = arith.addf %15, %17 : vector<32x128xf32>
    %cst_11 = arith.constant 0.000000e+00 : f32
    %19 = vector.broadcast %cst_11 : f32 to vector<32x128xf32>
    %20 = arith.maximumf %18, %19 : vector<32x128xf32>
    %21 = arith.mulf %20, %11 : vector<32x128xf32>
    %22 = arith.mulf %2, %21 : vector<32x128xf32>
    %c0_12 = arith.constant 0 : index
    %c0_13 = arith.constant 0 : index
    %23 = vector.load %arg7[%c0_12, %c0_13] : memref<32x128xf32, #tpu.memory_space<vmem>>, vector<32x128xf32>
    tpu.vector_store %arg7[%c0_12, %c0_13], %22 {strides = array<i32>} : memref<32x128xf32, #tpu.memory_space<vmem>>, vector<32x128xf32>,
    %24 = arith.mulf %5, %21 : vector<32x128xf32>
    %c0_14 = arith.constant 0 : index
    %c0_15 = arith.constant 0 : index
    %25 = vector.load %arg8[%c0_14, %c0_15] : memref<32x128xf32, #tpu.memory_space<vmem>>, vector<32x128xf32>
    tpu.vector_store %arg8[%c0_14, %c0_15], %24 {strides = array<i32>} : memref<32x128xf32, #tpu.memory_space<vmem>>, vector<32x128xf32>,
    return
  }
  func.func @transform_0(%arg0: i32) -> (i32, i32) {
    %c0_i32 = arith.constant 0 : i32
    %c0_i32_0 = arith.constant 0 : i32
    return %arg0, %c0_i32 : i32, i32
  }
  func.func @transform_1(%arg0: i32) -> (i32, i32) {
    %c0_i32 = arith.constant 0 : i32
    %c0_i32_0 = arith.constant 0 : i32
    return %arg0, %c0_i32 : i32, i32
  }
  func.func @transform_2(%arg0: i32) -> (i32, i32) {
    %c0_i32 = arith.constant 0 : i32
    %c0_i32_0 = arith.constant 0 : i32
    %c0_i32_1 = arith.constant 0 : i32
    return %c0_i32, %c0_i32_0 : i32, i32
  }
  func.func @transform_3(%arg0: i32) -> (i32, i32) {
    %c0_i32 = arith.constant 0 : i32
    %c0_i32_0 = arith.constant 0 : i32
    %c0_i32_1 = arith.constant 0 : i32
    return %c0_i32, %c0_i32_0 : i32, i32
  }
  func.func @transform_4(%arg0: i32) -> (i32, i32) {
    %c0_i32 = arith.constant 0 : i32
    %c0_i32_0 = arith.constant 0 : i32
    return %arg0, %c0_i32 : i32, i32
  }
  func.func @transform_5(%arg0: i32) -> (i32, i32) {
    %c0_i32 = arith.constant 0 : i32
    %c0_i32_0 = arith.constant 0 : i32
    return %arg0, %c0_i32 : i32, i32
  }
  func.func @transform_6(%arg0: i32) -> (i32, i32) {
    %c0_i32 = arith.constant 0 : i32
    %c0_i32_0 = arith.constant 0 : i32
    return %arg0, %c0_i32 : i32, i32
  }
  func.func @transform_7(%arg0: i32) -> (i32, i32) {
    %c0_i32 = arith.constant 0 : i32
    %c0_i32_0 = arith.constant 0 : i32
    return %arg0, %c0_i32 : i32, i32
  }
}

module attributes {stable_mosaic.version = 11 : i64} {
  func.func @_magphase_kernel(%arg0: i32, %arg1: memref<8x256xf32, #tpu.memory_space<vmem>>, %arg2: memref<8x256xf32, #tpu.memory_space<vmem>>, %arg3: memref<1x256xf32, #tpu.memory_space<vmem>>, %arg4: memref<1x256xf32, #tpu.memory_space<vmem>>, %arg5: memref<8x256xf32, #tpu.memory_space<vmem>>, %arg6: memref<8x256xf32, #tpu.memory_space<vmem>>) attributes {dimension_semantics = [#tpu.dimension_semantics<parallel>], iteration_bounds = array<i64: 1>, scalar_prefetch = 0 : i64, scratch_operands = 0 : i64, tpu.core_type = #tpu.core_type<tc>, window_params = [{transform_indices = @transform_0, window_bounds = array<i64: 8, 256>}, {transform_indices = @transform_1, window_bounds = array<i64: 8, 256>}, {pipeline_mode = #tpu.pipeline_mode<synchronous>, transform_indices = @transform_2, window_bounds = array<i64: 1, 256>}, {pipeline_mode = #tpu.pipeline_mode<synchronous>, transform_indices = @transform_3, window_bounds = array<i64: 1, 256>}, {transform_indices = @transform_4, window_bounds = array<i64: 8, 256>}, {transform_indices = @transform_5, window_bounds = array<i64: 8, 256>}]} {
    %c0 = arith.constant 0 : index
    %c0_0 = arith.constant 0 : index
    %0 = vector.load %arg1[%c0, %c0_0] : memref<8x256xf32, #tpu.memory_space<vmem>>, vector<8x256xf32>
    %c0_1 = arith.constant 0 : index
    %c0_2 = arith.constant 0 : index
    %1 = vector.load %arg2[%c0_1, %c0_2] : memref<8x256xf32, #tpu.memory_space<vmem>>, vector<8x256xf32>
    %2 = arith.mulf %0, %0 : vector<8x256xf32>
    %3 = arith.mulf %1, %1 : vector<8x256xf32>
    %4 = arith.addf %2, %3 : vector<8x256xf32>
    %cst = arith.constant 9.99999996E-13 : f32
    %5 = vector.broadcast %cst : f32 to vector<8x256xf32>
    %6 = arith.addf %4, %5 : vector<8x256xf32>
    %7 = math.rsqrt %6 : vector<8x256xf32>
    %8 = arith.mulf %4, %7 : vector<8x256xf32>
    %c0_3 = arith.constant 0 : index
    %c0_4 = arith.constant 0 : index
    %9 = vector.load %arg3[%c0_3, %c0_4] : memref<1x256xf32, #tpu.memory_space<vmem>>, vector<1x256xf32>
    %10 = vector.broadcast %9 : vector<1x256xf32> to vector<8x256xf32>
    %11 = arith.mulf %8, %10 : vector<8x256xf32>
    %c0_5 = arith.constant 0 : index
    %c0_6 = arith.constant 0 : index
    %12 = vector.load %arg4[%c0_5, %c0_6] : memref<1x256xf32, #tpu.memory_space<vmem>>, vector<1x256xf32>
    %13 = vector.broadcast %12 : vector<1x256xf32> to vector<8x256xf32>
    %14 = arith.addf %11, %13 : vector<8x256xf32>
    %cst_7 = arith.constant 0.000000e+00 : f32
    %15 = vector.broadcast %cst_7 : f32 to vector<8x256xf32>
    %16 = arith.maximumf %14, %15 : vector<8x256xf32>
    %17 = arith.mulf %16, %7 : vector<8x256xf32>
    %18 = arith.mulf %0, %17 : vector<8x256xf32>
    %c0_8 = arith.constant 0 : index
    %c0_9 = arith.constant 0 : index
    %19 = vector.load %arg5[%c0_8, %c0_9] : memref<8x256xf32, #tpu.memory_space<vmem>>, vector<8x256xf32>
    tpu.vector_store %arg5[%c0_8, %c0_9], %18 {strides = array<i32>} : memref<8x256xf32, #tpu.memory_space<vmem>>, vector<8x256xf32>,
    %20 = arith.mulf %1, %17 : vector<8x256xf32>
    %c0_10 = arith.constant 0 : index
    %c0_11 = arith.constant 0 : index
    %21 = vector.load %arg6[%c0_10, %c0_11] : memref<8x256xf32, #tpu.memory_space<vmem>>, vector<8x256xf32>
    tpu.vector_store %arg6[%c0_10, %c0_11], %20 {strides = array<i32>} : memref<8x256xf32, #tpu.memory_space<vmem>>, vector<8x256xf32>,
    return
  }
  func.func @transform_0(%arg0: i32) -> (i32, i32) {
    %c0_i32 = arith.constant 0 : i32
    %c0_i32_0 = arith.constant 0 : i32
    return %arg0, %c0_i32 : i32, i32
  }
  func.func @transform_1(%arg0: i32) -> (i32, i32) {
    %c0_i32 = arith.constant 0 : i32
    %c0_i32_0 = arith.constant 0 : i32
    return %arg0, %c0_i32 : i32, i32
  }
  func.func @transform_2(%arg0: i32) -> (i32, i32) {
    %c0_i32 = arith.constant 0 : i32
    %c0_i32_0 = arith.constant 0 : i32
    %c0_i32_1 = arith.constant 0 : i32
    return %c0_i32, %c0_i32_0 : i32, i32
  }
  func.func @transform_3(%arg0: i32) -> (i32, i32) {
    %c0_i32 = arith.constant 0 : i32
    %c0_i32_0 = arith.constant 0 : i32
    %c0_i32_1 = arith.constant 0 : i32
    return %c0_i32, %c0_i32_0 : i32, i32
  }
  func.func @transform_4(%arg0: i32) -> (i32, i32) {
    %c0_i32 = arith.constant 0 : i32
    %c0_i32_0 = arith.constant 0 : i32
    return %arg0, %c0_i32 : i32, i32
  }
  func.func @transform_5(%arg0: i32) -> (i32, i32) {
    %c0_i32 = arith.constant 0 : i32
    %c0_i32_0 = arith.constant 0 : i32
    return %arg0, %c0_i32 : i32, i32
  }
}

module attributes {stable_mosaic.version = 11 : i64} {
  func.func @_magphase_kernel(%arg0: i32, %arg1: memref<8x256xf32, #tpu.memory_space<vmem>>, %arg2: memref<8x256xf32, #tpu.memory_space<vmem>>, %arg3: memref<1x256xf32, #tpu.memory_space<vmem>>, %arg4: memref<1x256xf32, #tpu.memory_space<vmem>>, %arg5: memref<8x256xf32, #tpu.memory_space<vmem>>, %arg6: memref<8x256xf32, #tpu.memory_space<vmem>>) attributes {dimension_semantics = [#tpu.dimension_semantics<parallel>], iteration_bounds = array<i64: 1>, scalar_prefetch = 0 : i64, scratch_operands = 0 : i64, tpu.core_type = #tpu.core_type<tc>, window_params = [{transform_indices = @transform_0, window_bounds = array<i64: 8, 256>}, {transform_indices = @transform_1, window_bounds = array<i64: 8, 256>}, {pipeline_mode = #tpu.pipeline_mode<synchronous>, transform_indices = @transform_2, window_bounds = array<i64: 1, 256>}, {pipeline_mode = #tpu.pipeline_mode<synchronous>, transform_indices = @transform_3, window_bounds = array<i64: 1, 256>}, {transform_indices = @transform_4, window_bounds = array<i64: 8, 256>}, {transform_indices = @transform_5, window_bounds = array<i64: 8, 256>}]} {
    %c0 = arith.constant 0 : index
    %c0_0 = arith.constant 0 : index
    %0 = vector.load %arg1[%c0, %c0_0] : memref<8x256xf32, #tpu.memory_space<vmem>>, vector<8x256xf32>
    %c0_1 = arith.constant 0 : index
    %c0_2 = arith.constant 0 : index
    %1 = vector.load %arg2[%c0_1, %c0_2] : memref<8x256xf32, #tpu.memory_space<vmem>>, vector<8x256xf32>
    %2 = arith.mulf %0, %0 : vector<8x256xf32>
    %3 = arith.mulf %1, %1 : vector<8x256xf32>
    %4 = arith.addf %2, %3 : vector<8x256xf32>
    %cst = arith.constant 9.99999996E-13 : f32
    %5 = vector.broadcast %cst : f32 to vector<8x256xf32>
    %6 = arith.addf %4, %5 : vector<8x256xf32>
    %7 = math.rsqrt %6 : vector<8x256xf32>
    %8 = arith.mulf %4, %7 : vector<8x256xf32>
    %c0_3 = arith.constant 0 : index
    %c0_4 = arith.constant 0 : index
    %9 = vector.load %arg3[%c0_3, %c0_4] : memref<1x256xf32, #tpu.memory_space<vmem>>, vector<1x256xf32>
    %10 = vector.broadcast %9 : vector<1x256xf32> to vector<8x256xf32>
    %11 = arith.mulf %8, %10 : vector<8x256xf32>
    %c0_5 = arith.constant 0 : index
    %c0_6 = arith.constant 0 : index
    %12 = vector.load %arg4[%c0_5, %c0_6] : memref<1x256xf32, #tpu.memory_space<vmem>>, vector<1x256xf32>
    %13 = vector.broadcast %12 : vector<1x256xf32> to vector<8x256xf32>
    %14 = arith.addf %11, %13 : vector<8x256xf32>
    %15 = arith.mulf %14, %7 : vector<8x256xf32>
    %16 = arith.mulf %0, %15 : vector<8x256xf32>
    %c0_7 = arith.constant 0 : index
    %c0_8 = arith.constant 0 : index
    %17 = vector.load %arg5[%c0_7, %c0_8] : memref<8x256xf32, #tpu.memory_space<vmem>>, vector<8x256xf32>
    tpu.vector_store %arg5[%c0_7, %c0_8], %16 {strides = array<i32>} : memref<8x256xf32, #tpu.memory_space<vmem>>, vector<8x256xf32>,
    %18 = arith.mulf %1, %15 : vector<8x256xf32>
    %c0_9 = arith.constant 0 : index
    %c0_10 = arith.constant 0 : index
    %19 = vector.load %arg6[%c0_9, %c0_10] : memref<8x256xf32, #tpu.memory_space<vmem>>, vector<8x256xf32>
    tpu.vector_store %arg6[%c0_9, %c0_10], %18 {strides = array<i32>} : memref<8x256xf32, #tpu.memory_space<vmem>>, vector<8x256xf32>,
    return
  }
  func.func @transform_0(%arg0: i32) -> (i32, i32) {
    %c0_i32 = arith.constant 0 : i32
    %c0_i32_0 = arith.constant 0 : i32
    return %arg0, %c0_i32 : i32, i32
  }
  func.func @transform_1(%arg0: i32) -> (i32, i32) {
    %c0_i32 = arith.constant 0 : i32
    %c0_i32_0 = arith.constant 0 : i32
    return %arg0, %c0_i32 : i32, i32
  }
  func.func @transform_2(%arg0: i32) -> (i32, i32) {
    %c0_i32 = arith.constant 0 : i32
    %c0_i32_0 = arith.constant 0 : i32
    %c0_i32_1 = arith.constant 0 : i32
    return %c0_i32, %c0_i32_0 : i32, i32
  }
  func.func @transform_3(%arg0: i32) -> (i32, i32) {
    %c0_i32 = arith.constant 0 : i32
    %c0_i32_0 = arith.constant 0 : i32
    %c0_i32_1 = arith.constant 0 : i32
    return %c0_i32, %c0_i32_0 : i32, i32
  }
  func.func @transform_4(%arg0: i32) -> (i32, i32) {
    %c0_i32 = arith.constant 0 : i32
    %c0_i32_0 = arith.constant 0 : i32
    return %arg0, %c0_i32 : i32, i32
  }
  func.func @transform_5(%arg0: i32) -> (i32, i32) {
    %c0_i32 = arith.constant 0 : i32
    %c0_i32_0 = arith.constant 0 : i32
    return %arg0, %c0_i32 : i32, i32
  }
}

module attributes {stable_mosaic.version = 11 : i64} {
  func.func @_magphase_kernel(%arg0: i32, %arg1: memref<8x256xf32, #tpu.memory_space<vmem>>, %arg2: memref<8x256xf32, #tpu.memory_space<vmem>>, %arg3: memref<1x256xf32, #tpu.memory_space<vmem>>, %arg4: memref<1x256xf32, #tpu.memory_space<vmem>>, %arg5: memref<8x256xf32, #tpu.memory_space<vmem>>, %arg6: memref<8x256xf32, #tpu.memory_space<vmem>>, %arg7: memref<8x256xf32, #tpu.memory_space<vmem>>, %arg8: memref<8x256xf32, #tpu.memory_space<vmem>>) attributes {dimension_semantics = [#tpu.dimension_semantics<parallel>], iteration_bounds = array<i64: 1>, scalar_prefetch = 0 : i64, scratch_operands = 0 : i64, tpu.core_type = #tpu.core_type<tc>, window_params = [{transform_indices = @transform_0, window_bounds = array<i64: 8, 256>}, {transform_indices = @transform_1, window_bounds = array<i64: 8, 256>}, {pipeline_mode = #tpu.pipeline_mode<synchronous>, transform_indices = @transform_2, window_bounds = array<i64: 1, 256>}, {pipeline_mode = #tpu.pipeline_mode<synchronous>, transform_indices = @transform_3, window_bounds = array<i64: 1, 256>}, {transform_indices = @transform_4, window_bounds = array<i64: 8, 256>}, {transform_indices = @transform_5, window_bounds = array<i64: 8, 256>}, {transform_indices = @transform_6, window_bounds = array<i64: 8, 256>}, {transform_indices = @transform_7, window_bounds = array<i64: 8, 256>}]} {
    %c0 = arith.constant 0 : index
    %c0_0 = arith.constant 0 : index
    %0 = vector.load %arg1[%c0, %c0_0] : memref<8x256xf32, #tpu.memory_space<vmem>>, vector<8x256xf32>
    %c0_1 = arith.constant 0 : index
    %c0_2 = arith.constant 0 : index
    %1 = vector.load %arg5[%c0_1, %c0_2] : memref<8x256xf32, #tpu.memory_space<vmem>>, vector<8x256xf32>
    %2 = arith.addf %0, %1 : vector<8x256xf32>
    %c0_3 = arith.constant 0 : index
    %c0_4 = arith.constant 0 : index
    %3 = vector.load %arg2[%c0_3, %c0_4] : memref<8x256xf32, #tpu.memory_space<vmem>>, vector<8x256xf32>
    %c0_5 = arith.constant 0 : index
    %c0_6 = arith.constant 0 : index
    %4 = vector.load %arg6[%c0_5, %c0_6] : memref<8x256xf32, #tpu.memory_space<vmem>>, vector<8x256xf32>
    %5 = arith.addf %3, %4 : vector<8x256xf32>
    %6 = arith.mulf %2, %2 : vector<8x256xf32>
    %7 = arith.mulf %5, %5 : vector<8x256xf32>
    %8 = arith.addf %6, %7 : vector<8x256xf32>
    %cst = arith.constant 9.99999996E-13 : f32
    %9 = vector.broadcast %cst : f32 to vector<8x256xf32>
    %10 = arith.addf %8, %9 : vector<8x256xf32>
    %11 = math.rsqrt %10 : vector<8x256xf32>
    %12 = arith.mulf %8, %11 : vector<8x256xf32>
    %c0_7 = arith.constant 0 : index
    %c0_8 = arith.constant 0 : index
    %13 = vector.load %arg3[%c0_7, %c0_8] : memref<1x256xf32, #tpu.memory_space<vmem>>, vector<1x256xf32>
    %14 = vector.broadcast %13 : vector<1x256xf32> to vector<8x256xf32>
    %15 = arith.mulf %12, %14 : vector<8x256xf32>
    %c0_9 = arith.constant 0 : index
    %c0_10 = arith.constant 0 : index
    %16 = vector.load %arg4[%c0_9, %c0_10] : memref<1x256xf32, #tpu.memory_space<vmem>>, vector<1x256xf32>
    %17 = vector.broadcast %16 : vector<1x256xf32> to vector<8x256xf32>
    %18 = arith.addf %15, %17 : vector<8x256xf32>
    %cst_11 = arith.constant 0.000000e+00 : f32
    %19 = vector.broadcast %cst_11 : f32 to vector<8x256xf32>
    %20 = arith.maximumf %18, %19 : vector<8x256xf32>
    %21 = arith.mulf %20, %11 : vector<8x256xf32>
    %22 = arith.mulf %2, %21 : vector<8x256xf32>
    %c0_12 = arith.constant 0 : index
    %c0_13 = arith.constant 0 : index
    %23 = vector.load %arg7[%c0_12, %c0_13] : memref<8x256xf32, #tpu.memory_space<vmem>>, vector<8x256xf32>
    tpu.vector_store %arg7[%c0_12, %c0_13], %22 {strides = array<i32>} : memref<8x256xf32, #tpu.memory_space<vmem>>, vector<8x256xf32>,
    %24 = arith.mulf %5, %21 : vector<8x256xf32>
    %c0_14 = arith.constant 0 : index
    %c0_15 = arith.constant 0 : index
    %25 = vector.load %arg8[%c0_14, %c0_15] : memref<8x256xf32, #tpu.memory_space<vmem>>, vector<8x256xf32>
    tpu.vector_store %arg8[%c0_14, %c0_15], %24 {strides = array<i32>} : memref<8x256xf32, #tpu.memory_space<vmem>>, vector<8x256xf32>,
    return
  }
  func.func @transform_0(%arg0: i32) -> (i32, i32) {
    %c0_i32 = arith.constant 0 : i32
    %c0_i32_0 = arith.constant 0 : i32
    return %arg0, %c0_i32 : i32, i32
  }
  func.func @transform_1(%arg0: i32) -> (i32, i32) {
    %c0_i32 = arith.constant 0 : i32
    %c0_i32_0 = arith.constant 0 : i32
    return %arg0, %c0_i32 : i32, i32
  }
  func.func @transform_2(%arg0: i32) -> (i32, i32) {
    %c0_i32 = arith.constant 0 : i32
    %c0_i32_0 = arith.constant 0 : i32
    %c0_i32_1 = arith.constant 0 : i32
    return %c0_i32, %c0_i32_0 : i32, i32
  }
  func.func @transform_3(%arg0: i32) -> (i32, i32) {
    %c0_i32 = arith.constant 0 : i32
    %c0_i32_0 = arith.constant 0 : i32
    %c0_i32_1 = arith.constant 0 : i32
    return %c0_i32, %c0_i32_0 : i32, i32
  }
  func.func @transform_4(%arg0: i32) -> (i32, i32) {
    %c0_i32 = arith.constant 0 : i32
    %c0_i32_0 = arith.constant 0 : i32
    return %arg0, %c0_i32 : i32, i32
  }
  func.func @transform_5(%arg0: i32) -> (i32, i32) {
    %c0_i32 = arith.constant 0 : i32
    %c0_i32_0 = arith.constant 0 : i32
    return %arg0, %c0_i32 : i32, i32
  }
  func.func @transform_6(%arg0: i32) -> (i32, i32) {
    %c0_i32 = arith.constant 0 : i32
    %c0_i32_0 = arith.constant 0 : i32
    return %arg0, %c0_i32 : i32, i32
  }
  func.func @transform_7(%arg0: i32) -> (i32, i32) {
    %c0_i32 = arith.constant 0 : i32
    %c0_i32_0 = arith.constant 0 : i32
    return %arg0, %c0_i32 : i32, i32
  }
}

module attributes {stable_mosaic.version = 11 : i64} {
  func.func @_magphase_kernel(%arg0: i32, %arg1: memref<8x512xf32, #tpu.memory_space<vmem>>, %arg2: memref<8x512xf32, #tpu.memory_space<vmem>>, %arg3: memref<1x512xf32, #tpu.memory_space<vmem>>, %arg4: memref<1x512xf32, #tpu.memory_space<vmem>>, %arg5: memref<8x512xf32, #tpu.memory_space<vmem>>, %arg6: memref<8x512xf32, #tpu.memory_space<vmem>>) attributes {dimension_semantics = [#tpu.dimension_semantics<parallel>], iteration_bounds = array<i64: 1>, scalar_prefetch = 0 : i64, scratch_operands = 0 : i64, tpu.core_type = #tpu.core_type<tc>, window_params = [{transform_indices = @transform_0, window_bounds = array<i64: 8, 512>}, {transform_indices = @transform_1, window_bounds = array<i64: 8, 512>}, {pipeline_mode = #tpu.pipeline_mode<synchronous>, transform_indices = @transform_2, window_bounds = array<i64: 1, 512>}, {pipeline_mode = #tpu.pipeline_mode<synchronous>, transform_indices = @transform_3, window_bounds = array<i64: 1, 512>}, {transform_indices = @transform_4, window_bounds = array<i64: 8, 512>}, {transform_indices = @transform_5, window_bounds = array<i64: 8, 512>}]} {
    %c0 = arith.constant 0 : index
    %c0_0 = arith.constant 0 : index
    %0 = vector.load %arg1[%c0, %c0_0] : memref<8x512xf32, #tpu.memory_space<vmem>>, vector<8x512xf32>
    %c0_1 = arith.constant 0 : index
    %c0_2 = arith.constant 0 : index
    %1 = vector.load %arg2[%c0_1, %c0_2] : memref<8x512xf32, #tpu.memory_space<vmem>>, vector<8x512xf32>
    %2 = arith.mulf %0, %0 : vector<8x512xf32>
    %3 = arith.mulf %1, %1 : vector<8x512xf32>
    %4 = arith.addf %2, %3 : vector<8x512xf32>
    %cst = arith.constant 9.99999996E-13 : f32
    %5 = vector.broadcast %cst : f32 to vector<8x512xf32>
    %6 = arith.addf %4, %5 : vector<8x512xf32>
    %7 = math.rsqrt %6 : vector<8x512xf32>
    %8 = arith.mulf %4, %7 : vector<8x512xf32>
    %c0_3 = arith.constant 0 : index
    %c0_4 = arith.constant 0 : index
    %9 = vector.load %arg3[%c0_3, %c0_4] : memref<1x512xf32, #tpu.memory_space<vmem>>, vector<1x512xf32>
    %10 = vector.broadcast %9 : vector<1x512xf32> to vector<8x512xf32>
    %11 = arith.mulf %8, %10 : vector<8x512xf32>
    %c0_5 = arith.constant 0 : index
    %c0_6 = arith.constant 0 : index
    %12 = vector.load %arg4[%c0_5, %c0_6] : memref<1x512xf32, #tpu.memory_space<vmem>>, vector<1x512xf32>
    %13 = vector.broadcast %12 : vector<1x512xf32> to vector<8x512xf32>
    %14 = arith.addf %11, %13 : vector<8x512xf32>
    %cst_7 = arith.constant 0.000000e+00 : f32
    %15 = vector.broadcast %cst_7 : f32 to vector<8x512xf32>
    %16 = arith.maximumf %14, %15 : vector<8x512xf32>
    %17 = arith.mulf %16, %7 : vector<8x512xf32>
    %18 = arith.mulf %0, %17 : vector<8x512xf32>
    %c0_8 = arith.constant 0 : index
    %c0_9 = arith.constant 0 : index
    %19 = vector.load %arg5[%c0_8, %c0_9] : memref<8x512xf32, #tpu.memory_space<vmem>>, vector<8x512xf32>
    tpu.vector_store %arg5[%c0_8, %c0_9], %18 {strides = array<i32>} : memref<8x512xf32, #tpu.memory_space<vmem>>, vector<8x512xf32>,
    %20 = arith.mulf %1, %17 : vector<8x512xf32>
    %c0_10 = arith.constant 0 : index
    %c0_11 = arith.constant 0 : index
    %21 = vector.load %arg6[%c0_10, %c0_11] : memref<8x512xf32, #tpu.memory_space<vmem>>, vector<8x512xf32>
    tpu.vector_store %arg6[%c0_10, %c0_11], %20 {strides = array<i32>} : memref<8x512xf32, #tpu.memory_space<vmem>>, vector<8x512xf32>,
    return
  }
  func.func @transform_0(%arg0: i32) -> (i32, i32) {
    %c0_i32 = arith.constant 0 : i32
    %c0_i32_0 = arith.constant 0 : i32
    return %arg0, %c0_i32 : i32, i32
  }
  func.func @transform_1(%arg0: i32) -> (i32, i32) {
    %c0_i32 = arith.constant 0 : i32
    %c0_i32_0 = arith.constant 0 : i32
    return %arg0, %c0_i32 : i32, i32
  }
  func.func @transform_2(%arg0: i32) -> (i32, i32) {
    %c0_i32 = arith.constant 0 : i32
    %c0_i32_0 = arith.constant 0 : i32
    %c0_i32_1 = arith.constant 0 : i32
    return %c0_i32, %c0_i32_0 : i32, i32
  }
  func.func @transform_3(%arg0: i32) -> (i32, i32) {
    %c0_i32 = arith.constant 0 : i32
    %c0_i32_0 = arith.constant 0 : i32
    %c0_i32_1 = arith.constant 0 : i32
    return %c0_i32, %c0_i32_0 : i32, i32
  }
  func.func @transform_4(%arg0: i32) -> (i32, i32) {
    %c0_i32 = arith.constant 0 : i32
    %c0_i32_0 = arith.constant 0 : i32
    return %arg0, %c0_i32 : i32, i32
  }
  func.func @transform_5(%arg0: i32) -> (i32, i32) {
    %c0_i32 = arith.constant 0 : i32
    %c0_i32_0 = arith.constant 0 : i32
    return %arg0, %c0_i32 : i32, i32
  }
}

module attributes {stable_mosaic.version = 11 : i64} {
  func.func @_magphase_kernel(%arg0: i32, %arg1: memref<8x512xf32, #tpu.memory_space<vmem>>, %arg2: memref<8x512xf32, #tpu.memory_space<vmem>>, %arg3: memref<1x512xf32, #tpu.memory_space<vmem>>, %arg4: memref<1x512xf32, #tpu.memory_space<vmem>>, %arg5: memref<8x512xf32, #tpu.memory_space<vmem>>, %arg6: memref<8x512xf32, #tpu.memory_space<vmem>>) attributes {dimension_semantics = [#tpu.dimension_semantics<parallel>], iteration_bounds = array<i64: 1>, scalar_prefetch = 0 : i64, scratch_operands = 0 : i64, tpu.core_type = #tpu.core_type<tc>, window_params = [{transform_indices = @transform_0, window_bounds = array<i64: 8, 512>}, {transform_indices = @transform_1, window_bounds = array<i64: 8, 512>}, {pipeline_mode = #tpu.pipeline_mode<synchronous>, transform_indices = @transform_2, window_bounds = array<i64: 1, 512>}, {pipeline_mode = #tpu.pipeline_mode<synchronous>, transform_indices = @transform_3, window_bounds = array<i64: 1, 512>}, {transform_indices = @transform_4, window_bounds = array<i64: 8, 512>}, {transform_indices = @transform_5, window_bounds = array<i64: 8, 512>}]} {
    %c0 = arith.constant 0 : index
    %c0_0 = arith.constant 0 : index
    %0 = vector.load %arg1[%c0, %c0_0] : memref<8x512xf32, #tpu.memory_space<vmem>>, vector<8x512xf32>
    %c0_1 = arith.constant 0 : index
    %c0_2 = arith.constant 0 : index
    %1 = vector.load %arg2[%c0_1, %c0_2] : memref<8x512xf32, #tpu.memory_space<vmem>>, vector<8x512xf32>
    %2 = arith.mulf %0, %0 : vector<8x512xf32>
    %3 = arith.mulf %1, %1 : vector<8x512xf32>
    %4 = arith.addf %2, %3 : vector<8x512xf32>
    %cst = arith.constant 9.99999996E-13 : f32
    %5 = vector.broadcast %cst : f32 to vector<8x512xf32>
    %6 = arith.addf %4, %5 : vector<8x512xf32>
    %7 = math.rsqrt %6 : vector<8x512xf32>
    %8 = arith.mulf %4, %7 : vector<8x512xf32>
    %c0_3 = arith.constant 0 : index
    %c0_4 = arith.constant 0 : index
    %9 = vector.load %arg3[%c0_3, %c0_4] : memref<1x512xf32, #tpu.memory_space<vmem>>, vector<1x512xf32>
    %10 = vector.broadcast %9 : vector<1x512xf32> to vector<8x512xf32>
    %11 = arith.mulf %8, %10 : vector<8x512xf32>
    %c0_5 = arith.constant 0 : index
    %c0_6 = arith.constant 0 : index
    %12 = vector.load %arg4[%c0_5, %c0_6] : memref<1x512xf32, #tpu.memory_space<vmem>>, vector<1x512xf32>
    %13 = vector.broadcast %12 : vector<1x512xf32> to vector<8x512xf32>
    %14 = arith.addf %11, %13 : vector<8x512xf32>
    %15 = arith.mulf %14, %7 : vector<8x512xf32>
    %16 = arith.mulf %0, %15 : vector<8x512xf32>
    %c0_7 = arith.constant 0 : index
    %c0_8 = arith.constant 0 : index
    %17 = vector.load %arg5[%c0_7, %c0_8] : memref<8x512xf32, #tpu.memory_space<vmem>>, vector<8x512xf32>
    tpu.vector_store %arg5[%c0_7, %c0_8], %16 {strides = array<i32>} : memref<8x512xf32, #tpu.memory_space<vmem>>, vector<8x512xf32>,
    %18 = arith.mulf %1, %15 : vector<8x512xf32>
    %c0_9 = arith.constant 0 : index
    %c0_10 = arith.constant 0 : index
    %19 = vector.load %arg6[%c0_9, %c0_10] : memref<8x512xf32, #tpu.memory_space<vmem>>, vector<8x512xf32>
    tpu.vector_store %arg6[%c0_9, %c0_10], %18 {strides = array<i32>} : memref<8x512xf32, #tpu.memory_space<vmem>>, vector<8x512xf32>,
    return
  }
  func.func @transform_0(%arg0: i32) -> (i32, i32) {
    %c0_i32 = arith.constant 0 : i32
    %c0_i32_0 = arith.constant 0 : i32
    return %arg0, %c0_i32 : i32, i32
  }
  func.func @transform_1(%arg0: i32) -> (i32, i32) {
    %c0_i32 = arith.constant 0 : i32
    %c0_i32_0 = arith.constant 0 : i32
    return %arg0, %c0_i32 : i32, i32
  }
  func.func @transform_2(%arg0: i32) -> (i32, i32) {
    %c0_i32 = arith.constant 0 : i32
    %c0_i32_0 = arith.constant 0 : i32
    %c0_i32_1 = arith.constant 0 : i32
    return %c0_i32, %c0_i32_0 : i32, i32
  }
  func.func @transform_3(%arg0: i32) -> (i32, i32) {
    %c0_i32 = arith.constant 0 : i32
    %c0_i32_0 = arith.constant 0 : i32
    %c0_i32_1 = arith.constant 0 : i32
    return %c0_i32, %c0_i32_0 : i32, i32
  }
  func.func @transform_4(%arg0: i32) -> (i32, i32) {
    %c0_i32 = arith.constant 0 : i32
    %c0_i32_0 = arith.constant 0 : i32
    return %arg0, %c0_i32 : i32, i32
  }
  func.func @transform_5(%arg0: i32) -> (i32, i32) {
    %c0_i32 = arith.constant 0 : i32
    %c0_i32_0 = arith.constant 0 : i32
    return %arg0, %c0_i32 : i32, i32
  }
}

module attributes {stable_mosaic.version = 11 : i64} {
  func.func @_magphase_kernel(%arg0: i32, %arg1: memref<8x512xf32, #tpu.memory_space<vmem>>, %arg2: memref<8x512xf32, #tpu.memory_space<vmem>>, %arg3: memref<1x512xf32, #tpu.memory_space<vmem>>, %arg4: memref<1x512xf32, #tpu.memory_space<vmem>>, %arg5: memref<8x512xf32, #tpu.memory_space<vmem>>, %arg6: memref<8x512xf32, #tpu.memory_space<vmem>>, %arg7: memref<8x512xf32, #tpu.memory_space<vmem>>, %arg8: memref<8x512xf32, #tpu.memory_space<vmem>>) attributes {dimension_semantics = [#tpu.dimension_semantics<parallel>], iteration_bounds = array<i64: 1>, scalar_prefetch = 0 : i64, scratch_operands = 0 : i64, tpu.core_type = #tpu.core_type<tc>, window_params = [{transform_indices = @transform_0, window_bounds = array<i64: 8, 512>}, {transform_indices = @transform_1, window_bounds = array<i64: 8, 512>}, {pipeline_mode = #tpu.pipeline_mode<synchronous>, transform_indices = @transform_2, window_bounds = array<i64: 1, 512>}, {pipeline_mode = #tpu.pipeline_mode<synchronous>, transform_indices = @transform_3, window_bounds = array<i64: 1, 512>}, {transform_indices = @transform_4, window_bounds = array<i64: 8, 512>}, {transform_indices = @transform_5, window_bounds = array<i64: 8, 512>}, {transform_indices = @transform_6, window_bounds = array<i64: 8, 512>}, {transform_indices = @transform_7, window_bounds = array<i64: 8, 512>}]} {
    %c0 = arith.constant 0 : index
    %c0_0 = arith.constant 0 : index
    %0 = vector.load %arg1[%c0, %c0_0] : memref<8x512xf32, #tpu.memory_space<vmem>>, vector<8x512xf32>
    %c0_1 = arith.constant 0 : index
    %c0_2 = arith.constant 0 : index
    %1 = vector.load %arg5[%c0_1, %c0_2] : memref<8x512xf32, #tpu.memory_space<vmem>>, vector<8x512xf32>
    %2 = arith.addf %0, %1 : vector<8x512xf32>
    %c0_3 = arith.constant 0 : index
    %c0_4 = arith.constant 0 : index
    %3 = vector.load %arg2[%c0_3, %c0_4] : memref<8x512xf32, #tpu.memory_space<vmem>>, vector<8x512xf32>
    %c0_5 = arith.constant 0 : index
    %c0_6 = arith.constant 0 : index
    %4 = vector.load %arg6[%c0_5, %c0_6] : memref<8x512xf32, #tpu.memory_space<vmem>>, vector<8x512xf32>
    %5 = arith.addf %3, %4 : vector<8x512xf32>
    %6 = arith.mulf %2, %2 : vector<8x512xf32>
    %7 = arith.mulf %5, %5 : vector<8x512xf32>
    %8 = arith.addf %6, %7 : vector<8x512xf32>
    %cst = arith.constant 9.99999996E-13 : f32
    %9 = vector.broadcast %cst : f32 to vector<8x512xf32>
    %10 = arith.addf %8, %9 : vector<8x512xf32>
    %11 = math.rsqrt %10 : vector<8x512xf32>
    %12 = arith.mulf %8, %11 : vector<8x512xf32>
    %c0_7 = arith.constant 0 : index
    %c0_8 = arith.constant 0 : index
    %13 = vector.load %arg3[%c0_7, %c0_8] : memref<1x512xf32, #tpu.memory_space<vmem>>, vector<1x512xf32>
    %14 = vector.broadcast %13 : vector<1x512xf32> to vector<8x512xf32>
    %15 = arith.mulf %12, %14 : vector<8x512xf32>
    %c0_9 = arith.constant 0 : index
    %c0_10 = arith.constant 0 : index
    %16 = vector.load %arg4[%c0_9, %c0_10] : memref<1x512xf32, #tpu.memory_space<vmem>>, vector<1x512xf32>
    %17 = vector.broadcast %16 : vector<1x512xf32> to vector<8x512xf32>
    %18 = arith.addf %15, %17 : vector<8x512xf32>
    %cst_11 = arith.constant 0.000000e+00 : f32
    %19 = vector.broadcast %cst_11 : f32 to vector<8x512xf32>
    %20 = arith.maximumf %18, %19 : vector<8x512xf32>
    %21 = arith.mulf %20, %11 : vector<8x512xf32>
    %22 = arith.mulf %2, %21 : vector<8x512xf32>
    %c0_12 = arith.constant 0 : index
    %c0_13 = arith.constant 0 : index
    %23 = vector.load %arg7[%c0_12, %c0_13] : memref<8x512xf32, #tpu.memory_space<vmem>>, vector<8x512xf32>
    tpu.vector_store %arg7[%c0_12, %c0_13], %22 {strides = array<i32>} : memref<8x512xf32, #tpu.memory_space<vmem>>, vector<8x512xf32>,
    %24 = arith.mulf %5, %21 : vector<8x512xf32>
    %c0_14 = arith.constant 0 : index
    %c0_15 = arith.constant 0 : index
    %25 = vector.load %arg8[%c0_14, %c0_15] : memref<8x512xf32, #tpu.memory_space<vmem>>, vector<8x512xf32>
    tpu.vector_store %arg8[%c0_14, %c0_15], %24 {strides = array<i32>} : memref<8x512xf32, #tpu.memory_space<vmem>>, vector<8x512xf32>,
    return
  }
  func.func @transform_0(%arg0: i32) -> (i32, i32) {
    %c0_i32 = arith.constant 0 : i32
    %c0_i32_0 = arith.constant 0 : i32
    return %arg0, %c0_i32 : i32, i32
  }
  func.func @transform_1(%arg0: i32) -> (i32, i32) {
    %c0_i32 = arith.constant 0 : i32
    %c0_i32_0 = arith.constant 0 : i32
    return %arg0, %c0_i32 : i32, i32
  }
  func.func @transform_2(%arg0: i32) -> (i32, i32) {
    %c0_i32 = arith.constant 0 : i32
    %c0_i32_0 = arith.constant 0 : i32
    %c0_i32_1 = arith.constant 0 : i32
    return %c0_i32, %c0_i32_0 : i32, i32
  }
  func.func @transform_3(%arg0: i32) -> (i32, i32) {
    %c0_i32 = arith.constant 0 : i32
    %c0_i32_0 = arith.constant 0 : i32
    %c0_i32_1 = arith.constant 0 : i32
    return %c0_i32, %c0_i32_0 : i32, i32
  }
  func.func @transform_4(%arg0: i32) -> (i32, i32) {
    %c0_i32 = arith.constant 0 : i32
    %c0_i32_0 = arith.constant 0 : i32
    return %arg0, %c0_i32 : i32, i32
  }
  func.func @transform_5(%arg0: i32) -> (i32, i32) {
    %c0_i32 = arith.constant 0 : i32
    %c0_i32_0 = arith.constant 0 : i32
    return %arg0, %c0_i32 : i32, i32
  }
  func.func @transform_6(%arg0: i32) -> (i32, i32) {
    %c0_i32 = arith.constant 0 : i32
    %c0_i32_0 = arith.constant 0 : i32
    return %arg0, %c0_i32 : i32, i32
  }
  func.func @transform_7(%arg0: i32) -> (i32, i32) {
    %c0_i32 = arith.constant 0 : i32
    %c0_i32_0 = arith.constant 0 : i32
    return %arg0, %c0_i32 : i32, i32
  }
}

</mosaic_0001>

<bundles_post_ra>
// kernel: tile.53
= control target key start
LH: loop header
LB: loop body
LE: loop exit
PB: predicated region body
PF: predicated region fallthrough
CT: control target
= control target key end

     0   :  { %s22_s0 = inlined_call_operand.vmem [shape: f32[64], index: 0, kind: input, shape index: {}]   ;;  %s23_s1 = inlined_call_operand.vmem [shape: f32[2,64], index: 1, kind: output, shape index: {}]  }
   0x1   :  { %v4_v0 = vld [vmem:[%s22_s0] ss:$0 sm:$0xff] }
   0x2   :  { %5 = vst [vmem:[%s23_s1] sm:$0x3] %v4_v0 }

// kernel: tile.54
= control target key start
LH: loop header
LB: loop body
LE: loop exit
PB: predicated region body
PF: predicated region fallthrough
CT: control target
= control target key end

     0   :  { %vm7_vm0 = vcmask 523264   ;;  %vm13_vm1 = vcmask 1048064   ;;  %s39_s0 = inlined_call_operand.vmem [shape: f32[2,64], index: 0, kind: input, shape index: {}]   ;;  %s40_s1 = inlined_call_operand.vmem [shape: f32[1,128], index: 1, kind: output, shape index: {}]  }
   0x1   :  { %v4_v0 = vld [vmem:[%s39_s0] sm:$0x3]  ;;  %s22_s0 = smov 64  }
   0x2   :  { %5 = vst [vmem:[#allocation1] sm:$0x3] %v4_v0 }
   0x9   :  { %v10_v1 = vld [vmem:[#allocation1 + $0x1] sm:$0x1]   ;;  %v6_v2 = vld [vmem:[#allocation1] sm:$0x1]  }
   0xa   :  { %11 = vrot.lane.b32.xlu0 %v10_v1, %s22_s0  ;;  %8 = vst.msk [vmem:[#allocation0] sm:$0x1] %vm7_vm0, %v6_v2  }
  0x7c   :  { %v12_v3 = vpop.permute.xlu0 %11  }
  0x7d   :  { %14 = vst.msk [vmem:[#allocation0] sm:$0x1] %vm13_vm1, %v12_v3  }
  0x84   :  { %v18_v4 = vld [vmem:[#allocation0] sm:$0x1] }
  0x85   :  { %20 = vst [vmem:[%s40_s1] sm:$0x1] %v18_v4 }

// kernel: resnet_forward.17
= control target key start
LH: loop header
LB: loop body
LE: loop exit
PB: predicated region body
PF: predicated region fallthrough
CT: control target
= control target key end

     0   :  { %s1689_s0 = inlined_call_operand.vmem [shape: f32[256,128], index: 0, kind: input, shape index: {}]   ;;  %s1690_s1 = inlined_call_operand.vmem [shape: f32[256,128], index: 1, kind: input, shape index: {}]   ;;  %s1691_s2 = inlined_call_operand.vmem [shape: f32[1,128], index: 2, kind: input, shape index: {}]   ;;  %s1692_s3 = inlined_call_operand.vmem [shape: f32[1,128], index: 3, kind: input, shape index: {}]   ;;  %s1693_s4 = inlined_call_operand.vmem [shape: f32[256,128], index: 4, kind: output, shape index: {0}]   ;;  %s1694_s5 = inlined_call_operand.vmem [shape: f32[256,128], index: 5, kind: output, shape index: {1}]  }
   0x1   :  { %v652_v0 = vld [vmem:[%s1689_s0] sm:$0xff]  ;;  %v666_v4 = vld [vmem:[%s1689_s0 + $0x8] sm:$0xff]  ;;  %v680_v8 = vld [vmem:[%s1689_s0 + $0x10] sm:$0xff] }
   0x2   :  { %v657_v1 = vld [vmem:[%s1690_s1] sm:$0xff]  ;;  %v83_v2 = vmul.f32 %v652_v0, %v652_v0  ;;  %v671_v5 = vld [vmem:[%s1690_s1 + $0x8] sm:$0xff]  ;;  %v84_v6 = vmul.f32 %v666_v4, %v666_v4  ;;  %v685_v9 = vld [vmem:[%s1690_s1 + $0x10] sm:$0xff]  ;;  %v85_v12 = vmul.f32 %v680_v8, %v680_v8 }
   0x3   :  { %v115_v3 = vmul.f32 %v657_v1, %v657_v1  ;;  %v116_v7 = vmul.f32 %v671_v5, %v671_v5  ;;  %v690_v10 = vld [vmem:[%s1689_s0 + $0x18] sm:$0xff]  ;;  %v117_v13 = vmul.f32 %v685_v9, %v685_v9  ;;  %v708_v16 = vld [vmem:[%s1689_s0 + $0x20] sm:$0xff]  ;;  %v726_v22 = vld [vmem:[%s1689_s0 + $0x28] sm:$0xff] }
   0x4   :  { %v701_v14 = vld [vmem:[%s1690_s1 + $0x18] sm:$0xff]  ;;  %v86_v15 = vmul.f32 %v690_v10, %v690_v10  ;;  %v713_v17 = vld [vmem:[%s1690_s1 + $0x20] sm:$0xff]  ;;  %v87_v20 = vmul.f32 %v708_v16, %v708_v16  ;;  %v731_v23 = vld [vmem:[%s1690_s1 + $0x28] sm:$0xff]  ;;  %v88_v27 = vmul.f32 %v726_v22, %v726_v22 }
   0x5   :  { %v692_v11 = vadd.f32 %v115_v3, %v83_v2  ;;  %v715_v18 = vadd.f32 %v116_v7, %v84_v6  ;;  %v118_v19 = vmul.f32 %v701_v14, %v701_v14  ;;  %v119_v21 = vmul.f32 %v713_v17, %v713_v17  ;;  %v736_v24 = vld [vmem:[%s1689_s0 + $0x30] sm:$0xff]  ;;  %v753_v30 = vld [vmem:[%s1689_s0 + $0x38] sm:$0xff]  ;;  %v775_v39 = vld [vmem:[%s1689_s0 + $0x40] sm:$0xff] }
   0x6   :  { %v739_v26 = vadd.f32 %v117_v13, %v85_v12  ;;  %v120_v28 = vmul.f32 %v731_v23, %v731_v23  ;;  %v748_v29 = vld [vmem:[%s1690_s1 + $0x30] sm:$0xff]  ;;  %v89_v34 = vmul.f32 %v736_v24, %v736_v24  ;;  %v765_v35 = vld [vmem:[%s1690_s1 + $0x38] sm:$0xff]  ;;  %v780_v40 = vld [vmem:[%s1690_s1 + $0x40] sm:$0xff]  ;;  %v90_v44 = vmul.f32 %v753_v30, %v753_v30 }
   0x7   :  { %v179_v25 = vadd.f32 1e-12, %v692_v11  ;;  %v180_v31 = vadd.f32 1e-12, %v715_v18  ;;  %v756_v32 = vadd.f32 %v118_v19, %v86_v15  ;;  %v758_v33 = vadd.f32 %v119_v21, %v87_v20  ;;  %1728 = vst [vmem:[#allocation2_spill] sm:$0xff] %v780_v40  ;;  %v785_v41 = vld [vmem:[%s1689_s0 + $0x48] sm:$0xff] }
   0x8   :  { %v181_v36 = vadd.f32 1e-12, %v739_v26  ;;  %v768_v37 = vadd.f32 %v120_v28, %v88_v27  ;;  %v121_v38 = vmul.f32 %v748_v29, %v748_v29  ;;  %v794_v45 = vld [vmem:[%s1690_s1 + $0x48] sm:$0xff]  ;;  %v122_v48 = vmul.f32 %v765_v35, %v765_v35  ;;  %v804_v49 = vld [vmem:[%s1689_s0 + $0x50] sm:$0xff]  ;;  %v820_v54 = vld [vmem:[%s1689_s0 + $0x58] sm:$0xff] }
   0x9   :  { %555 = vrsqrt.f32 %v179_v25  ;;  %v182_v42 = vadd.f32 1e-12, %v756_v32  ;;  %v183_v43 = vadd.f32 1e-12, %v758_v33  ;;  %1729 = vst [vmem:[#allocation3_spill] sm:$0xff] %v794_v45  ;;  %v809_v50 = vld [vmem:[%s1690_s1 + $0x50] sm:$0xff]  ;;  %v91_v51 = vmul.f32 %v775_v39, %v775_v39 }
   0xa   :  { %557 = vrsqrt.f32 %v180_v31  ;;  %v184_v46 = vadd.f32 1e-12, %v768_v37  ;;  %v797_v47 = vadd.f32 %v121_v38, %v89_v34  ;;  %1730 = vst [vmem:[#allocation4_spill] sm:$0xff] %v809_v50  ;;  %v123_v52 = vmul.f32 %v780_v40, %v780_v40  ;;  %v830_v58 = vld [vmem:[%s1690_s1 + $0x58] sm:$0xff]  ;;  %v835_v59 = vld [vmem:[%s1689_s0 + $0x60] sm:$0xff]  ;;  %v851_v2 = vld [vmem:[%s1689_s0 + $0x68] sm:$0xff] }
   0xb   :  { %559 = vrsqrt.f32 %v181_v36  ;;  %v92_v53 = vmul.f32 %v785_v41, %v785_v41  ;;  %v823_v56 = vadd.f32 %v122_v48, %v90_v44  ;;  %v124_v57 = vmul.f32 %v794_v45, %v794_v45  ;;  %1731 = vst [vmem:[#allocation5_spill] sm:$0xff] %v830_v58  ;;  %v846_v63 = vld [vmem:[%s1690_s1 + $0x60] sm:$0xff]  ;;  %v861_v12 = vld [vmem:[%s1690_s1 + $0x68] sm:$0xff]  ;;  %v873_v21 = vld [vmem:[%s1689_s0 + $0x70] sm:$0xff] }
   0xc   :  { %561 = vrsqrt.f32 %v182_v42  ;;  %v185_v55 = vadd.f32 1e-12, %v797_v47  ;;  %v837_v60 = vadd.f32 %v123_v52, %v91_v51  ;;  %v93_v61 = vmul.f32 %v804_v49, %v804_v49  ;;  %1732 = vst [vmem:[#allocation6_spill] sm:$0xff] %v846_v63  ;;  %1733 = vst [vmem:[#allocation7_spill] sm:$0xff] %v861_v12  ;;  %v878_v25 = vld [vmem:[%s1690_s1 + $0x70] sm:$0xff]  ;;  %v893_v42 = vld [vmem:[%s1689_s0 + $0x78] sm:$0xff] }
   0xd   :  { %563 = vrsqrt.f32 %v183_v43  ;;  %v125_v62 = vmul.f32 %v809_v50, %v809_v50  ;;  %v186_v3 = vadd.f32 1e-12, %v823_v56  ;;  %v854_v6 = vadd.f32 %v124_v57, %v92_v53  ;;  %1734 = vst [vmem:[#allocation8_spill] sm:$0xff] %v878_v25  ;;  %v898_v44 = vld [vmem:[%s1691_s2] ss:$0 sm:$0xff] }
   0xe   :  { %565 = vrsqrt.f32 %v184_v46  ;;  %v94_v7 = vmul.f32 %v820_v54, %v820_v54  ;;  %v187_v13 = vadd.f32 1e-12, %v837_v60  ;;  %v126_v19 = vmul.f32 %v830_v58, %v830_v58 }
   0xf   :  { %567 = vrsqrt.f32 %v185_v55  ;;  %v864_v15 = vadd.f32 %v125_v62, %v93_v61  ;;  %v95_v20 = vmul.f32 %v835_v59, %v835_v59  ;;  %v188_v27 = vadd.f32 1e-12, %v854_v6  ;;  %v913_v62 = vld [vmem:[%s1692_s3] ss:$0 sm:$0xff] }
  0x10   :  { %569 = vrsqrt.f32 %v186_v3  ;;  %v127_v28 = vmul.f32 %v846_v63, %v846_v63  ;;  %v96_v31 = vmul.f32 %v851_v2, %v851_v2  ;;  %v886_v36 = vadd.f32 %v126_v19, %v94_v7 }
  0x11   :  { %571 = vrsqrt.f32 %v187_v13  ;;  %v189_v34 = vadd.f32 1e-12, %v864_v15  ;;  %v128_v38 = vmul.f32 %v861_v12, %v861_v12  ;;  %v97_v48 = vmul.f32 %v873_v21, %v873_v21 }
  0x12   :  { %573 = vrsqrt.f32 %v188_v27  ;;  %v900_v46 = vadd.f32 %v127_v28, %v95_v20  ;;  %v129_v51 = vmul.f32 %v878_v25, %v878_v25  ;;  %v190_v55 = vadd.f32 1e-12, %v886_v36 }
  0x13   :  { %v556_v43 = vpop.eup %555  ;;  %575 = vrsqrt.f32 %v189_v34  ;;  %v908_v57 = vadd.f32 %v128_v38, %v96_v31 }
  0x14   :  { %v558_v52 = vpop.eup %557  ;;  %v243_v53 = vmul.f32 %v556_v43, %v692_v11  ;;  %v191_v7 = vadd.f32 1e-12, %v900_v46  ;;  %v917_v13 = vadd.f32 %v129_v51, %v97_v48  ;;  %v921_v11 = vmul.f32 %v893_v42, %v893_v42 }
  0x15   :  { %v560_v61 = vpop.eup %559  ;;  %v244_v3 = vmul.f32 %v558_v52, %v715_v18  ;;  %577 = vrsqrt.f32 %v190_v55  ;;  %v192_v28 = vadd.f32 1e-12, %v908_v57 }
  0x16   :  { %v562_v19 = vpop.eup %561  ;;  %v282_v20 = vmul.f32 %v898_v44, %v243_v53  ;;  %v245_v27 = vmul.f32 %v560_v61, %v739_v26  ;;  %579 = vrsqrt.f32 %v191_v7  ;;  %v193_v38 = vadd.f32 1e-12, %v917_v13  ;;  %v935_v26 = vld [vmem:[%s1690_s1 + $0x78] sm:$0xff] }
  0x17   :  { %v564_v31 = vpop.eup %563  ;;  %v283_v34 = vmul.f32 %v898_v44, %v244_v3  ;;  %v246_v18 = vmul.f32 %v562_v19, %v756_v32  ;;  %581 = vrsqrt.f32 %v192_v28  ;;  %1735 = vst [vmem:[#allocation9_spill] sm:$0xff] %v935_v26 }
  0x18   :  { %v566_v48 = vpop.eup %565  ;;  %v321_v51 = vadd.f32 %v913_v62, %v282_v20  ;;  %v284_v25 = vmul.f32 %v898_v44, %v245_v27  ;;  %v247_v53 = vmul.f32 %v564_v31, %v758_v33  ;;  %583 = vrsqrt.f32 %v193_v38 }
  0x19   :  { %v568_v55 = vpop.eup %567  ;;  %v322_v3 = vadd.f32 %v913_v62, %v283_v34  ;;  %v285_v32 = vmul.f32 %v898_v44, %v246_v18  ;;  %v248_v7 = vmul.f32 %v566_v48, %v768_v37  ;;  %v947_v34 = vmul.f32 %v935_v26, %v935_v26 }
  0x1a   :  { %v353_v12 = vmax.f32 %v321_v51, 0.0  ;;  %v323_v20 = vadd.f32 %v913_v62, %v284_v25  ;;  %v286_v27 = vmul.f32 %v898_v44, %v247_v53  ;;  %v249_v33 = vmul.f32 %v568_v55, %v797_v47  ;;  %v570_v28 = vpop.eup %569 }
  0x1b   :  { %v354_v63 = vmax.f32 %v322_v3, 0.0  ;;  %v324_v58 = vadd.f32 %v913_v62, %v285_v32  ;;  %v287_v50 = vmul.f32 %v898_v44, %v248_v7  ;;  %v949_v18 = vpop.eup %571  ;;  %v250_v7 = vmul.f32 %v570_v28, %v823_v56 }
  0x1c   :  { %v951_v37 = vmul.f32 %v556_v43, %v353_v12  ;;  %v355_v38 = vmax.f32 %v323_v20, 0.0  ;;  %v325_v25 = vadd.f32 %v913_v62, %v286_v27  ;;  %v288_v51 = vmul.f32 %v898_v44, %v249_v33  ;;  %v955_v47 = vpop.eup %573 }
  0x1d   :  { %v957_v53 = vmul.f32 %v558_v52, %v354_v63  ;;  %v356_v3 = vmax.f32 %v324_v58, 0.0  ;;  %v326_v32 = vadd.f32 %v913_v62, %v287_v50  ;;  %v961_v26 = vpop.eup %575  ;;  %v289_v50 = vmul.f32 %v898_v44, %v250_v7 }
  0x1e   :  { %v417_v12 = vmul.f32 %v951_v37, %v652_v0  ;;  %v965_v43 = vmul.f32 %v560_v61, %v355_v38  ;;  %v357_v20 = vmax.f32 %v325_v25, 0.0  ;;  %v327_v27 = vadd.f32 %v913_v62, %v288_v51 }
  0x1f   :  { %v418_v33 = vmul.f32 %v957_v53, %v666_v4  ;;  %v970_v63 = vmul.f32 %v562_v19, %v356_v3  ;;  %v358_v58 = vmax.f32 %v326_v32, 0.0  ;;  %v578_v52 = vpop.eup %577  ;;  %v251_v38 = vmul.f32 %v949_v18, %v837_v60 }
  0x20   :  { %449 = vst [vmem:[%s1693_s4] sm:$0xff] %v417_v12  ;;  %v419_v0 = vmul.f32 %v965_v43, %v680_v8  ;;  %v978_v56 = vmul.f32 %v564_v31, %v357_v20  ;;  %v359_v61 = vmax.f32 %v327_v27, 0.0  ;;  %v580_v4 = vpop.eup %579  ;;  %v328_v51 = vadd.f32 %v913_v62, %v289_v50 }
  0x21   :  { %450 = vst [vmem:[%s1693_s4 + $0x8] sm:$0xff] %v418_v33  ;;  %v420_v19 = vmul.f32 %v970_v63, %v690_v10  ;;  %v987_v25 = vmul.f32 %v566_v48, %v358_v58  ;;  %v252_v8 = vmul.f32 %v955_v47, %v854_v6  ;;  %v582_v31 = vpop.eup %581  ;;  %v290_v32 = vmul.f32 %v898_v44, %v251_v38 }
  0x22   :  { %451 = vst [vmem:[%s1693_s4 + $0x10] sm:$0xff] %v419_v0  ;;  %v421_v60 = vmul.f32 %v978_v56, %v708_v16  ;;  %v997_v3 = vmul.f32 %v568_v55, %v359_v61  ;;  %v253_v10 = vmul.f32 %v961_v26, %v864_v15  ;;  %v584_v48 = vpop.eup %583  ;;  %v360_v7 = vmax.f32 %v328_v51, 0.0 }
  0x23   :  { %452 = vst [vmem:[%s1693_s4 + $0x18] sm:$0xff] %v420_v19  ;;  %v422_v6 = vmul.f32 %v987_v25, %v726_v22  ;;  %v291_v12 = vmul.f32 %v898_v44, %v252_v8  ;;  %v254_v16 = vmul.f32 %v578_v52, %v886_v36  ;;  %v329_v55 = vadd.f32 %v913_v62, %v290_v32 }
  0x24   :  { %453 = vst [vmem:[%s1693_s4 + $0x20] sm:$0xff] %v421_v60  ;;  %v423_v15 = vmul.f32 %v997_v3, %v736_v24  ;;  %v292_v20 = vmul.f32 %v898_v44, %v253_v10  ;;  %v255_v27 = vmul.f32 %v580_v4, %v900_v46  ;;  %v1020_v22 = vmul.f32 %v570_v28, %v360_v7 }
  0x25   :  { %454 = vst [vmem:[%s1693_s4 + $0x28] sm:$0xff] %v422_v6  ;;  %v330_v36 = vadd.f32 %v913_v62, %v291_v12  ;;  %v293_v33 = vmul.f32 %v898_v44, %v254_v16  ;;  %v256_v58 = vmul.f32 %v582_v31, %v908_v57  ;;  %v361_v24 = vmax.f32 %v329_v55, 0.0  ;;  %v1065_v16 = vld [vmem:[%s1690_s1 + $0x80] sm:$0xff] }
  0x26   :  { %1736 = vst [vmem:[#allocation10_spill] sm:$0xff] %v1020_v22  ;;  %455 = vst [vmem:[%s1693_s4 + $0x30] sm:$0xff] %v423_v15  ;;  %v331_v50 = vadd.f32 %v913_v62, %v292_v20  ;;  %v294_v46 = vmul.f32 %v898_v44, %v255_v27  ;;  %v257_v0 = vmul.f32 %v584_v48, %v917_v13 }
  0x27   :  { %v424_v28 = vmul.f32 %v1020_v22, %v753_v30  ;;  %v362_v61 = vmax.f32 %v330_v36, 0.0  ;;  %v332_v38 = vadd.f32 %v913_v62, %v293_v33  ;;  %v295_v19 = vmul.f32 %v898_v44, %v256_v58  ;;  %1740 = vst [vmem:[#allocation14_spill] sm:$0xff] %v1065_v16  ;;  %v1094_v36 = vld [vmem:[%s1689_s0 + $0x90] sm:$0xff] }
  0x28   :  { %v1036_v57 = vmul.f32 %v949_v18, %v361_v24  ;;  %v363_v51 = vmax.f32 %v331_v50, 0.0  ;;  %v333_v8 = vadd.f32 %v913_v62, %v294_v46  ;;  %v296_v60 = vmul.f32 %v898_v44, %v257_v0  ;;  %v1054_v18 = vld [vmem:[%s1689_s0 + $0x80] sm:$0xff]  ;;  %v1099_v33 = vld [vmem:[%s1690_s1 + $0x90] sm:$0xff]  ;;  %v1113_v24 = vld [vmem:[%s1689_s0 + $0x98] sm:$0xff] }
  0x29   :  { %456 = vst [vmem:[%s1693_s4 + $0x38] sm:$0xff] %v424_v28  ;;  %v1044_v13 = vmul.f32 %v955_v47, %v362_v61  ;;  %v364_v30 = vmax.f32 %v332_v38, 0.0  ;;  %v334_v32 = vadd.f32 %v913_v62, %v295_v19  ;;  %v1049_v10 = vadd.f32 %v947_v34, %v921_v11  ;;  %1744 = vst [vmem:[#allocation18_spill] sm:$0xff] %v1099_v33  ;;  %v1118_v50 = vld [vmem:[%s1690_s1 + $0x98] sm:$0xff]  ;;  %v1134_v28 = vld [vmem:[%s1689_s0 + $0xa0] sm:$0xff] }
  0x2a   :  { %1737 = vst [vmem:[#allocation11_spill] sm:$0xff] %v1036_v57  ;;  %v425_v6 = vmul.f32 %v1036_v57, %v775_v39  ;;  %v1059_v7 = vmul.f32 %v961_v26, %v363_v51  ;;  %v365_v47 = vmax.f32 %v333_v8, 0.0  ;;  %v335_v12 = vadd.f32 %v913_v62, %v296_v60  ;;  %v1075_v39 = vld [vmem:[%s1689_s0 + $0x88] sm:$0xff]  ;;  %1746 = vst [vmem:[#allocation20_spill] sm:$0xff] %v1118_v50  ;;  %v1139_v61 = vld [vmem:[%s1690_s1 + $0xa0] sm:$0xff] }
  0x2b   :  { %1738 = vst [vmem:[#allocation12_spill] sm:$0xff] %v1044_v13  ;;  %v426_v11 = vmul.f32 %v1044_v13, %v785_v41  ;;  %v1069_v34 = vmul.f32 %v578_v52, %v364_v30  ;;  %v366_v15 = vmax.f32 %v334_v32, 0.0  ;;  %v194_v55 = vadd.f32 1e-12, %v1049_v10  ;;  %v1080_v26 = vld [vmem:[%s1690_s1 + $0x88] sm:$0xff]  ;;  %1748 = vst [vmem:[#allocation22_spill] sm:$0xff] %v1139_v61 }
  0x2c   :  { %1739 = vst [vmem:[#allocation13_spill] sm:$0xff] %v1059_v7  ;;  %1742 = vst [vmem:[#allocation16_spill] sm:$0xff] %v1080_v26  ;;  %v427_v41 = vmul.f32 %v1059_v7, %v804_v49  ;;  %v1087_v52 = vmul.f32 %v580_v4, %v365_v47  ;;  %v367_v20 = vmax.f32 %v335_v12, 0.0  ;;  %v99_v27 = vmul.f32 %v1054_v18, %v1054_v18  ;;  %v1155_v51 = vld [vmem:[%s1689_s0 + $0xa8] sm:$0xff] }
  0x2d   :  { %1741 = vst [vmem:[#allocation15_spill] sm:$0xff] %v1069_v34  ;;  %457 = vst [vmem:[%s1693_s4 + $0x40] sm:$0xff] %v425_v6  ;;  %v428_v49 = vmul.f32 %v1069_v34, %v820_v54  ;;  %v1106_v4 = vmul.f32 %v582_v31, %v366_v15  ;;  %585 = vrsqrt.f32 %v194_v55  ;;  %v131_v58 = vmul.f32 %v1065_v16, %v1065_v16  ;;  %v1160_v8 = vld [vmem:[%s1690_s1 + $0xa8] sm:$0xff]  ;;  %v1176_v6 = vld [vmem:[%s1689_s0 + $0xb0] sm:$0xff] }
  0x2e   :  { %1743 = vst [vmem:[#allocation17_spill] sm:$0xff] %v1087_v52  ;;  %458 = vst [vmem:[%s1693_s4 + $0x48] sm:$0xff] %v426_v11  ;;  %v429_v54 = vmul.f32 %v1087_v52, %v835_v59  ;;  %v1125_v31 = vmul.f32 %v584_v48, %v367_v20  ;;  %v100_v46 = vmul.f32 %v1075_v39, %v1075_v39  ;;  %v1191_v15 = vld [vmem:[%s1690_s1 + $0xb0] sm:$0xff] }
  0x2f   :  { %1745 = vst [vmem:[#allocation19_spill] sm:$0xff] %v1106_v4  ;;  %459 = vst [vmem:[%s1693_s4 + $0x50] sm:$0xff] %v427_v41  ;;  %v132_v0 = vmul.f32 %v1080_v26, %v1080_v26  ;;  %v430_v59 = vmul.f32 %v1106_v4, %v851_v2  ;;  %v1146_v48 = vadd.f32 %v131_v58, %v99_v27  ;;  %v1211_v58 = vld [vmem:[%s1690_s1 + $0xb8] sm:$0xff] }
  0x30   :  { %1747 = vst [vmem:[#allocation21_spill] sm:$0xff] %v1125_v31  ;;  %460 = vst [vmem:[%s1693_s4 + $0x58] sm:$0xff] %v428_v49  ;;  %v101_v38 = vmul.f32 %v1094_v36, %v1094_v36  ;;  %v133_v19 = vmul.f32 %v1099_v33, %v1099_v33  ;;  %v431_v2 = vmul.f32 %v1125_v31, %v873_v21  ;;  %v1206_v49 = vld [vmem:[%s1689_s0 + $0xb8] sm:$0xff] }
  0x31   :  { %1749 = vst [vmem:[#allocation23_spill] sm:$0xff] %v1160_v8  ;;  %461 = vst [vmem:[%s1693_s4 + $0x60] sm:$0xff] %v429_v54  ;;  %v1167_v60 = vadd.f32 %v132_v0, %v100_v46  ;;  %v102_v30 = vmul.f32 %v1113_v24, %v1113_v24  ;;  %v134_v32 = vmul.f32 %v1118_v50, %v1118_v50  ;;  %v195_v47 = vadd.f32 1e-12, %v1146_v48 }
  0x32   :  { %462 = vst [vmem:[%s1693_s4 + $0x68] sm:$0xff] %v430_v59  ;;  %v1182_v21 = vadd.f32 %v133_v19, %v101_v38  ;;  %v103_v12 = vmul.f32 %v1134_v28, %v1134_v28  ;;  %v135_v11 = vmul.f32 %v1139_v61, %v1139_v61  ;;  %1750 = vst [vmem:[#allocation24_spill] sm:$0xff] %v1191_v15  ;;  %v1221_v59 = vld [vmem:[%s1689_s0 + $0xc0] sm:$0xff]  ;;  %v1272_v61 = vld [vmem:[%s1689_s0 + $0xd8] sm:$0xff] }
  0x33   :  { %463 = vst [vmem:[%s1693_s4 + $0x70] sm:$0xff] %v431_v2  ;;  %v196_v55 = vadd.f32 1e-12, %v1167_v60  ;;  %v1197_v41 = vadd.f32 %v134_v32, %v102_v30  ;;  %v104_v20 = vmul.f32 %v1155_v51, %v1155_v51  ;;  %v136_v27 = vmul.f32 %v1160_v8, %v1160_v8  ;;  %1751 = vst [vmem:[#allocation25_spill] sm:$0xff] %v1211_v58  ;;  %v1231_v30 = vld [vmem:[%s1690_s1 + $0xc0] sm:$0xff]  ;;  %v1236_v32 = vld [vmem:[%s1689_s0 + $0xc8] sm:$0xff] }
  0x34   :  { %587 = vrsqrt.f32 %v195_v47  ;;  %v197_v54 = vadd.f32 1e-12, %v1182_v21  ;;  %v1214_v46 = vadd.f32 %v135_v11, %v103_v12  ;;  %v105_v0 = vmul.f32 %v1176_v6, %v1176_v6  ;;  %1752 = vst [vmem:[#allocation26_spill] sm:$0xff] %v1231_v30 }
  0x35   :  { %589 = vrsqrt.f32 %v196_v55  ;;  %v198_v38 = vadd.f32 1e-12, %v1197_v41  ;;  %v1224_v19 = vadd.f32 %v136_v27, %v104_v20  ;;  %v137_v2 = vmul.f32 %v1191_v15, %v1191_v15  ;;  %v1246_v55 = vld [vmem:[%s1690_s1 + $0xc8] sm:$0xff]  ;;  %v1256_v15 = vld [vmem:[%s1689_s0 + $0xd0] sm:$0xff] }
  0x36   :  { %591 = vrsqrt.f32 %v197_v54  ;;  %v199_v47 = vadd.f32 1e-12, %v1214_v46  ;;  %v106_v12 = vmul.f32 %v1206_v49, %v1206_v49  ;;  %v138_v11 = vmul.f32 %v1211_v58, %v1211_v58  ;;  %1753 = vst [vmem:[#allocation27_spill] sm:$0xff] %v1246_v55  ;;  %v1261_v58 = vld [vmem:[%s1690_s1 + $0xd0] sm:$0xff] }
  0x37   :  { %593 = vrsqrt.f32 %v198_v38  ;;  %v200_v20 = vadd.f32 1e-12, %v1224_v19  ;;  %v1249_v27 = vadd.f32 %v137_v2, %v105_v0  ;;  %v107_v54 = vmul.f32 %v1221_v59, %v1221_v59  ;;  %1754 = vst [vmem:[#allocation28_spill] sm:$0xff] %v1261_v58  ;;  %v586_v8 = vpop.eup %585 }
  0x38   :  { %595 = vrsqrt.f32 %v199_v47  ;;  %v1263_v38 = vadd.f32 %v138_v11, %v106_v12  ;;  %v139_v0 = vmul.f32 %v1231_v30, %v1231_v30  ;;  %v108_v2 = vmul.f32 %v1236_v32, %v1236_v32  ;;  %v1281_v12 = vld [vmem:[%s1690_s1 + $0xd8] sm:$0xff] }
  0x39   :  { %v258_v50 = vmul.f32 %v586_v8, %v1049_v10  ;;  %597 = vrsqrt.f32 %v200_v20  ;;  %v201_v33 = vadd.f32 1e-12, %v1249_v27  ;;  %v140_v47 = vmul.f32 %v1246_v55, %v1246_v55  ;;  %1755 = vst [vmem:[#allocation29_spill] sm:$0xff] %v1281_v12  ;;  %v1293_v20 = vld [vmem:[%s1689_s0 + $0xe0] sm:$0xff] }
  0x3a   :  { %v202_v11 = vadd.f32 1e-12, %v1263_v38  ;;  %v1284_v30 = vadd.f32 %v139_v0, %v107_v54  ;;  %v109_v26 = vmul.f32 %v1256_v15, %v1256_v15  ;;  %v141_v10 = vmul.f32 %v1261_v58, %v1261_v58  ;;  %v1298_v55 = vld [vmem:[%s1690_s1 + $0xe0] sm:$0xff]  ;;  %v1308_v58 = vld [vmem:[%s1689_s0 + $0xe8] sm:$0xff] }
  0x3b   :  { %1756 = vst [vmem:[#allocation30_spill] sm:$0xff] %v1298_v55  ;;  %v297_v16 = vmul.f32 %v898_v44, %v258_v50  ;;  %599 = vrsqrt.f32 %v201_v33  ;;  %v1301_v54 = vadd.f32 %v140_v47, %v108_v2  ;;  %v110_v0 = vmul.f32 %v1272_v61, %v1272_v61  ;;  %1757 = vst [vmem:[#allocation31_spill] sm:$0xff] %v1308_v58 }
  0x3c   :  { %601 = vrsqrt.f32 %v202_v11  ;;  %v203_v31 = vadd.f32 1e-12, %v1284_v30  ;;  %v1311_v4 = vadd.f32 %v141_v10, %v109_v26  ;;  %v142_v52 = vmul.f32 %v1281_v12, %v1281_v12  ;;  %v1324_v11 = vld [vmem:[%s1690_s1 + $0xe8] sm:$0xff] }
  0x3d   :  { %v336_v33 = vadd.f32 %v913_v62, %v297_v16  ;;  %v204_v50 = vadd.f32 1e-12, %v1301_v54  ;;  %v111_v2 = vmul.f32 %v1293_v20, %v1293_v20  ;;  %v143_v47 = vmul.f32 %v1298_v55, %v1298_v55  ;;  %1758 = vst [vmem:[#allocation32_spill] sm:$0xff] %v1324_v11 }
  0x3e   :  { %v588_v26 = vpop.eup %587  ;;  %603 = vrsqrt.f32 %v203_v31  ;;  %v205_v10 = vadd.f32 1e-12, %v1311_v4  ;;  %v1327_v12 = vadd.f32 %v142_v52, %v110_v0  ;;  %v112_v16 = vmul.f32 %v1308_v58, %v1308_v58 }
  0x3f   :  { %v590_v34 = vpop.eup %589  ;;  %v368_v7 = vmax.f32 %v336_v33, 0.0  ;;  %v259_v13 = vmul.f32 %v588_v26, %v1146_v48  ;;  %605 = vrsqrt.f32 %v204_v50  ;;  %v1332_v55 = vadd.f32 %v143_v47, %v111_v2 }
  0x40   :  { %v592_v45 = vpop.eup %591  ;;  %v260_v57 = vmul.f32 %v590_v34, %v1167_v60  ;;  %607 = vrsqrt.f32 %v205_v10  ;;  %v206_v31 = vadd.f32 1e-12, %v1327_v12  ;;  %v144_v52 = vmul.f32 %v1324_v11, %v1324_v11 }
  0x41   :  { %v594_v0 = vpop.eup %593  ;;  %v1338_v40 = vmul.f32 %v586_v8, %v368_v7  ;;  %v298_v58 = vmul.f32 %v898_v44, %v259_v13  ;;  %v261_v33 = vmul.f32 %v592_v45, %v1182_v21  ;;  %v207_v48 = vadd.f32 1e-12, %v1332_v55 }
  0x42   :  { %v596_v50 = vpop.eup %595  ;;  %v299_v2 = vmul.f32 %v898_v44, %v260_v57  ;;  %v262_v60 = vmul.f32 %v594_v0, %v1197_v41  ;;  %609 = vrsqrt.f32 %v206_v31  ;;  %v1345_v47 = vadd.f32 %v144_v52, %v112_v16 }
  0x43   :  { %1759 = vst [vmem:[#allocation33_spill] sm:$0xff] %v1338_v40  ;;  %v598_v10 = vpop.eup %597  ;;  %v432_v11 = vmul.f32 %v1338_v40, %v893_v42  ;;  %v337_v7 = vadd.f32 %v913_v62, %v298_v58  ;;  %v300_v13 = vmul.f32 %v898_v44, %v261_v33  ;;  %v263_v8 = vmul.f32 %v596_v50, %v1214_v46 }
  0x44   :  { %1760 = vst [vmem:[#allocation34_spill] sm:$0xff] %v1345_v47  ;;  %v338_v21 = vadd.f32 %v913_v62, %v299_v2  ;;  %v301_v22 = vmul.f32 %v898_v44, %v262_v60  ;;  %v264_v57 = vmul.f32 %v598_v10, %v1224_v19  ;;  %611 = vrsqrt.f32 %v207_v48 }
  0x45   :  { %v600_v41 = vpop.eup %599  ;;  %464 = vst [vmem:[%s1693_s4 + $0x78] sm:$0xff] %v432_v11  ;;  %v369_v16 = vmax.f32 %v337_v7, 0.0  ;;  %v339_v42 = vadd.f32 %v913_v62, %v300_v13  ;;  %v302_v58 = vmul.f32 %v898_v44, %v263_v8  ;;  %v208_v31 = vadd.f32 1e-12, %v1345_v47 }
  0x46   :  { %v602_v46 = vpop.eup %601  ;;  %v370_v52 = vmax.f32 %v338_v21, 0.0  ;;  %v340_v33 = vadd.f32 %v913_v62, %v301_v22  ;;  %v303_v2 = vmul.f32 %v898_v44, %v264_v57  ;;  %v265_v19 = vmul.f32 %v600_v41, %v1249_v27 }
  0x47   :  { %v1364_v48 = vmul.f32 %v588_v26, %v369_v16  ;;  %v371_v60 = vmax.f32 %v339_v42, 0.0  ;;  %v341_v11 = vadd.f32 %v913_v62, %v302_v58  ;;  %v266_v7 = vmul.f32 %v602_v46, %v1263_v38 }
  0x48   :  { %v604_v13 = vpop.eup %603  ;;  %v1368_v40 = vmul.f32 %v590_v34, %v370_v52  ;;  %v372_v8 = vmax.f32 %v340_v33, 0.0  ;;  %v342_v47 = vadd.f32 %v913_v62, %v303_v2  ;;  %v304_v21 = vmul.f32 %v898_v44, %v265_v19 }
  0x49   :  { %v606_v22 = vpop.eup %605  ;;  %v433_v57 = vmul.f32 %v1364_v48, %v1054_v18  ;;  %v1374_v27 = vmul.f32 %v592_v45, %v371_v60  ;;  %v373_v26 = vmax.f32 %v341_v11, 0.0  ;;  %v305_v16 = vmul.f32 %v898_v44, %v266_v7 }
  0x4a   :  { %v608_v42 = vpop.eup %607  ;;  %v434_v38 = vmul.f32 %v1368_v40, %v1075_v39  ;;  %v1379_v34 = vmul.f32 %v594_v0, %v372_v8  ;;  %v374_v58 = vmax.f32 %v342_v47, 0.0  ;;  %v343_v52 = vadd.f32 %v913_v62, %v304_v21 }
  0x4b   :  { %465 = vst [vmem:[%s1693_s4 + $0x80] sm:$0xff] %v433_v57  ;;  %v435_v45 = vmul.f32 %v1374_v27, %v1094_v36  ;;  %v1387_v18 = vmul.f32 %v596_v50, %v373_v26  ;;  %v344_v33 = vadd.f32 %v913_v62, %v305_v16  ;;  %v267_v2 = vmul.f32 %v604_v13, %v1284_v30  ;;  %v1443_v26 = vld [vmem:[%s1689_s0 + $0xf8] sm:$0xff] }
  0x4c   :  { %v610_v19 = vpop.eup %609  ;;  %466 = vst [vmem:[%s1693_s4 + $0x88] sm:$0xff] %v434_v38  ;;  %v436_v39 = vmul.f32 %v1379_v34, %v1113_v24  ;;  %v1396_v0 = vmul.f32 %v598_v10, %v374_v58  ;;  %v375_v47 = vmax.f32 %v343_v52, 0.0  ;;  %v268_v60 = vmul.f32 %v606_v22, %v1301_v54 }
  0x4d   :  { %467 = vst [vmem:[%s1693_s4 + $0x90] sm:$0xff] %v435_v45  ;;  %v437_v36 = vmul.f32 %v1387_v18, %v1134_v28  ;;  %v376_v30 = vmax.f32 %v344_v33, 0.0  ;;  %v306_v50 = vmul.f32 %v898_v44, %v267_v2  ;;  %v269_v11 = vmul.f32 %v608_v42, %v1311_v4 }
  0x4e   :  { %v612_v7 = vpop.eup %611  ;;  %468 = vst [vmem:[%s1693_s4 + $0x98] sm:$0xff] %v436_v39  ;;  %v438_v24 = vmul.f32 %v1396_v0, %v1155_v51  ;;  %v1411_v54 = vmul.f32 %v600_v41, %v375_v47  ;;  %v307_v10 = vmul.f32 %v898_v44, %v268_v60  ;;  %v270_v8 = vmul.f32 %v610_v19, %v1327_v12  ;;  %v1426_v51 = vld [vmem:[%s1689_s0 + $0xf0] sm:$0xff] }
  0x4f   :  { %469 = vst [vmem:[%s1693_s4 + $0xa0] sm:$0xff] %v437_v36  ;;  %v1418_v28 = vmul.f32 %v602_v46, %v376_v30  ;;  %v345_v4 = vadd.f32 %v913_v62, %v306_v50  ;;  %v308_v21 = vmul.f32 %v898_v44, %v269_v11  ;;  %v271_v57 = vmul.f32 %v612_v7, %v1332_v55  ;;  %v1431_v12 = vld [vmem:[%s1690_s1 + $0xf0] sm:$0xff] }
  0x50   :  { %470 = vst [vmem:[%s1693_s4 + $0xa8] sm:$0xff] %v438_v24  ;;  %v439_v41 = vmul.f32 %v1411_v54, %v1176_v6  ;;  %v346_v46 = vadd.f32 %v913_v62, %v307_v10  ;;  %v309_v55 = vmul.f32 %v898_v44, %v270_v8  ;;  %613 = vrsqrt.f32 %v208_v31  ;;  %v1452_v6 = vld [vmem:[%s1690_s1 + $0xf8] sm:$0xff] }
  0x51   :  { %v440_v16 = vmul.f32 %v1418_v28, %v1206_v49  ;;  %v377_v38 = vmax.f32 %v345_v4, 0.0  ;;  %v347_v58 = vadd.f32 %v913_v62, %v308_v21  ;;  %v310_v52 = vmul.f32 %v898_v44, %v271_v57 }
  0x52   :  { %471 = vst [vmem:[%s1693_s4 + $0xb0] sm:$0xff] %v439_v41  ;;  %v378_v31 = vmax.f32 %v346_v46, 0.0  ;;  %v348_v45 = vadd.f32 %v913_v62, %v309_v55  ;;  %v113_v49 = vmul.f32 %v1426_v51, %v1426_v51  ;;  %v145_v33 = vmul.f32 %v1431_v12, %v1431_v12  ;;  %v1768_v41 = vld [vmem:[#allocation13_spill] sm:$0xff] }
  0x53   :  { %472 = vst [vmem:[%s1693_s4 + $0xb8] sm:$0xff] %v440_v16  ;;  %v1465_v2 = vmul.f32 %v604_v13, %v377_v38  ;;  %v379_v39 = vmax.f32 %v347_v58, 0.0  ;;  %v349_v47 = vadd.f32 %v913_v62, %v310_v52  ;;  %v114_v60 = vmul.f32 %v1443_v26, %v1443_v26  ;;  %v1769_v55 = vld [vmem:[#allocation5_spill] sm:$0xff]  ;;  %v1770_v16 = vld [vmem:[#allocation15_spill] sm:$0xff]  ;;  %v1771_v58 = vld [vmem:[#allocation6_spill] sm:$0xff] }
  0x54   :  { %v1470_v36 = vmul.f32 %v606_v22, %v378_v31  ;;  %v380_v30 = vmax.f32 %v348_v45, 0.0  ;;  %v1472_v50 = vadd.f32 %v145_v33, %v113_v49  ;;  %v146_v11 = vmul.f32 %v1452_v6, %v1452_v6  ;;  %v1772_v52 = vld [vmem:[#allocation17_spill] sm:$0xff]  ;;  %v1773_v45 = vld [vmem:[#allocation7_spill] sm:$0xff] }
  0x55   :  { %v441_v24 = vmul.f32 %v1465_v2, %v1221_v59  ;;  %v1478_v10 = vmul.f32 %v608_v42, %v379_v39  ;;  %v381_v13 = vmax.f32 %v349_v47, 0.0  ;;  %v481_v8 = vmul.f32 %v951_v37, %v657_v1  ;;  %v1774_v49 = vld [vmem:[#allocation19_spill] sm:$0xff]  ;;  %v1775_v39 = vld [vmem:[#allocation8_spill] sm:$0xff]  ;;  %v1776_v47 = vld [vmem:[#allocation21_spill] sm:$0xff] }
  0x56   :  { %v442_v4 = vmul.f32 %v1470_v36, %v1236_v32  ;;  %v1484_v22 = vmul.f32 %v610_v19, %v380_v30  ;;  %v209_v21 = vadd.f32 1e-12, %v1472_v50  ;;  %v1487_v57 = vadd.f32 %v146_v11, %v114_v60  ;;  %v1777_v30 = vld [vmem:[#allocation9_spill] sm:$0xff] }
  0x57   :  { %473 = vst [vmem:[%s1693_s4 + $0xc0] sm:$0xff] %v441_v24  ;;  %v443_v59 = vmul.f32 %v1478_v10, %v1256_v15  ;;  %v1494_v42 = vmul.f32 %v612_v7, %v381_v13  ;;  %513 = vst [vmem:[%s1694_s5] sm:$0xff] %v481_v8  ;;  %v482_v1 = vmul.f32 %v957_v53, %v671_v5  ;;  %v1778_v11 = vld [vmem:[#allocation33_spill] sm:$0xff]  ;;  %v1779_v13 = vld [vmem:[#allocation14_spill] sm:$0xff] }
  0x58   :  { %v483_v37 = vmul.f32 %v965_v43, %v685_v9  ;;  %474 = vst [vmem:[%s1693_s4 + $0xc8] sm:$0xff] %v442_v4  ;;  %v444_v32 = vmul.f32 %v1484_v22, %v1272_v61  ;;  %615 = vrsqrt.f32 %v209_v21  ;;  %v210_v15 = vadd.f32 1e-12, %v1487_v57  ;;  %v1780_v21 = vld [vmem:[#allocation16_spill] sm:$0xff] }
  0x59   :  { %v484_v19 = vmul.f32 %v970_v63, %v701_v14  ;;  %475 = vst [vmem:[%s1693_s4 + $0xd0] sm:$0xff] %v443_v59  ;;  %v445_v5 = vmul.f32 %v1494_v42, %v1293_v20  ;;  %514 = vst [vmem:[%s1694_s5 + $0x8] sm:$0xff] %v482_v1  ;;  %v485_v9 = vmul.f32 %v978_v56, %v713_v17  ;;  %v1761_v63 = vld [vmem:[#allocation10_spill] sm:$0xff]  ;;  %v1763_v56 = vld [vmem:[#allocation11_spill] sm:$0xff] }
  0x5a   :  { %515 = vst [vmem:[%s1694_s5 + $0x10] sm:$0xff] %v483_v37  ;;  %v486_v14 = vmul.f32 %v987_v25, %v731_v23  ;;  %v487_v53 = vmul.f32 %v997_v3, %v748_v29  ;;  %v614_v43 = vpop.eup %613  ;;  %476 = vst [vmem:[%s1693_s4 + $0xd8] sm:$0xff] %v444_v32  ;;  %617 = vrsqrt.f32 %v210_v15  ;;  %v488_v61 = vmul.f32 %v1761_v63, %v765_v35  ;;  %v1762_v17 = vld [vmem:[#allocation2_spill] sm:$0xff]  ;;  %v1764_v23 = vld [vmem:[#allocation3_spill] sm:$0xff] }
  0x5b   :  { %516 = vst [vmem:[%s1694_s5 + $0x18] sm:$0xff] %v484_v19  ;;  %v489_v20 = vmul.f32 %v1763_v56, %v1762_v17  ;;  %v1765_v25 = vld [vmem:[#allocation12_spill] sm:$0xff]  ;;  %477 = vst [vmem:[%s1693_s4 + $0xe0] sm:$0xff] %v445_v5  ;;  %v1766_v29 = vld [vmem:[#allocation34_spill] sm:$0xff]  ;;  %v492_v38 = vmul.f32 %v1770_v16, %v1769_v55  ;;  %v493_v31 = vmul.f32 %v1772_v52, %v1771_v58 }
  0x5c   :  { %v490_v7 = vmul.f32 %v1765_v25, %v1764_v23  ;;  %v272_v3 = vmul.f32 %v614_v43, %v1766_v29  ;;  %517 = vst [vmem:[%s1694_s5 + $0x20] sm:$0xff] %v485_v9  ;;  %518 = vst [vmem:[%s1694_s5 + $0x28] sm:$0xff] %v486_v14  ;;  %v1767_v35 = vld [vmem:[#allocation4_spill] sm:$0xff]  ;;  %v494_v33 = vmul.f32 %v1774_v49, %v1773_v45  ;;  %v1781_v1 = vld [vmem:[#allocation18_spill] sm:$0xff] }
  0x5d   :  { %519 = vst [vmem:[%s1694_s5 + $0x30] sm:$0xff] %v487_v53  ;;  %v491_v46 = vmul.f32 %v1768_v41, %v1767_v35  ;;  %520 = vst [vmem:[%s1694_s5 + $0x38] sm:$0xff] %v488_v61  ;;  %v495_v60 = vmul.f32 %v1776_v47, %v1775_v39  ;;  %v496_v24 = vmul.f32 %v1778_v11, %v1777_v30  ;;  %v1782_v37 = vld [vmem:[#allocation20_spill] sm:$0xff]  ;;  %v1786_v9 = vld [vmem:[#allocation25_spill] sm:$0xff] }
  0x5e   :  { %521 = vst [vmem:[%s1694_s5 + $0x40] sm:$0xff] %v489_v20  ;;  %522 = vst [vmem:[%s1694_s5 + $0x48] sm:$0xff] %v490_v7  ;;  %v497_v8 = vmul.f32 %v1364_v48, %v1779_v13  ;;  %v311_v4 = vmul.f32 %v898_v44, %v272_v3  ;;  %v498_v59 = vmul.f32 %v1368_v40, %v1780_v21  ;;  %v1783_v40 = vld [vmem:[#allocation22_spill] sm:$0xff]  ;;  %v1785_v19 = vld [vmem:[#allocation24_spill] sm:$0xff] }
  0x5f   :  { %523 = vst [vmem:[%s1694_s5 + $0x50] sm:$0xff] %v491_v46  ;;  %524 = vst [vmem:[%s1694_s5 + $0x58] sm:$0xff] %v492_v38  ;;  %v499_v48 = vmul.f32 %v1374_v27, %v1781_v1  ;;  %v500_v32 = vmul.f32 %v1379_v34, %v1782_v37  ;;  %v501_v27 = vmul.f32 %v1387_v18, %v1783_v40  ;;  %v1784_v34 = vld [vmem:[#allocation23_spill] sm:$0xff]  ;;  %v1787_v18 = vld [vmem:[#allocation26_spill] sm:$0xff] }
  0x60   :  { %525 = vst [vmem:[%s1694_s5 + $0x60] sm:$0xff] %v493_v31  ;;  %526 = vst [vmem:[%s1694_s5 + $0x68] sm:$0xff] %v494_v33  ;;  %v502_v15 = vmul.f32 %v1396_v0, %v1784_v34  ;;  %v503_v5 = vmul.f32 %v1411_v54, %v1785_v19  ;;  %v504_v14 = vmul.f32 %v1418_v28, %v1786_v9  ;;  %v1788_v54 = vld [vmem:[#allocation27_spill] sm:$0xff]  ;;  %v1789_v63 = vld [vmem:[#allocation28_spill] sm:$0xff] }
  0x61   :  { %527 = vst [vmem:[%s1694_s5 + $0x70] sm:$0xff] %v495_v60  ;;  %528 = vst [vmem:[%s1694_s5 + $0x78] sm:$0xff] %v496_v24  ;;  %v350_v53 = vadd.f32 %v913_v62, %v311_v4  ;;  %v505_v0 = vmul.f32 %v1465_v2, %v1787_v18  ;;  %v506_v28 = vmul.f32 %v1470_v36, %v1788_v54  ;;  %v1790_v2 = vld [vmem:[#allocation29_spill] sm:$0xff]  ;;  %v1792_v25 = vld [vmem:[#allocation31_spill] sm:$0xff] }
  0x62   :  { %529 = vst [vmem:[%s1694_s5 + $0x80] sm:$0xff] %v497_v8  ;;  %530 = vst [vmem:[%s1694_s5 + $0x88] sm:$0xff] %v498_v59  ;;  %v507_v61 = vmul.f32 %v1478_v10, %v1789_v63  ;;  %v508_v36 = vmul.f32 %v1484_v22, %v1790_v2  ;;  %v1791_v10 = vld [vmem:[#allocation30_spill] sm:$0xff]  ;;  %v616_v20 = vpop.eup %615  ;;  %v1793_v35 = vld [vmem:[#allocation32_spill] sm:$0xff] }
  0x63   :  { %531 = vst [vmem:[%s1694_s5 + $0x90] sm:$0xff] %v499_v48  ;;  %532 = vst [vmem:[%s1694_s5 + $0x98] sm:$0xff] %v500_v32  ;;  %v509_v17 = vmul.f32 %v1494_v42, %v1791_v10  ;;  %v382_v56 = vmax.f32 %v350_v53, 0.0  ;;  %v273_v42 = vmul.f32 %v616_v20, %v1472_v50 }
  0x64   :  { %533 = vst [vmem:[%s1694_s5 + $0xa0] sm:$0xff] %v501_v27  ;;  %534 = vst [vmem:[%s1694_s5 + $0xa8] sm:$0xff] %v502_v15  ;;  %v618_v23 = vpop.eup %617 }
  0x65   :  { %535 = vst [vmem:[%s1694_s5 + $0xb0] sm:$0xff] %v503_v5  ;;  %536 = vst [vmem:[%s1694_s5 + $0xb8] sm:$0xff] %v504_v14  ;;  %v414_v22 = vmul.f32 %v614_v43, %v382_v56  ;;  %v312_v29 = vmul.f32 %v898_v44, %v273_v42  ;;  %v274_v3 = vmul.f32 %v618_v23, %v1487_v57 }
  0x66   :  { %537 = vst [vmem:[%s1694_s5 + $0xc0] sm:$0xff] %v505_v0  ;;  %538 = vst [vmem:[%s1694_s5 + $0xc8] sm:$0xff] %v506_v28 }
  0x67   :  { %539 = vst [vmem:[%s1694_s5 + $0xd0] sm:$0xff] %v507_v61  ;;  %540 = vst [vmem:[%s1694_s5 + $0xd8] sm:$0xff] %v508_v36  ;;  %v446_v7 = vmul.f32 %v414_v22, %v1792_v25  ;;  %v510_v41 = vmul.f32 %v414_v22, %v1793_v35  ;;  %v351_v46 = vadd.f32 %v913_v62, %v312_v29 }
  0x68   :  { %541 = vst [vmem:[%s1694_s5 + $0xe0] sm:$0xff] %v509_v17  ;;  %v313_v55 = vmul.f32 %v898_v44, %v274_v3 }
  0x69   :  { %478 = vst [vmem:[%s1693_s4 + $0xe8] sm:$0xff] %v446_v7  ;;  %542 = vst [vmem:[%s1694_s5 + $0xe8] sm:$0xff] %v510_v41  ;;  %v383_v50 = vmax.f32 %v351_v46, 0.0 }
  0x6a   :  { %v352_v43 = vadd.f32 %v913_v62, %v313_v55 }
  0x6b   :  { %v415_v16 = vmul.f32 %v616_v20, %v383_v50 }
  0x6c   :  { %v384_v38 = vmax.f32 %v352_v43, 0.0 }
  0x6d   :  { %v447_v57 = vmul.f32 %v415_v16, %v1426_v51  ;;  %v511_v52 = vmul.f32 %v415_v16, %v1431_v12 }
  0x6e   :  { %v416_v58 = vmul.f32 %v618_v23, %v384_v38 }
  0x6f   :  { %479 = vst [vmem:[%s1693_s4 + $0xf0] sm:$0xff] %v447_v57  ;;  %543 = vst [vmem:[%s1694_s5 + $0xf0] sm:$0xff] %v511_v52 }
  0x70   :  { %v448_v44 = vmul.f32 %v416_v58, %v1443_v26  ;;  %v512_v31 = vmul.f32 %v416_v58, %v1452_v6 }
  0x72   :  { %480 = vst [vmem:[%s1693_s4 + $0xf8] sm:$0xff] %v448_v44  ;;  %544 = vst [vmem:[%s1694_s5 + $0xf8] sm:$0xff] %v512_v31 }

// kernel: resnet_forward.16
= control target key start
LH: loop header
LB: loop body
LE: loop exit
PB: predicated region body
PF: predicated region fallthrough
CT: control target
= control target key end

     0   :  { %s2744_s24 = smov 0   ;;  %s2746_s25 = smov 0   ;;  %s3435_s0 = inlined_call_operand.vmem [shape: bf16[512,256], index: 0, kind: input, shape index: {}]   ;;  %s3436_s1 = inlined_call_operand.vmem [shape: bf16[256,128], index: 1, kind: input, shape index: {}]   ;;  %s3437_s2 = inlined_call_operand.vmem [shape: bf16[256,128], index: 2, kind: input, shape index: {}]   ;;  %s3438_s3 = inlined_call_operand.vmem [shape: f32[1,128], index: 3, kind: input, shape index: {}]   ;;  %s3439_s4 = inlined_call_operand.vmem [shape: f32[1,128], index: 4, kind: input, shape index: {}]   ;;  %s3440_s5 = inlined_call_operand.vmem [shape: f32[512,128], index: 5, kind: output, shape index: {0}]   ;;  %s3441_s6 = inlined_call_operand.vmem [shape: f32[512,128], index: 6, kind: output, shape index: {1}]   ;;  %s3442_s7 = inlined_call_operand.vmem [shape: f32[16,128], index: 7, kind: output, shape index: {2}]  }
   0x1   :  { %s2748_s26 = smov 0  }
   0x2 LB: > { %s37_s27 = sadd.s32 1, %s2697_s25  ;;  %p2208_p0 = scmp.ge.s32.totalorder %s2701_s26, 1  ;;  %s2701_s26 = sphi %s2748_s26, %s18_s26   ;;  %s2697_s25 = sphi %s2746_s25, %s3444_s25   ;;  %s2693_s24 = sphi %s2744_s24, %s3443_s24  }
   0x3   : > { %p39_p1 = scmp.ge.s32.totalorder %s37_s27, 2  ;;  %p324_p2 = scmp.lt.s32.totalorder %s2701_s26, 3 }
   0x5   : > { %s3446_s27 = smov (%p39_p1, %s37_s27), 0  ;;  %p325_p3 = pnand %p2208_p0, %p324_p2 }
   0x6   : > { %v2535_v0 = vld [vmem:[%s3436_s1 + $0x40] sm:$0xff] (!%p325_p3)   ;;  %v2539_v4 = vld [vmem:[%s3436_s1 + $0x48] sm:$0xff] (!%p325_p3)   ;;  %v2543_v8 = vld [vmem:[%s3436_s1 + $0x50] sm:$0xff] (!%p325_p3)   ;;  %s2209_s18 = sshll.u32 (!%p325_p3), %s2693_s24, 5  ;;  %p455_p5 = scmp.lt.s32.totalorder (!%p325_p3), %s2693_s24, 1 }
   0x7   : > { %328 = sbr.rel (%p325_p3) target bundleno = 415 (0x19f), region = 40  ;;  %v2536_v1 = vld [vmem:[%s3437_s2 + $0x40] sm:$0xff] (!%p325_p3)   ;;  %2286 = vmatprep.subr.bf16.mxu0 (!%p325_p3), %v2535_v0  ;;  %v2540_v5 = vld [vmem:[%s3437_s2 + $0x48] sm:$0xff] (!%p325_p3)   ;;  %v2544_v9 = vld [vmem:[%s3437_s2 + $0x50] sm:$0xff] (!%p325_p3)   ;;  %p403_p4 = scmp.lt.s32.totalorder (!%p325_p3), %s2209_s18, 63 }
   0x8   : > { %v2537_v2 = vld [vmem:[%s3436_s1] sm:$0xff] (!%p325_p3)   ;;  %2398 = vmatprep.subr.bf16.mxu1 (!%p325_p3), %v2536_v1  ;;  %v2541_v6 = vld [vmem:[%s3436_s1 + $0x8] sm:$0xff] (!%p325_p3)   ;;  %v2545_v10 = vld [vmem:[%s3436_s1 + $0x10] sm:$0xff] (!%p325_p3)  }
   0x9   : > { %v2538_v3 = vld [vmem:[%s3437_s2] sm:$0xff] (!%p325_p3)   ;;  %2287 = vmatpush3.bf16.msra.mxu0 (!%p325_p3), %v2537_v2  ;;  %v2542_v7 = vld [vmem:[%s3437_s2 + $0x8] sm:$0xff] (!%p325_p3)   ;;  %v2546_v11 = vld [vmem:[%s3437_s2 + $0x10] sm:$0xff] (!%p325_p3)  }
   0xa   : > { %2399 = vmatpush3.bf16.msra.mxu1 (!%p325_p3), %v2538_v3  ;;  %2288 = vmatprep.subr.bf16.mxu0 (!%p325_p3), %v2539_v4  ;;  %v2547_v12 = vld [vmem:[%s3436_s1 + $0x58] sm:$0xff] (!%p325_p3)   ;;  %v2551_v16 = vld [vmem:[%s3436_s1 + $0x60] sm:$0xff] (!%p325_p3)   ;;  %v2555_v20 = vld [vmem:[%s3436_s1 + $0x68] sm:$0xff] (!%p325_p3)  }
   0xb   : > { %2400 = vmatprep.subr.bf16.mxu1 (!%p325_p3), %v2540_v5  ;;  %v2548_v13 = vld [vmem:[%s3437_s2 + $0x58] sm:$0xff] (!%p325_p3)   ;;  %v2552_v17 = vld [vmem:[%s3437_s2 + $0x60] sm:$0xff] (!%p325_p3)   ;;  %v2556_v21 = vld [vmem:[%s3437_s2 + $0x68] sm:$0xff] (!%p325_p3)  }
   0xc   : > { %v2549_v14 = vld [vmem:[%s3436_s1 + $0x18] sm:$0xff] (!%p325_p3)   ;;  %v2553_v18 = vld [vmem:[%s3436_s1 + $0x20] sm:$0xff] (!%p325_p3)   ;;  %v2557_v22 = vld [vmem:[%s3436_s1 + $0x28] sm:$0xff] (!%p325_p3)  }
   0xd   : > { %2289 = vmatpush3.bf16.msra.mxu0 (!%p325_p3), %v2541_v6  ;;  %v2550_v15 = vld [vmem:[%s3437_s2 + $0x18] sm:$0xff] (!%p325_p3)   ;;  %v2554_v19 = vld [vmem:[%s3437_s2 + $0x20] sm:$0xff] (!%p325_p3)   ;;  %v2558_v23 = vld [vmem:[%s3437_s2 + $0x28] sm:$0xff] (!%p325_p3)  }
   0xe   : > { %2401 = vmatpush3.bf16.msra.mxu1 %v2542_v7  ;;  %2290 = vmatprep.subr.bf16.mxu0 %v2543_v8  ;;  %s3448_s18 = smov (!%p403_p4, %s2209_s18), 63  ;;  %v2559_v24 = vld [vmem:[%s3436_s1 + $0x70] sm:$0xff]   ;;  %v2563_v28 = vld [vmem:[%s3436_s1 + $0x78] sm:$0xff]   ;;  %v2901_v55 = vld [vmem:[%s3438_s3] ss:$0 sm:$0xff]  ;;  %s3450_s24 = smov (!%p455_p5, %s2693_s24), 1 }
   0xf   : > { %2402 = vmatprep.subr.bf16.mxu1 %v2544_v9  ;;  %v2560_v25 = vld [vmem:[%s3437_s2 + $0x70] sm:$0xff]   ;;  %s2846_s23 = sshll.u32 %s3448_s18, 3  ;;  %v2564_v29 = vld [vmem:[%s3437_s2 + $0x78] sm:$0xff]   ;;  %v2940_v58 = vld [vmem:[%s3439_s4] ss:$0 sm:$0xff] }
  0x10   : > { %v2561_v26 = vld [vmem:[%s3436_s1 + $0x30] sm:$0xff]   ;;  %s2861_s18 = scalar_lea.vmem %s3435_s0, %s2846_s23  ;;  %v2565_v30 = vld [vmem:[%s3436_s1 + $0x38] sm:$0xff]   ;;  %s2896_s20 = scalar_lea.vmem %s3440_s5, %s2846_s23 }
  0x11   : > { %2291 = vmatpush3.bf16.msra.mxu0 %v2545_v10  ;;  %v2562_v27 = vld [vmem:[%s3437_s2 + $0x30] sm:$0xff]   ;;  %v2566_v31 = vld [vmem:[%s3437_s2 + $0x38] sm:$0xff]   ;;  %v2567_v32 = vld [vmem:[%s2861_s18] ss:$8 sps:$4 sm:$0xff]   ;;  %493 = vst [vmem:[%s2896_s20 + $0x98] sm:$0xff] %v2901_v55  ;;  %s2935_s30 = scalar_lea.vmem %s3441_s6, %s2846_s23  ;;  %s2216_s23 = sshll.u32 %s3450_s24, 3 }
  0x12   : > { %2403 = vmatpush3.bf16.msra.mxu1 %v2546_v11  ;;  %2292 = vmatprep.subr.bf16.mxu0 %v2547_v12  ;;  %v2569_v33 = vld [vmem:[%s2861_s18 + $0x4] ss:$8 sps:$4 sm:$0xff]   ;;  %v2570_v34 = vld [vmem:[%s2861_s18 + $0x14] ss:$8 sps:$4 sm:$0xff]   ;;  %v2572_v35 = vld [vmem:[%s2861_s18 + $0x10] ss:$8 sps:$4 sm:$0xff]   ;;  %s3104_s11 = scalar_lea.vmem %s3442_s7, %s2216_s23 }
  0x13   : > { %2404 = vmatprep.subr.bf16.mxu1 %v2548_v13  ;;  %929 = vmatprep.mubr.bf16.mxu0 %v2569_v33  ;;  %v2573_v36 = vld [vmem:[%s2861_s18 + $0x24] ss:$8 sps:$4 sm:$0xff]   ;;  %v2575_v37 = vld [vmem:[%s2861_s18 + $0x20] ss:$8 sps:$4 sm:$0xff]   ;;  %v2576_v38 = vld [vmem:[%s2861_s18 + $0x34] ss:$8 sps:$4 sm:$0xff]  }
  0x14   : > { %1314 = vmatprep.mubr.bf16.mxu1 %v2569_v33  ;;  %v2578_v39 = vld [vmem:[%s2861_s18 + $0x30] ss:$8 sps:$4 sm:$0xff]   ;;  %v2579_v40 = vld [vmem:[%s2861_s18 + $0x44] ss:$8 sps:$4 sm:$0xff]   ;;  %v2581_v41 = vld [vmem:[%s2861_s18 + $0x40] ss:$8 sps:$4 sm:$0xff]  }
  0x15   : > { %2293 = vmatpush3.bf16.msra.mxu0 %v2549_v14  ;;  %v2582_v42 = vld [vmem:[%s2861_s18 + $0x54] ss:$8 sps:$4 sm:$0xff]   ;;  %v2584_v43 = vld [vmem:[%s2861_s18 + $0x50] ss:$8 sps:$4 sm:$0xff]   ;;  %v2585_v44 = vld [vmem:[%s2861_s18 + $0x64] ss:$8 sps:$4 sm:$0xff]  }
  0x16   : > { %2405 = vmatpush3.bf16.msra.mxu1 %v2550_v15  ;;  %2294 = vmatprep.subr.bf16.mxu0 %v2551_v16  ;;  %v2587_v45 = vld [vmem:[%s2861_s18 + $0x60] ss:$8 sps:$4 sm:$0xff]   ;;  %v2588_v46 = vld [vmem:[%s2861_s18 + $0x74] ss:$8 sps:$4 sm:$0xff]   ;;  %v2590_v47 = vld [vmem:[%s2861_s18 + $0x70] ss:$8 sps:$4 sm:$0xff]  }
  0x17   : > { %2406 = vmatprep.subr.bf16.mxu1 %v2552_v17  ;;  %v2591_v48 = vld [vmem:[%s2861_s18 + $0x84] ss:$8 sps:$4 sm:$0xff]   ;;  %v2593_v49 = vld [vmem:[%s2861_s18 + $0x80] ss:$8 sps:$4 sm:$0xff]   ;;  %v2594_v50 = vld [vmem:[%s2861_s18 + $0x94] ss:$8 sps:$4 sm:$0xff]  }
  0x18   : > { %v2596_v51 = vld [vmem:[%s2861_s18 + $0x90] ss:$8 sps:$4 sm:$0xff]   ;;  %v2597_v52 = vld [vmem:[%s2861_s18 + $0xa4] ss:$8 sps:$4 sm:$0xff]   ;;  %v2599_v53 = vld [vmem:[%s2861_s18 + $0xa0] ss:$8 sps:$4 sm:$0xff]  }
  0x19   : > { %2295 = vmatpush3.bf16.msra.mxu0 %v2553_v18  ;;  %v2600_v54 = vld [vmem:[%s2861_s18 + $0xb4] ss:$8 sps:$4 sm:$0xff]   ;;  %v2602_v56 = vld [vmem:[%s2861_s18 + $0xb0] ss:$8 sps:$4 sm:$0xff]   ;;  %494 = vst [vmem:[%s2896_s20 + $0xa0] sm:$0xff] %v2901_v55  ;;  %495 = vst [vmem:[%s2896_s20 + $0xa8] sm:$0xff] %v2901_v55 }
  0x1a   : > { %2407 = vmatpush3.bf16.msra.mxu1 %v2554_v19  ;;  %2296 = vmatprep.subr.bf16.mxu0 %v2555_v20  ;;  %496 = vst [vmem:[%s2896_s20 + $0xb0] sm:$0xff] %v2901_v55  ;;  %497 = vst [vmem:[%s2896_s20 + $0xb8] sm:$0xff] %v2901_v55  ;;  %v2603_v57 = vld [vmem:[%s2861_s18 + $0xc4] ss:$8 sps:$4 sm:$0xff]   ;;  %v2605_v59 = vld [vmem:[%s2861_s18 + $0xc0] ss:$8 sps:$4 sm:$0xff]  }
  0x1b   : > { %2408 = vmatprep.subr.bf16.mxu1 %v2556_v21  ;;  %498 = vst [vmem:[%s2896_s20 + $0xc0] sm:$0xff] %v2901_v55  ;;  %499 = vst [vmem:[%s2896_s20 + $0xc8] sm:$0xff] %v2901_v55  ;;  %v2606_v60 = vld [vmem:[%s2861_s18 + $0xd4] ss:$8 sps:$4 sm:$0xff]   ;;  %v2608_v61 = vld [vmem:[%s2861_s18 + $0xd0] ss:$8 sps:$4 sm:$0xff]  }
  0x1c   : > { %500 = vst [vmem:[%s2896_s20 + $0xd0] sm:$0xff] %v2901_v55  ;;  %501 = vst [vmem:[%s2896_s20 + $0xd8] sm:$0xff] %v2901_v55  ;;  %v2609_v62 = vld [vmem:[%s2861_s18 + $0xe4] ss:$8 sps:$4 sm:$0xff]   ;;  %v2611_v63 = vld [vmem:[%s2861_s18 + $0xe0] ss:$8 sps:$4 sm:$0xff]  }
  0x1d   : > { %2297 = vmatpush3.bf16.msra.mxu0 %v2557_v22  ;;  %502 = vst [vmem:[%s2896_s20 + $0xe0] sm:$0xff] %v2901_v55  ;;  %503 = vst [vmem:[%s2896_s20 + $0xe8] sm:$0xff] %v2901_v55  ;;  %v2612_v0 = vld [vmem:[%s2861_s18 + $0xf4] ss:$8 sps:$4 sm:$0xff]   ;;  %v2614_v1 = vld [vmem:[%s2861_s18 + $0xf0] ss:$8 sps:$4 sm:$0xff]  }
  0x1e   : > { %2409 = vmatpush3.bf16.msra.mxu1 %v2558_v23  ;;  %2298 = vmatprep.subr.bf16.mxu0 %v2559_v24  ;;  %504 = vst [vmem:[%s2896_s20 + $0xf0] sm:$0xff] %v2901_v55  ;;  %505 = vst [vmem:[%s2896_s20 + $0xf8] sm:$0xff] %v2901_v55 }
  0x1f   : > { %2410 = vmatprep.subr.bf16.mxu1 %v2560_v25  ;;  %533 = vst [vmem:[%s2935_s30 + $0xa0] sm:$0xff] %v2940_v58  ;;  %534 = vst [vmem:[%s2935_s30 + $0xa8] sm:$0xff] %v2940_v58 }
  0x20   : > { %535 = vst [vmem:[%s2935_s30 + $0xb0] sm:$0xff] %v2940_v58  ;;  %536 = vst [vmem:[%s2935_s30 + $0xb8] sm:$0xff] %v2940_v58 }
  0x21   : > { %2299 = vmatpush3.bf16.msra.mxu0 %v2561_v26  ;;  %537 = vst [vmem:[%s2935_s30 + $0xc0] sm:$0xff] %v2940_v58  ;;  %538 = vst [vmem:[%s2935_s30 + $0xc8] sm:$0xff] %v2940_v58 }
  0x22   : > { %2411 = vmatpush3.bf16.msra.mxu1 %v2562_v27  ;;  %2300 = vmatprep.subr.bf16.mxu0 %v2563_v28  ;;  %539 = vst [vmem:[%s2935_s30 + $0xd0] sm:$0xff] %v2940_v58  ;;  %540 = vst [vmem:[%s2935_s30 + $0xd8] sm:$0xff] %v2940_v58 }
  0x23   : > { %2412 = vmatprep.subr.bf16.mxu1 %v2564_v29  ;;  %541 = vst [vmem:[%s2935_s30 + $0xe0] sm:$0xff] %v2940_v58  ;;  %542 = vst [vmem:[%s2935_s30 + $0xe8] sm:$0xff] %v2940_v58 }
  0x24   : > { %543 = vst [vmem:[%s2935_s30 + $0xf0] sm:$0xff] %v2940_v58  ;;  %544 = vst [vmem:[%s2935_s30 + $0xf8] sm:$0xff] %v2940_v58 }
  0x25   : > { %2301 = vmatpush3.bf16.msra.mxu0 %v2565_v30 }
  0x26   : > { %2413 = vmatpush3.bf16.msra.mxu1 %v2566_v31 }
  0x28   : > { %930 = vmatmul.mubr.bf16.vlgmr.msra.gmra.mrb[0].mxu0 %v2567_v32 }
  0x29   : > { %1315 = vmatmul.mubr.bf16.vlgmr.msra.gmra.mrb[0].mxu1 %v2567_v32  ;;  %937 = vmatprep.mubr.bf16.mxu0 %v2570_v34 }
  0x2a   : > { %1322 = vmatprep.mubr.bf16.mxu1 %v2570_v34 }
  0x30   : > { %938 = vmatmul.mubr.bf16.gmra.mrb[4].mxu0 %v2572_v35 }
  0x31   : > { %1323 = vmatmul.mubr.bf16.gmra.mrb[4].mxu1 %v2572_v35  ;;  %945 = vmatprep.mubr.bf16.mxu0 %v2573_v36 }
  0x32   : > { %1330 = vmatprep.mubr.bf16.mxu1 %v2573_v36 }
  0x38   : > { %946 = vmatmul.mubr.bf16.gmra.mrb[8].mxu0 %v2575_v37 }
  0x39   : > { %1331 = vmatmul.mubr.bf16.gmra.mrb[8].mxu1 %v2575_v37  ;;  %953 = vmatprep.mubr.bf16.mxu0 %v2576_v38 }
  0x3a   : > { %1338 = vmatprep.mubr.bf16.mxu1 %v2576_v38 }
  0x40   : > { %954 = vmatmul.mubr.bf16.gmra.mrb[12].mxu0 %v2578_v39 }
  0x41   : > { %1339 = vmatmul.mubr.bf16.gmra.mrb[12].mxu1 %v2578_v39  ;;  %961 = vmatprep.mubr.bf16.mxu0 %v2579_v40 }
  0x42   : > { %1346 = vmatprep.mubr.bf16.mxu1 %v2579_v40 }
  0x48   : > { %962 = vmatmul.mubr.bf16.gmra.mrb[16].mxu0 %v2581_v41 }
  0x49   : > { %1347 = vmatmul.mubr.bf16.gmra.mrb[16].mxu1 %v2581_v41  ;;  %969 = vmatprep.mubr.bf16.mxu0 %v2582_v42 }
  0x4a   : > { %1354 = vmatprep.mubr.bf16.mxu1 %v2582_v42 }
  0x50   : > { %970 = vmatmul.mubr.bf16.gmra.mrb[20].mxu0 %v2584_v43 }
  0x51   : > { %1355 = vmatmul.mubr.bf16.gmra.mrb[20].mxu1 %v2584_v43  ;;  %977 = vmatprep.mubr.bf16.mxu0 %v2585_v44 }
  0x52   : > { %1362 = vmatprep.mubr.bf16.mxu1 %v2585_v44 }
  0x58   : > { %978 = vmatmul.mubr.bf16.gmra.mrb[24].mxu0 %v2587_v45 }
  0x59   : > { %1363 = vmatmul.mubr.bf16.gmra.mrb[24].mxu1 %v2587_v45  ;;  %985 = vmatprep.mubr.bf16.mxu0 %v2588_v46 }
  0x5a   : > { %1370 = vmatprep.mubr.bf16.mxu1 %v2588_v46 }
  0x60   : > { %986 = vmatmul.mubr.bf16.gmra.mrb[28].mxu0 %v2590_v47 }
  0x61   : > { %1371 = vmatmul.mubr.bf16.gmra.mrb[28].mxu1 %v2590_v47  ;;  %993 = vmatprep.mubr.bf16.mxu0 %v2591_v48 }
  0x62   : > { %1378 = vmatprep.mubr.bf16.mxu1 %v2591_v48 }
  0x68   : > { %994 = vmatmul.mubr.bf16.gmra.mrb[32].mxu0 %v2593_v49 }
  0x69   : > { %1379 = vmatmul.mubr.bf16.gmra.mrb[32].mxu1 %v2593_v49  ;;  %1001 = vmatprep.mubr.bf16.mxu0 %v2594_v50 }
  0x6a   : > { %1386 = vmatprep.mubr.bf16.mxu1 %v2594_v50 }
  0x70   : > { %1002 = vmatmul.mubr.bf16.gmra.mrb[36].mxu0 %v2596_v51 }
  0x71   : > { %1387 = vmatmul.mubr.bf16.gmra.mrb[36].mxu1 %v2596_v51  ;;  %1009 = vmatprep.mubr.bf16.mxu0 %v2597_v52 }
  0x72   : > { %1394 = vmatprep.mubr.bf16.mxu1 %v2597_v52 }
  0x78   : > { %1010 = vmatmul.mubr.bf16.gmra.mrb[40].mxu0 %v2599_v53 }
  0x79   : > { %1395 = vmatmul.mubr.bf16.gmra.mrb[40].mxu1 %v2599_v53  ;;  %1017 = vmatprep.mubr.bf16.mxu0 %v2600_v54 }
  0x7a   : > { %1402 = vmatprep.mubr.bf16.mxu1 %v2600_v54 }
  0x80   : > { %1018 = vmatmul.mubr.bf16.gmra.mrb[44].mxu0 %v2602_v56 }
  0x81   : > { %1403 = vmatmul.mubr.bf16.gmra.mrb[44].mxu1 %v2602_v56  ;;  %1025 = vmatprep.mubr.bf16.mxu0 %v2603_v57 }
  0x82   : > { %1410 = vmatprep.mubr.bf16.mxu1 %v2603_v57 }
  0x88   : > { %1026 = vmatmul.mubr.bf16.gmra.mrb[48].mxu0 %v2605_v59 }
  0x89   : > { %1411 = vmatmul.mubr.bf16.gmra.mrb[48].mxu1 %v2605_v59  ;;  %1033 = vmatprep.mubr.bf16.mxu0 %v2606_v60 }
  0x8a   : > { %1418 = vmatprep.mubr.bf16.mxu1 %v2606_v60 }
  0x90   : > { %1034 = vmatmul.mubr.bf16.gmra.mrb[52].mxu0 %v2608_v61 }
  0x91   : > { %1419 = vmatmul.mubr.bf16.gmra.mrb[52].mxu1 %v2608_v61  ;;  %1041 = vmatprep.mubr.bf16.mxu0 %v2609_v62 }
  0x92   : > { %1426 = vmatprep.mubr.bf16.mxu1 %v2609_v62 }
  0x98   : > { %1042 = vmatmul.mubr.bf16.gmra.mrb[56].mxu0 %v2611_v63 }
  0x99   : > { %1427 = vmatmul.mubr.bf16.gmra.mrb[56].mxu1 %v2611_v63  ;;  %1049 = vmatprep.mubr.bf16.mxu0 %v2612_v0 }
  0x9a   : > { %1434 = vmatprep.mubr.bf16.mxu1 %v2612_v0 }
  0xa0   : > { %1050 = vmatmul.mubr.bf16.gmra.mrb[60].mxu0 %v2614_v1 }
  0xa1   : > { %1435 = vmatmul.mubr.bf16.gmra.mrb[60].mxu1 %v2614_v1 }
  0xfb   : > { %v2302_v2 = vpop.f32.mrb[0].mxu0 }
  0xfc   : > { %v2414_v3 = vpop.f32.mrb[0].mxu1  ;;  %v2303_v4 = vpop.f32.mrb[1].mxu0 }
  0xfd   : > { %v2415_v5 = vpop.f32.mrb[1].mxu1  ;;  %v2304_v6 = vadd.f32 %v2303_v4, %v2302_v2  ;;  %v2305_v8 = vpop.f32.mrb[2].mxu0 }
  0xfe   : > { %v2416_v7 = vadd.f32 %v2415_v5, %v2414_v3  ;;  %v2417_v9 = vpop.f32.mrb[2].mxu1  ;;  %v2306_v10 = vpop.f32.mrb[3].mxu0 }
  0xff   : > { %v2418_v11 = vpop.f32.mrb[3].mxu1  ;;  %v1058_v12 = vadd.f32 %v2304_v6, %v2901_v55  ;;  %v2307_v14 = vadd.f32 %v2306_v10, %v2305_v8 }
 0x100   : > { %v1443_v13 = vadd.f32 %v2416_v7, %v2940_v58  ;;  %v2419_v15 = vadd.f32 %v2418_v11, %v2417_v9 }
 0x101   : > { %1090 = vst [vmem:[%s2896_s20] sm:$0xff] %v1058_v12  ;;  %v1574_v16 = vmul.f32 %v1058_v12, %v1058_v12  ;;  %v1059_v18 = vadd.f32 %v2307_v14, %v2901_v55 }
 0x102   : > { %1475 = vst [vmem:[%s2935_s30] sm:$0xff] %v1443_v13  ;;  %v1606_v17 = vmul.f32 %v1443_v13, %v1443_v13  ;;  %v1444_v19 = vadd.f32 %v2419_v15, %v2940_v58 }
 0x103   : > { %1091 = vst [vmem:[%s2896_s20 + $0x8] sm:$0xff] %v1059_v18  ;;  %v1575_v21 = vmul.f32 %v1059_v18, %v1059_v18  ;;  %v2308_v23 = vpop.f32.mrb[4].mxu0 }
 0x104   : > { %v2979_v20 = vadd.f32 %v1606_v17, %v1574_v16  ;;  %1476 = vst [vmem:[%s2935_s30 + $0x8] sm:$0xff] %v1444_v19  ;;  %v1607_v22 = vmul.f32 %v1444_v19, %v1444_v19  ;;  %v2420_v24 = vpop.f32.mrb[4].mxu1  ;;  %v2309_v25 = vpop.f32.mrb[5].mxu0 }
 0x105   : > { %v2421_v26 = vpop.f32.mrb[5].mxu1  ;;  %v2311_v27 = vpop.f32.mrb[6].mxu0  ;;  %v2310_v30 = vadd.f32 %v2309_v25, %v2308_v23 }
 0x106   : > { %2615 = vrsqrt.f32 %v2979_v20  ;;  %v2423_v28 = vpop.f32.mrb[6].mxu1  ;;  %v2984_v29 = vadd.f32 %v1607_v22, %v1575_v21  ;;  %v2422_v31 = vadd.f32 %v2421_v26, %v2420_v24  ;;  %v2312_v32 = vpop.f32.mrb[7].mxu0  ;;  %vm1672_vm0 = vcmp.eq.f32.partialorder %v2979_v20, inf }
 0x107   : > { %v2424_v33 = vpop.f32.mrb[7].mxu1  ;;  %v2313_v34 = vadd.f32 %v2312_v32, %v2311_v27  ;;  %v1060_v37 = vadd.f32 %v2310_v30, %v2901_v55  ;;  %vm1674_vm1 = vcmp.eq.f32.partialorder %v2979_v20, 0.0  ;;  %v1675_v62 = vand.u32 2147483648, %v2979_v20 }
 0x108   : > { %v2425_v35 = vadd.f32 %v2424_v33, %v2423_v28  ;;  %2617 = vrsqrt.f32 %v2984_v29  ;;  %v1932_v36 = vadd.f32 %v2984_v29, %v2979_v20  ;;  %v1445_v38 = vadd.f32 %v2422_v31, %v2940_v58 }
 0x109   : > { %v1061_v39 = vadd.f32 %v2313_v34, %v2901_v55  ;;  %1092 = vst [vmem:[%s2896_s20 + $0x10] sm:$0xff] %v1060_v37  ;;  %v1576_v41 = vmul.f32 %v1060_v37, %v1060_v37  ;;  %vm1679_vm2 = vcmp.eq.f32.partialorder %v2984_v29, inf  ;;  %vm1681_vm3 = vcmp.eq.f32.partialorder %v2984_v29, 0.0 }
 0x10a   : > { %v1446_v40 = vadd.f32 %v2425_v35, %v2940_v58  ;;  %1477 = vst [vmem:[%s2935_s30 + $0x10] sm:$0xff] %v1445_v38  ;;  %v1608_v42 = vmul.f32 %v1445_v38, %v1445_v38  ;;  %v1682_v11 = vand.u32 2147483648, %v2984_v29 }
 0x10b   : > { %1093 = vst [vmem:[%s2896_s20 + $0x18] sm:$0xff] %v1061_v39  ;;  %v1577_v43 = vmul.f32 %v1061_v39, %v1061_v39  ;;  %v2314_v44 = vpop.f32.mrb[8].mxu0 }
 0x10c   : > { %v2426_v45 = vpop.f32.mrb[8].mxu1  ;;  %1478 = vst [vmem:[%s2935_s30 + $0x18] sm:$0xff] %v1446_v40  ;;  %v1609_v46 = vmul.f32 %v1446_v40, %v1446_v40  ;;  %v2315_v47 = vpop.f32.mrb[9].mxu0  ;;  %v2997_v49 = vadd.f32 %v1608_v42, %v1576_v41 }
 0x10d   : > { %v2427_v48 = vpop.f32.mrb[9].mxu1  ;;  %v2316_v50 = vadd.f32 %v2315_v47, %v2314_v44  ;;  %v2317_v52 = vpop.f32.mrb[10].mxu0 }
 0x10e   : > { %v2428_v51 = vadd.f32 %v2427_v48, %v2426_v45  ;;  %v2429_v53 = vpop.f32.mrb[10].mxu1  ;;  %v2999_v54 = vadd.f32 %v1609_v46, %v1577_v43  ;;  %v2318_v56 = vpop.f32.mrb[11].mxu0  ;;  %2619 = vrsqrt.f32 %v2997_v49  ;;  %v1933_v61 = vadd.f32 %v1932_v36, %v2997_v49 }
 0x10f   : > { %v2430_v57 = vpop.f32.mrb[11].mxu1  ;;  %v1062_v63 = vadd.f32 %v2316_v50, %v2901_v55  ;;  %v2319_v3 = vadd.f32 %v2318_v56, %v2317_v52  ;;  %vm1686_vm4 = vcmp.eq.f32.partialorder %v2997_v49, inf  ;;  %vm1688_vm5 = vcmp.eq.f32.partialorder %v2997_v49, 0.0 }
 0x110   : > { %v2616_v59 = vpop.eup %2615  ;;  %2621 = vrsqrt.f32 %v2999_v54  ;;  %v1447_v0 = vadd.f32 %v2428_v51, %v2940_v58  ;;  %v1934_v2 = vadd.f32 %v1933_v61, %v2999_v54  ;;  %v2431_v4 = vadd.f32 %v2430_v57, %v2429_v53 }
 0x111   : > { %v1671_v60 = vmul.f32 %v2616_v59, %v2979_v20  ;;  %1094 = vst [vmem:[%s2896_s20 + $0x20] sm:$0xff] %v1062_v63  ;;  %v1578_v7 = vmul.f32 %v1062_v63, %v1062_v63  ;;  %v1063_v12 = vadd.f32 %v2319_v3, %v2901_v55  ;;  %v1689_v33 = vand.u32 2147483648, %v2997_v49 }
 0x112   : > { %v2618_v1 = vpop.eup %2617  ;;  %1479 = vst [vmem:[%s2935_s30 + $0x20] sm:$0xff] %v1447_v0  ;;  %v1610_v8 = vmul.f32 %v1447_v0, %v1447_v0  ;;  %v1448_v13 = vadd.f32 %v2431_v4, %v2940_v58  ;;  %vm1693_vm6 = vcmp.eq.f32.partialorder %v2999_v54, inf  ;;  %vm1695_vm7 = vcmp.eq.f32.partialorder %v2999_v54, 0.0 }
 0x113   : > { %v1673_v5 = vsel %vm1672_vm0, %v2979_v20, %v1671_v60  ;;  %v1678_v6 = vmul.f32 %v2618_v1, %v2984_v29  ;;  %v2320_v9 = vpop.f32.mrb[12].mxu0  ;;  %1095 = vst [vmem:[%s2896_s20 + $0x28] sm:$0xff] %v1063_v12  ;;  %v1579_v25 = vmul.f32 %v1063_v12, %v1063_v12  ;;  %v1696_v40 = vand.u32 2147483648, %v2999_v54 }
 0x114   : > { %v2432_v10 = vpop.f32.mrb[12].mxu1  ;;  %v2321_v14 = vpop.f32.mrb[13].mxu0  ;;  %v3023_v17 = vadd.f32 %v1610_v8, %v1578_v7  ;;  %v1676_v23 = vsel %vm1674_vm1, %v1675_v62, %v1673_v5  ;;  %1480 = vst [vmem:[%s2935_s30 + $0x28] sm:$0xff] %v1448_v13  ;;  %v1611_v26 = vmul.f32 %v1448_v13, %v1448_v13 }
 0x115   : > { %v2433_v15 = vpop.f32.mrb[13].mxu1  ;;  %v1680_v16 = vsel %vm1679_vm2, %v2984_v29, %v1678_v6  ;;  %v2322_v18 = vadd.f32 %v2321_v14, %v2320_v9  ;;  %v2323_v21 = vpop.f32.mrb[14].mxu0 }
 0x116   : > { %v2434_v19 = vadd.f32 %v2433_v15, %v2432_v10  ;;  %v2435_v22 = vpop.f32.mrb[14].mxu1  ;;  %v1683_v24 = vsel %vm1681_vm3, %v1682_v11, %v1680_v16  ;;  %v2324_v27 = vpop.f32.mrb[15].mxu0  ;;  %2623 = vrsqrt.f32 %v3023_v17  ;;  %v1935_v29 = vadd.f32 %v1934_v2, %v3023_v17 }
 0x117   : > { %v2436_v28 = vpop.f32.mrb[15].mxu1  ;;  %v1894_v30 = vadd.f32 %v1683_v24, %v1676_v23  ;;  %v3033_v31 = vadd.f32 %v1611_v26, %v1579_v25  ;;  %v1064_v20 = vadd.f32 %v2322_v18, %v2901_v55  ;;  %v2325_v35 = vadd.f32 %v2324_v27, %v2323_v21 }
 0x118   : > { %v2620_v32 = vpop.eup %2619  ;;  %v1449_v34 = vadd.f32 %v2434_v19, %v2940_v58  ;;  %v2437_v36 = vadd.f32 %v2436_v28, %v2435_v22  ;;  %vm1700_vm8 = vcmp.eq.f32.partialorder %v3023_v17, inf  ;;  %vm1702_vm9 = vcmp.eq.f32.partialorder %v3023_v17, 0.0 }
 0x119   : > { %v1685_v38 = vmul.f32 %v2620_v32, %v2997_v49  ;;  %2625 = vrsqrt.f32 %v3033_v31  ;;  %1096 = vst [vmem:[%s2896_s20 + $0x30] sm:$0xff] %v1064_v20  ;;  %v1936_v41 = vadd.f32 %v1935_v29, %v3033_v31  ;;  %v1580_v42 = vmul.f32 %v1064_v20, %v1064_v20 }
 0x11a   : > { %v2622_v37 = vpop.eup %2621  ;;  %1481 = vst [vmem:[%s2935_s30 + $0x30] sm:$0xff] %v1449_v34  ;;  %v1612_v46 = vmul.f32 %v1449_v34, %v1449_v34  ;;  %v1065_v47 = vadd.f32 %v2325_v35, %v2901_v55  ;;  %v1450_v48 = vadd.f32 %v2437_v36, %v2940_v58  ;;  %v1703_v14 = vand.u32 2147483648, %v3023_v17 }
 0x11b   : > { %v1692_v39 = vmul.f32 %v2622_v37, %v2999_v54  ;;  %v2326_v43 = vpop.f32.mrb[16].mxu0  ;;  %v1687_v45 = vsel %vm1686_vm4, %v2997_v49, %v1685_v38  ;;  %vm1707_vm10 = vcmp.eq.f32.partialorder %v3033_v31, inf  ;;  %vm1709_vm11 = vcmp.eq.f32.partialorder %v3033_v31, 0.0 }
 0x11c   : > { %v2438_v44 = vpop.f32.mrb[16].mxu1  ;;  %v2327_v50 = vpop.f32.mrb[17].mxu0  ;;  %v1690_v52 = vsel %vm1688_vm5, %v1689_v33, %v1687_v45  ;;  %v3059_v63 = vadd.f32 %v1612_v46, %v1580_v42  ;;  %1097 = vst [vmem:[%s2896_s20 + $0x38] sm:$0xff] %v1065_v47  ;;  %v1581_v0 = vmul.f32 %v1065_v47, %v1065_v47  ;;  %1482 = vst [vmem:[%s2935_s30 + $0x38] sm:$0xff] %v1450_v48 }
 0x11d   : > { %v2439_v51 = vpop.f32.mrb[17].mxu1  ;;  %v1694_v53 = vsel %vm1693_vm6, %v2999_v54, %v1692_v39  ;;  %v2328_v56 = vadd.f32 %v2327_v50, %v2326_v43  ;;  %v2329_v59 = vpop.f32.mrb[18].mxu0  ;;  %v1895_v61 = vadd.f32 %v1894_v30, %v1690_v52  ;;  %v1613_v2 = vmul.f32 %v1450_v48, %v1450_v48 }
 0x11e   : > { %v2440_v57 = vadd.f32 %v2439_v51, %v2438_v44  ;;  %v2441_v60 = vpop.f32.mrb[18].mxu1  ;;  %v1697_v62 = vsel %vm1695_vm7, %v1696_v40, %v1694_v53  ;;  %v2330_v49 = vpop.f32.mrb[19].mxu0  ;;  %2627 = vrsqrt.f32 %v3059_v63  ;;  %v1937_v7 = vadd.f32 %v1936_v41, %v3059_v63 }
 0x11f   : > { %v2442_v1 = vpop.f32.mrb[19].mxu1  ;;  %v1066_v3 = vadd.f32 %v2328_v56, %v2901_v55  ;;  %v2331_v5 = vadd.f32 %v2330_v49, %v2329_v59  ;;  %v1896_v54 = vadd.f32 %v1895_v61, %v1697_v62  ;;  %v3068_v8 = vadd.f32 %v1613_v2, %v1581_v0 }
 0x120   : > { %v1451_v4 = vadd.f32 %v2440_v57, %v2940_v58  ;;  %v2624_v6 = vpop.eup %2623  ;;  %v2443_v13 = vadd.f32 %v2442_v1, %v2441_v60  ;;  %vm1714_vm12 = vcmp.eq.f32.partialorder %v3059_v63, inf  ;;  %v2703_v48 = vmov 0.0  }
 0x121   : > { %1098 = vst [vmem:[%s2896_s20 + $0x40] sm:$0xff] %v1066_v3  ;;  %v1582_v9 = vmul.f32 %v1066_v3, %v1066_v3  ;;  %v1699_v10 = vmul.f32 %v2624_v6, %v3023_v17  ;;  %v1067_v12 = vadd.f32 %v2331_v5, %v2901_v55  ;;  %2629 = vrsqrt.f32 %v3068_v8  ;;  %1970 = vst [vmem:[%s3104_s11 + $0x2] sm:$0x3f] %v2703_v48 }
 0x122   : > { %1483 = vst [vmem:[%s2935_s30 + $0x40] sm:$0xff] %v1451_v4  ;;  %v1614_v11 = vmul.f32 %v1451_v4, %v1451_v4  ;;  %v1938_v21 = vadd.f32 %v1937_v7, %v3068_v8  ;;  %v1452_v28 = vadd.f32 %v2443_v13, %v2940_v58  ;;  %vm1716_vm13 = vcmp.eq.f32.partialorder %v3059_v63, 0.0 }
 0x123   : > { %v2332_v15 = vpop.f32.mrb[20].mxu0  ;;  %v2626_v18 = vpop.eup %2625  ;;  %v1701_v19 = vsel %vm1700_vm8, %v3023_v17, %v1699_v10  ;;  %1099 = vst [vmem:[%s2896_s20 + $0x48] sm:$0xff] %v1067_v12  ;;  %v1583_v23 = vmul.f32 %v1067_v12, %v1067_v12  ;;  %v1710_v17 = vand.u32 2147483648, %v3033_v31  ;;  %v1717_v51 = vand.u32 2147483648, %v3059_v63 }
 0x124   : > { %v2444_v16 = vpop.f32.mrb[20].mxu1  ;;  %v3085_v22 = vadd.f32 %v1614_v11, %v1582_v9  ;;  %v2333_v24 = vpop.f32.mrb[21].mxu0  ;;  %v1704_v26 = vsel %vm1702_vm9, %v1703_v14, %v1701_v19  ;;  %v1706_v27 = vmul.f32 %v2626_v18, %v3033_v31  ;;  %1484 = vst [vmem:[%s2935_s30 + $0x48] sm:$0xff] %v1452_v28  ;;  %v1615_v37 = vmul.f32 %v1452_v28, %v1452_v28 }
 0x125   : > { %v2445_v25 = vpop.f32.mrb[21].mxu1  ;;  %v2334_v30 = vadd.f32 %v2333_v24, %v2332_v15  ;;  %v2335_v29 = vpop.f32.mrb[22].mxu0  ;;  %v1897_v32 = vadd.f32 %v1896_v54, %v1704_v26  ;;  %vm1721_vm14 = vcmp.eq.f32.partialorder %v3068_v8, inf  ;;  %v1724_v56 = vand.u32 2147483648, %v3068_v8 }
 0x126   : > { %v2447_v20 = vpop.f32.mrb[22].mxu1  ;;  %2631 = vrsqrt.f32 %v3085_v22  ;;  %v2336_v33 = vpop.f32.mrb[23].mxu0  ;;  %v1708_v35 = vsel %vm1707_vm10, %v3033_v31, %v1706_v27  ;;  %v1939_v36 = vadd.f32 %v1938_v21, %v3085_v22  ;;  %v2446_v40 = vadd.f32 %v2445_v25, %v2444_v16 }
 0x127   : > { %v2448_v34 = vpop.f32.mrb[23].mxu1  ;;  %v1711_v38 = vsel %vm1709_vm11, %v1710_v17, %v1708_v35  ;;  %v1068_v39 = vadd.f32 %v2334_v30, %v2901_v55  ;;  %v2337_v41 = vadd.f32 %v2336_v33, %v2335_v29  ;;  %v3099_v43 = vadd.f32 %v1615_v37, %v1583_v23 }
 0x128   : > { %v1898_v42 = vadd.f32 %v1897_v32, %v1711_v38  ;;  %v2449_v44 = vadd.f32 %v2448_v34, %v2447_v20  ;;  %v2628_v31 = vpop.eup %2627  ;;  %v1453_v46 = vadd.f32 %v2446_v40, %v2940_v58  ;;  %vm1723_vm15 = vcmp.eq.f32.partialorder %v3068_v8, 0.0 }
 0x129   : > { %1100 = vst [vmem:[%s2896_s20 + $0x50] sm:$0xff] %v1068_v39  ;;  %v1584_v45 = vmul.f32 %v1068_v39, %v1068_v39  ;;  %v1069_v47 = vadd.f32 %v2337_v41, %v2901_v55  ;;  %v1713_v50 = vmul.f32 %v2628_v31, %v3059_v63  ;;  %2633 = vrsqrt.f32 %v3099_v43 }
 0x12a   : > { %v1940_v57 = vadd.f32 %v1939_v36, %v3099_v43  ;;  %1485 = vst [vmem:[%s2935_s30 + $0x50] sm:$0xff] %v1453_v46  ;;  %v1616_v59 = vmul.f32 %v1453_v46, %v1453_v46  ;;  %v1454_v49 = vadd.f32 %v2449_v44, %v2940_v58  ;;  %vm1728_vm0 = vcmp.eq.f32.partialorder %v3085_v22, inf }
 0x12b   : > { %v2338_v52 = vpop.f32.mrb[24].mxu0  ;;  %1101 = vst [vmem:[%s2896_s20 + $0x58] sm:$0xff] %v1069_v47  ;;  %v2630_v62 = vpop.eup %2629  ;;  %v1715_v0 = vsel %vm1714_vm12, %v3059_v63, %v1713_v50  ;;  %v1585_v7 = vmul.f32 %v1069_v47, %v1069_v47  ;;  %v1731_v19 = vand.u32 2147483648, %v3085_v22  ;;  %vm1730_vm1 = vcmp.eq.f32.partialorder %v3085_v22, 0.0 }
 0x12c   : > { %v2450_v53 = vpop.f32.mrb[24].mxu1  ;;  %v2339_v60 = vpop.f32.mrb[25].mxu0  ;;  %v1718_v5 = vsel %vm1716_vm13, %v1717_v51, %v1715_v0  ;;  %v1720_v54 = vmul.f32 %v2630_v62, %v3068_v8  ;;  %v3127_v6 = vadd.f32 %v1616_v59, %v1584_v45  ;;  %1486 = vst [vmem:[%s2935_s30 + $0x58] sm:$0xff] %v1454_v49  ;;  %v1617_v12 = vmul.f32 %v1454_v49, %v1454_v49 }
 0x12d   : > { %v2451_v61 = vpop.f32.mrb[25].mxu1  ;;  %v2340_v1 = vadd.f32 %v2339_v60, %v2338_v52  ;;  %v2341_v3 = vpop.f32.mrb[26].mxu0  ;;  %v1899_v11 = vadd.f32 %v1898_v42, %v1718_v5  ;;  %vm1735_vm2 = vcmp.eq.f32.partialorder %v3099_v43, inf  ;;  %vm1737_vm3 = vcmp.eq.f32.partialorder %v3099_v43, 0.0 }
 0x12e   : > { %v2452_v2 = vadd.f32 %v2451_v61, %v2450_v53  ;;  %v2453_v4 = vpop.f32.mrb[26].mxu1  ;;  %v2342_v9 = vpop.f32.mrb[27].mxu0  ;;  %v1722_v63 = vsel %vm1721_vm14, %v3068_v8, %v1720_v54  ;;  %2635 = vrsqrt.f32 %v3127_v6  ;;  %v1941_v21 = vadd.f32 %v1940_v57, %v3127_v6 }
 0x12f   : > { %v2454_v10 = vpop.f32.mrb[27].mxu1  ;;  %v1070_v13 = vadd.f32 %v2340_v1, %v2901_v55  ;;  %v1725_v16 = vsel %vm1723_vm15, %v1724_v56, %v1722_v63  ;;  %v3143_v24 = vadd.f32 %v1617_v12, %v1585_v7  ;;  %v2343_v27 = vadd.f32 %v2342_v9, %v2341_v3 }
 0x130   : > { %v1455_v14 = vadd.f32 %v2452_v2, %v2940_v58  ;;  %v2632_v15 = vpop.eup %2631  ;;  %v1900_v23 = vadd.f32 %v1899_v11, %v1725_v16  ;;  %v2455_v28 = vadd.f32 %v2454_v10, %v2453_v4  ;;  %v1738_v31 = vand.u32 2147483648, %v3099_v43 }
 0x131   : > { %v1727_v18 = vmul.f32 %v2632_v15, %v3085_v22  ;;  %1102 = vst [vmem:[%s2896_s20 + $0x60] sm:$0xff] %v1070_v13  ;;  %v1586_v25 = vmul.f32 %v1070_v13, %v1070_v13  ;;  %2637 = vrsqrt.f32 %v3143_v24  ;;  %v1942_v35 = vadd.f32 %v1941_v21, %v3143_v24 }
 0x132   : > { %1487 = vst [vmem:[%s2935_s30 + $0x60] sm:$0xff] %v1455_v14  ;;  %v1618_v26 = vmul.f32 %v1455_v14, %v1455_v14  ;;  %v1071_v39 = vadd.f32 %v2343_v27, %v2901_v55  ;;  %v1456_v40 = vadd.f32 %v2455_v28, %v2940_v58  ;;  %vm1742_vm4 = vcmp.eq.f32.partialorder %v3127_v6, inf }
 0x133   : > { %v1729_v8 = vsel %vm1728_vm0, %v3085_v22, %v1727_v18  ;;  %v2344_v30 = vpop.f32.mrb[28].mxu0  ;;  %v2634_v33 = vpop.eup %2633  ;;  %vm1744_vm5 = vcmp.eq.f32.partialorder %v3127_v6, 0.0  ;;  %v1745_v2 = vand.u32 2147483648, %v3127_v6  ;;  %vm1749_vm6 = vcmp.eq.f32.partialorder %v3143_v24, inf }
 0x134   : > { %v2456_v29 = vpop.f32.mrb[28].mxu1  ;;  %v1732_v20 = vsel %vm1730_vm1, %v1731_v19, %v1729_v8  ;;  %v2345_v32 = vpop.f32.mrb[29].mxu0  ;;  %v3150_v36 = vadd.f32 %v1618_v26, %v1586_v25  ;;  %v1734_v38 = vmul.f32 %v2634_v33, %v3099_v43  ;;  %1103 = vst [vmem:[%s2896_s20 + $0x68] sm:$0xff] %v1071_v39  ;;  %v1587_v47 = vmul.f32 %v1071_v39, %v1071_v39 }
 0x135   : > { %v2457_v17 = vpop.f32.mrb[29].mxu1  ;;  %v1901_v34 = vadd.f32 %v1900_v23, %v1732_v20  ;;  %v2347_v37 = vpop.f32.mrb[30].mxu0  ;;  %v2346_v41 = vadd.f32 %v2345_v32, %v2344_v30  ;;  %1488 = vst [vmem:[%s2935_s30 + $0x68] sm:$0xff] %v1456_v40  ;;  %v1619_v48 = vmul.f32 %v1456_v40, %v1456_v40  ;;  %v1752_v3 = vand.u32 2147483648, %v3143_v24 }
 0x136   : > { %v2459_v22 = vpop.f32.mrb[30].mxu1  ;;  %v2348_v42 = vpop.f32.mrb[31].mxu0  ;;  %2639 = vrsqrt.f32 %v3150_v36  ;;  %v1736_v45 = vsel %vm1735_vm2, %v3099_v43, %v1734_v38  ;;  %v1943_v46 = vadd.f32 %v1942_v35, %v3150_v36  ;;  %v2458_v52 = vadd.f32 %v2457_v17, %v2456_v29 }
 0x137   : > { %v2460_v44 = vpop.f32.mrb[31].mxu1  ;;  %v1739_v50 = vsel %vm1737_vm3, %v1738_v31, %v1736_v45  ;;  %v1072_v51 = vadd.f32 %v2346_v41, %v2901_v55  ;;  %v2349_v53 = vadd.f32 %v2348_v42, %v2347_v37  ;;  %v3165_v59 = vadd.f32 %v1619_v48, %v1587_v47 }
 0x138   : > { %v2636_v56 = vpop.eup %2635  ;;  %v1902_v57 = vadd.f32 %v1901_v34, %v1739_v50  ;;  %v2461_v60 = vadd.f32 %v2460_v44, %v2459_v22  ;;  %v1457_v62 = vadd.f32 %v2458_v52, %v2940_v58  ;;  %vm1751_vm7 = vcmp.eq.f32.partialorder %v3143_v24, 0.0 }
 0x139   : > { %v1741_v43 = vmul.f32 %v2636_v56, %v3127_v6  ;;  %1104 = vst [vmem:[%s2896_s20 + $0x70] sm:$0xff] %v1072_v51  ;;  %v1588_v61 = vmul.f32 %v1072_v51, %v1072_v51  ;;  %v1073_v0 = vadd.f32 %v2349_v53, %v2901_v55  ;;  %2641 = vrsqrt.f32 %v3165_v59 }
 0x13a   : > { %v1944_v7 = vadd.f32 %v1943_v46, %v3165_v59  ;;  %1489 = vst [vmem:[%s2935_s30 + $0x70] sm:$0xff] %v1457_v62  ;;  %v1620_v9 = vmul.f32 %v1457_v62, %v1457_v62  ;;  %v1458_v15 = vadd.f32 %v2461_v60, %v2940_v58  ;;  %vm1756_vm8 = vcmp.eq.f32.partialorder %v3150_v36, inf }
 0x13b   : > { %v2350_v49 = vpop.f32.mrb[32].mxu0  ;;  %v1743_v54 = vsel %vm1742_vm4, %v3127_v6, %v1741_v43  ;;  %1105 = vst [vmem:[%s2896_s20 + $0x78] sm:$0xff] %v1073_v0  ;;  %v1589_v10 = vmul.f32 %v1073_v0, %v1073_v0  ;;  %v2638_v13 = vpop.eup %2637  ;;  %v1759_v17 = vand.u32 2147483648, %v3150_v36  ;;  %vm1758_vm9 = vcmp.eq.f32.partialorder %v3150_v36, 0.0 }
 0x13c   : > { %v2462_v1 = vpop.f32.mrb[32].mxu1  ;;  %v2351_v4 = vpop.f32.mrb[33].mxu0  ;;  %v1746_v14 = vsel %vm1744_vm5, %v1745_v2, %v1743_v54  ;;  %v1748_v23 = vmul.f32 %v2638_v13, %v3143_v24  ;;  %v3185_v25 = vadd.f32 %v1620_v9, %v1588_v61  ;;  %1490 = vst [vmem:[%s2935_s30 + $0x78] sm:$0xff] %v1458_v15  ;;  %v1621_v8 = vmul.f32 %v1458_v15, %v1458_v15 }
 0x13d   : > { %v2463_v5 = vpop.f32.mrb[33].mxu1  ;;  %v2353_v11 = vpop.f32.mrb[34].mxu0  ;;  %v2352_v63 = vadd.f32 %v2351_v4, %v2350_v49  ;;  %v1903_v21 = vadd.f32 %v1902_v57, %v1746_v14  ;;  %vm1763_vm10 = vcmp.eq.f32.partialorder %v3165_v59, inf  ;;  %vm1765_vm11 = vcmp.eq.f32.partialorder %v3165_v59, 0.0 }
 0x13e   : > { %v2465_v12 = vpop.f32.mrb[34].mxu1  ;;  %v2464_v16 = vadd.f32 %v2463_v5, %v2462_v1  ;;  %v2354_v18 = vpop.f32.mrb[35].mxu0  ;;  %v1750_v29 = vsel %vm1749_vm6, %v3143_v24, %v1748_v23  ;;  %2643 = vrsqrt.f32 %v3185_v25  ;;  %v1945_v33 = vadd.f32 %v1944_v7, %v3185_v25 }
 0x13f   : > { %v2466_v19 = vpop.f32.mrb[35].mxu1  ;;  %v2355_v26 = vadd.f32 %v2354_v18, %v2353_v11  ;;  %v1074_v27 = vadd.f32 %v2352_v63, %v2901_v55  ;;  %v1753_v20 = vsel %vm1751_vm7, %v1752_v3, %v1750_v29  ;;  %v3201_v35 = vadd.f32 %v1621_v8, %v1589_v10  ;;  %v596_v3 = vld [vmem:[%s2896_s20 + $0x98] sm:$0xff]  ;;  %v597_v18 = vld [vmem:[%s2896_s20 + $0xa0] sm:$0xff] }
 0x140   : > { %v1459_v6 = vadd.f32 %v2464_v16, %v2940_v58  ;;  %v2467_v28 = vadd.f32 %v2466_v19, %v2465_v12  ;;  %v2640_v30 = vpop.eup %2639  ;;  %v1904_v34 = vadd.f32 %v1903_v21, %v1753_v20  ;;  %v1766_v43 = vand.u32 2147483648, %v3165_v59  ;;  %v1142_v21 = vld [vmem:[%s2935_s30 + $0xa0] sm:$0xff] }
 0x141   : > { %v1755_v32 = vmul.f32 %v2640_v30, %v3150_v36  ;;  %1106 = vst [vmem:[%s2896_s20 + $0x80] sm:$0xff] %v1074_v27  ;;  %v1590_v37 = vmul.f32 %v1074_v27, %v1074_v27  ;;  %v1075_v40 = vadd.f32 %v2355_v26, %v2901_v55  ;;  %2645 = vrsqrt.f32 %v3201_v35 }
 0x142   : > { %1491 = vst [vmem:[%s2935_s30 + $0x80] sm:$0xff] %v1459_v6  ;;  %v1622_v22 = vmul.f32 %v1459_v6, %v1459_v6  ;;  %v1460_v41 = vadd.f32 %v2467_v28, %v2940_v58  ;;  %v1946_v50 = vadd.f32 %v1945_v33, %v3201_v35  ;;  %vm1770_vm12 = vcmp.eq.f32.partialorder %v3185_v25, inf }
 0x143   : > { %v2356_v38 = vpop.f32.mrb[36].mxu0  ;;  %v1757_v39 = vsel %vm1756_vm8, %v3150_v36, %v1755_v32  ;;  %v2642_v47 = vpop.eup %2641  ;;  %1107 = vst [vmem:[%s2896_s20 + $0x88] sm:$0xff] %v1075_v40  ;;  %v1591_v56 = vmul.f32 %v1075_v40, %v1075_v40  ;;  %vm1772_vm13 = vcmp.eq.f32.partialorder %v3185_v25, 0.0  ;;  %v1773_v10 = vand.u32 2147483648, %v3185_v25 }
 0x144   : > { %v2468_v24 = vpop.f32.mrb[36].mxu1  ;;  %v2357_v42 = vpop.f32.mrb[37].mxu0  ;;  %v1760_v31 = vsel %vm1758_vm9, %v1759_v17, %v1757_v39  ;;  %v3209_v51 = vadd.f32 %v1622_v22, %v1590_v37  ;;  %1492 = vst [vmem:[%s2935_s30 + $0x88] sm:$0xff] %v1460_v41  ;;  %v1762_v53 = vmul.f32 %v2642_v47, %v3165_v59  ;;  %v1623_v57 = vmul.f32 %v1460_v41, %v1460_v41 }
 0x145   : > { %v2469_v44 = vpop.f32.mrb[37].mxu1  ;;  %v2359_v45 = vpop.f32.mrb[38].mxu0  ;;  %v1905_v48 = vadd.f32 %v1904_v34, %v1760_v31  ;;  %v2358_v60 = vadd.f32 %v2357_v42, %v2356_v38  ;;  %vm1777_vm14 = vcmp.eq.f32.partialorder %v3201_v35, inf  ;;  %v1780_v27 = vand.u32 2147483648, %v3201_v35 }
 0x146   : > { %v2471_v46 = vpop.f32.mrb[38].mxu1  ;;  %v2360_v36 = vpop.f32.mrb[39].mxu0  ;;  %2647 = vrsqrt.f32 %v3209_v51  ;;  %v1764_v61 = vsel %vm1763_vm10, %v3165_v59, %v1762_v53  ;;  %v1947_v62 = vadd.f32 %v1946_v50, %v3209_v51  ;;  %v3220_v0 = vadd.f32 %v1623_v57, %v1591_v56 }
 0x147   : > { %v2472_v52 = vpop.f32.mrb[39].mxu1  ;;  %v1076_v49 = vadd.f32 %v2358_v60, %v2901_v55  ;;  %v1767_v1 = vsel %vm1765_vm11, %v1766_v43, %v1764_v61  ;;  %v2470_v2 = vadd.f32 %v2469_v44, %v2468_v24  ;;  %v2361_v4 = vadd.f32 %v2360_v36, %v2359_v45  ;;  %v598_v36 = vld [vmem:[%s2896_s20 + $0xa8] sm:$0xff] }
 0x148   : > { %v2473_v5 = vadd.f32 %v2472_v52, %v2471_v46  ;;  %v2644_v54 = vpop.eup %2643  ;;  %v1906_v7 = vadd.f32 %v1905_v48, %v1767_v1  ;;  %2649 = vrsqrt.f32 %v3220_v0  ;;  %v1948_v11 = vadd.f32 %v1947_v62, %v3220_v0  ;;  %v1143_v52 = vld [vmem:[%s2935_s30 + $0xa8] sm:$0xff] }
 0x149   : > { %1108 = vst [vmem:[%s2896_s20 + $0x90] sm:$0xff] %v1076_v49  ;;  %v1769_v55 = vmul.f32 %v2644_v54, %v3185_v25  ;;  %v1592_v12 = vmul.f32 %v1076_v49, %v1076_v49  ;;  %v1461_v15 = vadd.f32 %v2470_v2, %v2940_v58  ;;  %v1077_v63 = vadd.f32 %v2361_v4, %v596_v3 }
 0x14a   : > { %v1462_v16 = vadd.f32 %v2473_v5, %v2940_v58  ;;  %vm1779_vm15 = vcmp.eq.f32.partialorder %v3201_v35, 0.0  ;;  %vm1784_vm0 = vcmp.eq.f32.partialorder %v3209_v51, inf  ;;  %vm1786_vm1 = vcmp.eq.f32.partialorder %v3209_v51, 0.0 }
 0x14b   : > { %v2362_v59 = vpop.f32.mrb[40].mxu0  ;;  %v1771_v8 = vsel %vm1770_vm12, %v3185_v25, %v1769_v55  ;;  %v2646_v29 = vpop.eup %2645  ;;  %1493 = vst [vmem:[%s2935_s30 + $0x90] sm:$0xff] %v1461_v15  ;;  %v1624_v20 = vmul.f32 %v1461_v15, %v1461_v15  ;;  %1109 = vst [vmem:[%s2896_s20 + $0x98] sm:$0xff] %v1077_v63  ;;  %v1593_v32 = vmul.f32 %v1077_v63, %v1077_v63  ;;  %v1787_v50 = vand.u32 2147483648, %v3209_v51 }
 0x14c   : > { %v2474_v9 = vpop.f32.mrb[40].mxu1  ;;  %v2363_v13 = vpop.f32.mrb[41].mxu0  ;;  %v1774_v58 = vsel %vm1772_vm13, %v1773_v10, %v1771_v8  ;;  %1494 = vst [vmem:[%s2935_s30 + $0x98] sm:$0xff] %v1462_v16  ;;  %v1625_v17 = vmul.f32 %v1462_v16, %v1462_v16  ;;  %v1776_v34 = vmul.f32 %v2646_v29, %v3201_v35  ;;  %vm1791_vm2 = vcmp.eq.f32.partialorder %v3220_v0, inf  ;;  %v1144_v10 = vld [vmem:[%s2935_s30 + $0xb0] sm:$0xff] }
 0x14d   : > { %v2475_v14 = vpop.f32.mrb[41].mxu1  ;;  %v2364_v19 = vadd.f32 %v2363_v13, %v2362_v59  ;;  %v2365_v23 = vpop.f32.mrb[42].mxu0  ;;  %v1907_v33 = vadd.f32 %v1906_v7, %v1774_v58  ;;  %v3246_v38 = vadd.f32 %v1624_v20, %v1592_v12  ;;  %vm1793_vm3 = vcmp.eq.f32.partialorder %v3220_v0, 0.0  ;;  %v600_v12 = vld [vmem:[%s2896_s20 + $0xb8] sm:$0xff] }
 0x14e   : > { %v2477_v26 = vpop.f32.mrb[42].mxu1  ;;  %v2476_v6 = vadd.f32 %v2475_v14, %v2474_v9  ;;  %v2366_v28 = vpop.f32.mrb[43].mxu0  ;;  %v3248_v24 = vadd.f32 %v1625_v17, %v1593_v32  ;;  %v1778_v41 = vsel %vm1777_vm14, %v3201_v35, %v1776_v34  ;;  %v1794_v1 = vand.u32 2147483648, %v3220_v0  ;;  %v599_v9 = vld [vmem:[%s2896_s20 + $0xb0] sm:$0xff] }
 0x14f   : > { %v2478_v30 = vpop.f32.mrb[43].mxu1  ;;  %v1078_v37 = vadd.f32 %v2364_v19, %v597_v18  ;;  %v2367_v39 = vadd.f32 %v2366_v28, %v2365_v23  ;;  %v1781_v44 = vsel %vm1779_vm15, %v1780_v27, %v1778_v41  ;;  %2651 = vrsqrt.f32 %v3246_v38 }
 0x150   : > { %v1463_v22 = vadd.f32 %v2476_v6, %v1142_v21  ;;  %v2479_v25 = vadd.f32 %v2478_v30, %v2477_v26  ;;  %v2648_v40 = vpop.eup %2647  ;;  %v1908_v48 = vadd.f32 %v1907_v33, %v1781_v44  ;;  %v1949_v35 = vadd.f32 %v1948_v11, %v3246_v38  ;;  %v1145_v26 = vld [vmem:[%s2935_s30 + $0xb8] sm:$0xff] }
 0x151   : > { %1110 = vst [vmem:[%s2896_s20 + $0xa0] sm:$0xff] %v1078_v37  ;;  %v1594_v42 = vmul.f32 %v1078_v37, %v1078_v37  ;;  %v1783_v31 = vmul.f32 %v2648_v40, %v3209_v51  ;;  %2653 = vrsqrt.f32 %v3248_v24  ;;  %v1079_v54 = vadd.f32 %v2367_v39, %v598_v36 }
 0x152   : > { %1495 = vst [vmem:[%s2935_s30 + $0xa0] sm:$0xff] %v1463_v22  ;;  %v1626_v45 = vmul.f32 %v1463_v22, %v1463_v22  ;;  %v2650_v57 = vpop.eup %2649  ;;  %v1950_v2 = vadd.f32 %v1949_v35, %v3248_v24  ;;  %v1464_v7 = vadd.f32 %v2479_v25, %v1143_v52  ;;  %vm1798_vm4 = vcmp.eq.f32.partialorder %v3246_v38, inf  ;;  %v601_v22 = vld [vmem:[%s2896_s20 + $0xc0] sm:$0xff] }
 0x153   : > { %v2368_v46 = vpop.f32.mrb[44].mxu0  ;;  %v1785_v60 = vsel %vm1784_vm0, %v3209_v51, %v1783_v31  ;;  %v1790_v49 = vmul.f32 %v2650_v57, %v3220_v0  ;;  %1111 = vst [vmem:[%s2896_s20 + $0xa8] sm:$0xff] %v1079_v54  ;;  %v1595_v16 = vmul.f32 %v1079_v54, %v1079_v54  ;;  %vm1800_vm5 = vcmp.eq.f32.partialorder %v3246_v38, 0.0  ;;  %v1146_v25 = vld [vmem:[%s2935_s30 + $0xc0] sm:$0xff] }
 0x154   : > { %v2480_v47 = vpop.f32.mrb[44].mxu1  ;;  %v2369_v53 = vpop.f32.mrb[45].mxu0  ;;  %v1788_v62 = vsel %vm1786_vm1, %v1787_v50, %v1785_v60  ;;  %v3273_v5 = vadd.f32 %v1626_v45, %v1594_v42  ;;  %1496 = vst [vmem:[%s2935_s30 + $0xa8] sm:$0xff] %v1464_v7  ;;  %v1627_v18 = vmul.f32 %v1464_v7, %v1464_v7  ;;  %v1801_v29 = vand.u32 2147483648, %v3246_v38  ;;  %v602_v7 = vld [vmem:[%s2896_s20 + $0xc8] sm:$0xff] }
 0x155   : > { %v2481_v56 = vpop.f32.mrb[45].mxu1  ;;  %v2371_v43 = vpop.f32.mrb[46].mxu0  ;;  %v1909_v4 = vadd.f32 %v1908_v48, %v1788_v62  ;;  %v1792_v59 = vsel %vm1791_vm2, %v3220_v0, %v1790_v49  ;;  %v2370_v55 = vadd.f32 %v2369_v53, %v2368_v46  ;;  %vm1805_vm6 = vcmp.eq.f32.partialorder %v3248_v24, inf }
 0x156   : > { %v2483_v61 = vpop.f32.mrb[46].mxu1  ;;  %v2372_v51 = vpop.f32.mrb[47].mxu0  ;;  %v2482_v11 = vadd.f32 %v2481_v56, %v2480_v47  ;;  %v1795_v14 = vsel %vm1793_vm3, %v1794_v1, %v1792_v59  ;;  %2655 = vrsqrt.f32 %v3273_v5  ;;  %v1951_v63 = vadd.f32 %v1950_v2, %v3273_v5 }
 0x157   : > { %v2484_v3 = vpop.f32.mrb[47].mxu1  ;;  %v2373_v13 = vadd.f32 %v2372_v51, %v2371_v43  ;;  %v1910_v15 = vadd.f32 %v1909_v4, %v1795_v14  ;;  %v1080_v19 = vadd.f32 %v2370_v55, %v599_v9  ;;  %v3289_v58 = vadd.f32 %v1627_v18, %v1595_v16  ;;  %v1147_v9 = vld [vmem:[%s2935_s30 + $0xc8] sm:$0xff] }
 0x158   : > { %v1465_v21 = vadd.f32 %v2482_v11, %v1144_v10  ;;  %v2485_v0 = vadd.f32 %v2484_v3, %v2483_v61  ;;  %v1808_v31 = vand.u32 2147483648, %v3248_v24  ;;  %vm1807_vm7 = vcmp.eq.f32.partialorder %v3248_v24, 0.0  ;;  %v603_v10 = vld [vmem:[%s2896_s20 + $0xd0] sm:$0xff] }
 0x159   : > { %v1081_v23 = vadd.f32 %v2373_v13, %v600_v12  ;;  %v2652_v30 = vpop.eup %2651  ;;  %1112 = vst [vmem:[%s2896_s20 + $0xb0] sm:$0xff] %v1080_v19  ;;  %v1596_v20 = vmul.f32 %v1080_v19, %v1080_v19  ;;  %2657 = vrsqrt.f32 %v3289_v58  ;;  %v1952_v48 = vadd.f32 %v1951_v63, %v3289_v58 }
 0x15a   : > { %1497 = vst [vmem:[%s2935_s30 + $0xb0] sm:$0xff] %v1465_v21  ;;  %v1628_v32 = vmul.f32 %v1465_v21, %v1465_v21  ;;  %v1797_v34 = vmul.f32 %v2652_v30, %v3246_v38  ;;  %v1466_v37 = vadd.f32 %v2485_v0, %v1145_v26  ;;  %vm1812_vm8 = vcmp.eq.f32.partialorder %v3273_v5, inf }
 0x15b   : > { %v2374_v8 = vpop.f32.mrb[48].mxu0  ;;  %1113 = vst [vmem:[%s2896_s20 + $0xb8] sm:$0xff] %v1081_v23  ;;  %v2654_v44 = vpop.eup %2653  ;;  %v1597_v45 = vmul.f32 %v1081_v23, %v1081_v23  ;;  %v1815_v61 = vand.u32 2147483648, %v3273_v5  ;;  %vm1814_vm9 = vcmp.eq.f32.partialorder %v3273_v5, 0.0  ;;  %vm1819_vm10 = vcmp.eq.f32.partialorder %v3289_v58, inf }
 0x15c   : > { %v2486_v27 = vpop.f32.mrb[48].mxu1  ;;  %v2375_v6 = vpop.f32.mrb[49].mxu0  ;;  %v1799_v46 = vsel %vm1798_vm4, %v3246_v38, %v1797_v34  ;;  %v1804_v47 = vmul.f32 %v2654_v44, %v3248_v24  ;;  %v3305_v50 = vadd.f32 %v1628_v32, %v1596_v20  ;;  %1498 = vst [vmem:[%s2935_s30 + $0xb8] sm:$0xff] %v1466_v37  ;;  %v1629_v36 = vmul.f32 %v1466_v37, %v1466_v37  ;;  %v604_v20 = vld [vmem:[%s2896_s20 + $0xd8] sm:$0xff] }
 0x15d   : > { %v2487_v28 = vpop.f32.mrb[49].mxu1  ;;  %v2377_v17 = vpop.f32.mrb[50].mxu0  ;;  %v2376_v39 = vadd.f32 %v2375_v6, %v2374_v8  ;;  %v1802_v35 = vsel %vm1800_vm5, %v1801_v29, %v1799_v46  ;;  %vm1821_vm11 = vcmp.eq.f32.partialorder %v3289_v58, 0.0  ;;  %v1148_v29 = vld [vmem:[%s2935_s30 + $0xd0] sm:$0xff] }
 0x15e   : > { %v2489_v33 = vpop.f32.mrb[50].mxu1  ;;  %v2488_v40 = vadd.f32 %v2487_v28, %v2486_v27  ;;  %v2378_v41 = vpop.f32.mrb[51].mxu0  ;;  %v1911_v56 = vadd.f32 %v1910_v15, %v1802_v35  ;;  %v1806_v57 = vsel %vm1805_vm6, %v3248_v24, %v1804_v47  ;;  %2659 = vrsqrt.f32 %v3305_v50 }
 0x15f   : > { %v2490_v42 = vpop.f32.mrb[51].mxu1  ;;  %v1082_v52 = vadd.f32 %v2376_v39, %v601_v22  ;;  %v1809_v43 = vsel %vm1807_vm7, %v1808_v31, %v1806_v57  ;;  %v1953_v38 = vadd.f32 %v1952_v48, %v3305_v50  ;;  %v3319_v2 = vadd.f32 %v1629_v36, %v1597_v45  ;;  %v1149_v48 = vld [vmem:[%s2935_s30 + $0xd8] sm:$0xff] }
 0x160   : > { %v1467_v53 = vadd.f32 %v2488_v40, %v1146_v25  ;;  %v2656_v60 = vpop.eup %2655  ;;  %v1912_v1 = vadd.f32 %v1911_v56, %v1809_v43  ;;  %v2379_v59 = vadd.f32 %v2378_v41, %v2377_v17  ;;  %v2491_v55 = vadd.f32 %v2490_v42, %v2489_v33 }
 0x161   : > { %1114 = vst [vmem:[%s2896_s20 + $0xc0] sm:$0xff] %v1082_v52  ;;  %v1811_v24 = vmul.f32 %v2656_v60, %v3273_v5  ;;  %v1598_v51 = vmul.f32 %v1082_v52, %v1082_v52  ;;  %2661 = vrsqrt.f32 %v3319_v2  ;;  %v1954_v18 = vadd.f32 %v1953_v38, %v3319_v2 }
 0x162   : > { %1499 = vst [vmem:[%s2935_s30 + $0xc0] sm:$0xff] %v1467_v53  ;;  %v1630_v54 = vmul.f32 %v1467_v53, %v1467_v53  ;;  %v1083_v23 = vadd.f32 %v2379_v59, %v602_v7  ;;  %v1468_v26 = vadd.f32 %v2491_v55, %v1147_v9  ;;  %v1822_v27 = vand.u32 2147483648, %v3289_v58  ;;  %v1150_v9 = vld [vmem:[%s2935_s30 + $0xe0] sm:$0xff] }
 0x163   : > { %v2380_v62 = vpop.f32.mrb[52].mxu0  ;;  %v1813_v14 = vsel %vm1812_vm8, %v3273_v5, %v1811_v24  ;;  %v2658_v8 = vpop.eup %2657  ;;  %vm1826_vm12 = vcmp.eq.f32.partialorder %v3305_v50, inf  ;;  %vm1828_vm13 = vcmp.eq.f32.partialorder %v3305_v50, 0.0  ;;  %v1829_v25 = vand.u32 2147483648, %v3305_v50 }
 0x164   : > { %v2492_v49 = vpop.f32.mrb[52].mxu1  ;;  %v2381_v3 = vpop.f32.mrb[53].mxu0  ;;  %v1816_v16 = vsel %vm1814_vm9, %v1815_v61, %v1813_v14  ;;  %v3331_v19 = vadd.f32 %v1630_v54, %v1598_v51  ;;  %v1818_v0 = vmul.f32 %v2658_v8, %v3289_v58  ;;  %1115 = vst [vmem:[%s2896_s20 + $0xc8] sm:$0xff] %v1083_v23  ;;  %v1599_v28 = vmul.f32 %v1083_v23, %v1083_v23  ;;  %v605_v61 = vld [vmem:[%s2896_s20 + $0xe0] sm:$0xff] }
 0x165   : > { %v2493_v4 = vpop.f32.mrb[53].mxu1  ;;  %v2382_v11 = vadd.f32 %v2381_v3, %v2380_v62  ;;  %v2383_v12 = vpop.f32.mrb[54].mxu0  ;;  %v1913_v21 = vadd.f32 %v1912_v1, %v1816_v16  ;;  %1500 = vst [vmem:[%s2935_s30 + $0xc8] sm:$0xff] %v1468_v26  ;;  %v1631_v30 = vmul.f32 %v1468_v26, %v1468_v26  ;;  %vm1833_vm14 = vcmp.eq.f32.partialorder %v3319_v2, inf }
 0x166   : > { %v2495_v13 = vpop.f32.mrb[54].mxu1  ;;  %v2384_v15 = vpop.f32.mrb[55].mxu0  ;;  %2663 = vrsqrt.f32 %v3331_v19  ;;  %v1955_v6 = vadd.f32 %v1954_v18, %v3331_v19  ;;  %v2494_v32 = vadd.f32 %v2493_v4, %v2492_v49  ;;  %v1820_v39 = vsel %vm1819_vm10, %v3289_v58, %v1818_v0 }
 0x167   : > { %v2496_v63 = vpop.f32.mrb[55].mxu1  ;;  %v1084_v5 = vadd.f32 %v2382_v11, %v603_v10  ;;  %v2385_v17 = vadd.f32 %v2384_v15, %v2383_v12  ;;  %v3349_v40 = vadd.f32 %v1631_v30, %v1599_v28  ;;  %v1823_v31 = vsel %vm1821_vm11, %v1822_v27, %v1820_v39  ;;  %v606_v12 = vld [vmem:[%s2896_s20 + $0xe8] sm:$0xff] }
 0x168   : > { %v2497_v33 = vadd.f32 %v2496_v63, %v2495_v13  ;;  %v2660_v22 = vpop.eup %2659  ;;  %v1469_v46 = vadd.f32 %v2494_v32, %v1148_v29  ;;  %v1914_v52 = vadd.f32 %v1913_v21, %v1823_v31  ;;  %vm1835_vm15 = vcmp.eq.f32.partialorder %v3319_v2, 0.0  ;;  %v1151_v13 = vld [vmem:[%s2935_s30 + $0xe8] sm:$0xff] }
 0x169   : > { %1116 = vst [vmem:[%s2896_s20 + $0xd0] sm:$0xff] %v1084_v5  ;;  %v1600_v41 = vmul.f32 %v1084_v5, %v1084_v5  ;;  %v1825_v45 = vmul.f32 %v2660_v22, %v3305_v50  ;;  %v1085_v47 = vadd.f32 %v2385_v17, %v604_v20  ;;  %2665 = vrsqrt.f32 %v3349_v40  ;;  %v607_v20 = vld [vmem:[%s2896_s20 + $0xf0] sm:$0xff] }
 0x16a   : > { %v1836_v57 = vand.u32 2147483648, %v3319_v2  ;;  %v1956_v60 = vadd.f32 %v1955_v6, %v3349_v40  ;;  %1501 = vst [vmem:[%s2935_s30 + $0xd0] sm:$0xff] %v1469_v46  ;;  %v1632_v43 = vmul.f32 %v1469_v46, %v1469_v46  ;;  %v1470_v1 = vadd.f32 %v2497_v33, %v1149_v48 }
 0x16b   : > { %v2386_v34 = vpop.f32.mrb[56].mxu0  ;;  %v1827_v56 = vsel %vm1826_vm12, %v3305_v50, %v1825_v45  ;;  %1117 = vst [vmem:[%s2896_s20 + $0xd8] sm:$0xff] %v1085_v47  ;;  %v2662_v38 = vpop.eup %2661  ;;  %v1601_v49 = vmul.f32 %v1085_v47, %v1085_v47  ;;  %vm1840_vm0 = vcmp.eq.f32.partialorder %v3331_v19, inf  ;;  %vm1842_vm1 = vcmp.eq.f32.partialorder %v3331_v19, 0.0 }
 0x16c   : > { %v2498_v37 = vpop.f32.mrb[56].mxu1  ;;  %v2387_v42 = vpop.f32.mrb[57].mxu0  ;;  %v1830_v62 = vsel %vm1828_vm13, %v1829_v25, %v1827_v56  ;;  %v1832_v3 = vmul.f32 %v2662_v38, %v3319_v2  ;;  %v3369_v4 = vadd.f32 %v1632_v43, %v1600_v41  ;;  %1502 = vst [vmem:[%s2935_s30 + $0xd8] sm:$0xff] %v1470_v1  ;;  %v1633_v7 = vmul.f32 %v1470_v1, %v1470_v1  ;;  %v1153_v56 = vld [vmem:[%s2935_s30 + $0xf8] sm:$0xff] }
 0x16d   : > { %v2499_v44 = vpop.f32.mrb[57].mxu1  ;;  %v2389_v35 = vpop.f32.mrb[58].mxu0  ;;  %v2388_v24 = vadd.f32 %v2387_v42, %v2386_v34  ;;  %v1915_v51 = vadd.f32 %v1914_v52, %v1830_v62  ;;  %v1843_v18 = vand.u32 2147483648, %v3331_v19  ;;  %vm1847_vm2 = vcmp.eq.f32.partialorder %v3349_v40, inf }
 0x16e   : > { %v2501_v36 = vpop.f32.mrb[58].mxu1  ;;  %v2390_v53 = vpop.f32.mrb[59].mxu0  ;;  %v2500_v54 = vadd.f32 %v2499_v44, %v2498_v37  ;;  %v1834_v11 = vsel %vm1833_vm14, %v3319_v2, %v1832_v3  ;;  %2667 = vrsqrt.f32 %v3369_v4  ;;  %v1957_v21 = vadd.f32 %v1956_v60, %v3369_v4 }
 0x16f   : > { %v2502_v58 = vpop.f32.mrb[59].mxu1  ;;  %v1086_v59 = vadd.f32 %v2388_v24, %v605_v61  ;;  %v2391_v55 = vadd.f32 %v2390_v53, %v2389_v35  ;;  %v1837_v63 = vsel %vm1835_vm15, %v1836_v57, %v1834_v11  ;;  %v3387_v8 = vadd.f32 %v1633_v7, %v1601_v49  ;;  %v1152_v53 = vld [vmem:[%s2935_s30 + $0xf0] sm:$0xff] }
 0x170   : > { %v2503_v10 = vadd.f32 %v2502_v58, %v2501_v36  ;;  %v2664_v50 = vpop.eup %2663  ;;  %v1916_v5 = vadd.f32 %v1915_v51, %v1837_v63  ;;  %v1471_v0 = vadd.f32 %v2500_v54, %v1150_v9  ;;  %v1850_v39 = vand.u32 2147483648, %v3349_v40  ;;  %v608_v58 = vld [vmem:[%s2896_s20 + $0xf8] sm:$0xff] }
 0x171   : > { %v1839_v16 = vmul.f32 %v2664_v50, %v3331_v19  ;;  %1118 = vst [vmem:[%s2896_s20 + $0xe0] sm:$0xff] %v1086_v59  ;;  %v1602_v27 = vmul.f32 %v1086_v59, %v1086_v59  ;;  %v1087_v30 = vadd.f32 %v2391_v55, %v606_v12  ;;  %2669 = vrsqrt.f32 %v3387_v8 }
 0x172   : > { %v1472_v29 = vadd.f32 %v2503_v10, %v1151_v13  ;;  %1503 = vst [vmem:[%s2935_s30 + $0xe0] sm:$0xff] %v1471_v0  ;;  %v1958_v25 = vadd.f32 %v1957_v21, %v3387_v8  ;;  %v1634_v41 = vmul.f32 %v1471_v0, %v1471_v0  ;;  %vm1849_vm3 = vcmp.eq.f32.partialorder %v3349_v40, 0.0 }
 0x173   : > { %v2392_v14 = vpop.f32.mrb[60].mxu0  ;;  %v1841_v2 = vsel %vm1840_vm0, %v3331_v19, %v1839_v16  ;;  %v2666_v37 = vpop.eup %2665  ;;  %1119 = vst [vmem:[%s2896_s20 + $0xe8] sm:$0xff] %v1087_v30  ;;  %v1603_v42 = vmul.f32 %v1087_v30, %v1087_v30  ;;  %vm1854_vm4 = vcmp.eq.f32.partialorder %v3369_v4, inf  ;;  %vm1856_vm5 = vcmp.eq.f32.partialorder %v3369_v4, 0.0 }
 0x174   : > { %v2504_v15 = vpop.f32.mrb[60].mxu1  ;;  %v2393_v23 = vpop.f32.mrb[61].mxu0  ;;  %v1844_v34 = vsel %vm1842_vm1, %v1843_v18, %v1841_v2  ;;  %1504 = vst [vmem:[%s2935_s30 + $0xe8] sm:$0xff] %v1472_v29  ;;  %v1846_v19 = vmul.f32 %v2666_v37, %v3349_v40  ;;  %v1635_v44 = vmul.f32 %v1472_v29, %v1472_v29  ;;  %v1666_v45 = vadd.f32 %v1634_v41, %v1602_v27 }
 0x175   : > { %v2505_v26 = vpop.f32.mrb[61].mxu1  ;;  %v2395_v6 = vpop.f32.mrb[62].mxu0  ;;  %v2394_v32 = vadd.f32 %v2393_v23, %v2392_v14  ;;  %v1917_v22 = vadd.f32 %v1916_v5, %v1844_v34  ;;  %vm1861_vm6 = vcmp.eq.f32.partialorder %v3387_v8, inf  ;;  %v1864_v50 = vand.u32 2147483648, %v3387_v8 }
 0x176   : > { %v2507_v28 = vpop.f32.mrb[62].mxu1  ;;  %v2396_v17 = vpop.f32.mrb[63].mxu0  ;;  %v2506_v46 = vadd.f32 %v2505_v26, %v2504_v15  ;;  %v1848_v35 = vsel %vm1847_vm2, %v3349_v40, %v1846_v19  ;;  %v1667_v36 = vadd.f32 %v1635_v44, %v1603_v42  ;;  %2671 = vrsqrt.f32 %v1666_v45 }
 0x177   : > { %v2508_v33 = vpop.f32.mrb[63].mxu1  ;;  %v1088_v31 = vadd.f32 %v2394_v32, %v607_v20  ;;  %v2397_v47 = vadd.f32 %v2396_v17, %v2395_v6  ;;  %v1851_v52 = vsel %vm1849_vm3, %v1850_v39, %v1848_v35  ;;  %v1959_v43 = vadd.f32 %v1958_v25, %v1666_v45 }
 0x178   : > { %v2509_v48 = vadd.f32 %v2508_v33, %v2507_v28  ;;  %v2668_v57 = vpop.eup %2667  ;;  %v1918_v60 = vadd.f32 %v1917_v22, %v1851_v52  ;;  %2673 = vrsqrt.f32 %v1667_v36  ;;  %v1857_v40 = vand.u32 2147483648, %v3369_v4 }
 0x179   : > { %1120 = vst [vmem:[%s2896_s20 + $0xf0] sm:$0xff] %v1088_v31  ;;  %v1853_v61 = vmul.f32 %v2668_v57, %v3369_v4  ;;  %v1604_v38 = vmul.f32 %v1088_v31, %v1088_v31  ;;  %v1960_v62 = vadd.f32 %v1959_v43, %v1667_v36  ;;  %v1473_v49 = vadd.f32 %v2506_v46, %v1152_v53 }
 0x17a   : > { %v1089_v1 = vadd.f32 %v2397_v47, %v608_v58  ;;  %v1474_v24 = vadd.f32 %v2509_v48, %v1153_v56  ;;  %vm1863_vm7 = vcmp.eq.f32.partialorder %v3387_v8, 0.0  ;;  %vm1868_vm8 = vcmp.eq.f32.partialorder %v1666_v45, inf }
 0x17b   : > { %v1855_v51 = vsel %vm1854_vm4, %v3369_v4, %v1853_v61  ;;  %v2670_v3 = vpop.eup %2669  ;;  %1505 = vst [vmem:[%s2935_s30 + $0xf0] sm:$0xff] %v1473_v49  ;;  %v1636_v7 = vmul.f32 %v1473_v49, %v1473_v49  ;;  %v1871_v21 = vand.u32 2147483648, %v1666_v45  ;;  %vm1870_vm9 = vcmp.eq.f32.partialorder %v1666_v45, 0.0 }
 0x17c   : > { %v1858_v54 = vsel %vm1856_vm5, %v1857_v40, %v1855_v51  ;;  %1121 = vst [vmem:[%s2896_s20 + $0xf8] sm:$0xff] %v1089_v1  ;;  %v1605_v59 = vmul.f32 %v1089_v1, %v1089_v1  ;;  %1506 = vst [vmem:[%s2935_s30 + $0xf8] sm:$0xff] %v1474_v24  ;;  %v1637_v9 = vmul.f32 %v1474_v24, %v1474_v24  ;;  %vm1875_vm10 = vcmp.eq.f32.partialorder %v1667_v36, inf }
 0x17d   : > { %v1919_v55 = vadd.f32 %v1918_v60, %v1858_v54  ;;  %v1860_v10 = vmul.f32 %v2670_v3, %v3387_v8  ;;  %v1668_v11 = vadd.f32 %v1636_v7, %v1604_v38  ;;  %v1878_v27 = vand.u32 2147483648, %v1667_v36 }
 0x17e   : > { %v1669_v12 = vadd.f32 %v1637_v9, %v1605_v59  ;;  %vm1877_vm11 = vcmp.eq.f32.partialorder %v1667_v36, 0.0 }
 0x17f   : > { %v1862_v13 = vsel %vm1861_vm6, %v3387_v8, %v1860_v10  ;;  %2675 = vrsqrt.f32 %v1668_v11  ;;  %v1961_v63 = vadd.f32 %v1960_v62, %v1668_v11  ;;  %vm1882_vm12 = vcmp.eq.f32.partialorder %v1668_v11, inf }
 0x180   : > { %v1865_v4 = vsel %vm1863_vm7, %v1864_v50, %v1862_v13  ;;  %v2672_v14 = vpop.eup %2671  ;;  %2677 = vrsqrt.f32 %v1669_v12  ;;  %vm1884_vm13 = vcmp.eq.f32.partialorder %v1668_v11, 0.0  ;;  %v1885_v37 = vand.u32 2147483648, %v1668_v11 }
 0x181   : > { %v1920_v15 = vadd.f32 %v1919_v55, %v1865_v4  ;;  %v1867_v18 = vmul.f32 %v2672_v14, %v1666_v45  ;;  %v1962_v26 = vadd.f32 %v1961_v63, %v1669_v12  ;;  %vm1889_vm14 = vcmp.eq.f32.partialorder %v1669_v12, inf }
 0x182   : > { %v2674_v16 = vpop.eup %2673  ;;  %v1892_v25 = vand.u32 2147483648, %v1669_v12  ;;  %vm1891_vm15 = vcmp.eq.f32.partialorder %v1669_v12, 0.0 }
 0x183   : > { %v1874_v23 = vmul.f32 %v2674_v16, %v1667_v36  ;;  %v1869_v5 = vsel %vm1868_vm8, %v1666_v45, %v1867_v18  ;;  %v1963_v8 = vrot.slane %v1962_v26, 4 }
 0x184   : > { %v1872_v0 = vsel %vm1870_vm9, %v1871_v21, %v1869_v5 }
 0x185   : > { %v1876_v6 = vsel %vm1875_vm10, %v1667_v36, %v1874_v23  ;;  %v1921_v28 = vadd.f32 %v1920_v15, %v1872_v0  ;;  %v1964_v30 = vadd.f32 %v1963_v8, %v1962_v26 }
 0x186   : > { %v1879_v2 = vsel %vm1877_vm11, %v1878_v27, %v1876_v6 }
 0x187   : > { %v1922_v29 = vadd.f32 %v1921_v28, %v1879_v2  ;;  %v1965_v20 = vrot.slane %v1964_v30, 2 }
 0x189   : > { %v2676_v32 = vpop.eup %2675  ;;  %v1966_v34 = vadd.f32 %v1965_v20, %v1964_v30 }
 0x18a   : > { %v2678_v17 = vpop.eup %2677  ;;  %v1881_v33 = vmul.f32 %v2676_v32, %v1668_v11 }
 0x18b   : > { %v1888_v22 = vmul.f32 %v2678_v17, %v1669_v12  ;;  %v1967_v41 = vrot.slane %v1966_v34, 1 }
 0x18c   : > { %v1883_v39 = vsel %vm1882_vm12, %v1668_v11, %v1881_v33 }
 0x18d   : > { %v1886_v19 = vsel %vm1884_vm13, %v1885_v37, %v1883_v39  ;;  %v1890_v42 = vsel %vm1889_vm14, %v1669_v12, %v1888_v22  ;;  %v1968_v45 = vadd.f32 %v1967_v41, %v1966_v34 }
 0x18e   : > { %v1923_v44 = vadd.f32 %v1922_v29, %v1886_v19  ;;  %v1893_v31 = vsel %vm1891_vm15, %v1892_v25, %v1890_v42 }
 0x18f   : > { %1969 = vst [vmem:[%s3104_s11 + $0x1] sm:$0x1] %v1968_v45 }
 0x190   : > { %v1924_v46 = vadd.f32 %v1923_v44, %v1893_v31 }
 0x192   : > { %v1925_v47 = vrot.slane %v1924_v46, 4 }
 0x194   : > { %v1926_v48 = vadd.f32 %v1925_v47, %v1924_v46 }
 0x196   : > { %v1927_v35 = vrot.slane %v1926_v48, 2 }
 0x198   : > { %v1928_v36 = vadd.f32 %v1927_v35, %v1926_v48 }
 0x19a   : > { %v1929_v52 = vrot.slane %v1928_v36, 1 }
 0x19c   : > { %v1930_v53 = vadd.f32 %v1929_v52, %v1928_v36 }
 0x19e   : > { %1931 = vst [vmem:[%s3104_s11] sm:$0x1] %v1930_v53 }
 0x19f PF: > { %s18_s26 = sadd.s32 1, %s2701_s26   ;;  %s3443_s24 = smov %s2697_s25 }
 0x1a0   : > { %p15_p6 = scmp.ge.s32.totalorder %s18_s26, 4   ;;  %s3444_s25 = smov %s3446_s27 }
 0x1a2   :  { %17 = sbr.rel (!%p15_p6) target bundleno = 2 (0x2), region = 114 }

// kernel: squeeze.18
= control target key start
LH: loop header
LB: loop body
LE: loop exit
PB: predicated region body
PF: predicated region fallthrough
CT: control target
= control target key end

     0   :  { %s125_s10 = smov 64   ;;  %vm3_vm0 = vcmask 523264   ;;  %vm44_vm1 = vcmask 1048064   ;;  %s256_s0 = inlined_call_operand.vmem [shape: f32[2,8,8,1,64], index: 0, kind: input, shape index: {}]   ;;  %s257_s1 = inlined_call_operand.vmem [shape: f32[64,128], index: 1, kind: output, shape index: {}]  }
   0x1   :  { %v112_v0 = vld [vmem:[%s256_s0 + $0x11] ss:$2 sm:$0xff]   ;;  %v109_v1 = vld [vmem:[%s256_s0 + $0x1] ss:$2 sm:$0xff]   ;;  %v95_v4 = vld [vmem:[%s256_s0 + $0x10] ss:$2 sm:$0xff]  }
   0x2   :  { %55 = vrot.lane.b32.xlu1 %v112_v0, %s125_s10  ;;  %42 = vrot.lane.b32.xlu0 %v109_v1, %s125_s10  ;;  %v114_v2 = vld [vmem:[%s256_s0 + $0x51] ss:$2 sm:$0xff]   ;;  %v110_v3 = vld [vmem:[%s256_s0 + $0x41] ss:$2 sm:$0xff]  }
   0x3   :  { %v2_v5 = vld [vmem:[%s256_s0] ss:$2 sm:$0xff]   ;;  %v103_v6 = vld [vmem:[%s256_s0 + $0x50] ss:$2 sm:$0xff]   ;;  %96 = vst.msk [vmem:[%s257_s1 + $0x8] sm:$0xff] %vm3_vm0, %v95_v4  }
   0x4   :  { %4 = vst.msk [vmem:[%s257_s1] sm:$0xff] %vm3_vm0, %v2_v5   ;;  %104 = vst.msk [vmem:[%s257_s1 + $0x28] sm:$0xff] %vm3_vm0, %v103_v6   ;;  %v101_v7 = vld [vmem:[%s256_s0 + $0x40] ss:$2 sm:$0xff]   ;;  %v107_v10 = vld [vmem:[%s256_s0 + $0x70] ss:$2 sm:$0xff]  }
   0x5   :  { %v105_v8 = vld [vmem:[%s256_s0 + $0x60] ss:$2 sm:$0xff]   ;;  %102 = vst.msk [vmem:[%s257_s1 + $0x20] sm:$0xff] %vm3_vm0, %v101_v7   ;;  %v99_v11 = vld [vmem:[%s256_s0 + $0x30] ss:$2 sm:$0xff]   ;;  %108 = vst.msk [vmem:[%s257_s1 + $0x38] sm:$0xff] %vm3_vm0, %v107_v10  }
   0x6   :  { %v97_v9 = vld [vmem:[%s256_s0 + $0x20] ss:$2 sm:$0xff]   ;;  %62 = vrot.lane.b32.xlu1 %v114_v2, %s125_s10  ;;  %48 = vrot.lane.b32.xlu0 %v110_v3, %s125_s10  ;;  %106 = vst.msk [vmem:[%s257_s1 + $0x30] sm:$0xff] %vm3_vm0, %v105_v8  }
   0x7   :  { %98 = vst.msk [vmem:[%s257_s1 + $0x10] sm:$0xff] %vm3_vm0, %v97_v9   ;;  %v118_v12 = vld [vmem:[%s256_s0 + $0x61] ss:$2 sm:$0xff]   ;;  %100 = vst.msk [vmem:[%s257_s1 + $0x18] sm:$0xff] %vm3_vm0, %v99_v11   ;;  %v122_v14 = vld [vmem:[%s256_s0 + $0x71] ss:$2 sm:$0xff]  }
   0x8   :  { %v116_v13 = vld [vmem:[%s256_s0 + $0x21] ss:$2 sm:$0xff]   ;;  %v120_v15 = vld [vmem:[%s256_s0 + $0x31] ss:$2 sm:$0xff]  }
   0xa   :  { %76 = vrot.lane.b32.xlu1 %v118_v12, %s125_s10  ;;  %69 = vrot.lane.b32.xlu0 %v116_v13, %s125_s10 }
   0xe   :  { %90 = vrot.lane.b32.xlu1 %v122_v14, %s125_s10  ;;  %83 = vrot.lane.b32.xlu0 %v120_v15, %s125_s10 }
  0x74   :  { %v56_v16 = vpop.permute.xlu1 %55   ;;  %v43_v17 = vpop.permute.xlu0 %42  }
  0x75   :  { %113 = vst.msk [vmem:[%s257_s1 + $0x8] sm:$0xff] %vm44_vm1, %v56_v16   ;;  %45 = vst.msk [vmem:[%s257_s1] sm:$0xff] %vm44_vm1, %v43_v17  }
  0x78   :  { %v63_v18 = vpop.permute.xlu1 %62   ;;  %v49_v19 = vpop.permute.xlu0 %48  }
  0x79   :  { %115 = vst.msk [vmem:[%s257_s1 + $0x28] sm:$0xff] %vm44_vm1, %v63_v18   ;;  %111 = vst.msk [vmem:[%s257_s1 + $0x20] sm:$0xff] %vm44_vm1, %v49_v19  }
  0x7c   :  { %v77_v20 = vpop.permute.xlu1 %76   ;;  %v70_v21 = vpop.permute.xlu0 %69  }
  0x7d   :  { %119 = vst.msk [vmem:[%s257_s1 + $0x30] sm:$0xff] %vm44_vm1, %v77_v20   ;;  %117 = vst.msk [vmem:[%s257_s1 + $0x10] sm:$0xff] %vm44_vm1, %v70_v21  }
  0x80   :  { %v91_v22 = vpop.permute.xlu1 %90   ;;  %v84_v23 = vpop.permute.xlu0 %83  }
  0x81   :  { %123 = vst.msk [vmem:[%s257_s1 + $0x38] sm:$0xff] %vm44_vm1, %v91_v22   ;;  %121 = vst.msk [vmem:[%s257_s1 + $0x18] sm:$0xff] %vm44_vm1, %v84_v23  }

// kernel: resnet_forward.19
= control target key start
LH: loop header
LB: loop body
LE: loop exit
PB: predicated region body
PF: predicated region fallthrough
CT: control target
= control target key end

     0   :  { %s399_s0 = inlined_call_operand.vmem [shape: f32[64,128], index: 0, kind: input, shape index: {}]   ;;  %s400_s1 = inlined_call_operand.vmem [shape: f32[64,128], index: 1, kind: input, shape index: {}]   ;;  %s401_s2 = inlined_call_operand.vmem [shape: f32[1,128], index: 2, kind: input, shape index: {}]   ;;  %s402_s3 = inlined_call_operand.vmem [shape: f32[1,128], index: 3, kind: input, shape index: {}]   ;;  %s403_s4 = inlined_call_operand.vmem [shape: f32[64,128], index: 4, kind: output, shape index: {0}]   ;;  %s404_s5 = inlined_call_operand.vmem [shape: f32[64,128], index: 5, kind: output, shape index: {1}]  }
   0x1   :  { %v220_v0 = vld [vmem:[%s399_s0] sm:$0xff]  ;;  %v234_v4 = vld [vmem:[%s399_s0 + $0x8] sm:$0xff]  ;;  %v248_v8 = vld [vmem:[%s399_s0 + $0x10] sm:$0xff] }
   0x2   :  { %v225_v1 = vld [vmem:[%s400_s1] sm:$0xff]  ;;  %v35_v2 = vmul.f32 %v220_v0, %v220_v0  ;;  %v239_v5 = vld [vmem:[%s400_s1 + $0x8] sm:$0xff]  ;;  %v36_v6 = vmul.f32 %v234_v4, %v234_v4  ;;  %v253_v9 = vld [vmem:[%s400_s1 + $0x10] sm:$0xff]  ;;  %v37_v12 = vmul.f32 %v248_v8, %v248_v8 }
   0x3   :  { %v43_v3 = vmul.f32 %v225_v1, %v225_v1  ;;  %v44_v7 = vmul.f32 %v239_v5, %v239_v5  ;;  %v258_v10 = vld [vmem:[%s399_s0 + $0x18] sm:$0xff]  ;;  %v45_v13 = vmul.f32 %v253_v9, %v253_v9  ;;  %v274_v16 = vld [vmem:[%s399_s0 + $0x20] sm:$0xff]  ;;  %v290_v22 = vld [vmem:[%s399_s0 + $0x28] sm:$0xff] }
   0x4   :  { %v267_v14 = vld [vmem:[%s400_s1 + $0x18] sm:$0xff]  ;;  %v38_v15 = vmul.f32 %v258_v10, %v258_v10  ;;  %v279_v17 = vld [vmem:[%s400_s1 + $0x20] sm:$0xff]  ;;  %v39_v20 = vmul.f32 %v274_v16, %v274_v16  ;;  %v295_v23 = vld [vmem:[%s400_s1 + $0x28] sm:$0xff]  ;;  %v40_v27 = vmul.f32 %v290_v22, %v290_v22 }
   0x5   :  { %v51_v11 = vadd.f32 %v43_v3, %v35_v2  ;;  %v52_v18 = vadd.f32 %v44_v7, %v36_v6  ;;  %v46_v19 = vmul.f32 %v267_v14, %v267_v14  ;;  %v47_v21 = vmul.f32 %v279_v17, %v279_v17  ;;  %v300_v24 = vld [vmem:[%s399_s0 + $0x30] sm:$0xff]  ;;  %v314_v30 = vld [vmem:[%s399_s0 + $0x38] sm:$0xff]  ;;  %v169_v49 = vld [vmem:[%s401_s2] ss:$0 sm:$0xff] }
   0x6   :  { %v53_v26 = vadd.f32 %v45_v13, %v37_v12  ;;  %v48_v28 = vmul.f32 %v295_v23, %v295_v23  ;;  %v309_v29 = vld [vmem:[%s400_s1 + $0x30] sm:$0xff]  ;;  %v41_v34 = vmul.f32 %v300_v24, %v300_v24  ;;  %v321_v35 = vld [vmem:[%s400_s1 + $0x38] sm:$0xff]  ;;  %v42_v41 = vmul.f32 %v314_v30, %v314_v30  ;;  %v170_v53 = vld [vmem:[%s402_s3] ss:$0 sm:$0xff] }
   0x7   :  { %v59_v25 = vadd.f32 1e-12, %v51_v11  ;;  %v60_v31 = vadd.f32 1e-12, %v52_v18  ;;  %v54_v32 = vadd.f32 %v46_v19, %v38_v15  ;;  %v55_v33 = vadd.f32 %v47_v21, %v39_v20 }
   0x8   :  { %v61_v36 = vadd.f32 1e-12, %v53_v26  ;;  %v56_v37 = vadd.f32 %v48_v28, %v40_v27  ;;  %v49_v38 = vmul.f32 %v309_v29, %v309_v29  ;;  %v50_v44 = vmul.f32 %v321_v35, %v321_v35 }
   0x9   :  { %171 = vrsqrt.f32 %v59_v25  ;;  %v62_v39 = vadd.f32 1e-12, %v54_v32  ;;  %v63_v40 = vadd.f32 1e-12, %v55_v33 }
   0xa   :  { %173 = vrsqrt.f32 %v60_v31  ;;  %v64_v42 = vadd.f32 1e-12, %v56_v37  ;;  %v57_v43 = vadd.f32 %v49_v38, %v41_v34  ;;  %v58_v46 = vadd.f32 %v50_v44, %v42_v41 }
   0xb   :  { %175 = vrsqrt.f32 %v61_v36 }
   0xc   :  { %177 = vrsqrt.f32 %v62_v39  ;;  %v65_v45 = vadd.f32 1e-12, %v57_v43  ;;  %v66_v47 = vadd.f32 1e-12, %v58_v46 }
   0xd   :  { %179 = vrsqrt.f32 %v63_v40 }
   0xe   :  { %181 = vrsqrt.f32 %v64_v42 }
   0xf   :  { %183 = vrsqrt.f32 %v65_v45 }
  0x10   :  { %185 = vrsqrt.f32 %v66_v47 }
  0x13   :  { %v172_v48 = vpop.eup %171 }
  0x14   :  { %v174_v50 = vpop.eup %173  ;;  %v75_v51 = vmul.f32 %v172_v48, %v51_v11 }
  0x15   :  { %v176_v52 = vpop.eup %175  ;;  %v76_v54 = vmul.f32 %v174_v50, %v52_v18 }
  0x16   :  { %v178_v55 = vpop.eup %177  ;;  %v90_v56 = vmul.f32 %v169_v49, %v75_v51  ;;  %v77_v57 = vmul.f32 %v176_v52, %v53_v26 }
  0x17   :  { %v180_v58 = vpop.eup %179  ;;  %v91_v59 = vmul.f32 %v169_v49, %v76_v54  ;;  %v78_v60 = vmul.f32 %v178_v55, %v54_v32 }
  0x18   :  { %v182_v61 = vpop.eup %181  ;;  %v105_v62 = vadd.f32 %v170_v53, %v90_v56  ;;  %v92_v63 = vmul.f32 %v169_v49, %v77_v57  ;;  %v79_v2 = vmul.f32 %v180_v58, %v55_v33 }
  0x19   :  { %v184_v3 = vpop.eup %183  ;;  %v106_v6 = vadd.f32 %v170_v53, %v91_v59  ;;  %v93_v7 = vmul.f32 %v169_v49, %v78_v60  ;;  %v80_v11 = vmul.f32 %v182_v61, %v56_v37 }
  0x1a   :  { %v113_v12 = vmax.f32 %v105_v62, 0.0  ;;  %v107_v13 = vadd.f32 %v170_v53, %v92_v63  ;;  %v94_v15 = vmul.f32 %v169_v49, %v79_v2  ;;  %v81_v19 = vmul.f32 %v184_v3, %v57_v43  ;;  %v186_v20 = vpop.eup %185 }
  0x1b   :  { %v114_v18 = vmax.f32 %v106_v6, 0.0  ;;  %v108_v21 = vadd.f32 %v170_v53, %v93_v7  ;;  %v95_v25 = vmul.f32 %v169_v49, %v80_v11  ;;  %v82_v33 = vmul.f32 %v186_v20, %v58_v46 }
  0x1c   :  { %v121_v26 = vmul.f32 %v172_v48, %v113_v12  ;;  %v115_v27 = vmax.f32 %v107_v13, 0.0  ;;  %v109_v28 = vadd.f32 %v170_v53, %v94_v15  ;;  %v96_v31 = vmul.f32 %v169_v49, %v81_v19 }
  0x1d   :  { %v122_v32 = vmul.f32 %v174_v50, %v114_v18  ;;  %v116_v34 = vmax.f32 %v108_v21, 0.0  ;;  %v110_v36 = vadd.f32 %v170_v53, %v95_v25  ;;  %v97_v44 = vmul.f32 %v169_v49, %v82_v33 }
  0x1e   :  { %v129_v38 = vmul.f32 %v121_v26, %v220_v0  ;;  %v123_v39 = vmul.f32 %v176_v52, %v115_v27  ;;  %v117_v37 = vmax.f32 %v109_v28, 0.0  ;;  %v111_v40 = vadd.f32 %v170_v53, %v96_v31 }
  0x1f   :  { %v130_v41 = vmul.f32 %v122_v32, %v234_v4  ;;  %v124_v42 = vmul.f32 %v178_v55, %v116_v34  ;;  %v118_v43 = vmax.f32 %v110_v36, 0.0  ;;  %v145_v46 = vmul.f32 %v121_v26, %v225_v1 }
  0x20   :  { %137 = vst [vmem:[%s403_s4] sm:$0xff] %v129_v38  ;;  %v131_v45 = vmul.f32 %v123_v39, %v248_v8  ;;  %v125_v47 = vmul.f32 %v180_v58, %v117_v37  ;;  %v119_v48 = vmax.f32 %v111_v40, 0.0  ;;  %v112_v50 = vadd.f32 %v170_v53, %v97_v44 }
  0x21   :  { %138 = vst [vmem:[%s403_s4 + $0x8] sm:$0xff] %v130_v41  ;;  %v132_v0 = vmul.f32 %v124_v42, %v258_v10  ;;  %v126_v4 = vmul.f32 %v182_v61, %v118_v43  ;;  %v146_v49 = vmul.f32 %v122_v32, %v239_v5  ;;  %153 = vst [vmem:[%s404_s5] sm:$0xff] %v145_v46 }
  0x22   :  { %139 = vst [vmem:[%s403_s4 + $0x10] sm:$0xff] %v131_v45  ;;  %v133_v8 = vmul.f32 %v125_v47, %v274_v16  ;;  %v127_v51 = vmul.f32 %v184_v3, %v119_v48  ;;  %v147_v1 = vmul.f32 %v123_v39, %v253_v9  ;;  %v148_v52 = vmul.f32 %v124_v42, %v267_v14 }
  0x23   :  { %140 = vst [vmem:[%s403_s4 + $0x18] sm:$0xff] %v132_v0  ;;  %v134_v5 = vmul.f32 %v126_v4, %v290_v22  ;;  %v120_v10 = vmax.f32 %v112_v50, 0.0  ;;  %154 = vst [vmem:[%s404_s5 + $0x8] sm:$0xff] %v146_v49  ;;  %v149_v16 = vmul.f32 %v125_v47, %v279_v17  ;;  %v150_v53 = vmul.f32 %v126_v4, %v295_v23 }
  0x24   :  { %141 = vst [vmem:[%s403_s4 + $0x20] sm:$0xff] %v133_v8  ;;  %v135_v9 = vmul.f32 %v127_v51, %v300_v24  ;;  %155 = vst [vmem:[%s404_s5 + $0x10] sm:$0xff] %v147_v1  ;;  %v151_v14 = vmul.f32 %v127_v51, %v309_v29 }
  0x25   :  { %156 = vst [vmem:[%s404_s5 + $0x18] sm:$0xff] %v148_v52  ;;  %142 = vst [vmem:[%s403_s4 + $0x28] sm:$0xff] %v134_v5  ;;  %v128_v17 = vmul.f32 %v186_v20, %v120_v10 }
  0x26   :  { %157 = vst [vmem:[%s404_s5 + $0x20] sm:$0xff] %v149_v16  ;;  %158 = vst [vmem:[%s404_s5 + $0x28] sm:$0xff] %v150_v53 }
  0x27   :  { %143 = vst [vmem:[%s403_s4 + $0x30] sm:$0xff] %v135_v9  ;;  %159 = vst [vmem:[%s404_s5 + $0x30] sm:$0xff] %v151_v14  ;;  %v136_v22 = vmul.f32 %v128_v17, %v314_v30  ;;  %v152_v23 = vmul.f32 %v128_v17, %v321_v35 }
  0x29   :  { %144 = vst [vmem:[%s403_s4 + $0x38] sm:$0xff] %v136_v22  ;;  %160 = vst [vmem:[%s404_s5 + $0x38] sm:$0xff] %v152_v23 }

// kernel: resnet_forward.18
= control target key start
LH: loop header
LB: loop body
LE: loop exit
PB: predicated region body
PF: predicated region fallthrough
CT: control target
= control target key end

     0   :  { %s3528_s0 = inlined_call_operand.vmem [shape: bf16[128,640], index: 0, kind: input, shape index: {}]   ;;  %s3529_s1 = inlined_call_operand.vmem [shape: bf16[128,640], index: 1, kind: input, shape index: {}]   ;;  %s3530_s2 = inlined_call_operand.vmem [shape: bf16[640,128], index: 2, kind: input, shape index: {}]   ;;  %s3531_s3 = inlined_call_operand.vmem [shape: bf16[640,128], index: 3, kind: input, shape index: {}]   ;;  %s3532_s4 = inlined_call_operand.vmem [shape: bf16[640,128], index: 4, kind: input, shape index: {}]   ;;  %s3533_s5 = inlined_call_operand.vmem [shape: f32[1,128], index: 5, kind: input, shape index: {}]   ;;  %s3534_s6 = inlined_call_operand.vmem [shape: f32[1,128], index: 6, kind: input, shape index: {}]   ;;  %s3535_s7 = inlined_call_operand.vmem [shape: f32[128,128], index: 7, kind: output, shape index: {0}]   ;;  %s3536_s8 = inlined_call_operand.vmem [shape: f32[128,128], index: 8, kind: output, shape index: {1}]   ;;  %s3537_s9 = inlined_call_operand.vmem [shape: f32[8,128], index: 9, kind: output, shape index: {2}]  }
   0x1   :  { %3538 = sst [smem:[#allocation4_spill]] %s3528_s0 }
   0x2   :  { %3539 = sst [smem:[#allocation5_spill]] %s3529_s1 }
   0x3   :  { %s2565_s30 = smov 0   ;;  %s2567_s10 = smov 0  }
   0x4   :  { %s2569_s11 = smov 0   ;;  %s2571_s12 = smov 0  }
   0x5   :  { %s2573_s13 = smov 0  }
   0x6 LB: > { %s32_s14 = sadd.s32 1, %s2508_s12  ;;  %p55_p1 = scmp.ne.s32.totalorder %s2500_s10, %s2496_s30  ;;  %s2512_s13 = sphi %s2573_s13, %s20_s13   ;;  %s2508_s12 = sphi %s2571_s12, %s3546_s12   ;;  %s2504_s11 = sphi %s2569_s11, %s3545_s11   ;;  %s2500_s10 = sphi %s2567_s10, %s3544_s10   ;;  %s2496_s30 = sphi %s2565_s30, %s3543_s30  }
   0x7   : > { %p33_p0 = scmp.ge.s32.totalorder %s32_s14, 5  ;;  %p56_p2 = scmp.eq.s32.totalorder %s2512_s13, 0 }
   0x8   : > { %s48_s17 = sadd.s32 1, %s2500_s10  ;;  %p2128_p5 = scmp.ge.s32.totalorder %s2512_s13, 5 }
   0x9   : > { %s3548_s14 = smov (%p33_p0, %s32_s14), 0  ;;  %p2596_p3 = por %p56_p2, %p55_p1 }
   0xa   : > { %s44_s16 = ssub.s32 %s2508_s12, %s3548_s14  ;;  %341 = sbr.rel (%p2128_p5) target bundleno = 57 (0x39), region = 24 }
   0xb   : > { %p46_p4 = scmp.eq.s32.totalorder %s44_s16, 0 }
   0xd   : > { %s2604_s18 = scalar_select %p46_p4, %s2500_s10, %s48_s17  }
  0x11   : > { %344 = sbr.rel (!%p2596_p3) target bundleno = 37 (0x25), region = 28  ;;  %s346_s19 = sand.u32 (%p2596_p3), 1, %s2500_s10  }
  0x12   : > { %s2130_s20 = sshll.u32 (%p2596_p3), %s2508_s12, 2  ;;  %s2129_s21 = sshll.u32 (%p2596_p3), %s346_s19, 6 }
  0x13   : > { %s3541_s0 = sld [smem:[#allocation4_spill]] (%p2596_p3)  ;;  %s348_s25 = scalar_lea.vmem (%p2596_p3), [#allocation2], %s2129_s21 }
  0x19   : > { %s2614_s24 = scalar_lea.vmem %s3541_s0, %s2130_s20 }
  0x1a   : > { %v369_v0 = vld [vmem:[%s2614_s24] sm:$0xf]  ;;  %v371_v1 = vld [vmem:[%s2614_s24 + $0x14] sm:$0xf]  ;;  %v373_v2 = vld [vmem:[%s2614_s24 + $0x28] sm:$0xf] }
  0x1b   : > { %370 = vst [vmem:[%s348_s25] sm:$0xf] %v369_v0  ;;  %372 = vst [vmem:[%s348_s25 + $0x4] sm:$0xf] %v371_v1  ;;  %v375_v3 = vld [vmem:[%s2614_s24 + $0x3c] sm:$0xf] }
  0x1c   : > { %v377_v4 = vld [vmem:[%s2614_s24 + $0x50] sm:$0xf]  ;;  %374 = vst [vmem:[%s348_s25 + $0x8] sm:$0xf] %v373_v2  ;;  %376 = vst [vmem:[%s348_s25 + $0xc] sm:$0xf] %v375_v3 }
  0x1d   : > { %378 = vst [vmem:[%s348_s25 + $0x10] sm:$0xf] %v377_v4  ;;  %v379_v5 = vld [vmem:[%s2614_s24 + $0x64] sm:$0xf]  ;;  %v381_v6 = vld [vmem:[%s2614_s24 + $0x78] sm:$0xf] }
  0x1e   : > { %v383_v7 = vld [vmem:[%s2614_s24 + $0x8c] sm:$0xf]  ;;  %380 = vst [vmem:[%s348_s25 + $0x14] sm:$0xf] %v379_v5  ;;  %382 = vst [vmem:[%s348_s25 + $0x18] sm:$0xf] %v381_v6 }
  0x1f   : > { %384 = vst [vmem:[%s348_s25 + $0x1c] sm:$0xf] %v383_v7  ;;  %v385_v8 = vld [vmem:[%s2614_s24 + $0xa0] sm:$0xf]  ;;  %v387_v9 = vld [vmem:[%s2614_s24 + $0xb4] sm:$0xf] }
  0x20   : > { %v389_v10 = vld [vmem:[%s2614_s24 + $0xc8] sm:$0xf]  ;;  %386 = vst [vmem:[%s348_s25 + $0x20] sm:$0xf] %v385_v8  ;;  %388 = vst [vmem:[%s348_s25 + $0x24] sm:$0xf] %v387_v9 }
  0x21   : > { %390 = vst [vmem:[%s348_s25 + $0x28] sm:$0xf] %v389_v10  ;;  %v391_v11 = vld [vmem:[%s2614_s24 + $0xdc] sm:$0xf]  ;;  %v393_v12 = vld [vmem:[%s2614_s24 + $0xf0] sm:$0xf] }
  0x22   : > { %v395_v13 = vld [vmem:[%s2614_s24 + $0x104] sm:$0xf]  ;;  %392 = vst [vmem:[%s348_s25 + $0x2c] sm:$0xf] %v391_v11  ;;  %394 = vst [vmem:[%s348_s25 + $0x30] sm:$0xf] %v393_v12 }
  0x23   : > { %396 = vst [vmem:[%s348_s25 + $0x34] sm:$0xf] %v395_v13  ;;  %v397_v14 = vld [vmem:[%s2614_s24 + $0x118] sm:$0xf]  ;;  %v399_v15 = vld [vmem:[%s2614_s24 + $0x12c] sm:$0xf] }
  0x24   : > { %398 = vst [vmem:[%s348_s25 + $0x38] sm:$0xf] %v397_v14  ;;  %400 = vst [vmem:[%s348_s25 + $0x3c] sm:$0xf] %v399_v15 }
  0x25 PF: > { %455 = sbr.rel (!%p2596_p3) target bundleno = 57 (0x39), region = 69  ;;  %s457_s26 = sand.u32 (%p2596_p3), 1, %s2500_s10  }
  0x26   : > { %s2132_s27 = sshll.u32 (%p2596_p3), %s2508_s12, 2  ;;  %s2131_s28 = sshll.u32 (%p2596_p3), %s457_s26, 6 }
  0x27   : > { %s3542_s1 = sld [smem:[#allocation5_spill]] (%p2596_p3)  ;;  %s459_s15 = scalar_lea.vmem (%p2596_p3), [#allocation3], %s2131_s28 }
  0x2d   : > { %s2639_s17 = scalar_lea.vmem %s3542_s1, %s2132_s27 }
  0x2e   : > { %v480_v16 = vld [vmem:[%s2639_s17] sm:$0xf]  ;;  %v482_v17 = vld [vmem:[%s2639_s17 + $0x14] sm:$0xf]  ;;  %v484_v18 = vld [vmem:[%s2639_s17 + $0x28] sm:$0xf] }
  0x2f   : > { %481 = vst [vmem:[%s459_s15] sm:$0xf] %v480_v16  ;;  %483 = vst [vmem:[%s459_s15 + $0x4] sm:$0xf] %v482_v17  ;;  %v486_v19 = vld [vmem:[%s2639_s17 + $0x3c] sm:$0xf] }
  0x30   : > { %v488_v20 = vld [vmem:[%s2639_s17 + $0x50] sm:$0xf]  ;;  %485 = vst [vmem:[%s459_s15 + $0x8] sm:$0xf] %v484_v18  ;;  %487 = vst [vmem:[%s459_s15 + $0xc] sm:$0xf] %v486_v19 }
  0x31   : > { %489 = vst [vmem:[%s459_s15 + $0x10] sm:$0xf] %v488_v20  ;;  %v490_v21 = vld [vmem:[%s2639_s17 + $0x64] sm:$0xf]  ;;  %v492_v22 = vld [vmem:[%s2639_s17 + $0x78] sm:$0xf] }
  0x32   : > { %v494_v23 = vld [vmem:[%s2639_s17 + $0x8c] sm:$0xf]  ;;  %491 = vst [vmem:[%s459_s15 + $0x14] sm:$0xf] %v490_v21  ;;  %493 = vst [vmem:[%s459_s15 + $0x18] sm:$0xf] %v492_v22 }
  0x33   : > { %495 = vst [vmem:[%s459_s15 + $0x1c] sm:$0xf] %v494_v23  ;;  %v496_v24 = vld [vmem:[%s2639_s17 + $0xa0] sm:$0xf]  ;;  %v498_v25 = vld [vmem:[%s2639_s17 + $0xb4] sm:$0xf] }
  0x34   : > { %v500_v26 = vld [vmem:[%s2639_s17 + $0xc8] sm:$0xf]  ;;  %497 = vst [vmem:[%s459_s15 + $0x20] sm:$0xf] %v496_v24  ;;  %499 = vst [vmem:[%s459_s15 + $0x24] sm:$0xf] %v498_v25 }
  0x35   : > { %501 = vst [vmem:[%s459_s15 + $0x28] sm:$0xf] %v500_v26  ;;  %v502_v27 = vld [vmem:[%s2639_s17 + $0xdc] sm:$0xf]  ;;  %v504_v28 = vld [vmem:[%s2639_s17 + $0xf0] sm:$0xf] }
  0x36   : > { %v506_v29 = vld [vmem:[%s2639_s17 + $0x104] sm:$0xf]  ;;  %503 = vst [vmem:[%s459_s15 + $0x2c] sm:$0xf] %v502_v27  ;;  %505 = vst [vmem:[%s459_s15 + $0x30] sm:$0xf] %v504_v28 }
  0x37   : > { %507 = vst [vmem:[%s459_s15 + $0x34] sm:$0xf] %v506_v29  ;;  %v508_v30 = vld [vmem:[%s2639_s17 + $0x118] sm:$0xf]  ;;  %v510_v31 = vld [vmem:[%s2639_s17 + $0x12c] sm:$0xf] }
  0x38   : > { %509 = vst [vmem:[%s459_s15 + $0x38] sm:$0xf] %v508_v30  ;;  %511 = vst [vmem:[%s459_s15 + $0x3c] sm:$0xf] %v510_v31 }
  0x39 PF: > { %p2133_p6 = scmp.ge.s32.totalorder %s2512_s13, 1  ;;  %p601_p7 = scmp.lt.s32.totalorder %s2512_s13, 6 }
  0x3b   : > { %p602_p8 = pnand %p2133_p6, %p601_p7 }
  0x3c   : > { %s608_s19 = sand.u32 (!%p602_p8), 1, %s2496_s30   ;;  %s2136_s20 = sshll.u32 (!%p602_p8), %s2504_s11, 4 }
  0x3d   : > { %605 = sbr.rel (%p602_p8) target bundleno = 446 (0x1be), region = 122  ;;  %s2134_s21 = sshll.u32 (!%p602_p8), %s608_s19, 6 }
  0x3e   : > { %p705_p9 = scmp.lt.s32.totalorder (!%p602_p8), %s2136_s20, 79  ;;  %s2676_s30 = scalar_lea.vmem (!%p602_p8), [#allocation2], %s2134_s21 }
  0x3f   : > { %s2678_s15 = scalar_lea.vmem (!%p602_p8), [#allocation3], %s2134_s21  ;;  %p2142_p10 = scmp.ne.s32.totalorder (!%p602_p8), %s2504_s11, 0 }
  0x44   : > { %s3550_s20 = smov (!%p705_p9, %s2136_s20), 79  ;;  %766 = sbr.rel (%p2142_p10) target bundleno = 86 (0x56), region = 134 }
  0x45   : > { %s2137_s22 = sshll.u32 %s3550_s20, 2  ;;  %v2143_v32 = vld [vmem:[%s3533_s5] ss:$0 sm:$0xff] (!%p2142_p10) }
  0x46   : > { %s2664_s25 = scalar_lea.vmem %s3530_s2, %s2137_s22  ;;  %s2669_s28 = scalar_lea.vmem %s3531_s3, %s2137_s22  ;;  %v2144_v33 = vld [vmem:[%s3534_s6] ss:$0 sm:$0xff] (!%p2142_p10)  ;;  %774 = vst [vmem:[%s3535_s7] sm:$0xff] (!%p2142_p10), %v2143_v32  ;;  %775 = vst [vmem:[%s3535_s7 + $0x8] sm:$0xff] (!%p2142_p10), %v2143_v32 }
  0x47   : > { %s2674_s17 = scalar_lea.vmem %s3532_s4, %s2137_s22  ;;  %776 = vst [vmem:[%s3535_s7 + $0x10] sm:$0xff] (!%p2142_p10), %v2143_v32  ;;  %777 = vst [vmem:[%s3535_s7 + $0x18] sm:$0xff] (!%p2142_p10), %v2143_v32 }
  0x48   : > { %778 = vst [vmem:[%s3535_s7 + $0x20] sm:$0xff] (!%p2142_p10), %v2143_v32  ;;  %779 = vst [vmem:[%s3535_s7 + $0x28] sm:$0xff] (!%p2142_p10), %v2143_v32 }
  0x49   : > { %780 = vst [vmem:[%s3535_s7 + $0x30] sm:$0xff] (!%p2142_p10), %v2143_v32  ;;  %781 = vst [vmem:[%s3535_s7 + $0x38] sm:$0xff] (!%p2142_p10), %v2143_v32 }
  0x4a   : > { %782 = vst [vmem:[%s3535_s7 + $0x40] sm:$0xff] (!%p2142_p10), %v2143_v32  ;;  %783 = vst [vmem:[%s3535_s7 + $0x48] sm:$0xff] (!%p2142_p10), %v2143_v32 }
  0x4b   : > { %784 = vst [vmem:[%s3535_s7 + $0x50] sm:$0xff] %v2143_v32  ;;  %785 = vst [vmem:[%s3535_s7 + $0x58] sm:$0xff] %v2143_v32 }
  0x4c   : > { %786 = vst [vmem:[%s3535_s7 + $0x60] sm:$0xff] %v2143_v32  ;;  %787 = vst [vmem:[%s3535_s7 + $0x68] sm:$0xff] %v2143_v32 }
  0x4d   : > { %788 = vst [vmem:[%s3535_s7 + $0x70] sm:$0xff] %v2143_v32  ;;  %789 = vst [vmem:[%s3535_s7 + $0x78] sm:$0xff] %v2143_v32 }
  0x4e   : > { %797 = vst [vmem:[%s3536_s8] sm:$0xff] %v2144_v33  ;;  %798 = vst [vmem:[%s3536_s8 + $0x8] sm:$0xff] %v2144_v33 }
  0x4f   : > { %799 = vst [vmem:[%s3536_s8 + $0x10] sm:$0xff] %v2144_v33  ;;  %800 = vst [vmem:[%s3536_s8 + $0x18] sm:$0xff] %v2144_v33 }
  0x50   : > { %801 = vst [vmem:[%s3536_s8 + $0x20] sm:$0xff] %v2144_v33  ;;  %802 = vst [vmem:[%s3536_s8 + $0x28] sm:$0xff] %v2144_v33 }
  0x51   : > { %803 = vst [vmem:[%s3536_s8 + $0x30] sm:$0xff] %v2144_v33  ;;  %804 = vst [vmem:[%s3536_s8 + $0x38] sm:$0xff] %v2144_v33 }
  0x52   : > { %805 = vst [vmem:[%s3536_s8 + $0x40] sm:$0xff] %v2144_v33  ;;  %806 = vst [vmem:[%s3536_s8 + $0x48] sm:$0xff] %v2144_v33 }
  0x53   : > { %807 = vst [vmem:[%s3536_s8 + $0x50] sm:$0xff] %v2144_v33  ;;  %808 = vst [vmem:[%s3536_s8 + $0x58] sm:$0xff] %v2144_v33 }
  0x54   : > { %809 = vst [vmem:[%s3536_s8 + $0x60] sm:$0xff] %v2144_v33  ;;  %810 = vst [vmem:[%s3536_s8 + $0x68] sm:$0xff] %v2144_v33 }
  0x55   : > { %811 = vst [vmem:[%s3536_s8 + $0x70] sm:$0xff] %v2144_v33  ;;  %812 = vst [vmem:[%s3536_s8 + $0x78] sm:$0xff] %v2144_v33 }
  0x56 PF: > { %v2402_v34 = vld [vmem:[%s2664_s25] sm:$0xff]   ;;  %v2404_v36 = vld [vmem:[%s2664_s25 + $0x8] sm:$0xff]   ;;  %v2406_v38 = vld [vmem:[%s2664_s25 + $0x10] sm:$0xff]   ;;  %p2193_p11 = scmp.ne.s32.totalorder %s2504_s11, 4 }
  0x57   : > { %v2403_v35 = vld [vmem:[%s2669_s28] sm:$0xff]   ;;  %2249 = vmatprep.subr.bf16.mxu0 %v2402_v34  ;;  %v2405_v37 = vld [vmem:[%s2669_s28 + $0x8] sm:$0xff]   ;;  %v2407_v39 = vld [vmem:[%s2669_s28 + $0x10] sm:$0xff]  }
  0x58   : > { %2281 = vmatprep.subr.bf16.mxu1 %v2403_v35  ;;  %2250 = vmatpush3.bf16.msra.mxu0 %v2402_v34  ;;  %v2408_v40 = vld [vmem:[%s2664_s25 + $0x18] sm:$0xff]   ;;  %v2410_v42 = vld [vmem:[%s2664_s25 + $0x20] sm:$0xff]   ;;  %v2412_v44 = vld [vmem:[%s2664_s25 + $0x28] sm:$0xff]  }
  0x59   : > { %2282 = vmatpush3.bf16.msra.mxu1 %v2403_v35  ;;  %2251 = vmatprep.subr.bf16.mxu0 %v2404_v36  ;;  %v2409_v41 = vld [vmem:[%s2669_s28 + $0x18] sm:$0xff]   ;;  %v2411_v43 = vld [vmem:[%s2669_s28 + $0x20] sm:$0xff]   ;;  %v2413_v48 = vld [vmem:[%s2669_s28 + $0x28] sm:$0xff]  }
  0x5a   : > { %2283 = vmatprep.subr.bf16.mxu1 %v2405_v37  ;;  %v2795_v45 = vld [vmem:[%s2676_s30] sm:$0xf]  ;;  %v2798_v46 = vld [vmem:[%s2676_s30 + $0x4] sm:$0xf]  ;;  %v2414_v52 = vld [vmem:[%s2664_s25 + $0x30] sm:$0xff]  }
  0x5b   : > { %v2801_v47 = vld [vmem:[%s2678_s15] sm:$0xf]  ;;  %v2145_v49 = vcombine.low %v2795_v45, %v2798_v46  ;;  %v2807_v50 = vld [vmem:[%s2678_s15 + $0x4] sm:$0xf]  ;;  %v2415_v53 = vld [vmem:[%s2669_s28 + $0x30] sm:$0xff]  }
  0x5c   : > { %2252 = vmatpush3.bf16.msra.mxu0 %v2404_v36  ;;  %v2161_v51 = vcombine.low %v2801_v47, %v2807_v50  ;;  %v2416_v54 = vld [vmem:[%s2664_s25 + $0x38] sm:$0xff]   ;;  %v2816_v56 = vld [vmem:[%s2676_s30 + $0x8] sm:$0xf]  ;;  %v2819_v57 = vld [vmem:[%s2676_s30 + $0xc] sm:$0xf] }
  0x5d   : > { %2284 = vmatpush3.bf16.msra.mxu1 %v2405_v37  ;;  %2253 = vmatprep.subr.bf16.mxu0 %v2406_v38  ;;  %v2417_v55 = vld [vmem:[%s2669_s28 + $0x38] sm:$0xff]   ;;  %v2822_v58 = vld [vmem:[%s2678_s15 + $0x8] sm:$0xf]  ;;  %v2825_v59 = vld [vmem:[%s2678_s15 + $0xc] sm:$0xf]  ;;  %v2146_v61 = vcombine.low %v2816_v56, %v2819_v57 }
  0x5e   : > { %2285 = vmatprep.subr.bf16.mxu1 %v2407_v39  ;;  %2265 = vmatprep.mubr.bf16.mxu0 %v2145_v49  ;;  %v2422_v60 = vld [vmem:[%s2674_s17] sm:$0xff]   ;;  %v2831_v62 = vld [vmem:[%s2676_s30 + $0x10] sm:$0xf]  ;;  %v2834_v63 = vld [vmem:[%s2676_s30 + $0x14] sm:$0xf]  ;;  %v2162_v0 = vcombine.low %v2822_v58, %v2825_v59 }
  0x5f   : > { %2297 = vmatprep.mubr.bf16.mxu1 %v2161_v51  ;;  %v2839_v1 = vld [vmem:[%s2678_s15 + $0x10] sm:$0xf]  ;;  %v2842_v2 = vld [vmem:[%s2678_s15 + $0x14] sm:$0xf]  ;;  %v2423_v3 = vld [vmem:[%s2674_s17 + $0x8] sm:$0xff]   ;;  %v2147_v4 = vcombine.low %v2831_v62, %v2834_v63 }
  0x60   : > { %2254 = vmatpush3.bf16.msra.mxu0 %v2406_v38  ;;  %v2163_v5 = vcombine.low %v2839_v1, %v2842_v2  ;;  %v2850_v6 = vld [vmem:[%s2676_s30 + $0x18] sm:$0xf]  ;;  %v2853_v7 = vld [vmem:[%s2676_s30 + $0x1c] sm:$0xf]  ;;  %v2428_v10 = vld [vmem:[%s2674_s17 + $0x10] sm:$0xff]  }
  0x61   : > { %2286 = vmatpush3.bf16.msra.mxu1 %v2407_v39  ;;  %2255 = vmatprep.subr.bf16.mxu0 %v2408_v40  ;;  %v2856_v8 = vld [vmem:[%s2678_s15 + $0x18] sm:$0xf]  ;;  %v2859_v9 = vld [vmem:[%s2678_s15 + $0x1c] sm:$0xf]  ;;  %v2148_v11 = vcombine.low %v2850_v6, %v2853_v7  ;;  %v2865_v12 = vld [vmem:[%s2676_s30 + $0x20] sm:$0xf]  ;;  %v1263_v39 = vadd.bf16 %v2801_v47, %v2795_v45  ;;  %v1265_v45 = vadd.bf16 %v2822_v58, %v2816_v56 }
  0x62   : > { %2287 = vmatprep.subr.bf16.mxu1 %v2409_v41  ;;  %v2868_v13 = vld [vmem:[%s2676_s30 + $0x24] sm:$0xf]  ;;  %v2164_v14 = vcombine.low %v2856_v8, %v2859_v9  ;;  %v2873_v15 = vld [vmem:[%s2678_s15 + $0x20] sm:$0xf]  ;;  %v2429_v17 = vld [vmem:[%s2674_s17 + $0x18] sm:$0xff]  }
  0x63   : > { %v838_v16 = vld [vmem:[%s2678_s15 + $0x24] sm:$0xf]  ;;  %v2149_v18 = vcombine.low %v2865_v12, %v2868_v13  ;;  %v2881_v20 = vld [vmem:[%s2676_s30 + $0x28] sm:$0xf]  ;;  %v2884_v21 = vld [vmem:[%s2676_s30 + $0x2c] sm:$0xf] }
  0x64   : > { %2256 = vmatpush3.bf16.msra.mxu0 %v2408_v40  ;;  %v2165_v19 = vcombine.low %v2873_v15, %v838_v16  ;;  %v2887_v22 = vld [vmem:[%s2678_s15 + $0x28] sm:$0xf]  ;;  %v840_v23 = vld [vmem:[%s2678_s15 + $0x2c] sm:$0xf]  ;;  %v2434_v24 = vld [vmem:[%s2674_s17 + $0x20] sm:$0xff]   ;;  %v2150_v25 = vcombine.low %v2881_v20, %v2884_v21  ;;  %v1264_v40 = vadd.bf16 %v2807_v50, %v2798_v46  ;;  %v1266_v46 = vadd.bf16 %v2825_v59, %v2819_v57 }
  0x65   : > { %2288 = vmatpush3.bf16.msra.mxu1 %v2409_v41  ;;  %2257 = vmatprep.subr.bf16.mxu0 %v2410_v42  ;;  %v825_v26 = vld [vmem:[%s2676_s30 + $0x30] sm:$0xf]  ;;  %v826_v27 = vld [vmem:[%s2676_s30 + $0x34] sm:$0xf]  ;;  %v2166_v28 = vcombine.low %v2887_v22, %v840_v23  ;;  %v2435_v31 = vld [vmem:[%s2674_s17 + $0x28] sm:$0xff]   ;;  %v1267_v50 = vadd.bf16 %v2839_v1, %v2831_v62  ;;  %v1273_v51 = vadd.bf16 %v2887_v22, %v2881_v20 }
  0x66   : > { %2289 = vmatprep.subr.bf16.mxu1 %v2411_v43  ;;  %v841_v29 = vld [vmem:[%s2678_s15 + $0x30] sm:$0xf]  ;;  %v842_v30 = vld [vmem:[%s2678_s15 + $0x34] sm:$0xf]  ;;  %v2151_v32 = vcombine.low %v825_v26, %v826_v27  ;;  %v827_v34 = vld [vmem:[%s2676_s30 + $0x38] sm:$0xf]  ;;  %v2177_v49 = vcombine.low %v1263_v39, %v1264_v40  ;;  %v2178_v56 = vcombine.low %v1265_v45, %v1266_v46 }
  0x67   : > { %v2167_v33 = vcombine.low %v841_v29, %v842_v30  ;;  %v828_v35 = vld [vmem:[%s2676_s30 + $0x3c] sm:$0xf]  ;;  %v843_v36 = vld [vmem:[%s2678_s15 + $0x38] sm:$0xf]  ;;  %v2440_v38 = vld [vmem:[%s2674_s17 + $0x30] sm:$0xff]  }
  0x68   : > { %2258 = vmatpush3.bf16.msra.mxu0 %v2410_v42  ;;  %v844_v37 = vld [vmem:[%s2678_s15 + $0x3c] sm:$0xf]  ;;  %v2152_v41 = vcombine.low %v827_v34, %v828_v35  ;;  %v1271_v42 = vadd.bf16 %v2873_v15, %v2865_v12  ;;  %v1277_v62 = vadd.bf16 %v843_v36, %v827_v34  ;;  %v1496_v46 = vld [vmem:[%s3535_s7 + $0x40] sm:$0xff] }
  0x69   : > { %2290 = vmatpush3.bf16.msra.mxu1 %v2411_v43  ;;  %2259 = vmatprep.subr.bf16.mxu0 %v2412_v44  ;;  %v1272_v43 = vadd.bf16 %v838_v16, %v2868_v13  ;;  %v1491_v12 = vld [vmem:[%s3535_s7 + $0x18] sm:$0xff] }
  0x6a   : > { %2291 = vmatprep.subr.bf16.mxu1 %v2413_v48 }
  0x6b   : > { %v2181_v47 = vcombine.low %v1271_v42, %v1272_v43 }
  0x6c   : > { %2260 = vmatpush3.bf16.msra.mxu0 %v2412_v44  ;;  %v2168_v44 = vcombine.low %v843_v36, %v844_v37 }
  0x6d   : > { %2292 = vmatpush3.bf16.msra.mxu1 %v2413_v48  ;;  %2261 = vmatprep.subr.bf16.mxu0 %v2414_v52  ;;  %v2441_v48 = vld [vmem:[%s2674_s17 + $0x38] sm:$0xff]  }
  0x6e   : > { %2293 = vmatprep.subr.bf16.mxu1 %v2415_v53 }
  0x70   : > { %2262 = vmatpush3.bf16.msra.mxu0 %v2414_v52  ;;  %v1274_v52 = vadd.bf16 %v840_v23, %v2884_v21 }
  0x71   : > { %2294 = vmatpush3.bf16.msra.mxu1 %v2415_v53  ;;  %2263 = vmatprep.subr.bf16.mxu0 %v2416_v54  ;;  %v1268_v53 = vadd.bf16 %v2842_v2, %v2834_v63  ;;  %v1278_v63 = vadd.bf16 %v844_v37, %v828_v35  ;;  %v1493_v37 = vld [vmem:[%s3535_s7 + $0x28] sm:$0xff] }
  0x72   : > { %2295 = vmatprep.subr.bf16.mxu1 %v2417_v55  ;;  %v2182_v57 = vcombine.low %v1273_v51, %v1274_v52  ;;  %v1499_v52 = vld [vmem:[%s3535_s7 + $0x58] sm:$0xff] }
  0x73   : > { %v2179_v58 = vcombine.low %v1267_v50, %v1268_v53  ;;  %v2184_v1 = vcombine.low %v1277_v62, %v1278_v63 }
  0x74   : > { %2264 = vmatpush3.bf16.msra.mxu0 %v2416_v54  ;;  %v1275_v54 = vadd.bf16 %v841_v29, %v825_v26 }
  0x75   : > { %2296 = vmatpush3.bf16.msra.mxu1 %v2417_v55  ;;  %2313 = vmatprep.subr.bf16.mxu0 %v2422_v60  ;;  %v1276_v55 = vadd.bf16 %v842_v30, %v826_v27 }
  0x76   : > { %2345 = vmatprep.subr.bf16.mxu1 %v2422_v60 }
  0x77   : > { %2266 = vmatmul.mubr.bf16.vlgmr.msra.gmra.mrb[0].mxu0 %v2146_v61  ;;  %v2183_v59 = vcombine.low %v1275_v54, %v1276_v55  ;;  %v1270_v61 = vadd.bf16 %v2859_v9, %v2853_v7 }
  0x78   : > { %2298 = vmatmul.mubr.bf16.vlgmr.msra.gmra.mrb[0].mxu1 %v2162_v0  ;;  %2314 = vmatpush3.bf16.msra.mxu0 %v2422_v60 }
  0x79   : > { %2353 = vmatpush3.bf16.msra.mxu1 %v2422_v60  ;;  %2315 = vmatprep.subr.bf16.mxu0 %v2423_v3  ;;  %v1269_v60 = vadd.bf16 %v2856_v8, %v2850_v6  ;;  %v1488_v8 = vld [vmem:[%s3535_s7] sm:$0xff] }
  0x7a   : > { %2346 = vmatprep.subr.bf16.mxu1 %v2423_v3  ;;  %2269 = vmatprep.mubr.bf16.mxu0 %v2147_v4  ;;  %v1490_v4 = vld [vmem:[%s3535_s7 + $0x10] sm:$0xff] }
  0x7b   : > { %2301 = vmatprep.mubr.bf16.mxu1 %v2163_v5  ;;  %v2180_v0 = vcombine.low %v1269_v60, %v1270_v61 }
  0x7c   : > { %2316 = vmatpush3.bf16.msra.mxu0 %v2423_v3 }
  0x7d   : > { %2354 = vmatpush3.bf16.msra.mxu1 %v2423_v3  ;;  %2317 = vmatprep.subr.bf16.mxu0 %v2428_v10 }
  0x7e   : > { %2347 = vmatprep.subr.bf16.mxu1 %v2428_v10 }
  0x7f   : > { %2270 = vmatmul.mubr.bf16.gmra.mrb[4].mxu0 %v2148_v11 }
  0x80   : > { %2302 = vmatmul.mubr.bf16.gmra.mrb[4].mxu1 %v2164_v14  ;;  %2318 = vmatpush3.bf16.msra.mxu0 %v2428_v10 }
  0x81   : > { %2355 = vmatpush3.bf16.msra.mxu1 %v2428_v10  ;;  %2319 = vmatprep.subr.bf16.mxu0 %v2429_v17 }
  0x82   : > { %2348 = vmatprep.subr.bf16.mxu1 %v2429_v17  ;;  %2273 = vmatprep.mubr.bf16.mxu0 %v2149_v18 }
  0x83   : > { %2305 = vmatprep.mubr.bf16.mxu1 %v2165_v19 }
  0x84   : > { %2320 = vmatpush3.bf16.msra.mxu0 %v2429_v17 }
  0x85   : > { %2356 = vmatpush3.bf16.msra.mxu1 %v2429_v17  ;;  %2321 = vmatprep.subr.bf16.mxu0 %v2434_v24  ;;  %v1489_v17 = vld [vmem:[%s3535_s7 + $0x8] sm:$0xff] }
  0x86   : > { %2349 = vmatprep.subr.bf16.mxu1 %v2434_v24 }
  0x87   : > { %2274 = vmatmul.mubr.bf16.gmra.mrb[8].mxu0 %v2150_v25 }
  0x88   : > { %2306 = vmatmul.mubr.bf16.gmra.mrb[8].mxu1 %v2166_v28  ;;  %2322 = vmatpush3.bf16.msra.mxu0 %v2434_v24  ;;  %v1492_v28 = vld [vmem:[%s3535_s7 + $0x20] sm:$0xff] }
  0x89   : > { %2357 = vmatpush3.bf16.msra.mxu1 %v2434_v24  ;;  %2323 = vmatprep.subr.bf16.mxu0 %v2435_v31  ;;  %v1494_v24 = vld [vmem:[%s3535_s7 + $0x30] sm:$0xff] }
  0x8a   : > { %2350 = vmatprep.subr.bf16.mxu1 %v2435_v31  ;;  %2277 = vmatprep.mubr.bf16.mxu0 %v2151_v32  ;;  %v1495_v32 = vld [vmem:[%s3535_s7 + $0x38] sm:$0xff] }
  0x8b   : > { %2309 = vmatprep.mubr.bf16.mxu1 %v2167_v33 }
  0x8c   : > { %2324 = vmatpush3.bf16.msra.mxu0 %v2435_v31 }
  0x8d   : > { %2358 = vmatpush3.bf16.msra.mxu1 %v2435_v31  ;;  %2325 = vmatprep.subr.bf16.mxu0 %v2440_v38 }
  0x8e   : > { %2351 = vmatprep.subr.bf16.mxu1 %v2440_v38 }
  0x8f   : > { %2278 = vmatmul.mubr.bf16.gmra.mrb[12].mxu0 %v2152_v41 }
  0x90   : > { %2310 = vmatmul.mubr.bf16.gmra.mrb[12].mxu1 %v2168_v44  ;;  %2326 = vmatpush3.bf16.msra.mxu0 %v2440_v38  ;;  %v1498_v44 = vld [vmem:[%s3535_s7 + $0x50] sm:$0xff] }
  0x91   : > { %2359 = vmatpush3.bf16.msra.mxu1 %v2440_v38  ;;  %2327 = vmatprep.subr.bf16.mxu0 %v2441_v48 }
  0x92   : > { %2352 = vmatprep.subr.bf16.mxu1 %v2441_v48  ;;  %2329 = vmatprep.mubr.bf16.mxu0 %v2177_v49 }
  0x93   : > { %2337 = vmatprep.mubr.bf16.mxu1 %v2181_v47 }
  0x94   : > { %2328 = vmatpush3.bf16.msra.mxu0 %v2441_v48 }
  0x95   : > { %2360 = vmatpush3.bf16.msra.mxu1 %v2441_v48 }
  0x97   : > { %2330 = vmatmul.mubr.bf16.vlgmr.msra.gmra.mrb[16].mxu0 %v2178_v56 }
  0x98   : > { %2338 = vmatmul.mubr.bf16.vlgmr.msra.gmra.mrb[16].mxu1 %v2182_v57  ;;  %2333 = vmatprep.mubr.bf16.mxu0 %v2179_v58  ;;  %v1497_v57 = vld [vmem:[%s3535_s7 + $0x48] sm:$0xff] }
  0x99   : > { %2341 = vmatprep.mubr.bf16.mxu1 %v2183_v59 }
  0x9f   : > { %2334 = vmatmul.mubr.bf16.gmra.mrb[20].mxu0 %v2180_v0  ;;  %v1502_v0 = vld [vmem:[%s3535_s7 + $0x70] sm:$0xff] }
  0xa0   : > { %2342 = vmatmul.mubr.bf16.gmra.mrb[20].mxu1 %v2184_v1 }
 0x14a   : > { %v2927_v2 = vpop.f32.mrb[0].mxu0 }
 0x14b   : > { %v2929_v3 = vpop.f32.mrb[0].mxu1  ;;  %v2934_v5 = vpop.f32.mrb[1].mxu0 }
 0x14c   : > { %v1506_v6 = vsub.f32 %v2927_v2, %v2929_v3  ;;  %v2938_v7 = vpop.f32.mrb[1].mxu1  ;;  %v2943_v9 = vpop.f32.mrb[2].mxu0 }
 0x14d   : > { %v1504_v10 = vsub.f32 %v2934_v5, %v2938_v7  ;;  %v2947_v11 = vpop.f32.mrb[2].mxu1  ;;  %v2952_v13 = vpop.f32.mrb[3].mxu0 }
 0x14e   : > { %v1522_v14 = vadd.f32 %v1506_v6, %v1490_v4  ;;  %v1507_v15 = vsub.f32 %v2943_v9, %v2947_v11  ;;  %v2956_v16 = vpop.f32.mrb[3].mxu1 }
 0x14f   : > { %v1520_v18 = vadd.f32 %v1504_v10, %v1488_v8  ;;  %v1505_v19 = vsub.f32 %v2952_v13, %v2956_v16  ;;  %v1500_v8 = vld [vmem:[%s3535_s7 + $0x60] sm:$0xff] }
 0x150   : > { %1538 = vst [vmem:[%s3535_s7 + $0x10] sm:$0xff] %v1522_v14  ;;  %v1523_v20 = vadd.f32 %v1507_v15, %v1491_v12  ;;  %v1503_v15 = vld [vmem:[%s3535_s7 + $0x78] sm:$0xff] }
 0x151   : > { %1536 = vst [vmem:[%s3535_s7] sm:$0xff] %v1520_v18  ;;  %v1521_v21 = vadd.f32 %v1505_v19, %v1489_v17 }
 0x152   : > { %1539 = vst [vmem:[%s3535_s7 + $0x18] sm:$0xff] %v1523_v20  ;;  %v2972_v22 = vpop.f32.mrb[4].mxu0 }
 0x153   : > { %1537 = vst [vmem:[%s3535_s7 + $0x8] sm:$0xff] %v1521_v21  ;;  %v2977_v23 = vpop.f32.mrb[4].mxu1  ;;  %v2982_v25 = vpop.f32.mrb[5].mxu0  ;;  %v1501_v21 = vld [vmem:[%s3535_s7 + $0x68] sm:$0xff] }
 0x154   : > { %v1510_v26 = vsub.f32 %v2972_v22, %v2977_v23  ;;  %v2986_v27 = vpop.f32.mrb[5].mxu1  ;;  %v2991_v29 = vpop.f32.mrb[6].mxu0 }
 0x155   : > { %v1508_v30 = vsub.f32 %v2982_v25, %v2986_v27  ;;  %v2995_v31 = vpop.f32.mrb[6].mxu1  ;;  %v3000_v33 = vpop.f32.mrb[7].mxu0 }
 0x156   : > { %v1526_v34 = vadd.f32 %v1510_v26, %v1494_v24  ;;  %v1511_v35 = vsub.f32 %v2991_v29, %v2995_v31  ;;  %v3004_v36 = vpop.f32.mrb[7].mxu1 }
 0x157   : > { %v1524_v38 = vadd.f32 %v1508_v30, %v1492_v28  ;;  %v1509_v39 = vsub.f32 %v3000_v33, %v3004_v36 }
 0x158   : > { %1542 = vst [vmem:[%s3535_s7 + $0x30] sm:$0xff] %v1526_v34  ;;  %v1527_v40 = vadd.f32 %v1511_v35, %v1495_v32 }
 0x159   : > { %1540 = vst [vmem:[%s3535_s7 + $0x20] sm:$0xff] %v1524_v38  ;;  %v1525_v41 = vadd.f32 %v1509_v39, %v1493_v37  ;;  %v1554_v38 = vld [vmem:[%s3536_s8 + $0x10] sm:$0xff] }
 0x15a   : > { %1543 = vst [vmem:[%s3535_s7 + $0x38] sm:$0xff] %v1527_v40  ;;  %v3020_v42 = vpop.f32.mrb[8].mxu0 }
 0x15b   : > { %1541 = vst [vmem:[%s3535_s7 + $0x28] sm:$0xff] %v1525_v41  ;;  %v3025_v43 = vpop.f32.mrb[8].mxu1  ;;  %v3030_v48 = vpop.f32.mrb[9].mxu0 }
 0x15c   : > { %v1514_v49 = vsub.f32 %v3020_v42, %v3025_v43  ;;  %v3034_v45 = vpop.f32.mrb[9].mxu1  ;;  %v3039_v47 = vpop.f32.mrb[10].mxu0 }
 0x15d   : > { %v1512_v50 = vsub.f32 %v3030_v48, %v3034_v45  ;;  %v3043_v51 = vpop.f32.mrb[10].mxu1  ;;  %v3048_v53 = vpop.f32.mrb[11].mxu0 }
 0x15e   : > { %v1530_v54 = vadd.f32 %v1514_v49, %v1498_v44  ;;  %v1515_v55 = vsub.f32 %v3039_v47, %v3043_v51  ;;  %v3052_v56 = vpop.f32.mrb[11].mxu1 }
 0x15f   : > { %v1528_v58 = vadd.f32 %v1512_v50, %v1496_v46  ;;  %v1513_v59 = vsub.f32 %v3048_v53, %v3052_v56  ;;  %v1562_v46 = vld [vmem:[%s3536_s8 + $0x50] sm:$0xff] }
 0x160   : > { %1546 = vst [vmem:[%s3535_s7 + $0x50] sm:$0xff] %v1530_v54  ;;  %v1531_v60 = vadd.f32 %v1515_v55, %v1499_v52 }
 0x161   : > { %1544 = vst [vmem:[%s3535_s7 + $0x40] sm:$0xff] %v1528_v58  ;;  %v1529_v61 = vadd.f32 %v1513_v59, %v1497_v57  ;;  %v1555_v57 = vld [vmem:[%s3536_s8 + $0x18] sm:$0xff] }
 0x162   : > { %1547 = vst [vmem:[%s3535_s7 + $0x58] sm:$0xff] %v1531_v60  ;;  %v3068_v62 = vpop.f32.mrb[12].mxu0 }
 0x163   : > { %1545 = vst [vmem:[%s3535_s7 + $0x48] sm:$0xff] %v1529_v61  ;;  %v3073_v63 = vpop.f32.mrb[12].mxu1  ;;  %v3078_v1 = vpop.f32.mrb[13].mxu0  ;;  %v1553_v61 = vld [vmem:[%s3536_s8 + $0x8] sm:$0xff] }
 0x164   : > { %v1518_v4 = vsub.f32 %v3068_v62, %v3073_v63  ;;  %v3082_v6 = vpop.f32.mrb[13].mxu1  ;;  %v3087_v10 = vpop.f32.mrb[14].mxu0 }
 0x165   : > { %v1516_v12 = vsub.f32 %v3078_v1, %v3082_v6  ;;  %v3091_v14 = vpop.f32.mrb[14].mxu1  ;;  %v3096_v17 = vpop.f32.mrb[15].mxu0 }
 0x166   : > { %v1534_v18 = vadd.f32 %v1518_v4, %v1502_v0  ;;  %v1519_v19 = vsub.f32 %v3087_v10, %v3091_v14  ;;  %v3100_v20 = vpop.f32.mrb[15].mxu1 }
 0x167   : > { %v1532_v24 = vadd.f32 %v1516_v12, %v1500_v8  ;;  %v1517_v26 = vsub.f32 %v3096_v17, %v3100_v20 }
 0x168   : > { %1550 = vst [vmem:[%s3535_s7 + $0x70] sm:$0xff] %v1534_v18  ;;  %v1535_v28 = vadd.f32 %v1519_v19, %v1503_v15 }
 0x169   : > { %1548 = vst [vmem:[%s3535_s7 + $0x60] sm:$0xff] %v1532_v24  ;;  %v1533_v30 = vadd.f32 %v1517_v26, %v1501_v21  ;;  %v1558_v24 = vld [vmem:[%s3536_s8 + $0x30] sm:$0xff] }
 0x16a   : > { %1551 = vst [vmem:[%s3535_s7 + $0x78] sm:$0xff] %v1535_v28  ;;  %v2331_v32 = vpop.f32.mrb[16].mxu0 }
 0x16b   : > { %1549 = vst [vmem:[%s3535_s7 + $0x68] sm:$0xff] %v1533_v30  ;;  %v1570_v34 = vsub.f32 %v2331_v32, %v2927_v2  ;;  %v2339_v35 = vpop.f32.mrb[16].mxu1  ;;  %v1425_v37 = vpop.f32.mrb[17].mxu0  ;;  %v1552_v2 = vld [vmem:[%s3536_s8] sm:$0xff] }
 0x16c   : > { %v1578_v39 = vsub.f32 %v2339_v35, %v3020_v42  ;;  %v1568_v40 = vsub.f32 %v1425_v37, %v2934_v5  ;;  %v1457_v41 = vpop.f32.mrb[17].mxu1  ;;  %v2332_v44 = vpop.f32.mrb[18].mxu0  ;;  %v1556_v35 = vld [vmem:[%s3536_s8 + $0x20] sm:$0xff] }
 0x16d   : > { %v1586_v49 = vsub.f32 %v1570_v34, %v2929_v3  ;;  %v1576_v50 = vsub.f32 %v1457_v41, %v3030_v48  ;;  %v1571_v52 = vsub.f32 %v2332_v44, %v2943_v9  ;;  %v2340_v54 = vpop.f32.mrb[18].mxu1  ;;  %v1428_v42 = vpop.f32.mrb[19].mxu0  ;;  %v1560_v3 = vld [vmem:[%s3536_s8 + $0x40] sm:$0xff]  ;;  %v1566_v34 = vld [vmem:[%s3536_s8 + $0x70] sm:$0xff]  ;;  %v1559_v41 = vld [vmem:[%s3536_s8 + $0x38] sm:$0xff] }
 0x16e   : > { %v1594_v5 = vsub.f32 %v1578_v39, %v3025_v43  ;;  %v1584_v55 = vsub.f32 %v1568_v40, %v2938_v7  ;;  %v1579_v58 = vsub.f32 %v2340_v54, %v3039_v47  ;;  %v1569_v48 = vsub.f32 %v1428_v42, %v2952_v13  ;;  %v1460_v59 = vpop.f32.mrb[19].mxu1  ;;  %v1563_v7 = vld [vmem:[%s3536_s8 + $0x58] sm:$0xff] }
 0x16f   : > { %v1602_v9 = vadd.f32 %v1586_v49, %v1554_v38  ;;  %v1592_v60 = vsub.f32 %v1576_v50, %v3034_v45  ;;  %v1587_v43 = vsub.f32 %v1571_v52, %v2947_v11  ;;  %v1577_v0 = vsub.f32 %v1460_v59, %v3048_v53  ;;  %v1561_v11 = vld [vmem:[%s3536_s8 + $0x48] sm:$0xff] }
 0x170   : > { %v1610_v4 = vadd.f32 %v1594_v5, %v1562_v46  ;;  %v1600_v47 = vadd.f32 %v1584_v55, %v1552_v2  ;;  %v1595_v13 = vsub.f32 %v1579_v58, %v3043_v51  ;;  %v1585_v8 = vsub.f32 %v1569_v48, %v2956_v16  ;;  %v1557_v2 = vld [vmem:[%s3536_s8 + $0x28] sm:$0xff]  ;;  %v1636_v55 = vld [vmem:[%s3535_s7] sm:$0xff] (!%p2193_p11)  ;;  %v1638_v48 = vld [vmem:[%s3535_s7 + $0x10] sm:$0xff] (!%p2193_p11) }
 0x171   : > { %1618 = vst [vmem:[%s3536_s8 + $0x10] sm:$0xff] %v1602_v9  ;;  %v1608_v45 = vadd.f32 %v1592_v60, %v1560_v3  ;;  %v1603_v12 = vadd.f32 %v1587_v43, %v1555_v57  ;;  %v1593_v15 = vsub.f32 %v1577_v0, %v3052_v56  ;;  %v1637_v3 = vld [vmem:[%s3535_s7 + $0x8] sm:$0xff] (!%p2193_p11)  ;;  %v1668_v9 = vmul.f32 (!%p2193_p11), %v1636_v55, %v1636_v55 }
 0x172   : > { %1626 = vst [vmem:[%s3536_s8 + $0x50] sm:$0xff] %v1610_v4  ;;  %1616 = vst [vmem:[%s3536_s8] sm:$0xff] %v1600_v47  ;;  %v1611_v16 = vadd.f32 %v1595_v13, %v1563_v7  ;;  %v1601_v51 = vadd.f32 %v1585_v8, %v1553_v61  ;;  %v2335_v53 = vpop.f32.mrb[20].mxu0  ;;  %v1669_v43 = vmul.f32 (!%p2193_p11), %v1637_v3, %v1637_v3  ;;  %v1639_v61 = vld [vmem:[%s3535_s7 + $0x18] sm:$0xff] (!%p2193_p11)  ;;  %v1640_v13 = vld [vmem:[%s3535_s7 + $0x20] sm:$0xff] (!%p2193_p11) }
 0x173   : > { %1624 = vst [vmem:[%s3536_s8 + $0x40] sm:$0xff] %v1608_v45  ;;  %1619 = vst [vmem:[%s3536_s8 + $0x18] sm:$0xff] %v1603_v12  ;;  %v1609_v56 = vadd.f32 %v1593_v15, %v1561_v11  ;;  %v1574_v18 = vsub.f32 %v2335_v53, %v2972_v22  ;;  %v2343_v19 = vpop.f32.mrb[20].mxu1  ;;  %v1441_v21 = vpop.f32.mrb[21].mxu0  ;;  %v1670_v4 = vmul.f32 (!%p2193_p11), %v1638_v48, %v1638_v48 }
 0x174   : > { %1627 = vst [vmem:[%s3536_s8 + $0x58] sm:$0xff] %v1611_v16  ;;  %1617 = vst [vmem:[%s3536_s8 + $0x8] sm:$0xff] %v1601_v51  ;;  %v1582_v26 = vsub.f32 %v2343_v19, %v3068_v62  ;;  %v1572_v28 = vsub.f32 %v1441_v21, %v2982_v25  ;;  %v1473_v30 = vpop.f32.mrb[21].mxu1  ;;  %v2336_v22 = vpop.f32.mrb[22].mxu0  ;;  %v1671_v45 = vmul.f32 (!%p2193_p11), %v1639_v61, %v1639_v61  ;;  %v1641_v16 = vld [vmem:[%s3535_s7 + $0x28] sm:$0xff] (!%p2193_p11)  ;;  %v1642_v19 = vld [vmem:[%s3535_s7 + $0x30] sm:$0xff] (!%p2193_p11) }
 0x175   : > { %1625 = vst [vmem:[%s3536_s8 + $0x48] sm:$0xff] %v1609_v56  ;;  %v1590_v32 = vsub.f32 %v1574_v18, %v2977_v23  ;;  %v1580_v62 = vsub.f32 %v1473_v30, %v3078_v1  ;;  %v1575_v25 = vsub.f32 %v2336_v22, %v2991_v29  ;;  %v2344_v37 = vpop.f32.mrb[22].mxu1  ;;  %v1444_v38 = vpop.f32.mrb[23].mxu0  ;;  %v1564_v23 = vld [vmem:[%s3536_s8 + $0x60] sm:$0xff]  ;;  %v1672_v53 = vmul.f32 (!%p2193_p11), %v1640_v13, %v1640_v13  ;;  %v1643_v30 = vld [vmem:[%s3535_s7 + $0x38] sm:$0xff] (!%p2193_p11) }
 0x176   : > { %v1598_v39 = vsub.f32 %v1582_v26, %v3073_v63  ;;  %v1588_v40 = vsub.f32 %v1572_v28, %v2986_v27  ;;  %v1583_v44 = vsub.f32 %v2344_v37, %v3087_v10  ;;  %v1573_v1 = vsub.f32 %v1444_v38, %v3000_v33  ;;  %v1476_v49 = vpop.f32.mrb[23].mxu1  ;;  %v1567_v27 = vld [vmem:[%s3536_s8 + $0x78] sm:$0xff]  ;;  %v1646_v38 = vld [vmem:[%s3535_s7 + $0x50] sm:$0xff] (!%p2193_p11) }
 0x177   : > { %v1606_v29 = vadd.f32 %v1590_v32, %v1558_v24  ;;  %v1596_v46 = vsub.f32 %v1580_v62, %v3082_v6  ;;  %v1591_v63 = vsub.f32 %v1575_v25, %v2995_v31  ;;  %v1581_v50 = vsub.f32 %v1476_v49, %v3096_v17  ;;  %v1565_v31 = vld [vmem:[%s3536_s8 + $0x68] sm:$0xff]  ;;  %1635 = sbr.rel (%p2193_p11) target bundleno = 446 (0x1be), region = 138  ;;  %v1644_v62 = vld [vmem:[%s3535_s7 + $0x40] sm:$0xff] (!%p2193_p11) }
 0x178   : > { %v1614_v52 = vadd.f32 %v1598_v39, %v1566_v34  ;;  %v1604_v10 = vadd.f32 %v1588_v40, %v1556_v35  ;;  %v1599_v33 = vsub.f32 %v1583_v44, %v3091_v14  ;;  %v1589_v54 = vsub.f32 %v1573_v1, %v3004_v36  ;;  %v1654_v59 = vld [vmem:[%s3536_s8 + $0x10] sm:$0xff] (!%p2193_p11)  ;;  %v1645_v25 = vld [vmem:[%s3535_s7 + $0x48] sm:$0xff] (!%p2193_p11)  ;;  %v1647_v39 = vld [vmem:[%s3535_s7 + $0x58] sm:$0xff] (!%p2193_p11) }
 0x179   : > { %1622 = vst [vmem:[%s3536_s8 + $0x30] sm:$0xff] %v1606_v29  ;;  %v1612_v6 = vadd.f32 %v1596_v46, %v1564_v23  ;;  %v1607_v42 = vadd.f32 %v1591_v63, %v1559_v41  ;;  %v1597_v5 = vsub.f32 %v1581_v50, %v3100_v20  ;;  %v2514_v20 = vmov (!%p2193_p11), 0.0   ;;  %v1652_v57 = vld [vmem:[%s3536_s8] sm:$0xff] (!%p2193_p11)  ;;  %v1662_v49 = vld [vmem:[%s3536_s8 + $0x50] sm:$0xff] (!%p2193_p11)  ;;  %v1649_v46 = vld [vmem:[%s3535_s7 + $0x68] sm:$0xff] (!%p2193_p11) }
 0x17a   : > { %1630 = vst [vmem:[%s3536_s8 + $0x70] sm:$0xff] %v1614_v52  ;;  %1620 = vst [vmem:[%s3536_s8 + $0x20] sm:$0xff] %v1604_v10  ;;  %v1615_v36 = vadd.f32 %v1599_v33, %v1567_v27  ;;  %v1605_v14 = vadd.f32 %v1589_v54, %v1557_v2  ;;  %v1684_v60 = vmul.f32 (!%p2193_p11), %v1652_v57, %v1652_v57  ;;  %v1655_v0 = vld [vmem:[%s3536_s8 + $0x18] sm:$0xff] (!%p2193_p11)  ;;  %v1660_v37 = vld [vmem:[%s3536_s8 + $0x40] sm:$0xff] (!%p2193_p11) }
 0x17b   : > { %1628 = vst [vmem:[%s3536_s8 + $0x60] sm:$0xff] %v1612_v6  ;;  %1623 = vst [vmem:[%s3536_s8 + $0x38] sm:$0xff] %v1607_v42  ;;  %v1613_v17 = vadd.f32 %v1597_v5, %v1565_v31  ;;  %v1653_v58 = vld [vmem:[%s3536_s8 + $0x8] sm:$0xff] (!%p2193_p11)  ;;  %v1686_v47 = vmul.f32 (!%p2193_p11), %v1654_v59, %v1654_v59  ;;  %v1687_v12 = vmul.f32 (!%p2193_p11), %v1655_v0, %v1655_v0  ;;  %v1648_v1 = vld [vmem:[%s3535_s7 + $0x60] sm:$0xff] (!%p2193_p11) }
 0x17c   : > { %1631 = vst [vmem:[%s3536_s8 + $0x78] sm:$0xff] %v1615_v36  ;;  %1621 = vst [vmem:[%s3536_s8 + $0x28] sm:$0xff] %v1605_v14  ;;  %v1685_v7 = vmul.f32 (!%p2193_p11), %v1653_v58, %v1653_v58  ;;  %v3281_v11 = vadd.f32 (!%p2193_p11), %v1684_v60, %v1668_v9  ;;  %v1673_v24 = vmul.f32 (!%p2193_p11), %v1641_v16, %v1641_v16  ;;  %v1661_v40 = vld [vmem:[%s3536_s8 + $0x48] sm:$0xff] (!%p2193_p11)  ;;  %v1663_v29 = vld [vmem:[%s3536_s8 + $0x58] sm:$0xff] (!%p2193_p11) }
 0x17d   : > { %1629 = vst [vmem:[%s3536_s8 + $0x68] sm:$0xff] %v1613_v17  ;;  %1872 = vst [vmem:[%s3537_s9 + $0x2] sm:$0x3f] (!%p2193_p11), %v2514_v20  ;;  %v3291_v18 = vadd.f32 (!%p2193_p11), %v1686_v47, %v1670_v4  ;;  %v3300_v28 = vadd.f32 (!%p2193_p11), %v1687_v12, %v1671_v45  ;;  %v1674_v32 = vmul.f32 (!%p2193_p11), %v1642_v19, %v1642_v19  ;;  %v1650_v10 = vld [vmem:[%s3535_s7 + $0x70] sm:$0xff] (!%p2193_p11)  ;;  %v1651_v5 = vld [vmem:[%s3535_s7 + $0x78] sm:$0xff] (!%p2193_p11) }
 0x17e   : > { %v3283_v15 = vadd.f32 %v1685_v7, %v1669_v43  ;;  %2442 = vrsqrt.f32 %v3281_v11  ;;  %v1675_v23 = vmul.f32 %v1643_v30, %v1643_v30  ;;  %v1676_v2 = vmul.f32 %v1644_v62, %v1644_v62 }
 0x17f   : > { %v1692_v50 = vmul.f32 %v1660_v37, %v1660_v37  ;;  %v1677_v54 = vmul.f32 %v1645_v25, %v1645_v25  ;;  %v1678_v31 = vmul.f32 %v1646_v38, %v1646_v38  ;;  %v1679_v6 = vmul.f32 %v1647_v39, %v1647_v39 }
 0x180   : > { %v1658_v21 = vld [vmem:[%s3536_s8 + $0x30] sm:$0xff]  ;;  %2444 = vrsqrt.f32 %v3283_v15  ;;  %v1693_v42 = vmul.f32 %v1661_v40, %v1661_v40  ;;  %v1694_v14 = vmul.f32 %v1662_v49, %v1662_v49  ;;  %v1695_v17 = vmul.f32 %v1663_v29, %v1663_v29 }
 0x181   : > { %v1656_v8 = vld [vmem:[%s3536_s8 + $0x20] sm:$0xff]  ;;  %v1690_v34 = vmul.f32 %v1658_v21, %v1658_v21  ;;  %2446 = vrsqrt.f32 %v3291_v18  ;;  %v1666_v33 = vld [vmem:[%s3536_s8 + $0x70] sm:$0xff]  ;;  %v1680_v3 = vmul.f32 %v1648_v1, %v1648_v1  ;;  %v1681_v57 = vmul.f32 %v1649_v46, %v1649_v46 }
 0x182   : > { %v1688_v56 = vmul.f32 %v1656_v8, %v1656_v8  ;;  %v1659_v22 = vld [vmem:[%s3536_s8 + $0x38] sm:$0xff]  ;;  %2448 = vrsqrt.f32 %v3300_v28  ;;  %v1664_v63 = vld [vmem:[%s3536_s8 + $0x60] sm:$0xff]  ;;  %v1682_v9 = vmul.f32 %v1650_v10, %v1650_v10  ;;  %v1698_v60 = vmul.f32 %v1666_v33, %v1666_v33 }
 0x183   : > { %v1657_v51 = vld [vmem:[%s3536_s8 + $0x28] sm:$0xff]  ;;  %v1691_v41 = vmul.f32 %v1659_v22, %v1659_v22  ;;  %v3351_v52 = vadd.f32 %v1690_v34, %v1674_v32  ;;  %v1667_v36 = vld [vmem:[%s3536_s8 + $0x78] sm:$0xff]  ;;  %v1696_v58 = vmul.f32 %v1664_v63, %v1664_v63  ;;  %v3369_v43 = vadd.f32 %v1692_v50, %v1676_v2 }
 0x184   : > { %v1689_v26 = vmul.f32 %v1657_v51, %v1657_v51  ;;  %v3309_v35 = vadd.f32 %v1688_v56, %v1672_v53  ;;  %v1665_v27 = vld [vmem:[%s3536_s8 + $0x68] sm:$0xff]  ;;  %v1683_v7 = vmul.f32 %v1651_v5, %v1651_v5  ;;  %v1699_v61 = vmul.f32 %v1667_v36, %v1667_v36 }
 0x185   : > { %v3366_v20 = vadd.f32 %v1691_v41, %v1675_v23  ;;  %v1697_v48 = vmul.f32 %v1665_v27, %v1665_v27  ;;  %v3372_v4 = vadd.f32 %v1693_v42, %v1677_v54  ;;  %v3374_v47 = vadd.f32 %v1694_v14, %v1678_v31 }
 0x186   : > { %v3330_v44 = vadd.f32 %v1689_v26, %v1673_v24  ;;  %2450 = vrsqrt.f32 %v3309_v35  ;;  %v3376_v13 = vadd.f32 %v1695_v17, %v1679_v6  ;;  %v3379_v8 = vadd.f32 %v1696_v58, %v1680_v3 }
 0x187   : > { %v3381_v45 = vadd.f32 %v1697_v48, %v1681_v57  ;;  %v3385_v53 = vadd.f32 %v1698_v60, %v1682_v9  ;;  %vm1718_vm0 = vcmp.eq.f32.partialorder %v3281_v11, inf  ;;  %vm1725_vm1 = vcmp.eq.f32.partialorder %v3283_v15, inf }
 0x188   : > { %2452 = vrsqrt.f32 %v3330_v44  ;;  %v2443_v55 = vpop.eup %2442  ;;  %v3390_v56 = vadd.f32 %v1699_v61, %v1683_v7  ;;  %vm1720_vm2 = vcmp.eq.f32.partialorder %v3281_v11, 0.0  ;;  %v1721_v19 = vand.u32 2147483648, %v3281_v11 }
 0x189   : > { %2454 = vrsqrt.f32 %v3351_v52  ;;  %v1717_v12 = vmul.f32 %v2443_v55, %v3281_v11  ;;  %vm1727_vm3 = vcmp.eq.f32.partialorder %v3283_v15, 0.0  ;;  %v1728_v26 = vand.u32 2147483648, %v3283_v15 }
 0x18a   : > { %v2445_v59 = vpop.eup %2444  ;;  %2456 = vrsqrt.f32 %v3366_v20  ;;  %vm1732_vm4 = vcmp.eq.f32.partialorder %v3291_v18, inf  ;;  %vm1734_vm5 = vcmp.eq.f32.partialorder %v3291_v18, 0.0  ;;  %v1735_v62 = vand.u32 2147483648, %v3291_v18 }
 0x18b   : > { %v2447_v0 = vpop.eup %2446  ;;  %v1724_v16 = vmul.f32 %v2445_v59, %v3283_v15  ;;  %2458 = vrsqrt.f32 %v3369_v43  ;;  %v1719_v30 = vsel %vm1718_vm0, %v3281_v11, %v1717_v12  ;;  %vm1739_vm6 = vcmp.eq.f32.partialorder %v3300_v28, inf }
 0x18c   : > { %v2449_v51 = vpop.eup %2448  ;;  %v1731_v21 = vmul.f32 %v2447_v0, %v3291_v18  ;;  %2460 = vrsqrt.f32 %v3372_v4  ;;  %vm1741_vm7 = vcmp.eq.f32.partialorder %v3300_v28, 0.0  ;;  %v1742_v37 = vand.u32 2147483648, %v3300_v28 }
 0x18d   : > { %v1726_v22 = vsel %vm1725_vm1, %v3283_v15, %v1724_v16  ;;  %v1738_v32 = vmul.f32 %v2449_v51, %v3300_v28  ;;  %2462 = vrsqrt.f32 %v3374_v47  ;;  %vm1746_vm8 = vcmp.eq.f32.partialorder %v3309_v35, inf }
 0x18e   : > { %v1733_v25 = vsel %vm1732_vm4, %v3291_v18, %v1731_v21  ;;  %v1722_v40 = vsel %vm1720_vm2, %v1721_v19, %v1719_v30  ;;  %v1729_v23 = vsel %vm1727_vm3, %v1728_v26, %v1726_v22  ;;  %vm1748_vm9 = vcmp.eq.f32.partialorder %v3309_v35, 0.0 }
 0x18f   : > { %2464 = vrsqrt.f32 %v3376_v13  ;;  %v1740_v41 = vsel %vm1739_vm6, %v3300_v28, %v1738_v32  ;;  %v1749_v1 = vand.u32 2147483648, %v3309_v35  ;;  %vm1753_vm10 = vcmp.eq.f32.partialorder %v3330_v44, inf }
 0x190   : > { %v2451_v24 = vpop.eup %2450  ;;  %v1736_v46 = vsel %vm1734_vm5, %v1735_v62, %v1733_v25  ;;  %vm1755_vm11 = vcmp.eq.f32.partialorder %v3330_v44, 0.0  ;;  %v1756_v63 = vand.u32 2147483648, %v3330_v44  ;;  %2466 = vrsqrt.f32 %v3379_v8 }
 0x191   : > { %v1745_v38 = vmul.f32 %v2451_v24, %v3309_v35  ;;  %vm1760_vm12 = vcmp.eq.f32.partialorder %v3351_v52, inf  ;;  %v1828_v50 = vadd.f32 %v1729_v23, %v1722_v40  ;;  %v1743_v33 = vsel %vm1741_vm7, %v1742_v37, %v1740_v41 }
 0x192   : > { %v2453_v34 = vpop.eup %2452  ;;  %vm1762_vm13 = vcmp.eq.f32.partialorder %v3351_v52, 0.0  ;;  %2468 = vrsqrt.f32 %v3381_v45  ;;  %v1850_v54 = vadd.f32 %v3283_v15, %v3281_v11  ;;  %v1763_v6 = vand.u32 2147483648, %v3351_v52 }
 0x193   : > { %v2455_v39 = vpop.eup %2454  ;;  %v1752_v49 = vmul.f32 %v2453_v34, %v3330_v44  ;;  %v1747_v27 = vsel %vm1746_vm8, %v3309_v35, %v1745_v38  ;;  %v1829_v5 = vadd.f32 %v1828_v50, %v1736_v46  ;;  %vm1767_vm14 = vcmp.eq.f32.partialorder %v3366_v20, inf }
 0x194   : > { %v2457_v29 = vpop.eup %2456  ;;  %v1759_v2 = vmul.f32 %v2455_v39, %v3351_v52  ;;  %v1750_v14 = vsel %vm1748_vm9, %v1749_v1, %v1747_v27  ;;  %2470 = vrsqrt.f32 %v3385_v53  ;;  %v1851_v17 = vadd.f32 %v1850_v54, %v3291_v18 }
 0x195   : > { %v2459_v10 = vpop.eup %2458  ;;  %v1754_v31 = vsel %vm1753_vm10, %v3330_v44, %v1752_v49  ;;  %v1766_v42 = vmul.f32 %v2457_v29, %v3366_v20  ;;  %v1770_v15 = vand.u32 2147483648, %v3366_v20  ;;  %v1830_v3 = vadd.f32 %v1829_v5, %v1743_v33 }
 0x196   : > { %v2461_v36 = vpop.eup %2460  ;;  %v1761_v11 = vsel %vm1760_vm12, %v3351_v52, %v1759_v2  ;;  %v1773_v55 = vmul.f32 %v2459_v10, %v3369_v43  ;;  %v1757_v58 = vsel %vm1755_vm11, %v1756_v63, %v1754_v31  ;;  %vm1774_vm15 = vcmp.eq.f32.partialorder %v3369_v43, inf }
 0x197   : > { %v2463_v57 = vpop.eup %2462  ;;  %2472 = vrsqrt.f32 %v3390_v56  ;;  %v1852_v48 = vadd.f32 %v1851_v17, %v3300_v28  ;;  %v1768_v18 = vsel %vm1767_vm14, %v3366_v20, %v1766_v42  ;;  %vm1769_vm0 = vcmp.eq.f32.partialorder %v3366_v20, 0.0 }
 0x198   : > { %v1780_v59 = vmul.f32 %v2461_v36, %v3372_v4  ;;  %v1831_v9 = vadd.f32 %v1830_v3, %v1750_v14  ;;  %v1764_v7 = vsel %vm1762_vm13, %v1763_v6, %v1761_v11  ;;  %v1777_v61 = vand.u32 2147483648, %v3369_v43 }
 0x199   : > { %v2465_v60 = vpop.eup %2464  ;;  %vm1781_vm1 = vcmp.eq.f32.partialorder %v3372_v4, inf  ;;  %v1853_v0 = vadd.f32 %v1852_v48, %v3309_v35  ;;  %v1775_v12 = vsel %vm1774_vm15, %v3369_v43, %v1773_v55  ;;  %vm1776_vm2 = vcmp.eq.f32.partialorder %v3369_v43, 0.0 }
 0x19a   : > { %v1787_v28 = vmul.f32 %v2463_v57, %v3374_v47  ;;  %v1832_v16 = vadd.f32 %v1831_v9, %v1757_v58  ;;  %v2467_v51 = vpop.eup %2466  ;;  %v1771_v19 = vsel %vm1769_vm0, %v1770_v15, %v1768_v18  ;;  %v1784_v21 = vand.u32 2147483648, %v3372_v4 }
 0x19b   : > { %vm1788_vm3 = vcmp.eq.f32.partialorder %v3374_v47, inf  ;;  %v1854_v24 = vadd.f32 %v1853_v0, %v3330_v44  ;;  %v1782_v26 = vsel %vm1781_vm1, %v3372_v4, %v1780_v59  ;;  %vm1783_vm4 = vcmp.eq.f32.partialorder %v3372_v4, 0.0 }
 0x19c   : > { %v1794_v35 = vmul.f32 %v2465_v60, %v3376_v13  ;;  %v1833_v30 = vadd.f32 %v1832_v16, %v1764_v7  ;;  %v2469_v22 = vpop.eup %2468  ;;  %v1778_v32 = vsel %vm1776_vm2, %v1777_v61, %v1775_v12  ;;  %v1791_v34 = vand.u32 2147483648, %v3374_v47 }
 0x19d   : > { %vm1795_vm5 = vcmp.eq.f32.partialorder %v3376_v13, inf  ;;  %v1855_v62 = vadd.f32 %v1854_v24, %v3351_v52  ;;  %v1789_v25 = vsel %vm1788_vm3, %v3374_v47, %v1787_v28  ;;  %vm1790_vm6 = vcmp.eq.f32.partialorder %v3374_v47, 0.0 }
 0x19e   : > { %v1801_v44 = vmul.f32 %v2467_v51, %v3379_v8  ;;  %v1834_v37 = vadd.f32 %v1833_v30, %v1771_v19  ;;  %v2471_v38 = vpop.eup %2470  ;;  %v1785_v39 = vsel %vm1783_vm4, %v1784_v21, %v1782_v26  ;;  %v1798_v40 = vand.u32 2147483648, %v3376_v13 }
 0x19f   : > { %vm1802_vm7 = vcmp.eq.f32.partialorder %v3379_v8, inf  ;;  %v1856_v23 = vadd.f32 %v1855_v62, %v3366_v20  ;;  %v1796_v41 = vsel %vm1795_vm5, %v3376_v13, %v1794_v35  ;;  %vm1797_vm8 = vcmp.eq.f32.partialorder %v3376_v13, 0.0 }
 0x1a0   : > { %v1808_v52 = vmul.f32 %v2469_v22, %v3381_v45  ;;  %v1835_v1 = vadd.f32 %v1834_v37, %v1778_v32  ;;  %v1792_v29 = vsel %vm1790_vm6, %v1791_v34, %v1789_v25  ;;  %v1805_v46 = vand.u32 2147483648, %v3379_v8 }
 0x1a1   : > { %v2473_v49 = vpop.eup %2472  ;;  %vm1809_vm9 = vcmp.eq.f32.partialorder %v3381_v45, inf  ;;  %v1857_v63 = vadd.f32 %v1856_v23, %v3369_v43  ;;  %v1803_v27 = vsel %vm1802_vm7, %v3379_v8, %v1801_v44  ;;  %vm1804_vm10 = vcmp.eq.f32.partialorder %v3379_v8, 0.0 }
 0x1a2   : > { %v1815_v20 = vmul.f32 %v2471_v38, %v3385_v53  ;;  %v1836_v2 = vadd.f32 %v1835_v1, %v1785_v39  ;;  %v1799_v50 = vsel %vm1797_vm8, %v1798_v40, %v1796_v41  ;;  %v1812_v10 = vand.u32 2147483648, %v3381_v45 }
 0x1a3   : > { %vm1816_vm11 = vcmp.eq.f32.partialorder %v3385_v53, inf  ;;  %v1858_v33 = vadd.f32 %v1857_v63, %v3372_v4  ;;  %v1810_v54 = vsel %vm1809_vm9, %v3381_v45, %v1808_v52  ;;  %vm1811_vm12 = vcmp.eq.f32.partialorder %v3381_v45, 0.0 }
 0x1a4   : > { %v1822_v43 = vmul.f32 %v2473_v49, %v3390_v56  ;;  %v1837_v31 = vadd.f32 %v1836_v2, %v1792_v29  ;;  %v1806_v6 = vsel %vm1804_vm10, %v1805_v46, %v1803_v27  ;;  %v1819_v42 = vand.u32 2147483648, %v3385_v53 }
 0x1a5   : > { %vm1823_vm13 = vcmp.eq.f32.partialorder %v3390_v56, inf  ;;  %v1859_v5 = vadd.f32 %v1858_v33, %v3374_v47  ;;  %v1817_v36 = vsel %vm1816_vm11, %v3385_v53, %v1815_v20  ;;  %vm1818_vm14 = vcmp.eq.f32.partialorder %v3385_v53, 0.0 }
 0x1a6   : > { %v1838_v14 = vadd.f32 %v1837_v31, %v1799_v50  ;;  %v1813_v4 = vsel %vm1811_vm12, %v1812_v10, %v1810_v54  ;;  %v1826_v17 = vand.u32 2147483648, %v3390_v56  ;;  %v1824_v15 = vsel %vm1823_vm13, %v3390_v56, %v1822_v43 }
 0x1a7   : > { %v1860_v11 = vadd.f32 %v1859_v5, %v3376_v13  ;;  %vm1825_vm15 = vcmp.eq.f32.partialorder %v3390_v56, 0.0  ;;  %v1820_v3 = vsel %vm1818_vm14, %v1819_v42, %v1817_v36 }
 0x1a8   : > { %v1839_v55 = vadd.f32 %v1838_v14, %v1806_v6  ;;  %v1827_v47 = vsel %vm1825_vm15, %v1826_v17, %v1824_v15 }
 0x1a9   : > { %v1861_v57 = vadd.f32 %v1860_v11, %v3379_v8 }
 0x1aa   : > { %v1840_v58 = vadd.f32 %v1839_v55, %v1813_v4 }
 0x1ab   : > { %v1862_v48 = vadd.f32 %v1861_v57, %v3381_v45 }
 0x1ac   : > { %v1841_v18 = vadd.f32 %v1840_v58, %v1820_v3 }
 0x1ad   : > { %v1863_v59 = vadd.f32 %v1862_v48, %v3385_v53 }
 0x1ae   : > { %v1842_v9 = vadd.f32 %v1841_v18, %v1827_v47 }
 0x1af   : > { %v1864_v60 = vadd.f32 %v1863_v59, %v3390_v56 }
 0x1b0   : > { %v1843_v7 = vrot.slane %v1842_v9, 4 }
 0x1b1   : > { %v1865_v13 = vrot.slane %v1864_v60, 4 }
 0x1b2   : > { %v1844_v61 = vadd.f32 %v1843_v7, %v1842_v9 }
 0x1b3   : > { %v1866_v0 = vadd.f32 %v1865_v13, %v1864_v60 }
 0x1b4   : > { %v1845_v12 = vrot.slane %v1844_v61, 2 }
 0x1b5   : > { %v1867_v28 = vrot.slane %v1866_v0, 2 }
 0x1b6   : > { %v1846_v16 = vadd.f32 %v1845_v12, %v1844_v61 }
 0x1b7   : > { %v1868_v51 = vadd.f32 %v1867_v28, %v1866_v0 }
 0x1b8   : > { %v1847_v19 = vrot.slane %v1846_v16, 1 }
 0x1b9   : > { %v1869_v8 = vrot.slane %v1868_v51, 1 }
 0x1ba   : > { %v1848_v21 = vadd.f32 %v1847_v19, %v1846_v16 }
 0x1bb   : > { %v1870_v24 = vadd.f32 %v1869_v8, %v1868_v51 }
 0x1bc   : > { %1849 = vst [vmem:[%s3537_s9] sm:$0x1] %v1848_v21 }
 0x1bd   : > { %1871 = vst [vmem:[%s3537_s9 + $0x1] sm:$0x1] %v1870_v24 }
 0x1be PF: > { %s20_s13 = sadd.s32 1, %s2512_s13   ;;  %s3543_s30 = smov %s2500_s10 }
 0x1bf   : > { %p17_p12 = scmp.ge.s32.totalorder %s20_s13, 7   ;;  %s3544_s10 = smov %s2604_s18 }
 0x1c0   : > { %s3545_s11 = smov %s2508_s12  ;;  %s3546_s12 = smov %s3548_s14 }
 0x1c1   :  { %19 = sbr.rel (!%p17_p12) target bundleno = 6 (0x6), region = 220 }

// kernel: resnet_forward.21
= control target key start
LH: loop header
LB: loop body
LE: loop exit
PB: predicated region body
PF: predicated region fallthrough
CT: control target
= control target key end

     0   :  { %s391_s0 = inlined_call_operand.vmem [shape: f32[64,128], index: 0, kind: input, shape index: {}]   ;;  %s392_s1 = inlined_call_operand.vmem [shape: f32[64,128], index: 1, kind: input, shape index: {}]   ;;  %s393_s2 = inlined_call_operand.vmem [shape: f32[1,128], index: 2, kind: input, shape index: {}]   ;;  %s394_s3 = inlined_call_operand.vmem [shape: f32[1,128], index: 3, kind: input, shape index: {}]   ;;  %s395_s4 = inlined_call_operand.vmem [shape: f32[64,128], index: 4, kind: output, shape index: {0}]   ;;  %s396_s5 = inlined_call_operand.vmem [shape: f32[64,128], index: 5, kind: output, shape index: {1}]  }
   0x1   :  { %v212_v0 = vld [vmem:[%s391_s0] sm:$0xff]  ;;  %v226_v4 = vld [vmem:[%s391_s0 + $0x8] sm:$0xff]  ;;  %v240_v8 = vld [vmem:[%s391_s0 + $0x10] sm:$0xff] }
   0x2   :  { %v217_v1 = vld [vmem:[%s392_s1] sm:$0xff]  ;;  %v35_v2 = vmul.f32 %v212_v0, %v212_v0  ;;  %v231_v5 = vld [vmem:[%s392_s1 + $0x8] sm:$0xff]  ;;  %v36_v6 = vmul.f32 %v226_v4, %v226_v4  ;;  %v245_v9 = vld [vmem:[%s392_s1 + $0x10] sm:$0xff]  ;;  %v37_v12 = vmul.f32 %v240_v8, %v240_v8 }
   0x3   :  { %v43_v3 = vmul.f32 %v217_v1, %v217_v1  ;;  %v44_v7 = vmul.f32 %v231_v5, %v231_v5  ;;  %v250_v10 = vld [vmem:[%s391_s0 + $0x18] sm:$0xff]  ;;  %v45_v13 = vmul.f32 %v245_v9, %v245_v9  ;;  %v266_v16 = vld [vmem:[%s391_s0 + $0x20] sm:$0xff]  ;;  %v282_v22 = vld [vmem:[%s391_s0 + $0x28] sm:$0xff] }
   0x4   :  { %v259_v14 = vld [vmem:[%s392_s1 + $0x18] sm:$0xff]  ;;  %v38_v15 = vmul.f32 %v250_v10, %v250_v10  ;;  %v271_v17 = vld [vmem:[%s392_s1 + $0x20] sm:$0xff]  ;;  %v39_v20 = vmul.f32 %v266_v16, %v266_v16  ;;  %v287_v23 = vld [vmem:[%s392_s1 + $0x28] sm:$0xff]  ;;  %v40_v27 = vmul.f32 %v282_v22, %v282_v22 }
   0x5   :  { %v51_v11 = vadd.f32 %v43_v3, %v35_v2  ;;  %v52_v18 = vadd.f32 %v44_v7, %v36_v6  ;;  %v46_v19 = vmul.f32 %v259_v14, %v259_v14  ;;  %v47_v21 = vmul.f32 %v271_v17, %v271_v17  ;;  %v292_v24 = vld [vmem:[%s391_s0 + $0x30] sm:$0xff]  ;;  %v306_v30 = vld [vmem:[%s391_s0 + $0x38] sm:$0xff]  ;;  %v161_v49 = vld [vmem:[%s393_s2] ss:$0 sm:$0xff] }
   0x6   :  { %v53_v26 = vadd.f32 %v45_v13, %v37_v12  ;;  %v48_v28 = vmul.f32 %v287_v23, %v287_v23  ;;  %v301_v29 = vld [vmem:[%s392_s1 + $0x30] sm:$0xff]  ;;  %v41_v34 = vmul.f32 %v292_v24, %v292_v24  ;;  %v313_v35 = vld [vmem:[%s392_s1 + $0x38] sm:$0xff]  ;;  %v42_v41 = vmul.f32 %v306_v30, %v306_v30  ;;  %v162_v53 = vld [vmem:[%s394_s3] ss:$0 sm:$0xff] }
   0x7   :  { %v59_v25 = vadd.f32 1e-12, %v51_v11  ;;  %v60_v31 = vadd.f32 1e-12, %v52_v18  ;;  %v54_v32 = vadd.f32 %v46_v19, %v38_v15  ;;  %v55_v33 = vadd.f32 %v47_v21, %v39_v20 }
   0x8   :  { %v61_v36 = vadd.f32 1e-12, %v53_v26  ;;  %v56_v37 = vadd.f32 %v48_v28, %v40_v27  ;;  %v49_v38 = vmul.f32 %v301_v29, %v301_v29  ;;  %v50_v44 = vmul.f32 %v313_v35, %v313_v35 }
   0x9   :  { %163 = vrsqrt.f32 %v59_v25  ;;  %v62_v39 = vadd.f32 1e-12, %v54_v32  ;;  %v63_v40 = vadd.f32 1e-12, %v55_v33 }
   0xa   :  { %165 = vrsqrt.f32 %v60_v31  ;;  %v64_v42 = vadd.f32 1e-12, %v56_v37  ;;  %v57_v43 = vadd.f32 %v49_v38, %v41_v34  ;;  %v58_v46 = vadd.f32 %v50_v44, %v42_v41 }
   0xb   :  { %167 = vrsqrt.f32 %v61_v36 }
   0xc   :  { %169 = vrsqrt.f32 %v62_v39  ;;  %v65_v45 = vadd.f32 1e-12, %v57_v43  ;;  %v66_v47 = vadd.f32 1e-12, %v58_v46 }
   0xd   :  { %171 = vrsqrt.f32 %v63_v40 }
   0xe   :  { %173 = vrsqrt.f32 %v64_v42 }
   0xf   :  { %175 = vrsqrt.f32 %v65_v45 }
  0x10   :  { %177 = vrsqrt.f32 %v66_v47 }
  0x13   :  { %v164_v48 = vpop.eup %163 }
  0x14   :  { %v166_v50 = vpop.eup %165  ;;  %v75_v51 = vmul.f32 %v164_v48, %v51_v11 }
  0x15   :  { %v168_v52 = vpop.eup %167  ;;  %v76_v54 = vmul.f32 %v166_v50, %v52_v18 }
  0x16   :  { %v170_v55 = vpop.eup %169  ;;  %v90_v56 = vmul.f32 %v161_v49, %v75_v51  ;;  %v77_v57 = vmul.f32 %v168_v52, %v53_v26 }
  0x17   :  { %v172_v58 = vpop.eup %171  ;;  %v91_v59 = vmul.f32 %v161_v49, %v76_v54  ;;  %v78_v60 = vmul.f32 %v170_v55, %v54_v32 }
  0x18   :  { %v174_v61 = vpop.eup %173  ;;  %v105_v62 = vadd.f32 %v162_v53, %v90_v56  ;;  %v92_v63 = vmul.f32 %v161_v49, %v77_v57  ;;  %v79_v2 = vmul.f32 %v172_v58, %v55_v33 }
  0x19   :  { %v176_v3 = vpop.eup %175  ;;  %v106_v6 = vadd.f32 %v162_v53, %v91_v59  ;;  %v93_v7 = vmul.f32 %v161_v49, %v78_v60  ;;  %v80_v11 = vmul.f32 %v174_v61, %v56_v37 }
  0x1a   :  { %v113_v12 = vmul.f32 %v164_v48, %v105_v62  ;;  %v107_v13 = vadd.f32 %v162_v53, %v92_v63  ;;  %v94_v15 = vmul.f32 %v161_v49, %v79_v2  ;;  %v81_v19 = vmul.f32 %v176_v3, %v57_v43  ;;  %v178_v20 = vpop.eup %177 }
  0x1b   :  { %v114_v18 = vmul.f32 %v166_v50, %v106_v6  ;;  %v108_v21 = vadd.f32 %v162_v53, %v93_v7  ;;  %v95_v25 = vmul.f32 %v161_v49, %v80_v11  ;;  %v82_v36 = vmul.f32 %v178_v20, %v58_v46 }
  0x1c   :  { %v121_v26 = vmul.f32 %v113_v12, %v212_v0  ;;  %v115_v27 = vmul.f32 %v168_v52, %v107_v13  ;;  %v109_v28 = vadd.f32 %v162_v53, %v94_v15  ;;  %v96_v31 = vmul.f32 %v161_v49, %v81_v19 }
  0x1d   :  { %v122_v32 = vmul.f32 %v114_v18, %v226_v4  ;;  %v116_v33 = vmul.f32 %v170_v55, %v108_v21  ;;  %v110_v34 = vadd.f32 %v162_v53, %v95_v25  ;;  %v137_v40 = vmul.f32 %v113_v12, %v217_v1 }
  0x1e   :  { %129 = vst [vmem:[%s395_s4] sm:$0xff] %v121_v26  ;;  %v123_v37 = vmul.f32 %v115_v27, %v240_v8  ;;  %v117_v38 = vmul.f32 %v172_v58, %v109_v28  ;;  %v111_v39 = vadd.f32 %v162_v53, %v96_v31  ;;  %v97_v41 = vmul.f32 %v161_v49, %v82_v36 }
  0x1f   :  { %130 = vst [vmem:[%s395_s4 + $0x8] sm:$0xff] %v122_v32  ;;  %v124_v0 = vmul.f32 %v116_v33, %v250_v10  ;;  %v118_v4 = vmul.f32 %v174_v61, %v110_v34  ;;  %v138_v42 = vmul.f32 %v114_v18, %v231_v5  ;;  %145 = vst [vmem:[%s396_s5] sm:$0xff] %v137_v40 }
  0x20   :  { %131 = vst [vmem:[%s395_s4 + $0x10] sm:$0xff] %v123_v37  ;;  %v125_v8 = vmul.f32 %v117_v38, %v266_v16  ;;  %v119_v43 = vmul.f32 %v176_v3, %v111_v39  ;;  %v139_v1 = vmul.f32 %v115_v27, %v245_v9  ;;  %v140_v44 = vmul.f32 %v116_v33, %v259_v14 }
  0x21   :  { %132 = vst [vmem:[%s395_s4 + $0x18] sm:$0xff] %v124_v0  ;;  %v126_v5 = vmul.f32 %v118_v4, %v282_v22  ;;  %v112_v10 = vadd.f32 %v162_v53, %v97_v41  ;;  %146 = vst [vmem:[%s396_s5 + $0x8] sm:$0xff] %v138_v42  ;;  %v141_v16 = vmul.f32 %v117_v38, %v271_v17 }
  0x22   :  { %v142_v45 = vmul.f32 %v118_v4, %v287_v23  ;;  %133 = vst [vmem:[%s395_s4 + $0x20] sm:$0xff] %v125_v8  ;;  %v127_v9 = vmul.f32 %v119_v43, %v292_v24  ;;  %147 = vst [vmem:[%s396_s5 + $0x10] sm:$0xff] %v139_v1  ;;  %v143_v14 = vmul.f32 %v119_v43, %v301_v29 }
  0x23   :  { %148 = vst [vmem:[%s396_s5 + $0x18] sm:$0xff] %v140_v44  ;;  %134 = vst [vmem:[%s395_s4 + $0x28] sm:$0xff] %v126_v5  ;;  %v120_v17 = vmul.f32 %v178_v20, %v112_v10 }
  0x24   :  { %149 = vst [vmem:[%s396_s5 + $0x20] sm:$0xff] %v141_v16  ;;  %150 = vst [vmem:[%s396_s5 + $0x28] sm:$0xff] %v142_v45 }
  0x25   :  { %135 = vst [vmem:[%s395_s4 + $0x30] sm:$0xff] %v127_v9  ;;  %151 = vst [vmem:[%s396_s5 + $0x30] sm:$0xff] %v143_v14  ;;  %v128_v22 = vmul.f32 %v120_v17, %v306_v30  ;;  %v144_v23 = vmul.f32 %v120_v17, %v313_v35 }
  0x27   :  { %136 = vst [vmem:[%s395_s4 + $0x38] sm:$0xff] %v128_v22  ;;  %152 = vst [vmem:[%s396_s5 + $0x38] sm:$0xff] %v144_v23 }

// kernel: resnet_forward.22
= control target key start
LH: loop header
LB: loop body
LE: loop exit
PB: predicated region body
PF: predicated region fallthrough
CT: control target
= control target key end

     0   :  { %s499_s0 = inlined_call_operand.vmem [shape: f32[64,128], index: 0, kind: input, shape index: {}]   ;;  %s500_s1 = inlined_call_operand.vmem [shape: f32[64,128], index: 1, kind: input, shape index: {}]   ;;  %s501_s4 = inlined_call_operand.vmem [shape: f32[64,128], index: 4, kind: input, shape index: {}]   ;;  %s502_s5 = inlined_call_operand.vmem [shape: f32[64,128], index: 5, kind: input, shape index: {}]   ;;  %s503_s2 = inlined_call_operand.vmem [shape: f32[1,128], index: 2, kind: input, shape index: {}]   ;;  %s504_s3 = inlined_call_operand.vmem [shape: f32[1,128], index: 3, kind: input, shape index: {}]   ;;  %s505_s6 = inlined_call_operand.vmem [shape: f32[64,128], index: 6, kind: output, shape index: {0}]   ;;  %s506_s7 = inlined_call_operand.vmem [shape: f32[64,128], index: 7, kind: output, shape index: {1}]  }
   0x1   :  { %v25_v0 = vld [vmem:[%s499_s0] sm:$0xff]  ;;  %v26_v6 = vld [vmem:[%s499_s0 + $0x8] sm:$0xff]  ;;  %v27_v12 = vld [vmem:[%s499_s0 + $0x10] sm:$0xff] }
   0x2   :  { %v33_v1 = vld [vmem:[%s501_s4] sm:$0xff]  ;;  %v34_v7 = vld [vmem:[%s501_s4 + $0x8] sm:$0xff]  ;;  %v35_v13 = vld [vmem:[%s501_s4 + $0x10] sm:$0xff] }
   0x3   :  { %v49_v2 = vld [vmem:[%s500_s1] sm:$0xff]  ;;  %v274_v3 = vadd.f32 %v33_v1, %v25_v0  ;;  %v50_v8 = vld [vmem:[%s500_s1 + $0x8] sm:$0xff]  ;;  %v292_v10 = vadd.f32 %v34_v7, %v26_v6  ;;  %v307_v16 = vadd.f32 %v35_v13, %v27_v12  ;;  %v51_v17 = vld [vmem:[%s500_s1 + $0x10] sm:$0xff] }
   0x4   :  { %v57_v4 = vld [vmem:[%s502_s5] sm:$0xff]  ;;  %v58_v11 = vld [vmem:[%s502_s5 + $0x8] sm:$0xff]  ;;  %v59_v18 = vld [vmem:[%s502_s5 + $0x10] sm:$0xff] }
   0x5   :  { %v279_v5 = vadd.f32 %v57_v4, %v49_v2  ;;  %v73_v9 = vmul.f32 %v274_v3, %v274_v3  ;;  %v305_v15 = vadd.f32 %v58_v11, %v50_v8  ;;  %v28_v19 = vld [vmem:[%s499_s0 + $0x18] sm:$0xff]  ;;  %v74_v20 = vmul.f32 %v292_v10, %v292_v10  ;;  %v29_v29 = vld [vmem:[%s499_s0 + $0x20] sm:$0xff]  ;;  %v30_v36 = vld [vmem:[%s499_s0 + $0x28] sm:$0xff] }
   0x6   :  { %v320_v21 = vadd.f32 %v59_v18, %v51_v17  ;;  %v36_v22 = vld [vmem:[%s501_s4 + $0x18] sm:$0xff]  ;;  %v75_v27 = vmul.f32 %v307_v16, %v307_v16  ;;  %v37_v30 = vld [vmem:[%s501_s4 + $0x20] sm:$0xff]  ;;  %v38_v37 = vld [vmem:[%s501_s4 + $0x28] sm:$0xff] }
   0x7   :  { %v81_v14 = vmul.f32 %v279_v5, %v279_v5  ;;  %v52_v23 = vld [vmem:[%s500_s1 + $0x18] sm:$0xff]  ;;  %v82_v26 = vmul.f32 %v305_v15, %v305_v15  ;;  %v337_v28 = vadd.f32 %v36_v22, %v28_v19  ;;  %v53_v31 = vld [vmem:[%s500_s1 + $0x20] sm:$0xff]  ;;  %v352_v34 = vadd.f32 %v37_v30, %v29_v29  ;;  %v54_v42 = vld [vmem:[%s500_s1 + $0x28] sm:$0xff] }
   0x8   :  { %v60_v24 = vld [vmem:[%s502_s5 + $0x18] sm:$0xff]  ;;  %v83_v32 = vmul.f32 %v320_v21, %v320_v21  ;;  %v61_v35 = vld [vmem:[%s502_s5 + $0x20] sm:$0xff]  ;;  %v62_v43 = vld [vmem:[%s502_s5 + $0x28] sm:$0xff]  ;;  %v381_v48 = vadd.f32 %v38_v37, %v30_v36 }
   0x9   :  { %v331_v25 = vadd.f32 %v81_v14, %v73_v9  ;;  %v350_v33 = vadd.f32 %v60_v24, %v52_v23  ;;  %v90_v39 = vadd.f32 %v82_v26, %v74_v20  ;;  %v76_v40 = vmul.f32 %v337_v28, %v337_v28  ;;  %v31_v44 = vld [vmem:[%s499_s0 + $0x30] sm:$0xff]  ;;  %v32_v55 = vld [vmem:[%s499_s0 + $0x38] sm:$0xff]  ;;  %v207_v22 = vld [vmem:[%s503_s2] ss:$0 sm:$0xff] }
   0xa   :  { %v366_v41 = vadd.f32 %v61_v35, %v53_v31  ;;  %v91_v45 = vadd.f32 %v83_v32, %v75_v27  ;;  %v77_v47 = vmul.f32 %v352_v34, %v352_v34  ;;  %v39_v49 = vld [vmem:[%s501_s4 + $0x30] sm:$0xff]  ;;  %v394_v54 = vadd.f32 %v62_v43, %v54_v42  ;;  %v40_v56 = vld [vmem:[%s501_s4 + $0x38] sm:$0xff]  ;;  %v208_v27 = vld [vmem:[%s504_s3] ss:$0 sm:$0xff] }
   0xb   :  { %v97_v38 = vadd.f32 1e-12, %v331_v25  ;;  %v84_v46 = vmul.f32 %v350_v33, %v350_v33  ;;  %v55_v50 = vld [vmem:[%s500_s1 + $0x30] sm:$0xff]  ;;  %v98_v52 = vadd.f32 1e-12, %v90_v39  ;;  %v78_v59 = vmul.f32 %v381_v48, %v381_v48  ;;  %v56_v61 = vld [vmem:[%s500_s1 + $0x38] sm:$0xff] }
   0xc   :  { %v63_v51 = vld [vmem:[%s502_s5 + $0x30] sm:$0xff]  ;;  %v85_v53 = vmul.f32 %v366_v41, %v366_v41  ;;  %v99_v57 = vadd.f32 1e-12, %v91_v45  ;;  %v404_v60 = vadd.f32 %v39_v49, %v31_v44  ;;  %v64_v62 = vld [vmem:[%s502_s5 + $0x38] sm:$0xff]  ;;  %v86_v0 = vmul.f32 %v394_v54, %v394_v54 }
   0xd   :  { %209 = vrsqrt.f32 %v97_v38  ;;  %v92_v58 = vadd.f32 %v84_v46, %v76_v40  ;;  %v414_v1 = vadd.f32 %v63_v51, %v55_v50  ;;  %v418_v6 = vadd.f32 %v40_v56, %v32_v55 }
   0xe   :  { %211 = vrsqrt.f32 %v98_v52  ;;  %v93_v63 = vadd.f32 %v85_v53, %v77_v47  ;;  %v79_v4 = vmul.f32 %v404_v60, %v404_v60  ;;  %v94_v8 = vadd.f32 %v86_v0, %v78_v59 }
   0xf   :  { %213 = vrsqrt.f32 %v99_v57  ;;  %v100_v2 = vadd.f32 1e-12, %v92_v58  ;;  %v87_v9 = vmul.f32 %v414_v1, %v414_v1  ;;  %v422_v11 = vadd.f32 %v64_v62, %v56_v61 }
  0x10   :  { %v101_v7 = vadd.f32 1e-12, %v93_v63  ;;  %v80_v12 = vmul.f32 %v418_v6, %v418_v6  ;;  %v102_v13 = vadd.f32 1e-12, %v94_v8 }
  0x11   :  { %215 = vrsqrt.f32 %v100_v2  ;;  %v95_v14 = vadd.f32 %v87_v9, %v79_v4  ;;  %v88_v17 = vmul.f32 %v422_v11, %v422_v11 }
  0x12   :  { %217 = vrsqrt.f32 %v101_v7 }
  0x13   :  { %219 = vrsqrt.f32 %v102_v13  ;;  %v103_v18 = vadd.f32 1e-12, %v95_v14  ;;  %v96_v19 = vadd.f32 %v88_v17, %v80_v12 }
  0x15   :  { %221 = vrsqrt.f32 %v103_v18  ;;  %v104_v23 = vadd.f32 1e-12, %v96_v19 }
  0x17   :  { %v210_v20 = vpop.eup %209  ;;  %223 = vrsqrt.f32 %v104_v23 }
  0x18   :  { %v113_v24 = vmul.f32 %v210_v20, %v331_v25  ;;  %v212_v26 = vpop.eup %211 }
  0x19   :  { %v214_v29 = vpop.eup %213  ;;  %v114_v31 = vmul.f32 %v212_v26, %v90_v39 }
  0x1a   :  { %v128_v30 = vmul.f32 %v207_v22, %v113_v24  ;;  %v115_v32 = vmul.f32 %v214_v29, %v91_v45 }
  0x1b   :  { %v216_v35 = vpop.eup %215  ;;  %v129_v37 = vmul.f32 %v207_v22, %v114_v31 }
  0x1c   :  { %v143_v36 = vadd.f32 %v208_v27, %v128_v30  ;;  %v218_v38 = vpop.eup %217  ;;  %v130_v40 = vmul.f32 %v207_v22, %v115_v32  ;;  %v116_v42 = vmul.f32 %v216_v35, %v92_v58 }
  0x1d   :  { %v144_v44 = vadd.f32 %v208_v27, %v129_v37  ;;  %v117_v46 = vmul.f32 %v218_v38, %v93_v63  ;;  %v220_v25 = vpop.eup %219 }
  0x1e   :  { %v151_v43 = vmax.f32 %v143_v36, 0.0  ;;  %v145_v47 = vadd.f32 %v208_v27, %v130_v40  ;;  %v131_v49 = vmul.f32 %v207_v22, %v116_v42  ;;  %v118_v53 = vmul.f32 %v220_v25, %v94_v8 }
  0x1f   :  { %v152_v51 = vmax.f32 %v144_v44, 0.0  ;;  %v132_v52 = vmul.f32 %v207_v22, %v117_v46  ;;  %v222_v55 = vpop.eup %221 }
  0x20   :  { %v159_v50 = vmul.f32 %v210_v20, %v151_v43  ;;  %v153_v56 = vmax.f32 %v145_v47, 0.0  ;;  %v146_v39 = vadd.f32 %v208_v27, %v131_v49  ;;  %v133_v61 = vmul.f32 %v207_v22, %v118_v53 }
  0x21   :  { %v160_v57 = vmul.f32 %v212_v26, %v152_v51  ;;  %v147_v59 = vadd.f32 %v208_v27, %v132_v52  ;;  %v224_v62 = vpop.eup %223  ;;  %v119_v2 = vmul.f32 %v222_v55, %v95_v14 }
  0x22   :  { %v167_v45 = vmul.f32 %v159_v50, %v274_v3  ;;  %v161_v58 = vmul.f32 %v214_v29, %v153_v56  ;;  %v154_v0 = vmax.f32 %v146_v39, 0.0  ;;  %v183_v63 = vmul.f32 %v159_v50, %v279_v5 }
  0x23   :  { %v168_v4 = vmul.f32 %v160_v57, %v292_v10  ;;  %v155_v7 = vmax.f32 %v147_v59, 0.0  ;;  %v148_v8 = vadd.f32 %v208_v27, %v133_v61  ;;  %v120_v9 = vmul.f32 %v224_v62, %v96_v19 }
  0x24   :  { %175 = vst [vmem:[%s505_s6] sm:$0xff] %v167_v45  ;;  %v169_v3 = vmul.f32 %v161_v58, %v307_v16  ;;  %v162_v12 = vmul.f32 %v216_v35, %v154_v0  ;;  %v134_v13 = vmul.f32 %v207_v22, %v119_v2  ;;  %191 = vst [vmem:[%s506_s7] sm:$0xff] %v183_v63 }
  0x25   :  { %v184_v14 = vmul.f32 %v160_v57, %v305_v15  ;;  %176 = vst [vmem:[%s505_s6 + $0x8] sm:$0xff] %v168_v4  ;;  %v163_v5 = vmul.f32 %v218_v38, %v155_v7  ;;  %v156_v17 = vmax.f32 %v148_v8, 0.0  ;;  %v135_v10 = vmul.f32 %v207_v22, %v120_v9 }
  0x26   :  { %v185_v18 = vmul.f32 %v161_v58, %v320_v21  ;;  %177 = vst [vmem:[%s505_s6 + $0x10] sm:$0xff] %v169_v3  ;;  %v170_v16 = vmul.f32 %v162_v12, %v337_v28  ;;  %v149_v19 = vadd.f32 %v208_v27, %v134_v13  ;;  %v186_v15 = vmul.f32 %v162_v12, %v350_v33 }
  0x27   :  { %192 = vst [vmem:[%s506_s7 + $0x8] sm:$0xff] %v184_v14  ;;  %v171_v20 = vmul.f32 %v163_v5, %v352_v34  ;;  %v164_v23 = vmul.f32 %v220_v25, %v156_v17  ;;  %v150_v24 = vadd.f32 %v208_v27, %v135_v10  ;;  %v187_v21 = vmul.f32 %v163_v5, %v366_v41 }
  0x28   :  { %193 = vst [vmem:[%s506_s7 + $0x10] sm:$0xff] %v185_v18  ;;  %178 = vst [vmem:[%s505_s6 + $0x18] sm:$0xff] %v170_v16  ;;  %v157_v28 = vmax.f32 %v149_v19, 0.0 }
  0x29   :  { %194 = vst [vmem:[%s506_s7 + $0x18] sm:$0xff] %v186_v15  ;;  %179 = vst [vmem:[%s505_s6 + $0x20] sm:$0xff] %v171_v20  ;;  %v172_v33 = vmul.f32 %v164_v23, %v381_v48  ;;  %v158_v34 = vmax.f32 %v150_v24, 0.0  ;;  %v188_v41 = vmul.f32 %v164_v23, %v394_v54 }
  0x2a   :  { %195 = vst [vmem:[%s506_s7 + $0x20] sm:$0xff] %v187_v21  ;;  %v165_v22 = vmul.f32 %v222_v55, %v157_v28 }
  0x2b   :  { %180 = vst [vmem:[%s505_s6 + $0x28] sm:$0xff] %v172_v33  ;;  %v166_v26 = vmul.f32 %v224_v62, %v158_v34  ;;  %196 = vst [vmem:[%s506_s7 + $0x28] sm:$0xff] %v188_v41 }
  0x2c   :  { %v173_v27 = vmul.f32 %v165_v22, %v404_v60  ;;  %v189_v48 = vmul.f32 %v165_v22, %v414_v1 }
  0x2d   :  { %v174_v29 = vmul.f32 %v166_v26, %v418_v6  ;;  %v190_v30 = vmul.f32 %v166_v26, %v422_v11 }
  0x2e   :  { %181 = vst [vmem:[%s505_s6 + $0x30] sm:$0xff] %v173_v27  ;;  %197 = vst [vmem:[%s506_s7 + $0x30] sm:$0xff] %v189_v48 }
  0x2f   :  { %182 = vst [vmem:[%s505_s6 + $0x38] sm:$0xff] %v174_v29  ;;  %198 = vst [vmem:[%s506_s7 + $0x38] sm:$0xff] %v190_v30 }

// kernel: resnet_forward.23
= control target key start
LH: loop header
LB: loop body
LE: loop exit
PB: predicated region body
PF: predicated region fallthrough
CT: control target
= control target key end

     0   :  { %s199_s0 = inlined_call_operand.vmem [shape: f32[32,128], index: 0, kind: input, shape index: {}]   ;;  %s200_s1 = inlined_call_operand.vmem [shape: f32[32,128], index: 1, kind: input, shape index: {}]   ;;  %s201_s2 = inlined_call_operand.vmem [shape: f32[1,128], index: 2, kind: input, shape index: {}]   ;;  %s202_s3 = inlined_call_operand.vmem [shape: f32[1,128], index: 3, kind: input, shape index: {}]   ;;  %s203_s4 = inlined_call_operand.vmem [shape: f32[32,128], index: 4, kind: output, shape index: {0}]   ;;  %s204_s5 = inlined_call_operand.vmem [shape: f32[32,128], index: 5, kind: output, shape index: {1}]  }
   0x1   :  { %v19_v0 = vld [vmem:[%s199_s0] sm:$0xff]  ;;  %v20_v4 = vld [vmem:[%s199_s0 + $0x8] sm:$0xff]  ;;  %v21_v8 = vld [vmem:[%s199_s0 + $0x10] sm:$0xff] }
   0x2   :  { %v23_v1 = vld [vmem:[%s200_s1] sm:$0xff]  ;;  %v27_v2 = vmul.f32 %v19_v0, %v19_v0  ;;  %v24_v5 = vld [vmem:[%s200_s1 + $0x8] sm:$0xff]  ;;  %v28_v6 = vmul.f32 %v20_v4, %v20_v4  ;;  %v25_v9 = vld [vmem:[%s200_s1 + $0x10] sm:$0xff]  ;;  %v29_v12 = vmul.f32 %v21_v8, %v21_v8 }
   0x3   :  { %v31_v3 = vmul.f32 %v23_v1, %v23_v1  ;;  %v32_v7 = vmul.f32 %v24_v5, %v24_v5  ;;  %v22_v10 = vld [vmem:[%s199_s0 + $0x18] sm:$0xff]  ;;  %v33_v13 = vmul.f32 %v25_v9, %v25_v9  ;;  %v105_v25 = vld [vmem:[%s201_s2] ss:$0 sm:$0xff] }
   0x4   :  { %v26_v14 = vld [vmem:[%s200_s1 + $0x18] sm:$0xff]  ;;  %v30_v15 = vmul.f32 %v22_v10, %v22_v10  ;;  %v106_v29 = vld [vmem:[%s202_s3] ss:$0 sm:$0xff] }
   0x5   :  { %v35_v11 = vadd.f32 %v31_v3, %v27_v2  ;;  %v36_v16 = vadd.f32 %v32_v7, %v28_v6  ;;  %v34_v17 = vmul.f32 %v26_v14, %v26_v14  ;;  %v37_v19 = vadd.f32 %v33_v13, %v29_v12 }
   0x7   :  { %v39_v18 = vadd.f32 1e-12, %v35_v11  ;;  %v40_v20 = vadd.f32 1e-12, %v36_v16  ;;  %v38_v21 = vadd.f32 %v34_v17, %v30_v15  ;;  %v41_v22 = vadd.f32 1e-12, %v37_v19 }
   0x9   :  { %107 = vrsqrt.f32 %v39_v18  ;;  %v42_v23 = vadd.f32 1e-12, %v38_v21 }
   0xa   :  { %109 = vrsqrt.f32 %v40_v20 }
   0xb   :  { %111 = vrsqrt.f32 %v41_v22 }
   0xc   :  { %113 = vrsqrt.f32 %v42_v23 }
  0x13   :  { %v108_v24 = vpop.eup %107 }
  0x14   :  { %v110_v26 = vpop.eup %109  ;;  %v47_v27 = vmul.f32 %v108_v24, %v35_v11 }
  0x15   :  { %v112_v28 = vpop.eup %111  ;;  %v48_v30 = vmul.f32 %v110_v26, %v36_v16 }
  0x16   :  { %v114_v31 = vpop.eup %113  ;;  %v58_v32 = vmul.f32 %v105_v25, %v47_v27  ;;  %v49_v33 = vmul.f32 %v112_v28, %v37_v19 }
  0x17   :  { %v59_v34 = vmul.f32 %v105_v25, %v48_v30  ;;  %v50_v35 = vmul.f32 %v114_v31, %v38_v21 }
  0x18   :  { %v69_v36 = vadd.f32 %v106_v29, %v58_v32  ;;  %v60_v37 = vmul.f32 %v105_v25, %v49_v33 }
  0x19   :  { %v70_v38 = vadd.f32 %v106_v29, %v59_v34  ;;  %v61_v39 = vmul.f32 %v105_v25, %v50_v35 }
  0x1a   :  { %v73_v40 = vmax.f32 %v69_v36, 0.0  ;;  %v71_v41 = vadd.f32 %v106_v29, %v60_v37 }
  0x1b   :  { %v74_v42 = vmax.f32 %v70_v38, 0.0  ;;  %v72_v43 = vadd.f32 %v106_v29, %v61_v39 }
  0x1c   :  { %v77_v44 = vmul.f32 %v108_v24, %v73_v40  ;;  %v75_v45 = vmax.f32 %v71_v41, 0.0 }
  0x1d   :  { %v78_v46 = vmul.f32 %v110_v26, %v74_v42  ;;  %v76_v47 = vmax.f32 %v72_v43, 0.0 }
  0x1e   :  { %v81_v48 = vmul.f32 %v77_v44, %v19_v0  ;;  %v79_v49 = vmul.f32 %v112_v28, %v75_v45  ;;  %v89_v50 = vmul.f32 %v77_v44, %v23_v1 }
  0x1f   :  { %v82_v51 = vmul.f32 %v78_v46, %v20_v4  ;;  %v80_v52 = vmul.f32 %v114_v31, %v76_v47  ;;  %v90_v53 = vmul.f32 %v78_v46, %v24_v5 }
  0x20   :  { %85 = vst [vmem:[%s203_s4] sm:$0xff] %v81_v48  ;;  %v83_v54 = vmul.f32 %v79_v49, %v21_v8  ;;  %93 = vst [vmem:[%s204_s5] sm:$0xff] %v89_v50  ;;  %v91_v55 = vmul.f32 %v79_v49, %v25_v9 }
  0x21   :  { %86 = vst [vmem:[%s203_s4 + $0x8] sm:$0xff] %v82_v51  ;;  %v84_v56 = vmul.f32 %v80_v52, %v22_v10  ;;  %94 = vst [vmem:[%s204_s5 + $0x8] sm:$0xff] %v90_v53  ;;  %v92_v57 = vmul.f32 %v80_v52, %v26_v14 }
  0x22   :  { %87 = vst [vmem:[%s203_s4 + $0x10] sm:$0xff] %v83_v54  ;;  %95 = vst [vmem:[%s204_s5 + $0x10] sm:$0xff] %v91_v55 }
  0x23   :  { %88 = vst [vmem:[%s203_s4 + $0x18] sm:$0xff] %v84_v56  ;;  %96 = vst [vmem:[%s204_s5 + $0x18] sm:$0xff] %v92_v57 }

// kernel: resnet_forward.24
= control target key start
LH: loop header
LB: loop body
LE: loop exit
PB: predicated region body
PF: predicated region fallthrough
CT: control target
= control target key end

     0   :  { %s195_s0 = inlined_call_operand.vmem [shape: f32[32,128], index: 0, kind: input, shape index: {}]   ;;  %s196_s1 = inlined_call_operand.vmem [shape: f32[32,128], index: 1, kind: input, shape index: {}]   ;;  %s197_s2 = inlined_call_operand.vmem [shape: f32[1,128], index: 2, kind: input, shape index: {}]   ;;  %s198_s3 = inlined_call_operand.vmem [shape: f32[1,128], index: 3, kind: input, shape index: {}]   ;;  %s199_s4 = inlined_call_operand.vmem [shape: f32[32,128], index: 4, kind: output, shape index: {0}]   ;;  %s200_s5 = inlined_call_operand.vmem [shape: f32[32,128], index: 5, kind: output, shape index: {1}]  }
   0x1   :  { %v19_v0 = vld [vmem:[%s195_s0] sm:$0xff]  ;;  %v20_v4 = vld [vmem:[%s195_s0 + $0x8] sm:$0xff]  ;;  %v21_v8 = vld [vmem:[%s195_s0 + $0x10] sm:$0xff] }
   0x2   :  { %v23_v1 = vld [vmem:[%s196_s1] sm:$0xff]  ;;  %v27_v2 = vmul.f32 %v19_v0, %v19_v0  ;;  %v24_v5 = vld [vmem:[%s196_s1 + $0x8] sm:$0xff]  ;;  %v28_v6 = vmul.f32 %v20_v4, %v20_v4  ;;  %v25_v9 = vld [vmem:[%s196_s1 + $0x10] sm:$0xff]  ;;  %v29_v12 = vmul.f32 %v21_v8, %v21_v8 }
   0x3   :  { %v31_v3 = vmul.f32 %v23_v1, %v23_v1  ;;  %v32_v7 = vmul.f32 %v24_v5, %v24_v5  ;;  %v22_v10 = vld [vmem:[%s195_s0 + $0x18] sm:$0xff]  ;;  %v33_v13 = vmul.f32 %v25_v9, %v25_v9  ;;  %v101_v25 = vld [vmem:[%s197_s2] ss:$0 sm:$0xff] }
   0x4   :  { %v26_v14 = vld [vmem:[%s196_s1 + $0x18] sm:$0xff]  ;;  %v30_v15 = vmul.f32 %v22_v10, %v22_v10  ;;  %v102_v29 = vld [vmem:[%s198_s3] ss:$0 sm:$0xff] }
   0x5   :  { %v35_v11 = vadd.f32 %v31_v3, %v27_v2  ;;  %v36_v16 = vadd.f32 %v32_v7, %v28_v6  ;;  %v34_v17 = vmul.f32 %v26_v14, %v26_v14  ;;  %v37_v19 = vadd.f32 %v33_v13, %v29_v12 }
   0x7   :  { %v39_v18 = vadd.f32 1e-12, %v35_v11  ;;  %v40_v20 = vadd.f32 1e-12, %v36_v16  ;;  %v38_v21 = vadd.f32 %v34_v17, %v30_v15  ;;  %v41_v22 = vadd.f32 1e-12, %v37_v19 }
   0x9   :  { %103 = vrsqrt.f32 %v39_v18  ;;  %v42_v23 = vadd.f32 1e-12, %v38_v21 }
   0xa   :  { %105 = vrsqrt.f32 %v40_v20 }
   0xb   :  { %107 = vrsqrt.f32 %v41_v22 }
   0xc   :  { %109 = vrsqrt.f32 %v42_v23 }
  0x13   :  { %v104_v24 = vpop.eup %103 }
  0x14   :  { %v106_v26 = vpop.eup %105  ;;  %v47_v27 = vmul.f32 %v104_v24, %v35_v11 }
  0x15   :  { %v108_v28 = vpop.eup %107  ;;  %v48_v30 = vmul.f32 %v106_v26, %v36_v16 }
  0x16   :  { %v110_v31 = vpop.eup %109  ;;  %v58_v32 = vmul.f32 %v101_v25, %v47_v27  ;;  %v49_v33 = vmul.f32 %v108_v28, %v37_v19 }
  0x17   :  { %v59_v34 = vmul.f32 %v101_v25, %v48_v30  ;;  %v50_v35 = vmul.f32 %v110_v31, %v38_v21 }
  0x18   :  { %v69_v36 = vadd.f32 %v102_v29, %v58_v32  ;;  %v60_v37 = vmul.f32 %v101_v25, %v49_v33 }
  0x19   :  { %v70_v38 = vadd.f32 %v102_v29, %v59_v34  ;;  %v61_v39 = vmul.f32 %v101_v25, %v50_v35 }
  0x1a   :  { %v73_v40 = vmul.f32 %v104_v24, %v69_v36  ;;  %v71_v41 = vadd.f32 %v102_v29, %v60_v37 }
  0x1b   :  { %v74_v42 = vmul.f32 %v106_v26, %v70_v38  ;;  %v72_v43 = vadd.f32 %v102_v29, %v61_v39 }
  0x1c   :  { %v77_v44 = vmul.f32 %v73_v40, %v19_v0  ;;  %v75_v45 = vmul.f32 %v108_v28, %v71_v41  ;;  %v85_v46 = vmul.f32 %v73_v40, %v23_v1 }
  0x1d   :  { %v78_v47 = vmul.f32 %v74_v42, %v20_v4  ;;  %v76_v48 = vmul.f32 %v110_v31, %v72_v43  ;;  %v86_v49 = vmul.f32 %v74_v42, %v24_v5 }
  0x1e   :  { %81 = vst [vmem:[%s199_s4] sm:$0xff] %v77_v44  ;;  %v79_v50 = vmul.f32 %v75_v45, %v21_v8  ;;  %89 = vst [vmem:[%s200_s5] sm:$0xff] %v85_v46  ;;  %v87_v51 = vmul.f32 %v75_v45, %v25_v9 }
  0x1f   :  { %82 = vst [vmem:[%s199_s4 + $0x8] sm:$0xff] %v78_v47  ;;  %v80_v52 = vmul.f32 %v76_v48, %v22_v10  ;;  %90 = vst [vmem:[%s200_s5 + $0x8] sm:$0xff] %v86_v49  ;;  %v88_v53 = vmul.f32 %v76_v48, %v26_v14 }
  0x20   :  { %83 = vst [vmem:[%s199_s4 + $0x10] sm:$0xff] %v79_v50  ;;  %91 = vst [vmem:[%s200_s5 + $0x10] sm:$0xff] %v87_v51 }
  0x21   :  { %84 = vst [vmem:[%s199_s4 + $0x18] sm:$0xff] %v80_v52  ;;  %92 = vst [vmem:[%s200_s5 + $0x18] sm:$0xff] %v88_v53 }

// kernel: resnet_forward.25
= control target key start
LH: loop header
LB: loop body
LE: loop exit
PB: predicated region body
PF: predicated region fallthrough
CT: control target
= control target key end

     0   :  { %s280_s0 = inlined_call_operand.vmem [shape: f32[32,128], index: 0, kind: input, shape index: {}]   ;;  %s281_s1 = inlined_call_operand.vmem [shape: f32[32,128], index: 1, kind: input, shape index: {}]   ;;  %s282_s4 = inlined_call_operand.vmem [shape: f32[32,128], index: 4, kind: input, shape index: {}]   ;;  %s283_s5 = inlined_call_operand.vmem [shape: f32[32,128], index: 5, kind: input, shape index: {}]   ;;  %s284_s2 = inlined_call_operand.vmem [shape: f32[1,128], index: 2, kind: input, shape index: {}]   ;;  %s285_s3 = inlined_call_operand.vmem [shape: f32[1,128], index: 3, kind: input, shape index: {}]   ;;  %s286_s6 = inlined_call_operand.vmem [shape: f32[32,128], index: 6, kind: output, shape index: {0}]   ;;  %s287_s7 = inlined_call_operand.vmem [shape: f32[32,128], index: 7, kind: output, shape index: {1}]  }
   0x1   :  { %v25_v0 = vld [vmem:[%s280_s0] sm:$0xff]  ;;  %v26_v6 = vld [vmem:[%s280_s0 + $0x8] sm:$0xff]  ;;  %v27_v12 = vld [vmem:[%s280_s0 + $0x10] sm:$0xff] }
   0x2   :  { %v29_v1 = vld [vmem:[%s282_s4] sm:$0xff]  ;;  %v30_v7 = vld [vmem:[%s282_s4 + $0x8] sm:$0xff]  ;;  %v31_v13 = vld [vmem:[%s282_s4 + $0x10] sm:$0xff] }
   0x3   :  { %v37_v2 = vld [vmem:[%s281_s1] sm:$0xff]  ;;  %v186_v3 = vadd.f32 %v29_v1, %v25_v0  ;;  %v38_v8 = vld [vmem:[%s281_s1 + $0x8] sm:$0xff]  ;;  %v204_v10 = vadd.f32 %v30_v7, %v26_v6  ;;  %v219_v16 = vadd.f32 %v31_v13, %v27_v12  ;;  %v39_v17 = vld [vmem:[%s281_s1 + $0x10] sm:$0xff] }
   0x4   :  { %v41_v4 = vld [vmem:[%s283_s5] sm:$0xff]  ;;  %v42_v11 = vld [vmem:[%s283_s5 + $0x8] sm:$0xff]  ;;  %v43_v18 = vld [vmem:[%s283_s5 + $0x10] sm:$0xff] }
   0x5   :  { %v191_v5 = vadd.f32 %v41_v4, %v37_v2  ;;  %v49_v9 = vmul.f32 %v186_v3, %v186_v3  ;;  %v217_v15 = vadd.f32 %v42_v11, %v38_v8  ;;  %v28_v19 = vld [vmem:[%s280_s0 + $0x18] sm:$0xff]  ;;  %v50_v20 = vmul.f32 %v204_v10, %v204_v10  ;;  %v127_v41 = vld [vmem:[%s284_s2] ss:$0 sm:$0xff] }
   0x6   :  { %v47_v21 = vadd.f32 %v43_v18, %v39_v17  ;;  %v32_v22 = vld [vmem:[%s282_s4 + $0x18] sm:$0xff]  ;;  %v51_v27 = vmul.f32 %v219_v16, %v219_v16  ;;  %v128_v44 = vld [vmem:[%s285_s3] ss:$0 sm:$0xff] }
   0x7   :  { %v53_v14 = vmul.f32 %v191_v5, %v191_v5  ;;  %v40_v23 = vld [vmem:[%s281_s1 + $0x18] sm:$0xff]  ;;  %v54_v26 = vmul.f32 %v217_v15, %v217_v15  ;;  %v36_v28 = vadd.f32 %v32_v22, %v28_v19 }
   0x8   :  { %v44_v24 = vld [vmem:[%s283_s5 + $0x18] sm:$0xff]  ;;  %v55_v29 = vmul.f32 %v47_v21, %v47_v21 }
   0x9   :  { %v57_v25 = vadd.f32 %v53_v14, %v49_v9  ;;  %v48_v30 = vadd.f32 %v44_v24, %v40_v23  ;;  %v58_v32 = vadd.f32 %v54_v26, %v50_v20  ;;  %v52_v33 = vmul.f32 %v36_v28, %v36_v28 }
   0xa   :  { %v59_v34 = vadd.f32 %v55_v29, %v51_v27 }
   0xb   :  { %v61_v31 = vadd.f32 1e-12, %v57_v25  ;;  %v56_v35 = vmul.f32 %v48_v30, %v48_v30  ;;  %v62_v36 = vadd.f32 1e-12, %v58_v32 }
   0xc   :  { %v63_v37 = vadd.f32 1e-12, %v59_v34 }
   0xd   :  { %129 = vrsqrt.f32 %v61_v31  ;;  %v60_v38 = vadd.f32 %v56_v35, %v52_v33 }
   0xe   :  { %131 = vrsqrt.f32 %v62_v36 }
   0xf   :  { %133 = vrsqrt.f32 %v63_v37  ;;  %v64_v39 = vadd.f32 1e-12, %v60_v38 }
  0x11   :  { %135 = vrsqrt.f32 %v64_v39 }
  0x17   :  { %v130_v40 = vpop.eup %129 }
  0x18   :  { %v69_v42 = vmul.f32 %v130_v40, %v57_v25  ;;  %v132_v43 = vpop.eup %131 }
  0x19   :  { %v134_v45 = vpop.eup %133  ;;  %v70_v47 = vmul.f32 %v132_v43, %v58_v32 }
  0x1a   :  { %v80_v46 = vmul.f32 %v127_v41, %v69_v42  ;;  %v71_v48 = vmul.f32 %v134_v45, %v59_v34 }
  0x1b   :  { %v136_v49 = vpop.eup %135  ;;  %v81_v51 = vmul.f32 %v127_v41, %v70_v47 }
  0x1c   :  { %v91_v50 = vadd.f32 %v128_v44, %v80_v46  ;;  %v82_v52 = vmul.f32 %v127_v41, %v71_v48  ;;  %v72_v53 = vmul.f32 %v136_v49, %v60_v38 }
  0x1d   :  { %v92_v55 = vadd.f32 %v128_v44, %v81_v51 }
  0x1e   :  { %v95_v54 = vmax.f32 %v91_v50, 0.0  ;;  %v93_v56 = vadd.f32 %v128_v44, %v82_v52  ;;  %v83_v57 = vmul.f32 %v127_v41, %v72_v53 }
  0x1f   :  { %v96_v59 = vmax.f32 %v92_v55, 0.0 }
  0x20   :  { %v99_v58 = vmul.f32 %v130_v40, %v95_v54  ;;  %v97_v60 = vmax.f32 %v93_v56, 0.0  ;;  %v94_v61 = vadd.f32 %v128_v44, %v83_v57 }
  0x21   :  { %v100_v63 = vmul.f32 %v132_v43, %v96_v59 }
  0x22   :  { %v103_v62 = vmul.f32 %v99_v58, %v186_v3  ;;  %v111_v0 = vmul.f32 %v99_v58, %v191_v5  ;;  %v101_v1 = vmul.f32 %v134_v45, %v97_v60  ;;  %v98_v2 = vmax.f32 %v94_v61, 0.0 }
  0x23   :  { %v104_v4 = vmul.f32 %v100_v63, %v204_v10  ;;  %v112_v6 = vmul.f32 %v100_v63, %v217_v15 }
  0x24   :  { %107 = vst [vmem:[%s286_s6] sm:$0xff] %v103_v62  ;;  %115 = vst [vmem:[%s287_s7] sm:$0xff] %v111_v0  ;;  %v105_v7 = vmul.f32 %v101_v1, %v219_v16  ;;  %v102_v3 = vmul.f32 %v136_v49, %v98_v2  ;;  %v113_v8 = vmul.f32 %v101_v1, %v47_v21 }
  0x25   :  { %108 = vst [vmem:[%s286_s6 + $0x8] sm:$0xff] %v104_v4  ;;  %116 = vst [vmem:[%s287_s7 + $0x8] sm:$0xff] %v112_v6 }
  0x26   :  { %109 = vst [vmem:[%s286_s6 + $0x10] sm:$0xff] %v105_v7  ;;  %v106_v5 = vmul.f32 %v102_v3, %v36_v28  ;;  %117 = vst [vmem:[%s287_s7 + $0x10] sm:$0xff] %v113_v8  ;;  %v114_v9 = vmul.f32 %v102_v3, %v48_v30 }
  0x28   :  { %110 = vst [vmem:[%s286_s6 + $0x18] sm:$0xff] %v106_v5  ;;  %118 = vst [vmem:[%s287_s7 + $0x18] sm:$0xff] %v114_v9 }

// kernel: resnet_forward.26
= control target key start
LH: loop header
LB: loop body
LE: loop exit
PB: predicated region body
PF: predicated region fallthrough
CT: control target
= control target key end

     0   :  { %v37_v9 = vlaneseq  ;;  %s147_s0 = inlined_call_operand.vmem [shape: f32[8,256], index: 0, kind: input, shape index: {}]   ;;  %s148_s1 = inlined_call_operand.vmem [shape: f32[8,256], index: 1, kind: input, shape index: {}]   ;;  %s149_s2 = inlined_call_operand.vmem [shape: f32[1,256], index: 2, kind: input, shape index: {}]   ;;  %s150_s3 = inlined_call_operand.vmem [shape: f32[1,256], index: 3, kind: input, shape index: {}]   ;;  %s151_s4 = inlined_call_operand.vmem [shape: f32[8,256], index: 4, kind: output, shape index: {0}]   ;;  %s152_s5 = inlined_call_operand.vmem [shape: f32[8,256], index: 5, kind: output, shape index: {1}]  }
   0x1   :  { %v19_v0 = vld [vmem:[%s147_s0] sm:$0xff]  ;;  %v20_v4 = vld [vmem:[%s147_s0 + $0x8] sm:$0xff] }
   0x2   :  { %v21_v1 = vld [vmem:[%s148_s1] sm:$0xff]  ;;  %v23_v2 = vmul.f32 %v19_v0, %v19_v0  ;;  %v22_v5 = vld [vmem:[%s148_s1 + $0x8] sm:$0xff]  ;;  %v24_v6 = vmul.f32 %v20_v4, %v20_v4  ;;  %v38_v13 = vshrl.u32 %v37_v9, 7 }
   0x3   :  { %v25_v3 = vmul.f32 %v21_v1, %v21_v1  ;;  %v26_v7 = vmul.f32 %v22_v5, %v22_v5  ;;  %v35_v15 = vld [vmem:[%s149_s2] sm:$0x3] }
   0x4   :  { %v39_v14 = vsub.s32 0, %v38_v13  ;;  %v43_v16 = vsub.s32 1, %v38_v13  ;;  %v49_v17 = vld [vmem:[%s150_s3] sm:$0x3] }
   0x5   :  { %v27_v8 = vadd.f32 %v25_v3, %v23_v2  ;;  %v28_v10 = vadd.f32 %v26_v7, %v24_v6 }
   0x6   :  { %v40_v18 = vrot.slane %v35_v15, %v39_v14  ;;  %v44_v20 = vrot.slane %v35_v15, %v43_v16  ;;  %v54_v23 = vrot.slane %v49_v17, %v39_v14  ;;  %v58_v25 = vrot.slane %v49_v17, %v43_v16 }
   0x7   :  { %v29_v11 = vadd.f32 1e-12, %v27_v8  ;;  %v30_v12 = vadd.f32 1e-12, %v28_v10 }
   0x9   :  { %83 = vrsqrt.f32 %v29_v11 }
   0xa   :  { %85 = vrsqrt.f32 %v30_v12 }
  0x13   :  { %v84_v19 = vpop.eup %83 }
  0x14   :  { %v86_v21 = vpop.eup %85  ;;  %v33_v22 = vmul.f32 %v84_v19, %v27_v8 }
  0x15   :  { %v34_v24 = vmul.f32 %v86_v21, %v28_v10 }
  0x16   :  { %v47_v26 = vmul.f32 %v40_v18, %v33_v22 }
  0x17   :  { %v48_v27 = vmul.f32 %v44_v20, %v34_v24 }
  0x18   :  { %v61_v28 = vadd.f32 %v54_v23, %v47_v26 }
  0x19   :  { %v62_v29 = vadd.f32 %v58_v25, %v48_v27 }
  0x1a   :  { %v63_v30 = vmax.f32 %v61_v28, 0.0 }
  0x1b   :  { %v64_v31 = vmax.f32 %v62_v29, 0.0 }
  0x1c   :  { %v65_v32 = vmul.f32 %v84_v19, %v63_v30 }
  0x1d   :  { %v66_v33 = vmul.f32 %v86_v21, %v64_v31 }
  0x1e   :  { %v67_v34 = vmul.f32 %v65_v32, %v19_v0  ;;  %v71_v35 = vmul.f32 %v65_v32, %v21_v1 }
  0x1f   :  { %v68_v36 = vmul.f32 %v66_v33, %v20_v4  ;;  %v72_v37 = vmul.f32 %v66_v33, %v22_v5 }
  0x20   :  { %69 = vst [vmem:[%s151_s4] sm:$0xff] %v67_v34  ;;  %73 = vst [vmem:[%s152_s5] sm:$0xff] %v71_v35 }
  0x21   :  { %70 = vst [vmem:[%s151_s4 + $0x8] sm:$0xff] %v68_v36  ;;  %74 = vst [vmem:[%s152_s5 + $0x8] sm:$0xff] %v72_v37 }

// kernel: resnet_forward.27
= control target key start
LH: loop header
LB: loop body
LE: loop exit
PB: predicated region body
PF: predicated region fallthrough
CT: control target
= control target key end

     0   :  { %v37_v9 = vlaneseq  ;;  %s145_s0 = inlined_call_operand.vmem [shape: f32[8,256], index: 0, kind: input, shape index: {}]   ;;  %s146_s1 = inlined_call_operand.vmem [shape: f32[8,256], index: 1, kind: input, shape index: {}]   ;;  %s147_s2 = inlined_call_operand.vmem [shape: f32[1,256], index: 2, kind: input, shape index: {}]   ;;  %s148_s3 = inlined_call_operand.vmem [shape: f32[1,256], index: 3, kind: input, shape index: {}]   ;;  %s149_s4 = inlined_call_operand.vmem [shape: f32[8,256], index: 4, kind: output, shape index: {0}]   ;;  %s150_s5 = inlined_call_operand.vmem [shape: f32[8,256], index: 5, kind: output, shape index: {1}]  }
   0x1   :  { %v19_v0 = vld [vmem:[%s145_s0] sm:$0xff]  ;;  %v20_v4 = vld [vmem:[%s145_s0 + $0x8] sm:$0xff] }
   0x2   :  { %v21_v1 = vld [vmem:[%s146_s1] sm:$0xff]  ;;  %v23_v2 = vmul.f32 %v19_v0, %v19_v0  ;;  %v22_v5 = vld [vmem:[%s146_s1 + $0x8] sm:$0xff]  ;;  %v24_v6 = vmul.f32 %v20_v4, %v20_v4  ;;  %v38_v13 = vshrl.u32 %v37_v9, 7 }
   0x3   :  { %v25_v3 = vmul.f32 %v21_v1, %v21_v1  ;;  %v26_v7 = vmul.f32 %v22_v5, %v22_v5  ;;  %v35_v15 = vld [vmem:[%s147_s2] sm:$0x3] }
   0x4   :  { %v39_v14 = vsub.s32 0, %v38_v13  ;;  %v43_v16 = vsub.s32 1, %v38_v13  ;;  %v49_v17 = vld [vmem:[%s148_s3] sm:$0x3] }
   0x5   :  { %v27_v8 = vadd.f32 %v25_v3, %v23_v2  ;;  %v28_v10 = vadd.f32 %v26_v7, %v24_v6 }
   0x6   :  { %v40_v18 = vrot.slane %v35_v15, %v39_v14  ;;  %v44_v20 = vrot.slane %v35_v15, %v43_v16  ;;  %v54_v23 = vrot.slane %v49_v17, %v39_v14  ;;  %v58_v25 = vrot.slane %v49_v17, %v43_v16 }
   0x7   :  { %v29_v11 = vadd.f32 1e-12, %v27_v8  ;;  %v30_v12 = vadd.f32 1e-12, %v28_v10 }
   0x9   :  { %81 = vrsqrt.f32 %v29_v11 }
   0xa   :  { %83 = vrsqrt.f32 %v30_v12 }
  0x13   :  { %v82_v19 = vpop.eup %81 }
  0x14   :  { %v84_v21 = vpop.eup %83  ;;  %v33_v22 = vmul.f32 %v82_v19, %v27_v8 }
  0x15   :  { %v34_v24 = vmul.f32 %v84_v21, %v28_v10 }
  0x16   :  { %v47_v26 = vmul.f32 %v40_v18, %v33_v22 }
  0x17   :  { %v48_v27 = vmul.f32 %v44_v20, %v34_v24 }
  0x18   :  { %v61_v28 = vadd.f32 %v54_v23, %v47_v26 }
  0x19   :  { %v62_v29 = vadd.f32 %v58_v25, %v48_v27 }
  0x1a   :  { %v63_v30 = vmul.f32 %v82_v19, %v61_v28 }
  0x1b   :  { %v64_v31 = vmul.f32 %v84_v21, %v62_v29 }
  0x1c   :  { %v65_v32 = vmul.f32 %v63_v30, %v19_v0  ;;  %v69_v33 = vmul.f32 %v63_v30, %v21_v1 }
  0x1d   :  { %v66_v34 = vmul.f32 %v64_v31, %v20_v4  ;;  %v70_v35 = vmul.f32 %v64_v31, %v22_v5 }
  0x1e   :  { %67 = vst [vmem:[%s149_s4] sm:$0xff] %v65_v32  ;;  %71 = vst [vmem:[%s150_s5] sm:$0xff] %v69_v33 }
  0x1f   :  { %68 = vst [vmem:[%s149_s4 + $0x8] sm:$0xff] %v66_v34  ;;  %72 = vst [vmem:[%s150_s5 + $0x8] sm:$0xff] %v70_v35 }

// kernel: tile.48
= control target key start
LH: loop header
LB: loop body
LE: loop exit
PB: predicated region body
PF: predicated region fallthrough
CT: control target
= control target key end

     0   :  { %s26_s0 = inlined_call_operand.<no memory space> [shape: f32[], index: 0, kind: input, shape index: {}]   ;;  %s27_s1 = inlined_call_operand.vmem [shape: f32[1,256], index: 1, kind: output, shape index: {}]  }
   0x1   :  { %v2_v0 = vstv %s26_s0 }
   0x2   :  { %3 = vst [vmem:[%s27_s1] sm:$0x1] %v2_v0  ;;  %6 = vst [vmem:[%s27_s1 + $0x1] sm:$0x1] %v2_v0 }

// kernel: resnet_forward.28
= control target key start
LH: loop header
LB: loop body
LE: loop exit
PB: predicated region body
PF: predicated region fallthrough
CT: control target
= control target key end

     0   :  { %v51_v17 = vlaneseq  ;;  %s183_s0 = inlined_call_operand.vmem [shape: f32[8,256], index: 0, kind: input, shape index: {}]   ;;  %s184_s1 = inlined_call_operand.vmem [shape: f32[8,256], index: 1, kind: input, shape index: {}]   ;;  %s185_s4 = inlined_call_operand.vmem [shape: f32[8,256], index: 4, kind: input, shape index: {}]   ;;  %s186_s5 = inlined_call_operand.vmem [shape: f32[8,256], index: 5, kind: input, shape index: {}]   ;;  %s187_s2 = inlined_call_operand.vmem [shape: f32[1,256], index: 2, kind: input, shape index: {}]   ;;  %s188_s3 = inlined_call_operand.vmem [shape: f32[1,256], index: 3, kind: input, shape index: {}]   ;;  %s189_s6 = inlined_call_operand.vmem [shape: f32[8,256], index: 6, kind: output, shape index: {0}]   ;;  %s190_s7 = inlined_call_operand.vmem [shape: f32[8,256], index: 7, kind: output, shape index: {1}]  }
   0x1   :  { %v25_v0 = vld [vmem:[%s183_s0] sm:$0xff]  ;;  %v26_v6 = vld [vmem:[%s183_s0 + $0x8] sm:$0xff] }
   0x2   :  { %v27_v1 = vld [vmem:[%s185_s4] sm:$0xff]  ;;  %v28_v7 = vld [vmem:[%s185_s4 + $0x8] sm:$0xff]  ;;  %v52_v21 = vshrl.u32 %v51_v17, 7 }
   0x3   :  { %v31_v2 = vld [vmem:[%s184_s1] sm:$0xff]  ;;  %v29_v3 = vadd.f32 %v27_v1, %v25_v0  ;;  %v32_v8 = vld [vmem:[%s184_s1 + $0x8] sm:$0xff]  ;;  %v30_v10 = vadd.f32 %v28_v7, %v26_v6 }
   0x4   :  { %v33_v4 = vld [vmem:[%s186_s5] sm:$0xff]  ;;  %v34_v11 = vld [vmem:[%s186_s5 + $0x8] sm:$0xff]  ;;  %v53_v22 = vsub.s32 0, %v52_v21  ;;  %v57_v24 = vsub.s32 1, %v52_v21 }
   0x5   :  { %v35_v5 = vadd.f32 %v33_v4, %v31_v2  ;;  %v37_v9 = vmul.f32 %v29_v3, %v29_v3  ;;  %v36_v13 = vadd.f32 %v34_v11, %v32_v8  ;;  %v38_v14 = vmul.f32 %v30_v10, %v30_v10  ;;  %v49_v23 = vld [vmem:[%s187_s2] sm:$0x3] }
   0x6   :  { %v63_v25 = vld [vmem:[%s188_s3] sm:$0x3]  ;;  %v54_v26 = vrot.slane %v49_v23, %v53_v22  ;;  %v58_v30 = vrot.slane %v49_v23, %v57_v24 }
   0x7   :  { %v39_v12 = vmul.f32 %v35_v5, %v35_v5  ;;  %v40_v16 = vmul.f32 %v36_v13, %v36_v13  ;;  %v68_v29 = vrot.slane %v63_v25, %v53_v22  ;;  %v72_v34 = vrot.slane %v63_v25, %v57_v24 }
   0x9   :  { %v41_v15 = vadd.f32 %v39_v12, %v37_v9  ;;  %v42_v19 = vadd.f32 %v40_v16, %v38_v14 }
   0xb   :  { %v43_v18 = vadd.f32 1e-12, %v41_v15  ;;  %v44_v20 = vadd.f32 1e-12, %v42_v19 }
   0xd   :  { %97 = vrsqrt.f32 %v43_v18 }
   0xe   :  { %99 = vrsqrt.f32 %v44_v20 }
  0x17   :  { %v98_v27 = vpop.eup %97 }
  0x18   :  { %v47_v28 = vmul.f32 %v98_v27, %v41_v15  ;;  %v100_v31 = vpop.eup %99 }
  0x19   :  { %v48_v33 = vmul.f32 %v100_v31, %v42_v19 }
  0x1a   :  { %v61_v32 = vmul.f32 %v54_v26, %v47_v28 }
  0x1b   :  { %v62_v36 = vmul.f32 %v58_v30, %v48_v33 }
  0x1c   :  { %v75_v35 = vadd.f32 %v68_v29, %v61_v32 }
  0x1d   :  { %v76_v38 = vadd.f32 %v72_v34, %v62_v36 }
  0x1e   :  { %v77_v37 = vmax.f32 %v75_v35, 0.0 }
  0x1f   :  { %v78_v40 = vmax.f32 %v76_v38, 0.0 }
  0x20   :  { %v79_v39 = vmul.f32 %v98_v27, %v77_v37 }
  0x21   :  { %v80_v42 = vmul.f32 %v100_v31, %v78_v40 }
  0x22   :  { %v81_v41 = vmul.f32 %v79_v39, %v29_v3  ;;  %v85_v43 = vmul.f32 %v79_v39, %v35_v5 }
  0x23   :  { %v82_v44 = vmul.f32 %v80_v42, %v30_v10  ;;  %v86_v45 = vmul.f32 %v80_v42, %v36_v13 }
  0x24   :  { %83 = vst [vmem:[%s189_s6] sm:$0xff] %v81_v41  ;;  %87 = vst [vmem:[%s190_s7] sm:$0xff] %v85_v43 }
  0x25   :  { %84 = vst [vmem:[%s189_s6 + $0x8] sm:$0xff] %v82_v44  ;;  %88 = vst [vmem:[%s190_s7 + $0x8] sm:$0xff] %v86_v45 }

// kernel: resnet_forward.29
= control target key start
LH: loop header
LB: loop body
LE: loop exit
PB: predicated region body
PF: predicated region fallthrough
CT: control target
= control target key end

     0   :  { %v53_v13 = vlaneseq  ;;  %s267_s0 = inlined_call_operand.vmem [shape: f32[8,512], index: 0, kind: input, shape index: {}]   ;;  %s268_s1 = inlined_call_operand.vmem [shape: f32[8,512], index: 1, kind: input, shape index: {}]   ;;  %s269_s2 = inlined_call_operand.vmem [shape: f32[1,512], index: 2, kind: input, shape index: {}]   ;;  %s270_s3 = inlined_call_operand.vmem [shape: f32[1,512], index: 3, kind: input, shape index: {}]   ;;  %s271_s4 = inlined_call_operand.vmem [shape: f32[8,512], index: 4, kind: output, shape index: {0}]   ;;  %s272_s5 = inlined_call_operand.vmem [shape: f32[8,512], index: 5, kind: output, shape index: {1}]  }
   0x1   :  { %v176_v0 = vld [vmem:[%s267_s0] sm:$0xff]  ;;  %v190_v4 = vld [vmem:[%s267_s0 + $0x8] sm:$0xff]  ;;  %v204_v8 = vld [vmem:[%s267_s0 + $0x10] sm:$0xff] }
   0x2   :  { %v181_v1 = vld [vmem:[%s268_s1] sm:$0xff]  ;;  %v27_v2 = vmul.f32 %v176_v0, %v176_v0  ;;  %v195_v5 = vld [vmem:[%s268_s1 + $0x8] sm:$0xff]  ;;  %v28_v6 = vmul.f32 %v190_v4, %v190_v4  ;;  %v209_v9 = vld [vmem:[%s268_s1 + $0x10] sm:$0xff]  ;;  %v29_v12 = vmul.f32 %v204_v8, %v204_v8  ;;  %v54_v22 = vshrl.u32 %v53_v13, 7 }
   0x3   :  { %v31_v3 = vmul.f32 %v181_v1, %v181_v1  ;;  %v32_v7 = vmul.f32 %v195_v5, %v195_v5  ;;  %v214_v10 = vld [vmem:[%s267_s0 + $0x18] sm:$0xff]  ;;  %v33_v15 = vmul.f32 %v209_v9, %v209_v9  ;;  %v51_v27 = vld [vmem:[%s269_s2] sm:$0xf] }
   0x4   :  { %v223_v16 = vld [vmem:[%s268_s1 + $0x18] sm:$0xff]  ;;  %v30_v18 = vmul.f32 %v214_v10, %v214_v10  ;;  %v55_v26 = vsub.s32 0, %v54_v22  ;;  %v59_v28 = vsub.s32 1, %v54_v22  ;;  %v77_v29 = vld [vmem:[%s270_s3] sm:$0xf]  ;;  %v63_v30 = vsub.s32 2, %v54_v22 }
   0x5   :  { %v35_v11 = vadd.f32 %v31_v3, %v27_v2  ;;  %v36_v14 = vadd.f32 %v32_v7, %v28_v6  ;;  %v37_v20 = vadd.f32 %v33_v15, %v29_v12  ;;  %v34_v21 = vmul.f32 %v223_v16, %v223_v16 }
   0x6   :  { %v56_v31 = vrot.slane %v51_v27, %v55_v26  ;;  %v60_v33 = vrot.slane %v51_v27, %v59_v28  ;;  %v82_v36 = vrot.slane %v77_v29, %v55_v26  ;;  %v67_v37 = vsub.s32 3, %v54_v22 }
   0x7   :  { %v39_v17 = vadd.f32 1e-12, %v35_v11  ;;  %v40_v19 = vadd.f32 1e-12, %v36_v14  ;;  %v41_v23 = vadd.f32 1e-12, %v37_v20  ;;  %v38_v24 = vadd.f32 %v34_v21, %v30_v18 }
   0x8   :  { %v86_v39 = vrot.slane %v77_v29, %v59_v28  ;;  %v64_v40 = vrot.slane %v51_v27, %v63_v30  ;;  %v90_v45 = vrot.slane %v77_v29, %v63_v30  ;;  %v68_v47 = vrot.slane %v51_v27, %v67_v37 }
   0x9   :  { %135 = vrsqrt.f32 %v39_v17  ;;  %v42_v25 = vadd.f32 1e-12, %v38_v24  ;;  %v94_v53 = vrot.slane %v77_v29, %v67_v37 }
   0xa   :  { %137 = vrsqrt.f32 %v40_v19 }
   0xb   :  { %139 = vrsqrt.f32 %v41_v23 }
   0xc   :  { %141 = vrsqrt.f32 %v42_v25 }
  0x13   :  { %v136_v32 = vpop.eup %135 }
  0x14   :  { %v138_v34 = vpop.eup %137  ;;  %v47_v35 = vmul.f32 %v136_v32, %v35_v11 }
  0x15   :  { %v48_v38 = vmul.f32 %v138_v34, %v36_v14  ;;  %v140_v41 = vpop.eup %139 }
  0x16   :  { %v73_v42 = vmul.f32 %v56_v31, %v47_v35  ;;  %v49_v44 = vmul.f32 %v140_v41, %v37_v20  ;;  %v142_v48 = vpop.eup %141 }
  0x17   :  { %v74_v43 = vmul.f32 %v60_v33, %v48_v38  ;;  %v50_v52 = vmul.f32 %v142_v48, %v38_v24 }
  0x18   :  { %v99_v46 = vadd.f32 %v82_v36, %v73_v42  ;;  %v75_v50 = vmul.f32 %v64_v40, %v49_v44 }
  0x19   :  { %v100_v49 = vadd.f32 %v86_v39, %v74_v43  ;;  %v76_v57 = vmul.f32 %v68_v47, %v50_v52 }
  0x1a   :  { %v103_v51 = vmax.f32 %v99_v46, 0.0  ;;  %v101_v55 = vadd.f32 %v90_v45, %v75_v50 }
  0x1b   :  { %v104_v54 = vmax.f32 %v100_v49, 0.0  ;;  %v102_v61 = vadd.f32 %v94_v53, %v76_v57 }
  0x1c   :  { %v107_v56 = vmul.f32 %v136_v32, %v103_v51  ;;  %v105_v59 = vmax.f32 %v101_v55, 0.0 }
  0x1d   :  { %v108_v58 = vmul.f32 %v138_v34, %v104_v54  ;;  %v106_v6 = vmax.f32 %v102_v61, 0.0 }
  0x1e   :  { %v111_v60 = vmul.f32 %v107_v56, %v176_v0  ;;  %v119_v62 = vmul.f32 %v107_v56, %v181_v1  ;;  %v109_v2 = vmul.f32 %v140_v41, %v105_v59 }
  0x1f   :  { %v112_v63 = vmul.f32 %v108_v58, %v190_v4  ;;  %v120_v3 = vmul.f32 %v108_v58, %v195_v5  ;;  %v110_v4 = vmul.f32 %v142_v48, %v106_v6 }
  0x20   :  { %115 = vst [vmem:[%s271_s4] sm:$0xff] %v111_v60  ;;  %123 = vst [vmem:[%s272_s5] sm:$0xff] %v119_v62  ;;  %v113_v0 = vmul.f32 %v109_v2, %v204_v8  ;;  %v121_v1 = vmul.f32 %v109_v2, %v209_v9 }
  0x21   :  { %116 = vst [vmem:[%s271_s4 + $0x8] sm:$0xff] %v112_v63  ;;  %124 = vst [vmem:[%s272_s5 + $0x8] sm:$0xff] %v120_v3  ;;  %v114_v5 = vmul.f32 %v110_v4, %v214_v10  ;;  %v122_v7 = vmul.f32 %v110_v4, %v223_v16 }
  0x22   :  { %117 = vst [vmem:[%s271_s4 + $0x10] sm:$0xff] %v113_v0  ;;  %125 = vst [vmem:[%s272_s5 + $0x10] sm:$0xff] %v121_v1 }
  0x23   :  { %118 = vst [vmem:[%s271_s4 + $0x18] sm:$0xff] %v114_v5  ;;  %126 = vst [vmem:[%s272_s5 + $0x18] sm:$0xff] %v122_v7 }

// kernel: resnet_forward.30
= control target key start
LH: loop header
LB: loop body
LE: loop exit
PB: predicated region body
PF: predicated region fallthrough
CT: control target
= control target key end

     0   :  { %v53_v13 = vlaneseq  ;;  %s263_s0 = inlined_call_operand.vmem [shape: f32[8,512], index: 0, kind: input, shape index: {}]   ;;  %s264_s1 = inlined_call_operand.vmem [shape: f32[8,512], index: 1, kind: input, shape index: {}]   ;;  %s265_s2 = inlined_call_operand.vmem [shape: f32[1,512], index: 2, kind: input, shape index: {}]   ;;  %s266_s3 = inlined_call_operand.vmem [shape: f32[1,512], index: 3, kind: input, shape index: {}]   ;;  %s267_s4 = inlined_call_operand.vmem [shape: f32[8,512], index: 4, kind: output, shape index: {0}]   ;;  %s268_s5 = inlined_call_operand.vmem [shape: f32[8,512], index: 5, kind: output, shape index: {1}]  }
   0x1   :  { %v172_v0 = vld [vmem:[%s263_s0] sm:$0xff]  ;;  %v186_v4 = vld [vmem:[%s263_s0 + $0x8] sm:$0xff]  ;;  %v200_v8 = vld [vmem:[%s263_s0 + $0x10] sm:$0xff] }
   0x2   :  { %v177_v1 = vld [vmem:[%s264_s1] sm:$0xff]  ;;  %v27_v2 = vmul.f32 %v172_v0, %v172_v0  ;;  %v191_v5 = vld [vmem:[%s264_s1 + $0x8] sm:$0xff]  ;;  %v28_v6 = vmul.f32 %v186_v4, %v186_v4  ;;  %v205_v9 = vld [vmem:[%s264_s1 + $0x10] sm:$0xff]  ;;  %v29_v12 = vmul.f32 %v200_v8, %v200_v8  ;;  %v54_v22 = vshrl.u32 %v53_v13, 7 }
   0x3   :  { %v31_v3 = vmul.f32 %v177_v1, %v177_v1  ;;  %v32_v7 = vmul.f32 %v191_v5, %v191_v5  ;;  %v210_v10 = vld [vmem:[%s263_s0 + $0x18] sm:$0xff]  ;;  %v33_v15 = vmul.f32 %v205_v9, %v205_v9  ;;  %v51_v27 = vld [vmem:[%s265_s2] sm:$0xf] }
   0x4   :  { %v219_v16 = vld [vmem:[%s264_s1 + $0x18] sm:$0xff]  ;;  %v30_v18 = vmul.f32 %v210_v10, %v210_v10  ;;  %v55_v26 = vsub.s32 0, %v54_v22  ;;  %v59_v28 = vsub.s32 1, %v54_v22  ;;  %v77_v29 = vld [vmem:[%s266_s3] sm:$0xf]  ;;  %v63_v30 = vsub.s32 2, %v54_v22 }
   0x5   :  { %v35_v11 = vadd.f32 %v31_v3, %v27_v2  ;;  %v36_v14 = vadd.f32 %v32_v7, %v28_v6  ;;  %v37_v20 = vadd.f32 %v33_v15, %v29_v12  ;;  %v34_v21 = vmul.f32 %v219_v16, %v219_v16 }
   0x6   :  { %v56_v31 = vrot.slane %v51_v27, %v55_v26  ;;  %v60_v33 = vrot.slane %v51_v27, %v59_v28  ;;  %v82_v36 = vrot.slane %v77_v29, %v55_v26  ;;  %v67_v37 = vsub.s32 3, %v54_v22 }
   0x7   :  { %v39_v17 = vadd.f32 1e-12, %v35_v11  ;;  %v40_v19 = vadd.f32 1e-12, %v36_v14  ;;  %v41_v23 = vadd.f32 1e-12, %v37_v20  ;;  %v38_v24 = vadd.f32 %v34_v21, %v30_v18 }
   0x8   :  { %v86_v39 = vrot.slane %v77_v29, %v59_v28  ;;  %v64_v40 = vrot.slane %v51_v27, %v63_v30  ;;  %v90_v45 = vrot.slane %v77_v29, %v63_v30  ;;  %v68_v47 = vrot.slane %v51_v27, %v67_v37 }
   0x9   :  { %131 = vrsqrt.f32 %v39_v17  ;;  %v42_v25 = vadd.f32 1e-12, %v38_v24  ;;  %v94_v53 = vrot.slane %v77_v29, %v67_v37 }
   0xa   :  { %133 = vrsqrt.f32 %v40_v19 }
   0xb   :  { %135 = vrsqrt.f32 %v41_v23 }
   0xc   :  { %137 = vrsqrt.f32 %v42_v25 }
  0x13   :  { %v132_v32 = vpop.eup %131 }
  0x14   :  { %v134_v34 = vpop.eup %133  ;;  %v47_v35 = vmul.f32 %v132_v32, %v35_v11 }
  0x15   :  { %v48_v38 = vmul.f32 %v134_v34, %v36_v14  ;;  %v136_v41 = vpop.eup %135 }
  0x16   :  { %v73_v42 = vmul.f32 %v56_v31, %v47_v35  ;;  %v49_v44 = vmul.f32 %v136_v41, %v37_v20  ;;  %v138_v48 = vpop.eup %137 }
  0x17   :  { %v74_v43 = vmul.f32 %v60_v33, %v48_v38  ;;  %v50_v52 = vmul.f32 %v138_v48, %v38_v24 }
  0x18   :  { %v99_v46 = vadd.f32 %v82_v36, %v73_v42  ;;  %v75_v50 = vmul.f32 %v64_v40, %v49_v44 }
  0x19   :  { %v100_v49 = vadd.f32 %v86_v39, %v74_v43  ;;  %v76_v57 = vmul.f32 %v68_v47, %v50_v52 }
  0x1a   :  { %v103_v51 = vmul.f32 %v132_v32, %v99_v46  ;;  %v101_v55 = vadd.f32 %v90_v45, %v75_v50 }
  0x1b   :  { %v104_v54 = vmul.f32 %v134_v34, %v100_v49  ;;  %v102_v62 = vadd.f32 %v94_v53, %v76_v57 }
  0x1c   :  { %v107_v56 = vmul.f32 %v103_v51, %v172_v0  ;;  %v115_v58 = vmul.f32 %v103_v51, %v177_v1  ;;  %v105_v60 = vmul.f32 %v136_v41, %v101_v55 }
  0x1d   :  { %v108_v59 = vmul.f32 %v104_v54, %v186_v4  ;;  %v116_v61 = vmul.f32 %v104_v54, %v191_v5  ;;  %v106_v1 = vmul.f32 %v138_v48, %v102_v62 }
  0x1e   :  { %111 = vst [vmem:[%s267_s4] sm:$0xff] %v107_v56  ;;  %119 = vst [vmem:[%s268_s5] sm:$0xff] %v115_v58  ;;  %v109_v63 = vmul.f32 %v105_v60, %v200_v8  ;;  %v117_v0 = vmul.f32 %v105_v60, %v205_v9 }
  0x1f   :  { %112 = vst [vmem:[%s267_s4 + $0x8] sm:$0xff] %v108_v59  ;;  %120 = vst [vmem:[%s268_s5 + $0x8] sm:$0xff] %v116_v61  ;;  %v110_v2 = vmul.f32 %v106_v1, %v210_v10  ;;  %v118_v3 = vmul.f32 %v106_v1, %v219_v16 }
  0x20   :  { %113 = vst [vmem:[%s267_s4 + $0x10] sm:$0xff] %v109_v63  ;;  %121 = vst [vmem:[%s268_s5 + $0x10] sm:$0xff] %v117_v0 }
  0x21   :  { %114 = vst [vmem:[%s267_s4 + $0x18] sm:$0xff] %v110_v2  ;;  %122 = vst [vmem:[%s268_s5 + $0x18] sm:$0xff] %v118_v3 }

// kernel: tile.46
= control target key start
LH: loop header
LB: loop body
LE: loop exit
PB: predicated region body
PF: predicated region fallthrough
CT: control target
= control target key end

     0   :  { %s38_s0 = inlined_call_operand.<no memory space> [shape: f32[], index: 0, kind: input, shape index: {}]   ;;  %s39_s1 = inlined_call_operand.vmem [shape: f32[1,512], index: 1, kind: output, shape index: {}]  }
   0x1   :  { %v2_v0 = vstv %s38_s0 }
   0x2   :  { %3 = vst [vmem:[%s39_s1] sm:$0x1] %v2_v0  ;;  %10 = vst [vmem:[%s39_s1 + $0x1] sm:$0x1] %v2_v0 }
   0x3   :  { %11 = vst [vmem:[%s39_s1 + $0x2] sm:$0x1] %v2_v0  ;;  %12 = vst [vmem:[%s39_s1 + $0x3] sm:$0x1] %v2_v0 }

// kernel: resnet_forward.31
= control target key start
LH: loop header
LB: loop body
LE: loop exit
PB: predicated region body
PF: predicated region fallthrough
CT: control target
= control target key end

     0   :  { %v75_v27 = vlaneseq  ;;  %s323_s0 = inlined_call_operand.vmem [shape: f32[8,512], index: 0, kind: input, shape index: {}]   ;;  %s324_s1 = inlined_call_operand.vmem [shape: f32[8,512], index: 1, kind: input, shape index: {}]   ;;  %s325_s4 = inlined_call_operand.vmem [shape: f32[8,512], index: 4, kind: input, shape index: {}]   ;;  %s326_s5 = inlined_call_operand.vmem [shape: f32[8,512], index: 5, kind: input, shape index: {}]   ;;  %s327_s2 = inlined_call_operand.vmem [shape: f32[1,512], index: 2, kind: input, shape index: {}]   ;;  %s328_s3 = inlined_call_operand.vmem [shape: f32[1,512], index: 3, kind: input, shape index: {}]   ;;  %s329_s6 = inlined_call_operand.vmem [shape: f32[8,512], index: 6, kind: output, shape index: {0}]   ;;  %s330_s7 = inlined_call_operand.vmem [shape: f32[8,512], index: 7, kind: output, shape index: {1}]  }
   0x1   :  { %v25_v0 = vld [vmem:[%s323_s0] sm:$0xff]  ;;  %v26_v6 = vld [vmem:[%s323_s0 + $0x8] sm:$0xff]  ;;  %v27_v12 = vld [vmem:[%s323_s0 + $0x10] sm:$0xff] }
   0x2   :  { %v29_v1 = vld [vmem:[%s325_s4] sm:$0xff]  ;;  %v30_v7 = vld [vmem:[%s325_s4 + $0x8] sm:$0xff]  ;;  %v31_v13 = vld [vmem:[%s325_s4 + $0x10] sm:$0xff]  ;;  %v76_v38 = vshrl.u32 %v75_v27, 7 }
   0x3   :  { %v37_v2 = vld [vmem:[%s324_s1] sm:$0xff]  ;;  %v214_v3 = vadd.f32 %v29_v1, %v25_v0  ;;  %v38_v8 = vld [vmem:[%s324_s1 + $0x8] sm:$0xff]  ;;  %v232_v10 = vadd.f32 %v30_v7, %v26_v6  ;;  %v247_v16 = vadd.f32 %v31_v13, %v27_v12  ;;  %v39_v17 = vld [vmem:[%s324_s1 + $0x10] sm:$0xff] }
   0x4   :  { %v41_v4 = vld [vmem:[%s326_s5] sm:$0xff]  ;;  %v42_v11 = vld [vmem:[%s326_s5 + $0x8] sm:$0xff]  ;;  %v43_v18 = vld [vmem:[%s326_s5 + $0x10] sm:$0xff]  ;;  %v77_v42 = vsub.s32 0, %v76_v38  ;;  %v81_v44 = vsub.s32 1, %v76_v38  ;;  %v85_v47 = vsub.s32 2, %v76_v38 }
   0x5   :  { %v219_v5 = vadd.f32 %v41_v4, %v37_v2  ;;  %v49_v9 = vmul.f32 %v214_v3, %v214_v3  ;;  %v245_v15 = vadd.f32 %v42_v11, %v38_v8  ;;  %v28_v19 = vld [vmem:[%s323_s0 + $0x18] sm:$0xff]  ;;  %v50_v20 = vmul.f32 %v232_v10, %v232_v10  ;;  %v73_v43 = vld [vmem:[%s327_s2] sm:$0xf] }
   0x6   :  { %v32_v21 = vld [vmem:[%s325_s4 + $0x18] sm:$0xff]  ;;  %v271_v26 = vadd.f32 %v43_v18, %v39_v17  ;;  %v51_v28 = vmul.f32 %v247_v16, %v247_v16  ;;  %v99_v45 = vld [vmem:[%s328_s3] sm:$0xf]  ;;  %v78_v46 = vrot.slane %v73_v43, %v77_v42  ;;  %v82_v51 = vrot.slane %v73_v43, %v81_v44 }
   0x7   :  { %v53_v14 = vmul.f32 %v219_v5, %v219_v5  ;;  %v40_v22 = vld [vmem:[%s324_s1 + $0x18] sm:$0xff]  ;;  %v54_v25 = vmul.f32 %v245_v15, %v245_v15  ;;  %v275_v29 = vadd.f32 %v32_v21, %v28_v19  ;;  %v104_v50 = vrot.slane %v99_v45, %v77_v42 }
   0x8   :  { %v44_v23 = vld [vmem:[%s326_s5 + $0x18] sm:$0xff]  ;;  %v55_v32 = vmul.f32 %v271_v26, %v271_v26  ;;  %v89_v52 = vsub.s32 3, %v76_v38  ;;  %v108_v56 = vrot.slane %v99_v45, %v81_v44  ;;  %v86_v57 = vrot.slane %v73_v43, %v85_v47 }
   0x9   :  { %v57_v24 = vadd.f32 %v53_v14, %v49_v9  ;;  %v58_v31 = vadd.f32 %v54_v25, %v50_v20  ;;  %v279_v33 = vadd.f32 %v44_v23, %v40_v22  ;;  %v52_v34 = vmul.f32 %v275_v29, %v275_v29 }
   0xa   :  { %v59_v36 = vadd.f32 %v55_v32, %v51_v28  ;;  %v112_v59 = vrot.slane %v99_v45, %v85_v47  ;;  %v90_v63 = vrot.slane %v73_v43, %v89_v52  ;;  %v116_v1 = vrot.slane %v99_v45, %v89_v52 }
   0xb   :  { %v61_v30 = vadd.f32 1e-12, %v57_v24  ;;  %v62_v35 = vadd.f32 1e-12, %v58_v31  ;;  %v56_v37 = vmul.f32 %v279_v33, %v279_v33 }
   0xc   :  { %v63_v39 = vadd.f32 1e-12, %v59_v36 }
   0xd   :  { %157 = vrsqrt.f32 %v61_v30  ;;  %v60_v40 = vadd.f32 %v56_v37, %v52_v34 }
   0xe   :  { %159 = vrsqrt.f32 %v62_v35 }
   0xf   :  { %161 = vrsqrt.f32 %v63_v39  ;;  %v64_v41 = vadd.f32 1e-12, %v60_v40 }
  0x11   :  { %163 = vrsqrt.f32 %v64_v41 }
  0x17   :  { %v158_v48 = vpop.eup %157 }
  0x18   :  { %v69_v49 = vmul.f32 %v158_v48, %v57_v24  ;;  %v160_v53 = vpop.eup %159 }
  0x19   :  { %v70_v55 = vmul.f32 %v160_v53, %v58_v31  ;;  %v162_v58 = vpop.eup %161 }
  0x1a   :  { %v95_v54 = vmul.f32 %v78_v46, %v69_v49  ;;  %v71_v62 = vmul.f32 %v162_v58, %v59_v36 }
  0x1b   :  { %v96_v61 = vmul.f32 %v82_v51, %v70_v55  ;;  %v164_v0 = vpop.eup %163 }
  0x1c   :  { %v121_v60 = vadd.f32 %v104_v50, %v95_v54  ;;  %v97_v6 = vmul.f32 %v86_v57, %v71_v62  ;;  %v72_v7 = vmul.f32 %v164_v0, %v60_v40 }
  0x1d   :  { %v122_v4 = vadd.f32 %v108_v56, %v96_v61 }
  0x1e   :  { %v125_v2 = vmax.f32 %v121_v60, 0.0  ;;  %v123_v11 = vadd.f32 %v112_v59, %v97_v6  ;;  %v98_v12 = vmul.f32 %v90_v63, %v72_v7 }
  0x1f   :  { %v126_v9 = vmax.f32 %v122_v4, 0.0 }
  0x20   :  { %v129_v8 = vmul.f32 %v158_v48, %v125_v2  ;;  %v127_v17 = vmax.f32 %v123_v11, 0.0  ;;  %v124_v18 = vadd.f32 %v116_v1, %v98_v12 }
  0x21   :  { %v130_v14 = vmul.f32 %v160_v53, %v126_v9 }
  0x22   :  { %v133_v13 = vmul.f32 %v129_v8, %v214_v3  ;;  %v141_v19 = vmul.f32 %v129_v8, %v219_v5  ;;  %v131_v21 = vmul.f32 %v162_v58, %v127_v17  ;;  %v128_v22 = vmax.f32 %v124_v18, 0.0 }
  0x23   :  { %v134_v20 = vmul.f32 %v130_v14, %v232_v10  ;;  %v142_v23 = vmul.f32 %v130_v14, %v245_v15 }
  0x24   :  { %137 = vst [vmem:[%s329_s6] sm:$0xff] %v133_v13  ;;  %145 = vst [vmem:[%s330_s7] sm:$0xff] %v141_v19  ;;  %v135_v3 = vmul.f32 %v131_v21, %v247_v16  ;;  %v132_v5 = vmul.f32 %v164_v0, %v128_v22  ;;  %v143_v10 = vmul.f32 %v131_v21, %v271_v26 }
  0x25   :  { %138 = vst [vmem:[%s329_s6 + $0x8] sm:$0xff] %v134_v20  ;;  %146 = vst [vmem:[%s330_s7 + $0x8] sm:$0xff] %v142_v23 }
  0x26   :  { %139 = vst [vmem:[%s329_s6 + $0x10] sm:$0xff] %v135_v3  ;;  %v136_v15 = vmul.f32 %v132_v5, %v275_v29  ;;  %147 = vst [vmem:[%s330_s7 + $0x10] sm:$0xff] %v143_v10  ;;  %v144_v24 = vmul.f32 %v132_v5, %v279_v33 }
  0x28   :  { %140 = vst [vmem:[%s329_s6 + $0x18] sm:$0xff] %v136_v15  ;;  %148 = vst [vmem:[%s330_s7 + $0x18] sm:$0xff] %v144_v24 }

// kernel: custom-call
= control target key start
LH: loop header
LB: loop body
LE: loop exit
PB: predicated region body
PF: predicated region fallthrough
CT: control target
= control target key end

     0   :  { %s126_s0 = inlined_call_operand.vmem [shape: f32[2,10,1,1], index: 0, kind: input, shape index: {}]   ;;  %s127_s1 = inlined_call_operand.vmem [shape: f32[2,10,1,1], index: 1, kind: input, shape index: {}]   ;;  %s128_s2 = inlined_call_operand.hbm [shape: c64[2,10,1,1], index: 2, kind: output, shape index: {}]  }
   0x1   :  { %s87_s11 = scalar_lea.hbm %s128_s2, 32 }
   0x2   :  { %4 = vsyncpa [#allocation0], 0  ;;  %s5_s14 = sshll.u32 %s126_s0, 4  ;;  %s6_s14 = int_to_ptr.vmem [resolvable:$true] %s5_s14 }
   0x3   :  { %s18_s15 = scalar_lea.vmem %s6_s14, 32  ;;  %p23_p1 = scmp.lt.s32.totalorder %s6_s14, %s6_s14 }
   0x4   :  { %p19_p0 = scmp.ne.s32.totalorder %s6_s14, %s18_s15  ;;  %p24_p2 = scmp.lt.s32.totalorder %s18_s15, %s18_s15 }
   0x6   :  { %p25_p3 = por %p24_p2, %p23_p1 }
   0x8   :  { %p26_p4 = pnand %p25_p3, %p19_p0 }
   0xa   :  { %29 = shalt.err (!%p26_p4)  }
   0xb   :  { %p31_p5 = scmp.ne.s32.totalorder %s128_s2, %s87_s11  ;;  %s32_s0 = scalar_lea.hbm %s128_s2, 64 }
   0xc   :  { %p33_p6 = scmp.lt.u32.totalorder %s32_s0, %s87_s11  ;;  %p34_p7 = scmp.lt.u32.totalorder %s87_s11, %s128_s2 }
   0xe   :  { %p35_p8 = por %p34_p7, %p33_p6 }
  0x10   :  { %p36_p9 = pnand %p35_p8, %p31_p5 }
  0x12   :  { %39 = shalt.err (!%p36_p9)  }
  0x13   :  { %8 = dma.vmem_to_hbm [thread:$0]  %s6_s14, 32, %s128_s2, [#allocation0] }
  0x14   :  { %65 = dma.done.wait [#allocation0], 32  }
  0x15   :  { %66 = vsyncadd [#allocation0], 4294967264 }
  0x16   :  { %10 = vsyncpa [#allocation0], 1 }
  0x17   :  { %11 = vsyncpa [#allocation1], 0  ;;  %s12_s28 = sshll.u32 %s127_s1, 4  ;;  %s13_s28 = int_to_ptr.vmem [resolvable:$true] %s12_s28 }
  0x18   :  { %s40_s29 = scalar_lea.vmem %s13_s28, 32  ;;  %p45_p11 = scmp.lt.s32.totalorder %s13_s28, %s13_s28 }
  0x19   :  { %p41_p10 = scmp.ne.s32.totalorder %s13_s28, %s40_s29  ;;  %p46_p12 = scmp.lt.s32.totalorder %s40_s29, %s40_s29 }
  0x1b   :  { %p47_p13 = por %p46_p12, %p45_p11 }
  0x1d   :  { %p48_p0 = pnand %p47_p13, %p41_p10 }
  0x1f   :  { %51 = shalt.err (!%p48_p0)  }
  0x20   :  { %p53_p1 = scmp.ne.s32.totalorder %s87_s11, %s32_s0  ;;  %p56_p2 = scmp.lt.u32.totalorder %s32_s0, %s32_s0 }
  0x22   :  { %p57_p3 = por %p56_p2, %p34_p7 }
  0x24   :  { %p59_p4 = por %p57_p3, %p33_p6 }
  0x26   :  { %p60_p5 = pnand %p59_p4, %p53_p1 }
  0x28   :  { %63 = shalt.err (!%p60_p5)  }
  0x29   :  { %15 = dma.vmem_to_hbm [thread:$0]  %s13_s28, 32, %s87_s11, [#allocation1] }
  0x2a   :  { %67 = dma.done.wait [#allocation1], 32  }
  0x2b   :  { %68 = vsyncadd [#allocation1], 4294967264 }
  0x2c   :  { %17 = vsyncpa [#allocation1], 1 }

</bundles_post_ra>
